<compile_context>
chip_gen: v5e
topology: v5e:2x2
jax: 0.10.0
libtpu: 0.0.40
codegen_flags: <defaults>
</compile_context>

<pallas_src>
import functools

import jax
import jax.numpy as jnp
import numpy as np
from jax.experimental import pallas as pl
from jax.experimental.pallas import tpu as pltpu


# ---------------------------------------------------------------------------
# VMEM budgeting helpers
# ---------------------------------------------------------------------------
def _vmem_bytes(B_blk, tile_t, D, H, L, w_bytes, x_itemsize):
    f32 = 4
    b = 0
    b += 2 * B_blk * tile_t * D * x_itemsize        # x block (double-buffered)
    b += 2 * B_blk * tile_t * H * f32               # out block (double-buffered)
    b += B_blk * tile_t * 4 * H * f32               # proj scratch (f32)
    b += 2 * L * B_blk * H * f32                    # recurrent h/c scratch
    b += 4 * 2 * L * B_blk * H * f32                # h0/c0 in + hN/cN out blocks
    b += w_bytes                                    # staged weights (single-buffered)
    return b


def _derive_tile_t(T, B_blk, D, H, L, w_bytes, x_itemsize, budget, max_unroll):
    cands = [t for t in range(1, min(T, max_unroll) + 1) if T % t == 0]
    if not cands:
        cands = [T]
    aligned = [t for t in cands if t == T or t % 8 == 0]
    pool = aligned or cands
    best = pool[0]
    for t in pool:
        if _vmem_bytes(B_blk, t, D, H, L, w_bytes, x_itemsize) <= budget:
            best = max(best, t)
    return best


# ---------------------------------------------------------------------------
# Pallas kernel
# ---------------------------------------------------------------------------
def _lstm_decoder_kernel(L, H, tile_t, *refs):
    """refs = inputs (x, h0, c0, 3L HBM weight refs) + outputs (out, hN, cN)
    + scratch (3L staged weights, DMA sems, h state, c state, proj)."""
    n_in = 3 + 3 * L
    x_ref, h0_ref, c0_ref = refs[0:3]
    w_hbm = refs[3:n_in]
    out_ref, hN_ref, cN_ref = refs[n_in:n_in + 3]
    scratch = refs[n_in + 3:]
    w_vmem = scratch[0:3 * L]
    sem = scratch[3 * L]
    h_s, c_s, proj_ref = scratch[3 * L + 1:]

    chunk = pl.program_id(1)
    B_blk = x_ref.shape[0]

    # --- once per core / batch shard: stage weights (single VMEM copy, all
    # DMAs overlapped) and load the encoder final state into the recurrent
    # state scratch.  Scratch persists across the "arbitrary" time-chunk axis.
    @pl.when(chunk == 0)
    def _stage_weights_and_init_state():
        copies = [pltpu.make_async_copy(w_hbm[k], w_vmem[k], sem.at[k])
                  for k in range(3 * L)]
        for cp in copies:
            cp.start()
        h_s[...] = h0_ref[...]
        c_s[...] = c0_ref[...]
        for cp in copies:
            cp.wait()

    for j in range(L):                                   # static unroll over layers
        w_ih = w_vmem[3 * j][...]
        w_hh = w_vmem[3 * j + 1][...]
        bias = w_vmem[3 * j + 2][...].astype(jnp.float32)

        # ---- hoisted input projection: one big MXU matmul per (layer, chunk)
        xin = x_ref[...] if j == 0 else out_ref[...]     # (B_blk, tile_t, D_in)
        d_in = xin.shape[-1]
        proj = jnp.dot(xin.reshape(B_blk * tile_t, d_in).astype(w_ih.dtype),
                       w_ih, preferred_element_type=jnp.float32)
        proj = proj + bias                               # bias folded in once
        proj_ref[...] = proj.reshape(B_blk, tile_t, 4 * H)

        # ---- serial recurrence, fully unrolled: only h @ W_hh + gates on the
        # critical path; W_hh is loop-invariant (stationary RHS).
        h = h_s[j]
        c = c_s[j]
        for t in range(tile_t):
            gates = proj_ref[:, t, :] + jnp.dot(
                h.astype(w_hh.dtype), w_hh, preferred_element_type=jnp.float32)
            i_g = jax.nn.sigmoid(gates[:, 0 * H:1 * H])
            f_g = jax.nn.sigmoid(gates[:, 1 * H:2 * H])
            g_g = jnp.tanh(gates[:, 2 * H:3 * H])
            o_g = jax.nn.sigmoid(gates[:, 3 * H:4 * H])
            c = f_g * c + i_g * g_g
            h = o_g * jnp.tanh(c)
            out_ref[:, t, :] = h.astype(out_ref.dtype)   # next layer's input
        h_s[j] = h
        c_s[j] = c

    @pl.when(chunk == pl.num_programs(1) - 1)            # final-state copy gated
    def _write_final_state():
        hN_ref[...] = h_s[...]
        cN_ref[...] = c_s[...]


# ---------------------------------------------------------------------------
# Wrapper (PyTorch-convention shapes in / out)
# ---------------------------------------------------------------------------
def lstm_decoder(x, encoder_h, encoder_c, params, hidden_size, *,
                 tile_t=None, num_batch_shards=1,
                 vmem_budget_bytes=48 * 1024 * 1024, max_unroll=64):
    """x: (B, T, D); encoder_h/c: (L, B, H); params: [w_ih_t, w_hh_t, b] * L with
    w_ih_t:(D_in,4H), w_hh_t:(H,4H), b:(1,4H) (b_ih + b_hh folded; gates i,f,g,o).
    Returns out:(B, T, H), (h, c):(L, B, H) — same as LSTM_Decoder.forward.
    num_batch_shards=2 splits the batch across v7x's two TensorCores (on 1-TC
    chips it just runs the shards sequentially)."""
    B, T, D = x.shape
    L = encoder_h.shape[0]
    H = hidden_size
    assert B % num_batch_shards == 0, "B must be divisible by num_batch_shards"
    B_blk = B // num_batch_shards
    if num_batch_shards > 1:
        assert B_blk % 8 == 0, "per-shard batch must be a multiple of 8"

    w_bytes = sum(int(np.prod(w.shape)) * w.dtype.itemsize for w in params)
    x_itemsize = x.dtype.itemsize

    if tile_t is None:
        tile_t = _derive_tile_t(T, B_blk, D, H, L, w_bytes, x_itemsize,
                                vmem_budget_bytes, max_unroll)
    assert T % tile_t == 0, "T must be divisible by tile_t"
    num_chunks = T // tile_t

    footprint = _vmem_bytes(B_blk, tile_t, D, H, L, w_bytes, x_itemsize)
    vmem_limit = int(min(max(32 << 20, footprint * 5 // 4 + (4 << 20)), 128 << 20))

    in_specs = [
        pl.BlockSpec((B_blk, tile_t, D), lambda b, c: (b, c, 0)),
        pl.BlockSpec((L, B_blk, H), lambda b, c: (0, b, 0)),
        pl.BlockSpec((L, B_blk, H), lambda b, c: (0, b, 0)),
    ]
    # Weights stay in HBM (no auto double-buffering); staged manually in-kernel.
    in_specs += [pl.BlockSpec(memory_space=pl.ANY) for _ in params]

    out_shape = (
        jax.ShapeDtypeStruct((B, T, H), jnp.float32),     # out (batch-major)
        jax.ShapeDtypeStruct((L, B, H), jnp.float32),     # final h
        jax.ShapeDtypeStruct((L, B, H), jnp.float32),     # final c
    )
    out_specs = (
        pl.BlockSpec((B_blk, tile_t, H), lambda b, c: (b, c, 0)),
        pl.BlockSpec((L, B_blk, H), lambda b, c: (0, b, 0)),
        pl.BlockSpec((L, B_blk, H), lambda b, c: (0, b, 0)),
    )

    scratch_shapes = [pltpu.VMEM(w.shape, w.dtype) for w in params]
    scratch_shapes.append(pltpu.SemaphoreType.DMA((3 * L,)))
    scratch_shapes += [
        pltpu.VMEM((L, B_blk, H), jnp.float32),           # recurrent h state
        pltpu.VMEM((L, B_blk, H), jnp.float32),           # recurrent c state
        pltpu.VMEM((B_blk, tile_t, 4 * H), jnp.float32),  # per-layer input projection
    ]

    kernel = functools.partial(_lstm_decoder_kernel, L, H, tile_t)
    out, h_n, c_n = pl.pallas_call(
        kernel,
        grid=(num_batch_shards, num_chunks),
        in_specs=in_specs,
        out_specs=out_specs,
        out_shape=out_shape,
        scratch_shapes=scratch_shapes,
        compiler_params=pltpu.CompilerParams(
            dimension_semantics=("parallel", "arbitrary"),  # batch || , time serial
            vmem_limit_bytes=vmem_limit),
    )(x, encoder_h, encoder_c, *params)

    return out, (h_n, c_n)


# ---------------------------------------------------------------------------
# Deterministic parameter init (PyTorch LSTMCell-compatible: gate order
# i, f, g, o; weights transposed for x @ W; bias = b_ih + b_hh folded).
# ---------------------------------------------------------------------------
def init_params(key, input_size, hidden_size, num_layers, dtype=jnp.float32):
    params = []
    in_dim = input_size
    bound = 1.0 / np.sqrt(hidden_size)
    for _ in range(num_layers):
        key, k1, k2, k3 = jax.random.split(key, 4)
        w_ih_t = jax.random.uniform(k1, (in_dim, 4 * hidden_size),
                                    jnp.float32, -bound, bound).astype(dtype)
        w_hh_t = jax.random.uniform(k2, (hidden_size, 4 * hidden_size),
                                    jnp.float32, -bound, bound).astype(dtype)
        b = jax.random.uniform(k3, (1, 4 * hidden_size),
                               jnp.float32, -bound, bound).astype(dtype)
        params += [w_ih_t, w_hh_t, b]
        in_dim = hidden_size
    return params


# ---------------------------------------------------------------------------
# Pure-JAX reference (mirrors the PyTorch forward exactly)
# ---------------------------------------------------------------------------
def reference_forward(x, encoder_h, encoder_c, params, hidden_size, num_layers):
    B, T, D = x.shape
    H, L = hidden_size, num_layers
    h_n = [encoder_h[j] for j in range(L)]
    c_n = [encoder_c[j] for j in range(L)]

    def cell(xi, h, c, w_ih_t, w_hh_t, b):
        gates = (xi @ w_ih_t.astype(jnp.float32) + h @ w_hh_t.astype(jnp.float32)
                 + b.astype(jnp.float32))
        i_g = jax.nn.sigmoid(gates[:, 0 * H:1 * H])
        f_g = jax.nn.sigmoid(gates[:, 1 * H:2 * H])
        g_g = jnp.tanh(gates[:, 2 * H:3 * H])
        o_g = jax.nn.sigmoid(gates[:, 3 * H:4 * H])
        c_new = f_g * c + i_g * g_g
        return o_g * jnp.tanh(c_new), c_new

    outs = []
    for i in range(T):
        x_i = x[:, i, :]
        for j in range(L):
            x_i, c_j = cell(x_i, h_n[j], c_n[j], *params[3 * j:3 * j + 3])
            h_n[j], c_n[j] = x_i, c_j
        outs.append(x_i)
    out = jnp.stack(outs, axis=1)
    return out, (jnp.stack(h_n, 0), jnp.stack(c_n, 0))


# ---------------------------------------------------------------------------
if __name__ == "__main__":
    def run_case(case_idx, B, T, D, H, L, tile_t=None, shards=1,
                 w_dtype=jnp.float32, rtol=2e-3, atol=2e-3):
        key = jax.random.fold_in(jax.random.PRNGKey(0), case_idx)
        kx, kh, kc, kp = jax.random.split(key, 4)
        x = jax.random.normal(kx, (B, T, D), jnp.float32)
        eh = jax.random.normal(kh, (L, B, H), jnp.float32)
        ec = jax.random.normal(kc, (L, B, H), jnp.float32)
        params = init_params(kp, D, H, L, dtype=w_dtype)

        out, (h, c) = lstm_decoder(x, eh, ec, params, H,
                                   tile_t=tile_t, num_batch_shards=shards)
        jax.block_until_ready((out, h, c))

        out_r, (h_r, c_r) = reference_forward(x, eh, ec, params, H, L)
        np.testing.assert_allclose(np.asarray(out), np.asarray(out_r),
                                   rtol=rtol, atol=atol)
        np.testing.assert_allclose(np.asarray(h), np.asarray(h_r),
                                   rtol=rtol, atol=atol)
        np.testing.assert_allclose(np.asarray(c), np.asarray(c_r),
                                   rtol=rtol, atol=atol)

    # 0: small unaligned shapes (H=32, D=16), whole sequence, 2 stacked layers.
    run_case(0, B=8, T=8, D=16, H=32, L=2)
    # 1: lane-dense H (128), multi-chunk grid AND L=2 simultaneously
    #    (recurrent state carried in VMEM scratch across chunks).
    run_case(1, B=8, T=32, D=64, H=128, L=2, tile_t=8)
    # 2: batch sharded across the "parallel" grid axis (v7x dual-TC path).
    run_case(2, B=16, T=16, D=64, H=128, L=1, tile_t=8, shards=2)
    # 3: bf16 weight path (bf16 MXU operands, f32 accumulation / gate math).
    run_case(3, B=8, T=8, D=64, H=128, L=1, w_dtype=jnp.bfloat16,
             rtol=1e-1, atol=1e-1)

    print("KERNEL_OK")
</pallas_src>

<mosaic_0001>
module attributes {stable_mosaic.version = 11 : i64} {
  func.func @_lstm_decoder_kernel(%arg0: i32, %arg1: i32, %arg2: memref<8x8x16xf32, #tpu.memory_space<vmem>>, %arg3: memref<2x8x32xf32, #tpu.memory_space<vmem>>, %arg4: memref<2x8x32xf32, #tpu.memory_space<vmem>>, %arg5: memref<16x128xf32, #tpu.memory_space<any>>, %arg6: memref<32x128xf32, #tpu.memory_space<any>>, %arg7: memref<1x128xf32, #tpu.memory_space<any>>, %arg8: memref<32x128xf32, #tpu.memory_space<any>>, %arg9: memref<32x128xf32, #tpu.memory_space<any>>, %arg10: memref<1x128xf32, #tpu.memory_space<any>>, %arg11: memref<8x8x32xf32, #tpu.memory_space<vmem>>, %arg12: memref<2x8x32xf32, #tpu.memory_space<vmem>>, %arg13: memref<2x8x32xf32, #tpu.memory_space<vmem>>, %arg14: memref<16x128xf32, #tpu.memory_space<vmem>>, %arg15: memref<32x128xf32, #tpu.memory_space<vmem>>, %arg16: memref<1x128xf32, #tpu.memory_space<vmem>>, %arg17: memref<32x128xf32, #tpu.memory_space<vmem>>, %arg18: memref<32x128xf32, #tpu.memory_space<vmem>>, %arg19: memref<1x128xf32, #tpu.memory_space<vmem>>, %arg20: memref<6x!tpu.dma_semaphore, #tpu.memory_space<semaphore_mem>>, %arg21: memref<2x8x32xf32, #tpu.memory_space<vmem>>, %arg22: memref<2x8x32xf32, #tpu.memory_space<vmem>>, %arg23: memref<8x8x128xf32, #tpu.memory_space<vmem>>) attributes {dimension_semantics = [#tpu.dimension_semantics<parallel>, #tpu.dimension_semantics<arbitrary>], iteration_bounds = array<i64: 1, 1>, scalar_prefetch = 0 : i64, scratch_operands = 10 : i64, tpu.core_type = #tpu.core_type<tc>, window_params = [{transform_indices = @transform_0, window_bounds = array<i64: 8, 8, 16>}, {transform_indices = @transform_1, window_bounds = array<i64: 2, 8, 32>}, {transform_indices = @transform_2, window_bounds = array<i64: 2, 8, 32>}, {}, {}, {}, {}, {}, {}, {transform_indices = @transform_9, window_bounds = array<i64: 8, 8, 32>}, {transform_indices = @transform_10, window_bounds = array<i64: 2, 8, 32>}, {transform_indices = @transform_11, window_bounds = array<i64: 2, 8, 32>}]} {
    %c0_i32 = arith.constant 0 : i32
    %0 = arith.cmpi eq, %arg1, %c0_i32 : i32
    %1 = arith.extui %0 : i1 to i32
    %c0_i32_0 = arith.constant 0 : i32
    %2 = arith.cmpi ne, %1, %c0_i32_0 : i32
    scf.if %2 {
      %c0_i32_204 = arith.constant 0 : i32
      %558 = tpu.memref_slice %arg20[%c0_i32_204] : memref<6x!tpu.dma_semaphore, #tpu.memory_space<semaphore_mem>> -> memref<1x!tpu.dma_semaphore, #tpu.memory_space<semaphore_mem>>
      %559 = tpu.memref_squeeze %558 : memref<1x!tpu.dma_semaphore, #tpu.memory_space<semaphore_mem>> -> memref<!tpu.dma_semaphore, #tpu.memory_space<semaphore_mem>>
      tpu.enqueue_dma source(%arg5 : memref<16x128xf32, #tpu.memory_space<any>>) target(%arg14 : memref<16x128xf32, #tpu.memory_space<vmem>>) target_semaphore(%559 : memref<!tpu.dma_semaphore, #tpu.memory_space<semaphore_mem>>)
      %c1_i32 = arith.constant 1 : i32
      %560 = tpu.memref_slice %arg20[%c1_i32] : memref<6x!tpu.dma_semaphore, #tpu.memory_space<semaphore_mem>> -> memref<1x!tpu.dma_semaphore, #tpu.memory_space<semaphore_mem>>
      %561 = tpu.memref_squeeze %560 : memref<1x!tpu.dma_semaphore, #tpu.memory_space<semaphore_mem>> -> memref<!tpu.dma_semaphore, #tpu.memory_space<semaphore_mem>>
      tpu.enqueue_dma source(%arg6 : memref<32x128xf32, #tpu.memory_space<any>>) target(%arg15 : memref<32x128xf32, #tpu.memory_space<vmem>>) target_semaphore(%561 : memref<!tpu.dma_semaphore, #tpu.memory_space<semaphore_mem>>)
      %c2_i32 = arith.constant 2 : i32
      %562 = tpu.memref_slice %arg20[%c2_i32] : memref<6x!tpu.dma_semaphore, #tpu.memory_space<semaphore_mem>> -> memref<1x!tpu.dma_semaphore, #tpu.memory_space<semaphore_mem>>
      %563 = tpu.memref_squeeze %562 : memref<1x!tpu.dma_semaphore, #tpu.memory_space<semaphore_mem>> -> memref<!tpu.dma_semaphore, #tpu.memory_space<semaphore_mem>>
      tpu.enqueue_dma source(%arg7 : memref<1x128xf32, #tpu.memory_space<any>>) target(%arg16 : memref<1x128xf32, #tpu.memory_space<vmem>>) target_semaphore(%563 : memref<!tpu.dma_semaphore, #tpu.memory_space<semaphore_mem>>)
      %c3_i32 = arith.constant 3 : i32
      %564 = tpu.memref_slice %arg20[%c3_i32] : memref<6x!tpu.dma_semaphore, #tpu.memory_space<semaphore_mem>> -> memref<1x!tpu.dma_semaphore, #tpu.memory_space<semaphore_mem>>
      %565 = tpu.memref_squeeze %564 : memref<1x!tpu.dma_semaphore, #tpu.memory_space<semaphore_mem>> -> memref<!tpu.dma_semaphore, #tpu.memory_space<semaphore_mem>>
      tpu.enqueue_dma source(%arg8 : memref<32x128xf32, #tpu.memory_space<any>>) target(%arg17 : memref<32x128xf32, #tpu.memory_space<vmem>>) target_semaphore(%565 : memref<!tpu.dma_semaphore, #tpu.memory_space<semaphore_mem>>)
      %c4_i32 = arith.constant 4 : i32
      %566 = tpu.memref_slice %arg20[%c4_i32] : memref<6x!tpu.dma_semaphore, #tpu.memory_space<semaphore_mem>> -> memref<1x!tpu.dma_semaphore, #tpu.memory_space<semaphore_mem>>
      %567 = tpu.memref_squeeze %566 : memref<1x!tpu.dma_semaphore, #tpu.memory_space<semaphore_mem>> -> memref<!tpu.dma_semaphore, #tpu.memory_space<semaphore_mem>>
      tpu.enqueue_dma source(%arg9 : memref<32x128xf32, #tpu.memory_space<any>>) target(%arg18 : memref<32x128xf32, #tpu.memory_space<vmem>>) target_semaphore(%567 : memref<!tpu.dma_semaphore, #tpu.memory_space<semaphore_mem>>)
      %c5_i32 = arith.constant 5 : i32
      %568 = tpu.memref_slice %arg20[%c5_i32] : memref<6x!tpu.dma_semaphore, #tpu.memory_space<semaphore_mem>> -> memref<1x!tpu.dma_semaphore, #tpu.memory_space<semaphore_mem>>
      %569 = tpu.memref_squeeze %568 : memref<1x!tpu.dma_semaphore, #tpu.memory_space<semaphore_mem>> -> memref<!tpu.dma_semaphore, #tpu.memory_space<semaphore_mem>>
      tpu.enqueue_dma source(%arg10 : memref<1x128xf32, #tpu.memory_space<any>>) target(%arg19 : memref<1x128xf32, #tpu.memory_space<vmem>>) target_semaphore(%569 : memref<!tpu.dma_semaphore, #tpu.memory_space<semaphore_mem>>)
      %c0_205 = arith.constant 0 : index
      %c0_206 = arith.constant 0 : index
      %c0_207 = arith.constant 0 : index
      %570 = vector.load %arg3[%c0_205, %c0_206, %c0_207] : memref<2x8x32xf32, #tpu.memory_space<vmem>>, vector<2x8x32xf32>
      %c0_208 = arith.constant 0 : index
      %c0_209 = arith.constant 0 : index
      %c0_210 = arith.constant 0 : index
      %571 = vector.load %arg21[%c0_208, %c0_209, %c0_210] : memref<2x8x32xf32, #tpu.memory_space<vmem>>, vector<2x8x32xf32>
      tpu.vector_store %arg21[%c0_208, %c0_209, %c0_210], %570 {strides = array<i32>} : memref<2x8x32xf32, #tpu.memory_space<vmem>>, vector<2x8x32xf32>,
      %c0_211 = arith.constant 0 : index
      %c0_212 = arith.constant 0 : index
      %c0_213 = arith.constant 0 : index
      %572 = vector.load %arg4[%c0_211, %c0_212, %c0_213] : memref<2x8x32xf32, #tpu.memory_space<vmem>>, vector<2x8x32xf32>
      %c0_214 = arith.constant 0 : index
      %c0_215 = arith.constant 0 : index
      %c0_216 = arith.constant 0 : index
      %573 = vector.load %arg22[%c0_214, %c0_215, %c0_216] : memref<2x8x32xf32, #tpu.memory_space<vmem>>, vector<2x8x32xf32>
      tpu.vector_store %arg22[%c0_214, %c0_215, %c0_216], %572 {strides = array<i32>} : memref<2x8x32xf32, #tpu.memory_space<vmem>>, vector<2x8x32xf32>,
      %c0_i32_217 = arith.constant 0 : i32
      %574 = tpu.memref_slice %arg20[%c0_i32_217] : memref<6x!tpu.dma_semaphore, #tpu.memory_space<semaphore_mem>> -> memref<1x!tpu.dma_semaphore, #tpu.memory_space<semaphore_mem>>
      %575 = tpu.memref_squeeze %574 : memref<1x!tpu.dma_semaphore, #tpu.memory_space<semaphore_mem>> -> memref<!tpu.dma_semaphore, #tpu.memory_space<semaphore_mem>>
      tpu.wait_dma2 semaphore(%575 : memref<!tpu.dma_semaphore, #tpu.memory_space<semaphore_mem>>) src(%arg5 : memref<16x128xf32, #tpu.memory_space<any>>) dst(%arg14 : memref<16x128xf32, #tpu.memory_space<vmem>>)
      %c1_i32_218 = arith.constant 1 : i32
      %576 = tpu.memref_slice %arg20[%c1_i32_218] : memref<6x!tpu.dma_semaphore, #tpu.memory_space<semaphore_mem>> -> memref<1x!tpu.dma_semaphore, #tpu.memory_space<semaphore_mem>>
      %577 = tpu.memref_squeeze %576 : memref<1x!tpu.dma_semaphore, #tpu.memory_space<semaphore_mem>> -> memref<!tpu.dma_semaphore, #tpu.memory_space<semaphore_mem>>
      tpu.wait_dma2 semaphore(%577 : memref<!tpu.dma_semaphore, #tpu.memory_space<semaphore_mem>>) src(%arg6 : memref<32x128xf32, #tpu.memory_space<any>>) dst(%arg15 : memref<32x128xf32, #tpu.memory_space<vmem>>)
      %c2_i32_219 = arith.constant 2 : i32
      %578 = tpu.memref_slice %arg20[%c2_i32_219] : memref<6x!tpu.dma_semaphore, #tpu.memory_space<semaphore_mem>> -> memref<1x!tpu.dma_semaphore, #tpu.memory_space<semaphore_mem>>
      %579 = tpu.memref_squeeze %578 : memref<1x!tpu.dma_semaphore, #tpu.memory_space<semaphore_mem>> -> memref<!tpu.dma_semaphore, #tpu.memory_space<semaphore_mem>>
      tpu.wait_dma2 semaphore(%579 : memref<!tpu.dma_semaphore, #tpu.memory_space<semaphore_mem>>) src(%arg7 : memref<1x128xf32, #tpu.memory_space<any>>) dst(%arg16 : memref<1x128xf32, #tpu.memory_space<vmem>>)
      %c3_i32_220 = arith.constant 3 : i32
      %580 = tpu.memref_slice %arg20[%c3_i32_220] : memref<6x!tpu.dma_semaphore, #tpu.memory_space<semaphore_mem>> -> memref<1x!tpu.dma_semaphore, #tpu.memory_space<semaphore_mem>>
      %581 = tpu.memref_squeeze %580 : memref<1x!tpu.dma_semaphore, #tpu.memory_space<semaphore_mem>> -> memref<!tpu.dma_semaphore, #tpu.memory_space<semaphore_mem>>
      tpu.wait_dma2 semaphore(%581 : memref<!tpu.dma_semaphore, #tpu.memory_space<semaphore_mem>>) src(%arg8 : memref<32x128xf32, #tpu.memory_space<any>>) dst(%arg17 : memref<32x128xf32, #tpu.memory_space<vmem>>)
      %c4_i32_221 = arith.constant 4 : i32
      %582 = tpu.memref_slice %arg20[%c4_i32_221] : memref<6x!tpu.dma_semaphore, #tpu.memory_space<semaphore_mem>> -> memref<1x!tpu.dma_semaphore, #tpu.memory_space<semaphore_mem>>
      %583 = tpu.memref_squeeze %582 : memref<1x!tpu.dma_semaphore, #tpu.memory_space<semaphore_mem>> -> memref<!tpu.dma_semaphore, #tpu.memory_space<semaphore_mem>>
      tpu.wait_dma2 semaphore(%583 : memref<!tpu.dma_semaphore, #tpu.memory_space<semaphore_mem>>) src(%arg9 : memref<32x128xf32, #tpu.memory_space<any>>) dst(%arg18 : memref<32x128xf32, #tpu.memory_space<vmem>>)
      %c5_i32_222 = arith.constant 5 : i32
      %584 = tpu.memref_slice %arg20[%c5_i32_222] : memref<6x!tpu.dma_semaphore, #tpu.memory_space<semaphore_mem>> -> memref<1x!tpu.dma_semaphore, #tpu.memory_space<semaphore_mem>>
      %585 = tpu.memref_squeeze %584 : memref<1x!tpu.dma_semaphore, #tpu.memory_space<semaphore_mem>> -> memref<!tpu.dma_semaphore, #tpu.memory_space<semaphore_mem>>
      tpu.wait_dma2 semaphore(%585 : memref<!tpu.dma_semaphore, #tpu.memory_space<semaphore_mem>>) src(%arg10 : memref<1x128xf32, #tpu.memory_space<any>>) dst(%arg19 : memref<1x128xf32, #tpu.memory_space<vmem>>)
    } else {
    }
    %c0 = arith.constant 0 : index
    %c0_1 = arith.constant 0 : index
    %3 = vector.load %arg14[%c0, %c0_1] : memref<16x128xf32, #tpu.memory_space<vmem>>, vector<16x128xf32>
    %c0_2 = arith.constant 0 : index
    %c0_3 = arith.constant 0 : index
    %4 = vector.load %arg15[%c0_2, %c0_3] : memref<32x128xf32, #tpu.memory_space<vmem>>, vector<32x128xf32>
    %c0_4 = arith.constant 0 : index
    %c0_5 = arith.constant 0 : index
    %5 = vector.load %arg16[%c0_4, %c0_5] : memref<1x128xf32, #tpu.memory_space<vmem>>, vector<1x128xf32>
    %c0_6 = arith.constant 0 : index
    %c0_7 = arith.constant 0 : index
    %c0_8 = arith.constant 0 : index
    %6 = vector.load %arg2[%c0_6, %c0_7, %c0_8] : memref<8x8x16xf32, #tpu.memory_space<vmem>>, vector<8x8x16xf32>
    %7 = vector.shape_cast %6 : vector<8x8x16xf32> to vector<64x16xf32>
    %cst = arith.constant dense<0.000000e+00> : vector<64x128xf32>
    %8 = tpu.matmul %7, %3, %cst {dimension_numbers = #tpu.dot_dimension_numbers<[1], [0], [0], [1], [0, 0, 1, 1], [], []>} : vector<64x16xf32>, vector<16x128xf32>, vector<64x128xf32> -> vector<64x128xf32>
    %9 = vector.broadcast %5 : vector<1x128xf32> to vector<64x128xf32>
    %10 = arith.addf %8, %9 : vector<64x128xf32>
    %11 = vector.shape_cast %10 : vector<64x128xf32> to vector<8x8x128xf32>
    %c0_9 = arith.constant 0 : index
    %c0_10 = arith.constant 0 : index
    %c0_11 = arith.constant 0 : index
    %12 = vector.load %arg23[%c0_9, %c0_10, %c0_11] : memref<8x8x128xf32, #tpu.memory_space<vmem>>, vector<8x8x128xf32>
    tpu.vector_store %arg23[%c0_9, %c0_10, %c0_11], %11 {strides = array<i32>} : memref<8x8x128xf32, #tpu.memory_space<vmem>>, vector<8x8x128xf32>,
    %c0_12 = arith.constant 0 : index
    %c0_13 = arith.constant 0 : index
    %c0_14 = arith.constant 0 : index
    %13 = vector.load %arg21[%c0_12, %c0_13, %c0_14] : memref<2x8x32xf32, #tpu.memory_space<vmem>>, vector<1x8x32xf32>
    %14 = vector.shape_cast %13 : vector<1x8x32xf32> to vector<8x32xf32>
    %c0_15 = arith.constant 0 : index
    %c0_16 = arith.constant 0 : index
    %c0_17 = arith.constant 0 : index
    %15 = vector.load %arg22[%c0_15, %c0_16, %c0_17] : memref<2x8x32xf32, #tpu.memory_space<vmem>>, vector<1x8x32xf32>
    %16 = vector.shape_cast %15 : vector<1x8x32xf32> to vector<8x32xf32>
    %c0_18 = arith.constant 0 : index
    %c0_19 = arith.constant 0 : index
    %c0_20 = arith.constant 0 : index
    %17 = vector.load %arg23[%c0_18, %c0_19, %c0_20] : memref<8x8x128xf32, #tpu.memory_space<vmem>>, vector<8x1x128xf32>
    %18 = vector.shape_cast %17 : vector<8x1x128xf32> to vector<8x128xf32>
    %cst_21 = arith.constant dense<0.000000e+00> : vector<8x128xf32>
    %19 = tpu.matmul %14, %4, %cst_21 {dimension_numbers = #tpu.dot_dimension_numbers<[1], [0], [0], [1], [0, 0, 1, 1], [], []>} : vector<8x32xf32>, vector<32x128xf32>, vector<8x128xf32> -> vector<8x128xf32>
    %20 = arith.addf %18, %19 : vector<8x128xf32>
    %21 = vector.extract_strided_slice %20 {offsets = [0, 0], sizes = [8, 32], strides = [1, 1]} : vector<8x128xf32> to vector<8x32xf32>
    %22 = arith.negf %21 : vector<8x32xf32>
    %23 = math.exp %22 : vector<8x32xf32>
    %cst_22 = arith.constant 1.000000e+00 : f32
    %24 = vector.broadcast %cst_22 : f32 to vector<8x32xf32>
    %25 = arith.addf %24, %23 : vector<8x32xf32>
    %26 = arith.divf %24, %25 : vector<8x32xf32>
    %27 = vector.extract_strided_slice %20 {offsets = [0, 32], sizes = [8, 32], strides = [1, 1]} : vector<8x128xf32> to vector<8x32xf32>
    %28 = arith.negf %27 : vector<8x32xf32>
    %29 = math.exp %28 : vector<8x32xf32>
    %cst_23 = arith.constant 1.000000e+00 : f32
    %30 = vector.broadcast %cst_23 : f32 to vector<8x32xf32>
    %31 = arith.addf %30, %29 : vector<8x32xf32>
    %32 = arith.divf %30, %31 : vector<8x32xf32>
    %33 = vector.extract_strided_slice %20 {offsets = [0, 64], sizes = [8, 32], strides = [1, 1]} : vector<8x128xf32> to vector<8x32xf32>
    %34 = math.tanh %33 : vector<8x32xf32>
    %35 = vector.extract_strided_slice %20 {offsets = [0, 96], sizes = [8, 32], strides = [1, 1]} : vector<8x128xf32> to vector<8x32xf32>
    %36 = arith.negf %35 : vector<8x32xf32>
    %37 = math.exp %36 : vector<8x32xf32>
    %cst_24 = arith.constant 1.000000e+00 : f32
    %38 = vector.broadcast %cst_24 : f32 to vector<8x32xf32>
    %39 = arith.addf %38, %37 : vector<8x32xf32>
    %40 = arith.divf %38, %39 : vector<8x32xf32>
    %41 = arith.mulf %32, %16 : vector<8x32xf32>
    %42 = arith.mulf %26, %34 : vector<8x32xf32>
    %43 = arith.addf %41, %42 : vector<8x32xf32>
    %44 = math.tanh %43 : vector<8x32xf32>
    %45 = arith.mulf %40, %44 : vector<8x32xf32>
    %c0_25 = arith.constant 0 : index
    %c0_26 = arith.constant 0 : index
    %c0_27 = arith.constant 0 : index
    %46 = vector.load %arg11[%c0_25, %c0_26, %c0_27] : memref<8x8x32xf32, #tpu.memory_space<vmem>>, vector<8x1x32xf32>
    %47 = vector.shape_cast %46 : vector<8x1x32xf32> to vector<8x32xf32>
    %48 = vector.shape_cast %45 : vector<8x32xf32> to vector<8x1x32xf32>
    tpu.vector_store %arg11[%c0_25, %c0_26, %c0_27], %48 {strides = array<i32>} : memref<8x8x32xf32, #tpu.memory_space<vmem>>, vector<8x1x32xf32>,
    %c0_28 = arith.constant 0 : index
    %c1 = arith.constant 1 : index
    %c0_29 = arith.constant 0 : index
    %49 = vector.load %arg23[%c0_28, %c1, %c0_29] : memref<8x8x128xf32, #tpu.memory_space<vmem>>, vector<8x1x128xf32>
    %50 = vector.shape_cast %49 : vector<8x1x128xf32> to vector<8x128xf32>
    %cst_30 = arith.constant dense<0.000000e+00> : vector<8x128xf32>
    %51 = tpu.matmul %45, %4, %cst_30 {dimension_numbers = #tpu.dot_dimension_numbers<[1], [0], [0], [1], [0, 0, 1, 1], [], []>} : vector<8x32xf32>, vector<32x128xf32>, vector<8x128xf32> -> vector<8x128xf32>
    %52 = arith.addf %50, %51 : vector<8x128xf32>
    %53 = vector.extract_strided_slice %52 {offsets = [0, 0], sizes = [8, 32], strides = [1, 1]} : vector<8x128xf32> to vector<8x32xf32>
    %54 = arith.negf %53 : vector<8x32xf32>
    %55 = math.exp %54 : vector<8x32xf32>
    %cst_31 = arith.constant 1.000000e+00 : f32
    %56 = vector.broadcast %cst_31 : f32 to vector<8x32xf32>
    %57 = arith.addf %56, %55 : vector<8x32xf32>
    %58 = arith.divf %56, %57 : vector<8x32xf32>
    %59 = vector.extract_strided_slice %52 {offsets = [0, 32], sizes = [8, 32], strides = [1, 1]} : vector<8x128xf32> to vector<8x32xf32>
    %60 = arith.negf %59 : vector<8x32xf32>
    %61 = math.exp %60 : vector<8x32xf32>
    %cst_32 = arith.constant 1.000000e+00 : f32
    %62 = vector.broadcast %cst_32 : f32 to vector<8x32xf32>
    %63 = arith.addf %62, %61 : vector<8x32xf32>
    %64 = arith.divf %62, %63 : vector<8x32xf32>
    %65 = vector.extract_strided_slice %52 {offsets = [0, 64], sizes = [8, 32], strides = [1, 1]} : vector<8x128xf32> to vector<8x32xf32>
    %66 = math.tanh %65 : vector<8x32xf32>
    %67 = vector.extract_strided_slice %52 {offsets = [0, 96], sizes = [8, 32], strides = [1, 1]} : vector<8x128xf32> to vector<8x32xf32>
    %68 = arith.negf %67 : vector<8x32xf32>
    %69 = math.exp %68 : vector<8x32xf32>
    %cst_33 = arith.constant 1.000000e+00 : f32
    %70 = vector.broadcast %cst_33 : f32 to vector<8x32xf32>
    %71 = arith.addf %70, %69 : vector<8x32xf32>
    %72 = arith.divf %70, %71 : vector<8x32xf32>
    %73 = arith.mulf %64, %43 : vector<8x32xf32>
    %74 = arith.mulf %58, %66 : vector<8x32xf32>
    %75 = arith.addf %73, %74 : vector<8x32xf32>
    %76 = math.tanh %75 : vector<8x32xf32>
    %77 = arith.mulf %72, %76 : vector<8x32xf32>
    %c0_34 = arith.constant 0 : index
    %c1_35 = arith.constant 1 : index
    %c0_36 = arith.constant 0 : index
    %78 = vector.load %arg11[%c0_34, %c1_35, %c0_36] : memref<8x8x32xf32, #tpu.memory_space<vmem>>, vector<8x1x32xf32>
    %79 = vector.shape_cast %78 : vector<8x1x32xf32> to vector<8x32xf32>
    %80 = vector.shape_cast %77 : vector<8x32xf32> to vector<8x1x32xf32>
    tpu.vector_store %arg11[%c0_34, %c1_35, %c0_36], %80 {strides = array<i32>} : memref<8x8x32xf32, #tpu.memory_space<vmem>>, vector<8x1x32xf32>,
    %c0_37 = arith.constant 0 : index
    %c2 = arith.constant 2 : index
    %c0_38 = arith.constant 0 : index
    %81 = vector.load %arg23[%c0_37, %c2, %c0_38] : memref<8x8x128xf32, #tpu.memory_space<vmem>>, vector<8x1x128xf32>
    %82 = vector.shape_cast %81 : vector<8x1x128xf32> to vector<8x128xf32>
    %cst_39 = arith.constant dense<0.000000e+00> : vector<8x128xf32>
    %83 = tpu.matmul %77, %4, %cst_39 {dimension_numbers = #tpu.dot_dimension_numbers<[1], [0], [0], [1], [0, 0, 1, 1], [], []>} : vector<8x32xf32>, vector<32x128xf32>, vector<8x128xf32> -> vector<8x128xf32>
    %84 = arith.addf %82, %83 : vector<8x128xf32>
    %85 = vector.extract_strided_slice %84 {offsets = [0, 0], sizes = [8, 32], strides = [1, 1]} : vector<8x128xf32> to vector<8x32xf32>
    %86 = arith.negf %85 : vector<8x32xf32>
    %87 = math.exp %86 : vector<8x32xf32>
    %cst_40 = arith.constant 1.000000e+00 : f32
    %88 = vector.broadcast %cst_40 : f32 to vector<8x32xf32>
    %89 = arith.addf %88, %87 : vector<8x32xf32>
    %90 = arith.divf %88, %89 : vector<8x32xf32>
    %91 = vector.extract_strided_slice %84 {offsets = [0, 32], sizes = [8, 32], strides = [1, 1]} : vector<8x128xf32> to vector<8x32xf32>
    %92 = arith.negf %91 : vector<8x32xf32>
    %93 = math.exp %92 : vector<8x32xf32>
    %cst_41 = arith.constant 1.000000e+00 : f32
    %94 = vector.broadcast %cst_41 : f32 to vector<8x32xf32>
    %95 = arith.addf %94, %93 : vector<8x32xf32>
    %96 = arith.divf %94, %95 : vector<8x32xf32>
    %97 = vector.extract_strided_slice %84 {offsets = [0, 64], sizes = [8, 32], strides = [1, 1]} : vector<8x128xf32> to vector<8x32xf32>
    %98 = math.tanh %97 : vector<8x32xf32>
    %99 = vector.extract_strided_slice %84 {offsets = [0, 96], sizes = [8, 32], strides = [1, 1]} : vector<8x128xf32> to vector<8x32xf32>
    %100 = arith.negf %99 : vector<8x32xf32>
    %101 = math.exp %100 : vector<8x32xf32>
    %cst_42 = arith.constant 1.000000e+00 : f32
    %102 = vector.broadcast %cst_42 : f32 to vector<8x32xf32>
    %103 = arith.addf %102, %101 : vector<8x32xf32>
    %104 = arith.divf %102, %103 : vector<8x32xf32>
    %105 = arith.mulf %96, %75 : vector<8x32xf32>
    %106 = arith.mulf %90, %98 : vector<8x32xf32>
    %107 = arith.addf %105, %106 : vector<8x32xf32>
    %108 = math.tanh %107 : vector<8x32xf32>
    %109 = arith.mulf %104, %108 : vector<8x32xf32>
    %c0_43 = arith.constant 0 : index
    %c2_44 = arith.constant 2 : index
    %c0_45 = arith.constant 0 : index
    %110 = vector.load %arg11[%c0_43, %c2_44, %c0_45] : memref<8x8x32xf32, #tpu.memory_space<vmem>>, vector<8x1x32xf32>
    %111 = vector.shape_cast %110 : vector<8x1x32xf32> to vector<8x32xf32>
    %112 = vector.shape_cast %109 : vector<8x32xf32> to vector<8x1x32xf32>
    tpu.vector_store %arg11[%c0_43, %c2_44, %c0_45], %112 {strides = array<i32>} : memref<8x8x32xf32, #tpu.memory_space<vmem>>, vector<8x1x32xf32>,
    %c0_46 = arith.constant 0 : index
    %c3 = arith.constant 3 : index
    %c0_47 = arith.constant 0 : index
    %113 = vector.load %arg23[%c0_46, %c3, %c0_47] : memref<8x8x128xf32, #tpu.memory_space<vmem>>, vector<8x1x128xf32>
    %114 = vector.shape_cast %113 : vector<8x1x128xf32> to vector<8x128xf32>
    %cst_48 = arith.constant dense<0.000000e+00> : vector<8x128xf32>
    %115 = tpu.matmul %109, %4, %cst_48 {dimension_numbers = #tpu.dot_dimension_numbers<[1], [0], [0], [1], [0, 0, 1, 1], [], []>} : vector<8x32xf32>, vector<32x128xf32>, vector<8x128xf32> -> vector<8x128xf32>
    %116 = arith.addf %114, %115 : vector<8x128xf32>
    %117 = vector.extract_strided_slice %116 {offsets = [0, 0], sizes = [8, 32], strides = [1, 1]} : vector<8x128xf32> to vector<8x32xf32>
    %118 = arith.negf %117 : vector<8x32xf32>
    %119 = math.exp %118 : vector<8x32xf32>
    %cst_49 = arith.constant 1.000000e+00 : f32
    %120 = vector.broadcast %cst_49 : f32 to vector<8x32xf32>
    %121 = arith.addf %120, %119 : vector<8x32xf32>
    %122 = arith.divf %120, %121 : vector<8x32xf32>
    %123 = vector.extract_strided_slice %116 {offsets = [0, 32], sizes = [8, 32], strides = [1, 1]} : vector<8x128xf32> to vector<8x32xf32>
    %124 = arith.negf %123 : vector<8x32xf32>
    %125 = math.exp %124 : vector<8x32xf32>
    %cst_50 = arith.constant 1.000000e+00 : f32
    %126 = vector.broadcast %cst_50 : f32 to vector<8x32xf32>
    %127 = arith.addf %126, %125 : vector<8x32xf32>
    %128 = arith.divf %126, %127 : vector<8x32xf32>
    %129 = vector.extract_strided_slice %116 {offsets = [0, 64], sizes = [8, 32], strides = [1, 1]} : vector<8x128xf32> to vector<8x32xf32>
    %130 = math.tanh %129 : vector<8x32xf32>
    %131 = vector.extract_strided_slice %116 {offsets = [0, 96], sizes = [8, 32], strides = [1, 1]} : vector<8x128xf32> to vector<8x32xf32>
    %132 = arith.negf %131 : vector<8x32xf32>
    %133 = math.exp %132 : vector<8x32xf32>
    %cst_51 = arith.constant 1.000000e+00 : f32
    %134 = vector.broadcast %cst_51 : f32 to vector<8x32xf32>
    %135 = arith.addf %134, %133 : vector<8x32xf32>
    %136 = arith.divf %134, %135 : vector<8x32xf32>
    %137 = arith.mulf %128, %107 : vector<8x32xf32>
    %138 = arith.mulf %122, %130 : vector<8x32xf32>
    %139 = arith.addf %137, %138 : vector<8x32xf32>
    %140 = math.tanh %139 : vector<8x32xf32>
    %141 = arith.mulf %136, %140 : vector<8x32xf32>
    %c0_52 = arith.constant 0 : index
    %c3_53 = arith.constant 3 : index
    %c0_54 = arith.constant 0 : index
    %142 = vector.load %arg11[%c0_52, %c3_53, %c0_54] : memref<8x8x32xf32, #tpu.memory_space<vmem>>, vector<8x1x32xf32>
    %143 = vector.shape_cast %142 : vector<8x1x32xf32> to vector<8x32xf32>
    %144 = vector.shape_cast %141 : vector<8x32xf32> to vector<8x1x32xf32>
    tpu.vector_store %arg11[%c0_52, %c3_53, %c0_54], %144 {strides = array<i32>} : memref<8x8x32xf32, #tpu.memory_space<vmem>>, vector<8x1x32xf32>,
    %c0_55 = arith.constant 0 : index
    %c4 = arith.constant 4 : index
    %c0_56 = arith.constant 0 : index
    %145 = vector.load %arg23[%c0_55, %c4, %c0_56] : memref<8x8x128xf32, #tpu.memory_space<vmem>>, vector<8x1x128xf32>
    %146 = vector.shape_cast %145 : vector<8x1x128xf32> to vector<8x128xf32>
    %cst_57 = arith.constant dense<0.000000e+00> : vector<8x128xf32>
    %147 = tpu.matmul %141, %4, %cst_57 {dimension_numbers = #tpu.dot_dimension_numbers<[1], [0], [0], [1], [0, 0, 1, 1], [], []>} : vector<8x32xf32>, vector<32x128xf32>, vector<8x128xf32> -> vector<8x128xf32>
    %148 = arith.addf %146, %147 : vector<8x128xf32>
    %149 = vector.extract_strided_slice %148 {offsets = [0, 0], sizes = [8, 32], strides = [1, 1]} : vector<8x128xf32> to vector<8x32xf32>
    %150 = arith.negf %149 : vector<8x32xf32>
    %151 = math.exp %150 : vector<8x32xf32>
    %cst_58 = arith.constant 1.000000e+00 : f32
    %152 = vector.broadcast %cst_58 : f32 to vector<8x32xf32>
    %153 = arith.addf %152, %151 : vector<8x32xf32>
    %154 = arith.divf %152, %153 : vector<8x32xf32>
    %155 = vector.extract_strided_slice %148 {offsets = [0, 32], sizes = [8, 32], strides = [1, 1]} : vector<8x128xf32> to vector<8x32xf32>
    %156 = arith.negf %155 : vector<8x32xf32>
    %157 = math.exp %156 : vector<8x32xf32>
    %cst_59 = arith.constant 1.000000e+00 : f32
    %158 = vector.broadcast %cst_59 : f32 to vector<8x32xf32>
    %159 = arith.addf %158, %157 : vector<8x32xf32>
    %160 = arith.divf %158, %159 : vector<8x32xf32>
    %161 = vector.extract_strided_slice %148 {offsets = [0, 64], sizes = [8, 32], strides = [1, 1]} : vector<8x128xf32> to vector<8x32xf32>
    %162 = math.tanh %161 : vector<8x32xf32>
    %163 = vector.extract_strided_slice %148 {offsets = [0, 96], sizes = [8, 32], strides = [1, 1]} : vector<8x128xf32> to vector<8x32xf32>
    %164 = arith.negf %163 : vector<8x32xf32>
    %165 = math.exp %164 : vector<8x32xf32>
    %cst_60 = arith.constant 1.000000e+00 : f32
    %166 = vector.broadcast %cst_60 : f32 to vector<8x32xf32>
    %167 = arith.addf %166, %165 : vector<8x32xf32>
    %168 = arith.divf %166, %167 : vector<8x32xf32>
    %169 = arith.mulf %160, %139 : vector<8x32xf32>
    %170 = arith.mulf %154, %162 : vector<8x32xf32>
    %171 = arith.addf %169, %170 : vector<8x32xf32>
    %172 = math.tanh %171 : vector<8x32xf32>
    %173 = arith.mulf %168, %172 : vector<8x32xf32>
    %c0_61 = arith.constant 0 : index
    %c4_62 = arith.constant 4 : index
    %c0_63 = arith.constant 0 : index
    %174 = vector.load %arg11[%c0_61, %c4_62, %c0_63] : memref<8x8x32xf32, #tpu.memory_space<vmem>>, vector<8x1x32xf32>
    %175 = vector.shape_cast %174 : vector<8x1x32xf32> to vector<8x32xf32>
    %176 = vector.shape_cast %173 : vector<8x32xf32> to vector<8x1x32xf32>
    tpu.vector_store %arg11[%c0_61, %c4_62, %c0_63], %176 {strides = array<i32>} : memref<8x8x32xf32, #tpu.memory_space<vmem>>, vector<8x1x32xf32>,
    %c0_64 = arith.constant 0 : index
    %c5 = arith.constant 5 : index
    %c0_65 = arith.constant 0 : index
    %177 = vector.load %arg23[%c0_64, %c5, %c0_65] : memref<8x8x128xf32, #tpu.memory_space<vmem>>, vector<8x1x128xf32>
    %178 = vector.shape_cast %177 : vector<8x1x128xf32> to vector<8x128xf32>
    %cst_66 = arith.constant dense<0.000000e+00> : vector<8x128xf32>
    %179 = tpu.matmul %173, %4, %cst_66 {dimension_numbers = #tpu.dot_dimension_numbers<[1], [0], [0], [1], [0, 0, 1, 1], [], []>} : vector<8x32xf32>, vector<32x128xf32>, vector<8x128xf32> -> vector<8x128xf32>
    %180 = arith.addf %178, %179 : vector<8x128xf32>
    %181 = vector.extract_strided_slice %180 {offsets = [0, 0], sizes = [8, 32], strides = [1, 1]} : vector<8x128xf32> to vector<8x32xf32>
    %182 = arith.negf %181 : vector<8x32xf32>
    %183 = math.exp %182 : vector<8x32xf32>
    %cst_67 = arith.constant 1.000000e+00 : f32
    %184 = vector.broadcast %cst_67 : f32 to vector<8x32xf32>
    %185 = arith.addf %184, %183 : vector<8x32xf32>
    %186 = arith.divf %184, %185 : vector<8x32xf32>
    %187 = vector.extract_strided_slice %180 {offsets = [0, 32], sizes = [8, 32], strides = [1, 1]} : vector<8x128xf32> to vector<8x32xf32>
    %188 = arith.negf %187 : vector<8x32xf32>
    %189 = math.exp %188 : vector<8x32xf32>
    %cst_68 = arith.constant 1.000000e+00 : f32
    %190 = vector.broadcast %cst_68 : f32 to vector<8x32xf32>
    %191 = arith.addf %190, %189 : vector<8x32xf32>
    %192 = arith.divf %190, %191 : vector<8x32xf32>
    %193 = vector.extract_strided_slice %180 {offsets = [0, 64], sizes = [8, 32], strides = [1, 1]} : vector<8x128xf32> to vector<8x32xf32>
    %194 = math.tanh %193 : vector<8x32xf32>
    %195 = vector.extract_strided_slice %180 {offsets = [0, 96], sizes = [8, 32], strides = [1, 1]} : vector<8x128xf32> to vector<8x32xf32>
    %196 = arith.negf %195 : vector<8x32xf32>
    %197 = math.exp %196 : vector<8x32xf32>
    %cst_69 = arith.constant 1.000000e+00 : f32
    %198 = vector.broadcast %cst_69 : f32 to vector<8x32xf32>
    %199 = arith.addf %198, %197 : vector<8x32xf32>
    %200 = arith.divf %198, %199 : vector<8x32xf32>
    %201 = arith.mulf %192, %171 : vector<8x32xf32>
    %202 = arith.mulf %186, %194 : vector<8x32xf32>
    %203 = arith.addf %201, %202 : vector<8x32xf32>
    %204 = math.tanh %203 : vector<8x32xf32>
    %205 = arith.mulf %200, %204 : vector<8x32xf32>
    %c0_70 = arith.constant 0 : index
    %c5_71 = arith.constant 5 : index
    %c0_72 = arith.constant 0 : index
    %206 = vector.load %arg11[%c0_70, %c5_71, %c0_72] : memref<8x8x32xf32, #tpu.memory_space<vmem>>, vector<8x1x32xf32>
    %207 = vector.shape_cast %206 : vector<8x1x32xf32> to vector<8x32xf32>
    %208 = vector.shape_cast %205 : vector<8x32xf32> to vector<8x1x32xf32>
    tpu.vector_store %arg11[%c0_70, %c5_71, %c0_72], %208 {strides = array<i32>} : memref<8x8x32xf32, #tpu.memory_space<vmem>>, vector<8x1x32xf32>,
    %c0_73 = arith.constant 0 : index
    %c6 = arith.constant 6 : index
    %c0_74 = arith.constant 0 : index
    %209 = vector.load %arg23[%c0_73, %c6, %c0_74] : memref<8x8x128xf32, #tpu.memory_space<vmem>>, vector<8x1x128xf32>
    %210 = vector.shape_cast %209 : vector<8x1x128xf32> to vector<8x128xf32>
    %cst_75 = arith.constant dense<0.000000e+00> : vector<8x128xf32>
    %211 = tpu.matmul %205, %4, %cst_75 {dimension_numbers = #tpu.dot_dimension_numbers<[1], [0], [0], [1], [0, 0, 1, 1], [], []>} : vector<8x32xf32>, vector<32x128xf32>, vector<8x128xf32> -> vector<8x128xf32>
    %212 = arith.addf %210, %211 : vector<8x128xf32>
    %213 = vector.extract_strided_slice %212 {offsets = [0, 0], sizes = [8, 32], strides = [1, 1]} : vector<8x128xf32> to vector<8x32xf32>
    %214 = arith.negf %213 : vector<8x32xf32>
    %215 = math.exp %214 : vector<8x32xf32>
    %cst_76 = arith.constant 1.000000e+00 : f32
    %216 = vector.broadcast %cst_76 : f32 to vector<8x32xf32>
    %217 = arith.addf %216, %215 : vector<8x32xf32>
    %218 = arith.divf %216, %217 : vector<8x32xf32>
    %219 = vector.extract_strided_slice %212 {offsets = [0, 32], sizes = [8, 32], strides = [1, 1]} : vector<8x128xf32> to vector<8x32xf32>
    %220 = arith.negf %219 : vector<8x32xf32>
    %221 = math.exp %220 : vector<8x32xf32>
    %cst_77 = arith.constant 1.000000e+00 : f32
    %222 = vector.broadcast %cst_77 : f32 to vector<8x32xf32>
    %223 = arith.addf %222, %221 : vector<8x32xf32>
    %224 = arith.divf %222, %223 : vector<8x32xf32>
    %225 = vector.extract_strided_slice %212 {offsets = [0, 64], sizes = [8, 32], strides = [1, 1]} : vector<8x128xf32> to vector<8x32xf32>
    %226 = math.tanh %225 : vector<8x32xf32>
    %227 = vector.extract_strided_slice %212 {offsets = [0, 96], sizes = [8, 32], strides = [1, 1]} : vector<8x128xf32> to vector<8x32xf32>
    %228 = arith.negf %227 : vector<8x32xf32>
    %229 = math.exp %228 : vector<8x32xf32>
    %cst_78 = arith.constant 1.000000e+00 : f32
    %230 = vector.broadcast %cst_78 : f32 to vector<8x32xf32>
    %231 = arith.addf %230, %229 : vector<8x32xf32>
    %232 = arith.divf %230, %231 : vector<8x32xf32>
    %233 = arith.mulf %224, %203 : vector<8x32xf32>
    %234 = arith.mulf %218, %226 : vector<8x32xf32>
    %235 = arith.addf %233, %234 : vector<8x32xf32>
    %236 = math.tanh %235 : vector<8x32xf32>
    %237 = arith.mulf %232, %236 : vector<8x32xf32>
    %c0_79 = arith.constant 0 : index
    %c6_80 = arith.constant 6 : index
    %c0_81 = arith.constant 0 : index
    %238 = vector.load %arg11[%c0_79, %c6_80, %c0_81] : memref<8x8x32xf32, #tpu.memory_space<vmem>>, vector<8x1x32xf32>
    %239 = vector.shape_cast %238 : vector<8x1x32xf32> to vector<8x32xf32>
    %240 = vector.shape_cast %237 : vector<8x32xf32> to vector<8x1x32xf32>
    tpu.vector_store %arg11[%c0_79, %c6_80, %c0_81], %240 {strides = array<i32>} : memref<8x8x32xf32, #tpu.memory_space<vmem>>, vector<8x1x32xf32>,
    %c0_82 = arith.constant 0 : index
    %c7 = arith.constant 7 : index
    %c0_83 = arith.constant 0 : index
    %241 = vector.load %arg23[%c0_82, %c7, %c0_83] : memref<8x8x128xf32, #tpu.memory_space<vmem>>, vector<8x1x128xf32>
    %242 = vector.shape_cast %241 : vector<8x1x128xf32> to vector<8x128xf32>
    %cst_84 = arith.constant dense<0.000000e+00> : vector<8x128xf32>
    %243 = tpu.matmul %237, %4, %cst_84 {dimension_numbers = #tpu.dot_dimension_numbers<[1], [0], [0], [1], [0, 0, 1, 1], [], []>} : vector<8x32xf32>, vector<32x128xf32>, vector<8x128xf32> -> vector<8x128xf32>
    %244 = arith.addf %242, %243 : vector<8x128xf32>
    %245 = vector.extract_strided_slice %244 {offsets = [0, 0], sizes = [8, 32], strides = [1, 1]} : vector<8x128xf32> to vector<8x32xf32>
    %246 = arith.negf %245 : vector<8x32xf32>
    %247 = math.exp %246 : vector<8x32xf32>
    %cst_85 = arith.constant 1.000000e+00 : f32
    %248 = vector.broadcast %cst_85 : f32 to vector<8x32xf32>
    %249 = arith.addf %248, %247 : vector<8x32xf32>
    %250 = arith.divf %248, %249 : vector<8x32xf32>
    %251 = vector.extract_strided_slice %244 {offsets = [0, 32], sizes = [8, 32], strides = [1, 1]} : vector<8x128xf32> to vector<8x32xf32>
    %252 = arith.negf %251 : vector<8x32xf32>
    %253 = math.exp %252 : vector<8x32xf32>
    %cst_86 = arith.constant 1.000000e+00 : f32
    %254 = vector.broadcast %cst_86 : f32 to vector<8x32xf32>
    %255 = arith.addf %254, %253 : vector<8x32xf32>
    %256 = arith.divf %254, %255 : vector<8x32xf32>
    %257 = vector.extract_strided_slice %244 {offsets = [0, 64], sizes = [8, 32], strides = [1, 1]} : vector<8x128xf32> to vector<8x32xf32>
    %258 = math.tanh %257 : vector<8x32xf32>
    %259 = vector.extract_strided_slice %244 {offsets = [0, 96], sizes = [8, 32], strides = [1, 1]} : vector<8x128xf32> to vector<8x32xf32>
    %260 = arith.negf %259 : vector<8x32xf32>
    %261 = math.exp %260 : vector<8x32xf32>
    %cst_87 = arith.constant 1.000000e+00 : f32
    %262 = vector.broadcast %cst_87 : f32 to vector<8x32xf32>
    %263 = arith.addf %262, %261 : vector<8x32xf32>
    %264 = arith.divf %262, %263 : vector<8x32xf32>
    %265 = arith.mulf %256, %235 : vector<8x32xf32>
    %266 = arith.mulf %250, %258 : vector<8x32xf32>
    %267 = arith.addf %265, %266 : vector<8x32xf32>
    %268 = math.tanh %267 : vector<8x32xf32>
    %269 = arith.mulf %264, %268 : vector<8x32xf32>
    %c0_88 = arith.constant 0 : index
    %c7_89 = arith.constant 7 : index
    %c0_90 = arith.constant 0 : index
    %270 = vector.load %arg11[%c0_88, %c7_89, %c0_90] : memref<8x8x32xf32, #tpu.memory_space<vmem>>, vector<8x1x32xf32>
    %271 = vector.shape_cast %270 : vector<8x1x32xf32> to vector<8x32xf32>
    %272 = vector.shape_cast %269 : vector<8x32xf32> to vector<8x1x32xf32>
    tpu.vector_store %arg11[%c0_88, %c7_89, %c0_90], %272 {strides = array<i32>} : memref<8x8x32xf32, #tpu.memory_space<vmem>>, vector<8x1x32xf32>,
    %c0_91 = arith.constant 0 : index
    %c0_92 = arith.constant 0 : index
    %c0_93 = arith.constant 0 : index
    %273 = vector.load %arg21[%c0_91, %c0_92, %c0_93] : memref<2x8x32xf32, #tpu.memory_space<vmem>>, vector<1x8x32xf32>
    %274 = vector.shape_cast %273 : vector<1x8x32xf32> to vector<8x32xf32>
    %275 = vector.shape_cast %269 : vector<8x32xf32> to vector<1x8x32xf32>
    tpu.vector_store %arg21[%c0_91, %c0_92, %c0_93], %275 {strides = array<i32>} : memref<2x8x32xf32, #tpu.memory_space<vmem>>, vector<1x8x32xf32>,
    %c0_94 = arith.constant 0 : index
    %c0_95 = arith.constant 0 : index
    %c0_96 = arith.constant 0 : index
    %276 = vector.load %arg22[%c0_94, %c0_95, %c0_96] : memref<2x8x32xf32, #tpu.memory_space<vmem>>, vector<1x8x32xf32>
    %277 = vector.shape_cast %276 : vector<1x8x32xf32> to vector<8x32xf32>
    %278 = vector.shape_cast %267 : vector<8x32xf32> to vector<1x8x32xf32>
    tpu.vector_store %arg22[%c0_94, %c0_95, %c0_96], %278 {strides = array<i32>} : memref<2x8x32xf32, #tpu.memory_space<vmem>>, vector<1x8x32xf32>,
    %c0_97 = arith.constant 0 : index
    %c0_98 = arith.constant 0 : index
    %279 = vector.load %arg17[%c0_97, %c0_98] : memref<32x128xf32, #tpu.memory_space<vmem>>, vector<32x128xf32>
    %c0_99 = arith.constant 0 : index
    %c0_100 = arith.constant 0 : index
    %280 = vector.load %arg18[%c0_99, %c0_100] : memref<32x128xf32, #tpu.memory_space<vmem>>, vector<32x128xf32>
    %c0_101 = arith.constant 0 : index
    %c0_102 = arith.constant 0 : index
    %281 = vector.load %arg19[%c0_101, %c0_102] : memref<1x128xf32, #tpu.memory_space<vmem>>, vector<1x128xf32>
    %c0_103 = arith.constant 0 : index
    %c0_104 = arith.constant 0 : index
    %c0_105 = arith.constant 0 : index
    %282 = vector.load %arg11[%c0_103, %c0_104, %c0_105] : memref<8x8x32xf32, #tpu.memory_space<vmem>>, vector<8x8x32xf32>
    %283 = vector.shape_cast %282 : vector<8x8x32xf32> to vector<64x32xf32>
    %cst_106 = arith.constant dense<0.000000e+00> : vector<64x128xf32>
    %284 = tpu.matmul %283, %279, %cst_106 {dimension_numbers = #tpu.dot_dimension_numbers<[1], [0], [0], [1], [0, 0, 1, 1], [], []>} : vector<64x32xf32>, vector<32x128xf32>, vector<64x128xf32> -> vector<64x128xf32>
    %285 = vector.broadcast %281 : vector<1x128xf32> to vector<64x128xf32>
    %286 = arith.addf %284, %285 : vector<64x128xf32>
    %287 = vector.shape_cast %286 : vector<64x128xf32> to vector<8x8x128xf32>
    %c0_107 = arith.constant 0 : index
    %c0_108 = arith.constant 0 : index
    %c0_109 = arith.constant 0 : index
    %288 = vector.load %arg23[%c0_107, %c0_108, %c0_109] : memref<8x8x128xf32, #tpu.memory_space<vmem>>, vector<8x8x128xf32>
    tpu.vector_store %arg23[%c0_107, %c0_108, %c0_109], %287 {strides = array<i32>} : memref<8x8x128xf32, #tpu.memory_space<vmem>>, vector<8x8x128xf32>,
    %c1_110 = arith.constant 1 : index
    %c0_111 = arith.constant 0 : index
    %c0_112 = arith.constant 0 : index
    %289 = vector.load %arg21[%c1_110, %c0_111, %c0_112] : memref<2x8x32xf32, #tpu.memory_space<vmem>>, vector<1x8x32xf32>
    %290 = vector.shape_cast %289 : vector<1x8x32xf32> to vector<8x32xf32>
    %c1_113 = arith.constant 1 : index
    %c0_114 = arith.constant 0 : index
    %c0_115 = arith.constant 0 : index
    %291 = vector.load %arg22[%c1_113, %c0_114, %c0_115] : memref<2x8x32xf32, #tpu.memory_space<vmem>>, vector<1x8x32xf32>
    %292 = vector.shape_cast %291 : vector<1x8x32xf32> to vector<8x32xf32>
    %c0_116 = arith.constant 0 : index
    %c0_117 = arith.constant 0 : index
    %c0_118 = arith.constant 0 : index
    %293 = vector.load %arg23[%c0_116, %c0_117, %c0_118] : memref<8x8x128xf32, #tpu.memory_space<vmem>>, vector<8x1x128xf32>
    %294 = vector.shape_cast %293 : vector<8x1x128xf32> to vector<8x128xf32>
    %cst_119 = arith.constant dense<0.000000e+00> : vector<8x128xf32>
    %295 = tpu.matmul %290, %280, %cst_119 {dimension_numbers = #tpu.dot_dimension_numbers<[1], [0], [0], [1], [0, 0, 1, 1], [], []>} : vector<8x32xf32>, vector<32x128xf32>, vector<8x128xf32> -> vector<8x128xf32>
    %296 = arith.addf %294, %295 : vector<8x128xf32>
    %297 = vector.extract_strided_slice %296 {offsets = [0, 0], sizes = [8, 32], strides = [1, 1]} : vector<8x128xf32> to vector<8x32xf32>
    %298 = arith.negf %297 : vector<8x32xf32>
    %299 = math.exp %298 : vector<8x32xf32>
    %cst_120 = arith.constant 1.000000e+00 : f32
    %300 = vector.broadcast %cst_120 : f32 to vector<8x32xf32>
    %301 = arith.addf %300, %299 : vector<8x32xf32>
    %302 = arith.divf %300, %301 : vector<8x32xf32>
    %303 = vector.extract_strided_slice %296 {offsets = [0, 32], sizes = [8, 32], strides = [1, 1]} : vector<8x128xf32> to vector<8x32xf32>
    %304 = arith.negf %303 : vector<8x32xf32>
    %305 = math.exp %304 : vector<8x32xf32>
    %cst_121 = arith.constant 1.000000e+00 : f32
    %306 = vector.broadcast %cst_121 : f32 to vector<8x32xf32>
    %307 = arith.addf %306, %305 : vector<8x32xf32>
    %308 = arith.divf %306, %307 : vector<8x32xf32>
    %309 = vector.extract_strided_slice %296 {offsets = [0, 64], sizes = [8, 32], strides = [1, 1]} : vector<8x128xf32> to vector<8x32xf32>
    %310 = math.tanh %309 : vector<8x32xf32>
    %311 = vector.extract_strided_slice %296 {offsets = [0, 96], sizes = [8, 32], strides = [1, 1]} : vector<8x128xf32> to vector<8x32xf32>
    %312 = arith.negf %311 : vector<8x32xf32>
    %313 = math.exp %312 : vector<8x32xf32>
    %cst_122 = arith.constant 1.000000e+00 : f32
    %314 = vector.broadcast %cst_122 : f32 to vector<8x32xf32>
    %315 = arith.addf %314, %313 : vector<8x32xf32>
    %316 = arith.divf %314, %315 : vector<8x32xf32>
    %317 = arith.mulf %308, %292 : vector<8x32xf32>
    %318 = arith.mulf %302, %310 : vector<8x32xf32>
    %319 = arith.addf %317, %318 : vector<8x32xf32>
    %320 = math.tanh %319 : vector<8x32xf32>
    %321 = arith.mulf %316, %320 : vector<8x32xf32>
    %c0_123 = arith.constant 0 : index
    %c0_124 = arith.constant 0 : index
    %c0_125 = arith.constant 0 : index
    %322 = vector.load %arg11[%c0_123, %c0_124, %c0_125] : memref<8x8x32xf32, #tpu.memory_space<vmem>>, vector<8x1x32xf32>
    %323 = vector.shape_cast %322 : vector<8x1x32xf32> to vector<8x32xf32>
    %324 = vector.shape_cast %321 : vector<8x32xf32> to vector<8x1x32xf32>
    tpu.vector_store %arg11[%c0_123, %c0_124, %c0_125], %324 {strides = array<i32>} : memref<8x8x32xf32, #tpu.memory_space<vmem>>, vector<8x1x32xf32>,
    %c0_126 = arith.constant 0 : index
    %c1_127 = arith.constant 1 : index
    %c0_128 = arith.constant 0 : index
    %325 = vector.load %arg23[%c0_126, %c1_127, %c0_128] : memref<8x8x128xf32, #tpu.memory_space<vmem>>, vector<8x1x128xf32>
    %326 = vector.shape_cast %325 : vector<8x1x128xf32> to vector<8x128xf32>
    %cst_129 = arith.constant dense<0.000000e+00> : vector<8x128xf32>
    %327 = tpu.matmul %321, %280, %cst_129 {dimension_numbers = #tpu.dot_dimension_numbers<[1], [0], [0], [1], [0, 0, 1, 1], [], []>} : vector<8x32xf32>, vector<32x128xf32>, vector<8x128xf32> -> vector<8x128xf32>
    %328 = arith.addf %326, %327 : vector<8x128xf32>
    %329 = vector.extract_strided_slice %328 {offsets = [0, 0], sizes = [8, 32], strides = [1, 1]} : vector<8x128xf32> to vector<8x32xf32>
    %330 = arith.negf %329 : vector<8x32xf32>
    %331 = math.exp %330 : vector<8x32xf32>
    %cst_130 = arith.constant 1.000000e+00 : f32
    %332 = vector.broadcast %cst_130 : f32 to vector<8x32xf32>
    %333 = arith.addf %332, %331 : vector<8x32xf32>
    %334 = arith.divf %332, %333 : vector<8x32xf32>
    %335 = vector.extract_strided_slice %328 {offsets = [0, 32], sizes = [8, 32], strides = [1, 1]} : vector<8x128xf32> to vector<8x32xf32>
    %336 = arith.negf %335 : vector<8x32xf32>
    %337 = math.exp %336 : vector<8x32xf32>
    %cst_131 = arith.constant 1.000000e+00 : f32
    %338 = vector.broadcast %cst_131 : f32 to vector<8x32xf32>
    %339 = arith.addf %338, %337 : vector<8x32xf32>
    %340 = arith.divf %338, %339 : vector<8x32xf32>
    %341 = vector.extract_strided_slice %328 {offsets = [0, 64], sizes = [8, 32], strides = [1, 1]} : vector<8x128xf32> to vector<8x32xf32>
    %342 = math.tanh %341 : vector<8x32xf32>
    %343 = vector.extract_strided_slice %328 {offsets = [0, 96], sizes = [8, 32], strides = [1, 1]} : vector<8x128xf32> to vector<8x32xf32>
    %344 = arith.negf %343 : vector<8x32xf32>
    %345 = math.exp %344 : vector<8x32xf32>
    %cst_132 = arith.constant 1.000000e+00 : f32
    %346 = vector.broadcast %cst_132 : f32 to vector<8x32xf32>
    %347 = arith.addf %346, %345 : vector<8x32xf32>
    %348 = arith.divf %346, %347 : vector<8x32xf32>
    %349 = arith.mulf %340, %319 : vector<8x32xf32>
    %350 = arith.mulf %334, %342 : vector<8x32xf32>
    %351 = arith.addf %349, %350 : vector<8x32xf32>
    %352 = math.tanh %351 : vector<8x32xf32>
    %353 = arith.mulf %348, %352 : vector<8x32xf32>
    %c0_133 = arith.constant 0 : index
    %c1_134 = arith.constant 1 : index
    %c0_135 = arith.constant 0 : index
    %354 = vector.load %arg11[%c0_133, %c1_134, %c0_135] : memref<8x8x32xf32, #tpu.memory_space<vmem>>, vector<8x1x32xf32>
    %355 = vector.shape_cast %354 : vector<8x1x32xf32> to vector<8x32xf32>
    %356 = vector.shape_cast %353 : vector<8x32xf32> to vector<8x1x32xf32>
    tpu.vector_store %arg11[%c0_133, %c1_134, %c0_135], %356 {strides = array<i32>} : memref<8x8x32xf32, #tpu.memory_space<vmem>>, vector<8x1x32xf32>,
    %c0_136 = arith.constant 0 : index
    %c2_137 = arith.constant 2 : index
    %c0_138 = arith.constant 0 : index
    %357 = vector.load %arg23[%c0_136, %c2_137, %c0_138] : memref<8x8x128xf32, #tpu.memory_space<vmem>>, vector<8x1x128xf32>
    %358 = vector.shape_cast %357 : vector<8x1x128xf32> to vector<8x128xf32>
    %cst_139 = arith.constant dense<0.000000e+00> : vector<8x128xf32>
    %359 = tpu.matmul %353, %280, %cst_139 {dimension_numbers = #tpu.dot_dimension_numbers<[1], [0], [0], [1], [0, 0, 1, 1], [], []>} : vector<8x32xf32>, vector<32x128xf32>, vector<8x128xf32> -> vector<8x128xf32>
    %360 = arith.addf %358, %359 : vector<8x128xf32>
    %361 = vector.extract_strided_slice %360 {offsets = [0, 0], sizes = [8, 32], strides = [1, 1]} : vector<8x128xf32> to vector<8x32xf32>
    %362 = arith.negf %361 : vector<8x32xf32>
    %363 = math.exp %362 : vector<8x32xf32>
    %cst_140 = arith.constant 1.000000e+00 : f32
    %364 = vector.broadcast %cst_140 : f32 to vector<8x32xf32>
    %365 = arith.addf %364, %363 : vector<8x32xf32>
    %366 = arith.divf %364, %365 : vector<8x32xf32>
    %367 = vector.extract_strided_slice %360 {offsets = [0, 32], sizes = [8, 32], strides = [1, 1]} : vector<8x128xf32> to vector<8x32xf32>
    %368 = arith.negf %367 : vector<8x32xf32>
    %369 = math.exp %368 : vector<8x32xf32>
    %cst_141 = arith.constant 1.000000e+00 : f32
    %370 = vector.broadcast %cst_141 : f32 to vector<8x32xf32>
    %371 = arith.addf %370, %369 : vector<8x32xf32>
    %372 = arith.divf %370, %371 : vector<8x32xf32>
    %373 = vector.extract_strided_slice %360 {offsets = [0, 64], sizes = [8, 32], strides = [1, 1]} : vector<8x128xf32> to vector<8x32xf32>
    %374 = math.tanh %373 : vector<8x32xf32>
    %375 = vector.extract_strided_slice %360 {offsets = [0, 96], sizes = [8, 32], strides = [1, 1]} : vector<8x128xf32> to vector<8x32xf32>
    %376 = arith.negf %375 : vector<8x32xf32>
    %377 = math.exp %376 : vector<8x32xf32>
    %cst_142 = arith.constant 1.000000e+00 : f32
    %378 = vector.broadcast %cst_142 : f32 to vector<8x32xf32>
    %379 = arith.addf %378, %377 : vector<8x32xf32>
    %380 = arith.divf %378, %379 : vector<8x32xf32>
    %381 = arith.mulf %372, %351 : vector<8x32xf32>
    %382 = arith.mulf %366, %374 : vector<8x32xf32>
    %383 = arith.addf %381, %382 : vector<8x32xf32>
    %384 = math.tanh %383 : vector<8x32xf32>
    %385 = arith.mulf %380, %384 : vector<8x32xf32>
    %c0_143 = arith.constant 0 : index
    %c2_144 = arith.constant 2 : index
    %c0_145 = arith.constant 0 : index
    %386 = vector.load %arg11[%c0_143, %c2_144, %c0_145] : memref<8x8x32xf32, #tpu.memory_space<vmem>>, vector<8x1x32xf32>
    %387 = vector.shape_cast %386 : vector<8x1x32xf32> to vector<8x32xf32>
    %388 = vector.shape_cast %385 : vector<8x32xf32> to vector<8x1x32xf32>
    tpu.vector_store %arg11[%c0_143, %c2_144, %c0_145], %388 {strides = array<i32>} : memref<8x8x32xf32, #tpu.memory_space<vmem>>, vector<8x1x32xf32>,
    %c0_146 = arith.constant 0 : index
    %c3_147 = arith.constant 3 : index
    %c0_148 = arith.constant 0 : index
    %389 = vector.load %arg23[%c0_146, %c3_147, %c0_148] : memref<8x8x128xf32, #tpu.memory_space<vmem>>, vector<8x1x128xf32>
    %390 = vector.shape_cast %389 : vector<8x1x128xf32> to vector<8x128xf32>
    %cst_149 = arith.constant dense<0.000000e+00> : vector<8x128xf32>
    %391 = tpu.matmul %385, %280, %cst_149 {dimension_numbers = #tpu.dot_dimension_numbers<[1], [0], [0], [1], [0, 0, 1, 1], [], []>} : vector<8x32xf32>, vector<32x128xf32>, vector<8x128xf32> -> vector<8x128xf32>
    %392 = arith.addf %390, %391 : vector<8x128xf32>
    %393 = vector.extract_strided_slice %392 {offsets = [0, 0], sizes = [8, 32], strides = [1, 1]} : vector<8x128xf32> to vector<8x32xf32>
    %394 = arith.negf %393 : vector<8x32xf32>
    %395 = math.exp %394 : vector<8x32xf32>
    %cst_150 = arith.constant 1.000000e+00 : f32
    %396 = vector.broadcast %cst_150 : f32 to vector<8x32xf32>
    %397 = arith.addf %396, %395 : vector<8x32xf32>
    %398 = arith.divf %396, %397 : vector<8x32xf32>
    %399 = vector.extract_strided_slice %392 {offsets = [0, 32], sizes = [8, 32], strides = [1, 1]} : vector<8x128xf32> to vector<8x32xf32>
    %400 = arith.negf %399 : vector<8x32xf32>
    %401 = math.exp %400 : vector<8x32xf32>
    %cst_151 = arith.constant 1.000000e+00 : f32
    %402 = vector.broadcast %cst_151 : f32 to vector<8x32xf32>
    %403 = arith.addf %402, %401 : vector<8x32xf32>
    %404 = arith.divf %402, %403 : vector<8x32xf32>
    %405 = vector.extract_strided_slice %392 {offsets = [0, 64], sizes = [8, 32], strides = [1, 1]} : vector<8x128xf32> to vector<8x32xf32>
    %406 = math.tanh %405 : vector<8x32xf32>
    %407 = vector.extract_strided_slice %392 {offsets = [0, 96], sizes = [8, 32], strides = [1, 1]} : vector<8x128xf32> to vector<8x32xf32>
    %408 = arith.negf %407 : vector<8x32xf32>
    %409 = math.exp %408 : vector<8x32xf32>
    %cst_152 = arith.constant 1.000000e+00 : f32
    %410 = vector.broadcast %cst_152 : f32 to vector<8x32xf32>
    %411 = arith.addf %410, %409 : vector<8x32xf32>
    %412 = arith.divf %410, %411 : vector<8x32xf32>
    %413 = arith.mulf %404, %383 : vector<8x32xf32>
    %414 = arith.mulf %398, %406 : vector<8x32xf32>
    %415 = arith.addf %413, %414 : vector<8x32xf32>
    %416 = math.tanh %415 : vector<8x32xf32>
    %417 = arith.mulf %412, %416 : vector<8x32xf32>
    %c0_153 = arith.constant 0 : index
    %c3_154 = arith.constant 3 : index
    %c0_155 = arith.constant 0 : index
    %418 = vector.load %arg11[%c0_153, %c3_154, %c0_155] : memref<8x8x32xf32, #tpu.memory_space<vmem>>, vector<8x1x32xf32>
    %419 = vector.shape_cast %418 : vector<8x1x32xf32> to vector<8x32xf32>
    %420 = vector.shape_cast %417 : vector<8x32xf32> to vector<8x1x32xf32>
    tpu.vector_store %arg11[%c0_153, %c3_154, %c0_155], %420 {strides = array<i32>} : memref<8x8x32xf32, #tpu.memory_space<vmem>>, vector<8x1x32xf32>,
    %c0_156 = arith.constant 0 : index
    %c4_157 = arith.constant 4 : index
    %c0_158 = arith.constant 0 : index
    %421 = vector.load %arg23[%c0_156, %c4_157, %c0_158] : memref<8x8x128xf32, #tpu.memory_space<vmem>>, vector<8x1x128xf32>
    %422 = vector.shape_cast %421 : vector<8x1x128xf32> to vector<8x128xf32>
    %cst_159 = arith.constant dense<0.000000e+00> : vector<8x128xf32>
    %423 = tpu.matmul %417, %280, %cst_159 {dimension_numbers = #tpu.dot_dimension_numbers<[1], [0], [0], [1], [0, 0, 1, 1], [], []>} : vector<8x32xf32>, vector<32x128xf32>, vector<8x128xf32> -> vector<8x128xf32>
    %424 = arith.addf %422, %423 : vector<8x128xf32>
    %425 = vector.extract_strided_slice %424 {offsets = [0, 0], sizes = [8, 32], strides = [1, 1]} : vector<8x128xf32> to vector<8x32xf32>
    %426 = arith.negf %425 : vector<8x32xf32>
    %427 = math.exp %426 : vector<8x32xf32>
    %cst_160 = arith.constant 1.000000e+00 : f32
    %428 = vector.broadcast %cst_160 : f32 to vector<8x32xf32>
    %429 = arith.addf %428, %427 : vector<8x32xf32>
    %430 = arith.divf %428, %429 : vector<8x32xf32>
    %431 = vector.extract_strided_slice %424 {offsets = [0, 32], sizes = [8, 32], strides = [1, 1]} : vector<8x128xf32> to vector<8x32xf32>
    %432 = arith.negf %431 : vector<8x32xf32>
    %433 = math.exp %432 : vector<8x32xf32>
    %cst_161 = arith.constant 1.000000e+00 : f32
    %434 = vector.broadcast %cst_161 : f32 to vector<8x32xf32>
    %435 = arith.addf %434, %433 : vector<8x32xf32>
    %436 = arith.divf %434, %435 : vector<8x32xf32>
    %437 = vector.extract_strided_slice %424 {offsets = [0, 64], sizes = [8, 32], strides = [1, 1]} : vector<8x128xf32> to vector<8x32xf32>
    %438 = math.tanh %437 : vector<8x32xf32>
    %439 = vector.extract_strided_slice %424 {offsets = [0, 96], sizes = [8, 32], strides = [1, 1]} : vector<8x128xf32> to vector<8x32xf32>
    %440 = arith.negf %439 : vector<8x32xf32>
    %441 = math.exp %440 : vector<8x32xf32>
    %cst_162 = arith.constant 1.000000e+00 : f32
    %442 = vector.broadcast %cst_162 : f32 to vector<8x32xf32>
    %443 = arith.addf %442, %441 : vector<8x32xf32>
    %444 = arith.divf %442, %443 : vector<8x32xf32>
    %445 = arith.mulf %436, %415 : vector<8x32xf32>
    %446 = arith.mulf %430, %438 : vector<8x32xf32>
    %447 = arith.addf %445, %446 : vector<8x32xf32>
    %448 = math.tanh %447 : vector<8x32xf32>
    %449 = arith.mulf %444, %448 : vector<8x32xf32>
    %c0_163 = arith.constant 0 : index
    %c4_164 = arith.constant 4 : index
    %c0_165 = arith.constant 0 : index
    %450 = vector.load %arg11[%c0_163, %c4_164, %c0_165] : memref<8x8x32xf32, #tpu.memory_space<vmem>>, vector<8x1x32xf32>
    %451 = vector.shape_cast %450 : vector<8x1x32xf32> to vector<8x32xf32>
    %452 = vector.shape_cast %449 : vector<8x32xf32> to vector<8x1x32xf32>
    tpu.vector_store %arg11[%c0_163, %c4_164, %c0_165], %452 {strides = array<i32>} : memref<8x8x32xf32, #tpu.memory_space<vmem>>, vector<8x1x32xf32>,
    %c0_166 = arith.constant 0 : index
    %c5_167 = arith.constant 5 : index
    %c0_168 = arith.constant 0 : index
    %453 = vector.load %arg23[%c0_166, %c5_167, %c0_168] : memref<8x8x128xf32, #tpu.memory_space<vmem>>, vector<8x1x128xf32>
    %454 = vector.shape_cast %453 : vector<8x1x128xf32> to vector<8x128xf32>
    %cst_169 = arith.constant dense<0.000000e+00> : vector<8x128xf32>
    %455 = tpu.matmul %449, %280, %cst_169 {dimension_numbers = #tpu.dot_dimension_numbers<[1], [0], [0], [1], [0, 0, 1, 1], [], []>} : vector<8x32xf32>, vector<32x128xf32>, vector<8x128xf32> -> vector<8x128xf32>
    %456 = arith.addf %454, %455 : vector<8x128xf32>
    %457 = vector.extract_strided_slice %456 {offsets = [0, 0], sizes = [8, 32], strides = [1, 1]} : vector<8x128xf32> to vector<8x32xf32>
    %458 = arith.negf %457 : vector<8x32xf32>
    %459 = math.exp %458 : vector<8x32xf32>
    %cst_170 = arith.constant 1.000000e+00 : f32
    %460 = vector.broadcast %cst_170 : f32 to vector<8x32xf32>
    %461 = arith.addf %460, %459 : vector<8x32xf32>
    %462 = arith.divf %460, %461 : vector<8x32xf32>
    %463 = vector.extract_strided_slice %456 {offsets = [0, 32], sizes = [8, 32], strides = [1, 1]} : vector<8x128xf32> to vector<8x32xf32>
    %464 = arith.negf %463 : vector<8x32xf32>
    %465 = math.exp %464 : vector<8x32xf32>
    %cst_171 = arith.constant 1.000000e+00 : f32
    %466 = vector.broadcast %cst_171 : f32 to vector<8x32xf32>
    %467 = arith.addf %466, %465 : vector<8x32xf32>
    %468 = arith.divf %466, %467 : vector<8x32xf32>
    %469 = vector.extract_strided_slice %456 {offsets = [0, 64], sizes = [8, 32], strides = [1, 1]} : vector<8x128xf32> to vector<8x32xf32>
    %470 = math.tanh %469 : vector<8x32xf32>
    %471 = vector.extract_strided_slice %456 {offsets = [0, 96], sizes = [8, 32], strides = [1, 1]} : vector<8x128xf32> to vector<8x32xf32>
    %472 = arith.negf %471 : vector<8x32xf32>
    %473 = math.exp %472 : vector<8x32xf32>
    %cst_172 = arith.constant 1.000000e+00 : f32
    %474 = vector.broadcast %cst_172 : f32 to vector<8x32xf32>
    %475 = arith.addf %474, %473 : vector<8x32xf32>
    %476 = arith.divf %474, %475 : vector<8x32xf32>
    %477 = arith.mulf %468, %447 : vector<8x32xf32>
    %478 = arith.mulf %462, %470 : vector<8x32xf32>
    %479 = arith.addf %477, %478 : vector<8x32xf32>
    %480 = math.tanh %479 : vector<8x32xf32>
    %481 = arith.mulf %476, %480 : vector<8x32xf32>
    %c0_173 = arith.constant 0 : index
    %c5_174 = arith.constant 5 : index
    %c0_175 = arith.constant 0 : index
    %482 = vector.load %arg11[%c0_173, %c5_174, %c0_175] : memref<8x8x32xf32, #tpu.memory_space<vmem>>, vector<8x1x32xf32>
    %483 = vector.shape_cast %482 : vector<8x1x32xf32> to vector<8x32xf32>
    %484 = vector.shape_cast %481 : vector<8x32xf32> to vector<8x1x32xf32>
    tpu.vector_store %arg11[%c0_173, %c5_174, %c0_175], %484 {strides = array<i32>} : memref<8x8x32xf32, #tpu.memory_space<vmem>>, vector<8x1x32xf32>,
    %c0_176 = arith.constant 0 : index
    %c6_177 = arith.constant 6 : index
    %c0_178 = arith.constant 0 : index
    %485 = vector.load %arg23[%c0_176, %c6_177, %c0_178] : memref<8x8x128xf32, #tpu.memory_space<vmem>>, vector<8x1x128xf32>
    %486 = vector.shape_cast %485 : vector<8x1x128xf32> to vector<8x128xf32>
    %cst_179 = arith.constant dense<0.000000e+00> : vector<8x128xf32>
    %487 = tpu.matmul %481, %280, %cst_179 {dimension_numbers = #tpu.dot_dimension_numbers<[1], [0], [0], [1], [0, 0, 1, 1], [], []>} : vector<8x32xf32>, vector<32x128xf32>, vector<8x128xf32> -> vector<8x128xf32>
    %488 = arith.addf %486, %487 : vector<8x128xf32>
    %489 = vector.extract_strided_slice %488 {offsets = [0, 0], sizes = [8, 32], strides = [1, 1]} : vector<8x128xf32> to vector<8x32xf32>
    %490 = arith.negf %489 : vector<8x32xf32>
    %491 = math.exp %490 : vector<8x32xf32>
    %cst_180 = arith.constant 1.000000e+00 : f32
    %492 = vector.broadcast %cst_180 : f32 to vector<8x32xf32>
    %493 = arith.addf %492, %491 : vector<8x32xf32>
    %494 = arith.divf %492, %493 : vector<8x32xf32>
    %495 = vector.extract_strided_slice %488 {offsets = [0, 32], sizes = [8, 32], strides = [1, 1]} : vector<8x128xf32> to vector<8x32xf32>
    %496 = arith.negf %495 : vector<8x32xf32>
    %497 = math.exp %496 : vector<8x32xf32>
    %cst_181 = arith.constant 1.000000e+00 : f32
    %498 = vector.broadcast %cst_181 : f32 to vector<8x32xf32>
    %499 = arith.addf %498, %497 : vector<8x32xf32>
    %500 = arith.divf %498, %499 : vector<8x32xf32>
    %501 = vector.extract_strided_slice %488 {offsets = [0, 64], sizes = [8, 32], strides = [1, 1]} : vector<8x128xf32> to vector<8x32xf32>
    %502 = math.tanh %501 : vector<8x32xf32>
    %503 = vector.extract_strided_slice %488 {offsets = [0, 96], sizes = [8, 32], strides = [1, 1]} : vector<8x128xf32> to vector<8x32xf32>
    %504 = arith.negf %503 : vector<8x32xf32>
    %505 = math.exp %504 : vector<8x32xf32>
    %cst_182 = arith.constant 1.000000e+00 : f32
    %506 = vector.broadcast %cst_182 : f32 to vector<8x32xf32>
    %507 = arith.addf %506, %505 : vector<8x32xf32>
    %508 = arith.divf %506, %507 : vector<8x32xf32>
    %509 = arith.mulf %500, %479 : vector<8x32xf32>
    %510 = arith.mulf %494, %502 : vector<8x32xf32>
    %511 = arith.addf %509, %510 : vector<8x32xf32>
    %512 = math.tanh %511 : vector<8x32xf32>
    %513 = arith.mulf %508, %512 : vector<8x32xf32>
    %c0_183 = arith.constant 0 : index
    %c6_184 = arith.constant 6 : index
    %c0_185 = arith.constant 0 : index
    %514 = vector.load %arg11[%c0_183, %c6_184, %c0_185] : memref<8x8x32xf32, #tpu.memory_space<vmem>>, vector<8x1x32xf32>
    %515 = vector.shape_cast %514 : vector<8x1x32xf32> to vector<8x32xf32>
    %516 = vector.shape_cast %513 : vector<8x32xf32> to vector<8x1x32xf32>
    tpu.vector_store %arg11[%c0_183, %c6_184, %c0_185], %516 {strides = array<i32>} : memref<8x8x32xf32, #tpu.memory_space<vmem>>, vector<8x1x32xf32>,
    %c0_186 = arith.constant 0 : index
    %c7_187 = arith.constant 7 : index
    %c0_188 = arith.constant 0 : index
    %517 = vector.load %arg23[%c0_186, %c7_187, %c0_188] : memref<8x8x128xf32, #tpu.memory_space<vmem>>, vector<8x1x128xf32>
    %518 = vector.shape_cast %517 : vector<8x1x128xf32> to vector<8x128xf32>
    %cst_189 = arith.constant dense<0.000000e+00> : vector<8x128xf32>
    %519 = tpu.matmul %513, %280, %cst_189 {dimension_numbers = #tpu.dot_dimension_numbers<[1], [0], [0], [1], [0, 0, 1, 1], [], []>} : vector<8x32xf32>, vector<32x128xf32>, vector<8x128xf32> -> vector<8x128xf32>
    %520 = arith.addf %518, %519 : vector<8x128xf32>
    %521 = vector.extract_strided_slice %520 {offsets = [0, 0], sizes = [8, 32], strides = [1, 1]} : vector<8x128xf32> to vector<8x32xf32>
    %522 = arith.negf %521 : vector<8x32xf32>
    %523 = math.exp %522 : vector<8x32xf32>
    %cst_190 = arith.constant 1.000000e+00 : f32
    %524 = vector.broadcast %cst_190 : f32 to vector<8x32xf32>
    %525 = arith.addf %524, %523 : vector<8x32xf32>
    %526 = arith.divf %524, %525 : vector<8x32xf32>
    %527 = vector.extract_strided_slice %520 {offsets = [0, 32], sizes = [8, 32], strides = [1, 1]} : vector<8x128xf32> to vector<8x32xf32>
    %528 = arith.negf %527 : vector<8x32xf32>
    %529 = math.exp %528 : vector<8x32xf32>
    %cst_191 = arith.constant 1.000000e+00 : f32
    %530 = vector.broadcast %cst_191 : f32 to vector<8x32xf32>
    %531 = arith.addf %530, %529 : vector<8x32xf32>
    %532 = arith.divf %530, %531 : vector<8x32xf32>
    %533 = vector.extract_strided_slice %520 {offsets = [0, 64], sizes = [8, 32], strides = [1, 1]} : vector<8x128xf32> to vector<8x32xf32>
    %534 = math.tanh %533 : vector<8x32xf32>
    %535 = vector.extract_strided_slice %520 {offsets = [0, 96], sizes = [8, 32], strides = [1, 1]} : vector<8x128xf32> to vector<8x32xf32>
    %536 = arith.negf %535 : vector<8x32xf32>
    %537 = math.exp %536 : vector<8x32xf32>
    %cst_192 = arith.constant 1.000000e+00 : f32
    %538 = vector.broadcast %cst_192 : f32 to vector<8x32xf32>
    %539 = arith.addf %538, %537 : vector<8x32xf32>
    %540 = arith.divf %538, %539 : vector<8x32xf32>
    %541 = arith.mulf %532, %511 : vector<8x32xf32>
    %542 = arith.mulf %526, %534 : vector<8x32xf32>
    %543 = arith.addf %541, %542 : vector<8x32xf32>
    %544 = math.tanh %543 : vector<8x32xf32>
    %545 = arith.mulf %540, %544 : vector<8x32xf32>
    %c0_193 = arith.constant 0 : index
    %c7_194 = arith.constant 7 : index
    %c0_195 = arith.constant 0 : index
    %546 = vector.load %arg11[%c0_193, %c7_194, %c0_195] : memref<8x8x32xf32, #tpu.memory_space<vmem>>, vector<8x1x32xf32>
    %547 = vector.shape_cast %546 : vector<8x1x32xf32> to vector<8x32xf32>
    %548 = vector.shape_cast %545 : vector<8x32xf32> to vector<8x1x32xf32>
    tpu.vector_store %arg11[%c0_193, %c7_194, %c0_195], %548 {strides = array<i32>} : memref<8x8x32xf32, #tpu.memory_space<vmem>>, vector<8x1x32xf32>,
    %c1_196 = arith.constant 1 : index
    %c0_197 = arith.constant 0 : index
    %c0_198 = arith.constant 0 : index
    %549 = vector.load %arg21[%c1_196, %c0_197, %c0_198] : memref<2x8x32xf32, #tpu.memory_space<vmem>>, vector<1x8x32xf32>
    %550 = vector.shape_cast %549 : vector<1x8x32xf32> to vector<8x32xf32>
    %551 = vector.shape_cast %545 : vector<8x32xf32> to vector<1x8x32xf32>
    tpu.vector_store %arg21[%c1_196, %c0_197, %c0_198], %551 {strides = array<i32>} : memref<2x8x32xf32, #tpu.memory_space<vmem>>, vector<1x8x32xf32>,
    %c1_199 = arith.constant 1 : index
    %c0_200 = arith.constant 0 : index
    %c0_201 = arith.constant 0 : index
    %552 = vector.load %arg22[%c1_199, %c0_200, %c0_201] : memref<2x8x32xf32, #tpu.memory_space<vmem>>, vector<1x8x32xf32>
    %553 = vector.shape_cast %552 : vector<1x8x32xf32> to vector<8x32xf32>
    %554 = vector.shape_cast %543 : vector<8x32xf32> to vector<1x8x32xf32>
    tpu.vector_store %arg22[%c1_199, %c0_200, %c0_201], %554 {strides = array<i32>} : memref<2x8x32xf32, #tpu.memory_space<vmem>>, vector<1x8x32xf32>,
    %c0_i32_202 = arith.constant 0 : i32
    %555 = arith.cmpi eq, %arg1, %c0_i32_202 : i32
    %556 = arith.extui %555 : i1 to i32
    %c0_i32_203 = arith.constant 0 : i32
    %557 = arith.cmpi ne, %556, %c0_i32_203 : i32
    scf.if %557 {
      %c0_204 = arith.constant 0 : index
      %c0_205 = arith.constant 0 : index
      %c0_206 = arith.constant 0 : index
      %558 = vector.load %arg21[%c0_204, %c0_205, %c0_206] : memref<2x8x32xf32, #tpu.memory_space<vmem>>, vector<2x8x32xf32>
      %c0_207 = arith.constant 0 : index
      %c0_208 = arith.constant 0 : index
      %c0_209 = arith.constant 0 : index
      %559 = vector.load %arg12[%c0_207, %c0_208, %c0_209] : memref<2x8x32xf32, #tpu.memory_space<vmem>>, vector<2x8x32xf32>
      tpu.vector_store %arg12[%c0_207, %c0_208, %c0_209], %558 {strides = array<i32>} : memref<2x8x32xf32, #tpu.memory_space<vmem>>, vector<2x8x32xf32>,
      %c0_210 = arith.constant 0 : index
      %c0_211 = arith.constant 0 : index
      %c0_212 = arith.constant 0 : index
      %560 = vector.load %arg22[%c0_210, %c0_211, %c0_212] : memref<2x8x32xf32, #tpu.memory_space<vmem>>, vector<2x8x32xf32>
      %c0_213 = arith.constant 0 : index
      %c0_214 = arith.constant 0 : index
      %c0_215 = arith.constant 0 : index
      %561 = vector.load %arg13[%c0_213, %c0_214, %c0_215] : memref<2x8x32xf32, #tpu.memory_space<vmem>>, vector<2x8x32xf32>
      tpu.vector_store %arg13[%c0_213, %c0_214, %c0_215], %560 {strides = array<i32>} : memref<2x8x32xf32, #tpu.memory_space<vmem>>, vector<2x8x32xf32>,
    } else {
    }
    return
  }
  func.func @transform_0(%arg0: i32, %arg1: i32) -> (i32, i32, i32) {
    %c0_i32 = arith.constant 0 : i32
    %c0_i32_0 = arith.constant 0 : i32
    return %arg0, %arg1, %c0_i32 : i32, i32, i32
  }
  func.func @transform_1(%arg0: i32, %arg1: i32) -> (i32, i32, i32) {
    %c0_i32 = arith.constant 0 : i32
    %c0_i32_0 = arith.constant 0 : i32
    %c0_i32_1 = arith.constant 0 : i32
    return %c0_i32, %arg0, %c0_i32_0 : i32, i32, i32
  }
  func.func @transform_2(%arg0: i32, %arg1: i32) -> (i32, i32, i32) {
    %c0_i32 = arith.constant 0 : i32
    %c0_i32_0 = arith.constant 0 : i32
    %c0_i32_1 = arith.constant 0 : i32
    return %c0_i32, %arg0, %c0_i32_0 : i32, i32, i32
  }
  func.func @transform_9(%arg0: i32, %arg1: i32) -> (i32, i32, i32) {
    %c0_i32 = arith.constant 0 : i32
    %c0_i32_0 = arith.constant 0 : i32
    return %arg0, %arg1, %c0_i32 : i32, i32, i32
  }
  func.func @transform_10(%arg0: i32, %arg1: i32) -> (i32, i32, i32) {
    %c0_i32 = arith.constant 0 : i32
    %c0_i32_0 = arith.constant 0 : i32
    %c0_i32_1 = arith.constant 0 : i32
    return %c0_i32, %arg0, %c0_i32_0 : i32, i32, i32
  }
  func.func @transform_11(%arg0: i32, %arg1: i32) -> (i32, i32, i32) {
    %c0_i32 = arith.constant 0 : i32
    %c0_i32_0 = arith.constant 0 : i32
    %c0_i32_1 = arith.constant 0 : i32
    return %c0_i32, %arg0, %c0_i32_0 : i32, i32, i32
  }
}

</mosaic_0001>

<bundles_post_ra>
// kernel: tpu_custom_call.1
= control target key start
LH: loop header
LB: loop body
LE: loop exit
PB: predicated region body
PF: predicated region fallthrough
CT: control target
= control target key end

     0   :  { %17 = vsyncpa [#allocation13], 0  ;;  %s12666_s0 = inlined_call_operand.hbm [shape: f32[8,8,16], index: 0, kind: input, shape index: {}]   ;;  %s12667_s1 = inlined_call_operand.hbm [shape: f32[2,8,32], index: 1, kind: input, shape index: {}]   ;;  %s12668_s2 = inlined_call_operand.hbm [shape: f32[2,8,32], index: 2, kind: input, shape index: {}]   ;;  %s12669_s3 = inlined_call_operand.hbm [shape: f32[16,128], index: 3, kind: input, shape index: {}]   ;;  %s12670_s4 = inlined_call_operand.hbm [shape: f32[32,128], index: 4, kind: input, shape index: {}]   ;;  %s12671_s5 = inlined_call_operand.vmem [shape: f32[1,128], index: 5, kind: input, shape index: {}]   ;;  %s12672_s6 = inlined_call_operand.hbm [shape: f32[32,128], index: 6, kind: input, shape index: {}]   ;;  %s12673_s7 = inlined_call_operand.hbm [shape: f32[32,128], index: 7, kind: input, shape index: {}]   ;;  %s12674_s8 = inlined_call_operand.vmem [shape: f32[1,128], index: 8, kind: input, shape index: {}]   ;;  %s12675_s9 = inlined_call_operand.hbm [shape: f32[8,8,32], index: 9, kind: output, shape index: {0}]   ;;  %s12676_s10 = inlined_call_operand.hbm [shape: f32[2,8,32], index: 10, kind: output, shape index: {1}]   ;;  %s12677_s11 = inlined_call_operand.hbm [shape: f32[2,8,32], index: 11, kind: output, shape index: {2}]  }
   0x1   :  { %18 = vsyncpa [#allocation16], 0 }
   0x2   :  { %19 = vsyncpa [#allocation14], 0 }
   0x3   :  { %20 = vsyncpa [#allocation20], 0  ;;  %s38_s19 = sshll.u32 %s12667_s1, 4  ;;  %s8637_s20 = smov [#allocation15]   ;;  %s39_s19 = int_to_ptr.hbm [resolvable:$true] %s38_s19 }
   0x4   :  { %s40_s21 = sshll.u32 %s8637_s20, 4  ;;  %s25_s24 = sshll.u32 %s12666_s0, 4  ;;  %s41_s21 = int_to_ptr.vmem [resolvable:$true] %s40_s21  ;;  %s26_s24 = int_to_ptr.hbm [resolvable:$true] %s25_s24 }
   0x5   :  { %s8638_s25 = smov 128   ;;  %s8639_s26 = smov 8  }
   0x6   :  { %46 = dma.hbm_to_vmem [thread:$0]  %s39_s19, 256, %s41_s21, [#allocation16], %s8638_s25, %s8638_s25, %s8639_s26  }
   0x7   :  { %s8640_s27 = smov [#allocation12]   ;;  %s51_s1 = sshll.u32 %s12668_s2, 4  ;;  %s52_s1 = int_to_ptr.hbm [resolvable:$true] %s51_s1 }
   0x8   :  { %s27_s28 = sshll.u32 %s8640_s27, 4  ;;  %s8641_s0 = smov [#allocation17]   ;;  %s28_s28 = int_to_ptr.vmem [resolvable:$true] %s27_s28 }
   0x9   :  { %33 = dma.hbm_to_vmem [thread:$0]  %s26_s24, 1024, %s28_s28, [#allocation13], %s8638_s25, %s8638_s25, %s8639_s26  }
   0xa   :  { %s53_s12 = sshll.u32 %s8641_s0, 4  ;;  %s54_s12 = int_to_ptr.vmem [resolvable:$true] %s53_s12 }
   0xb   :  { %59 = dma.hbm_to_vmem [thread:$0]  %s52_s1, 256, %s54_s12, [#allocation16], %s8638_s25, %s8638_s25, %s8639_s26  }
   0xc   :  { %8617 = dma.done.wait [#allocation13], 1024  }
   0xd   :  { %8618 = vsyncadd [#allocation13], 4294966272 }
   0xe   :  { %8619 = dma.done.wait [#allocation16], 512  }
   0xf   :  { %8620 = vsyncadd [#allocation16], 4294966784  ;;  %s83_s2 = sshll.u32 %s12669_s3, 4  ;;  %s8642_s15 = smov [#allocation2]   ;;  %v118_v0 = vld [vmem:[%s12671_s5] sm:$0x1]  ;;  %s84_s2 = int_to_ptr.hbm [resolvable:$true] %s83_s2 }
  0x10   :  { %s85_s16 = sshll.u32 %s8642_s15, 4  ;;  %s97_s19 = sshll.u32 %s12670_s4, 4  ;;  %119 = vst [vmem:[#allocation4] sm:$0x1] %v118_v0  ;;  %s86_s16 = int_to_ptr.vmem [resolvable:$true] %s85_s16  ;;  %s98_s19 = int_to_ptr.hbm [resolvable:$true] %s97_s19 }
  0x11   :  { %88 = dma.hbm_to_vmem [thread:$0]  %s84_s2, 256, %s86_s16, [#allocation8] }
  0x12   :  { %s8643_s20 = smov [#allocation3]  }
  0x13   :  { %s99_s21 = sshll.u32 %s8643_s20, 4  ;;  %s100_s21 = int_to_ptr.vmem [resolvable:$true] %s99_s21 }
  0x14   :  { %102 = dma.hbm_to_vmem [thread:$0]  %s98_s19, 512, %s100_s21, [#allocation8 + $0x1] }
  0x15   :  { %137 = vsyncadd [#allocation8 + $0x2], 16  ;;  %s146_s27 = sshll.u32 %s12672_s6, 4  ;;  %v181_v1 = vld [vmem:[%s12674_s8] sm:$0x1]  ;;  %s8644_s4 = smov [#allocation5]   ;;  %s147_s27 = int_to_ptr.hbm [resolvable:$true] %s146_s27 }
  0x16   :  { %s148_s30 = sshll.u32 %s8644_s4, 4  ;;  %182 = vst [vmem:[#allocation7] sm:$0x1] %v181_v1  ;;  %s160_s12 = sshll.u32 %s12673_s7, 4  ;;  %s149_s30 = int_to_ptr.vmem [resolvable:$true] %s148_s30  ;;  %s161_s12 = int_to_ptr.hbm [resolvable:$true] %s160_s12 }
  0x17   :  { %151 = dma.hbm_to_vmem [thread:$0]  %s147_s27, 512, %s149_s30, [#allocation8 + $0x3] }
  0x18   :  { %s8645_s5 = smov [#allocation6]  }
  0x19   :  { %s162_s13 = sshll.u32 %s8645_s5, 4  ;;  %s163_s13 = int_to_ptr.vmem [resolvable:$true] %s162_s13 }
  0x1a   :  { %165 = dma.hbm_to_vmem [thread:$0]  %s161_s12, 512, %s163_s13, [#allocation8 + $0x4] }
  0x1b   :  { %200 = vsyncadd [#allocation8 + $0x5], 16  ;;  %v201_v2 = vld [vmem:[#allocation15] sm:$0xff]  ;;  %vm203_vm0 = vcmask 261120   ;;  %v202_v3 = vld [vmem:[#allocation15 + $0x8] sm:$0xff] }
  0x1c   :  { %204 = vst.msk [vmem:[#allocation9] sm:$0xff] %vm203_vm0, %v201_v2  ;;  %v206_v4 = vld [vmem:[#allocation17] sm:$0xff]  ;;  %v207_v5 = vld [vmem:[#allocation17 + $0x8] sm:$0xff] }
  0x1d   :  { %205 = vst.msk [vmem:[#allocation9 + $0x8] sm:$0xff] %vm203_vm0, %v202_v3 }
  0x1e   :  { %208 = vst.msk [vmem:[#allocation10] sm:$0xff] %vm203_vm0, %v206_v4 }
  0x1f   :  { %209 = vst.msk [vmem:[#allocation10 + $0x8] sm:$0xff] %vm203_vm0, %v207_v5 }
  0x20   :  { %8621 = dma.done.wait [#allocation8], 256 }
  0x21   :  { %8622 = vsyncadd [#allocation8], 4294967040 }
  0x22   :  { %8623 = dma.done.wait [#allocation8 + $0x1], 512 }
  0x23   :  { %8624 = vsyncadd [#allocation8 + $0x1], 4294966784 }
  0x24   :  { %8625 = dma.done.wait [#allocation8 + $0x2], 16 }
  0x25   :  { %8626 = vsyncadd [#allocation8 + $0x2], 4294967280 }
  0x26   :  { %8627 = dma.done.wait [#allocation8 + $0x3], 512 }
  0x27   :  { %8628 = vsyncadd [#allocation8 + $0x3], 4294966784 }
  0x28   :  { %8629 = dma.done.wait [#allocation8 + $0x4], 512 }
  0x29   :  { %8630 = vsyncadd [#allocation8 + $0x4], 4294966784 }
  0x2a   :  { %8631 = dma.done.wait [#allocation8 + $0x5], 16 }
  0x2b   :  { %8632 = vsyncadd [#allocation8 + $0x5], 4294967280  ;;  %v226_v6 = vld [vmem:[#allocation2 + $0x8] sm:$0xff]  ;;  %v225_v7 = vld [vmem:[#allocation2] sm:$0xff]  ;;  %vm243_vm1 = vcmask 130048   ;;  %s8646_s6 = smov 64  }
  0x2c   :  { %282 = vmatpush.msra.mxu0 %v226_v6  ;;  %v232_v8 = vld [vmem:[#allocation12] sm:$0xff]  ;;  %v8752_v9 = vld [vmem:[#allocation3 + $0x18] sm:$0xff]  ;;  %v8754_v10 = vld [vmem:[#allocation3 + $0x10] sm:$0xff]  ;;  %s8647_s7 = smov 32   ;;  %s8648_s8 = smov 96  }
  0x2d   :  { %343 = vmatpush.msra.mxu1 %v8752_v9  ;;  %789 = vmatpush.msra.mxu2 %v8752_v9  ;;  %v8758_v11 = vld [vmem:[#allocation3 + $0x8] sm:$0xff]  ;;  %v8762_v12 = vld [vmem:[#allocation3] sm:$0xff]  ;;  %v234_v15 = vld [vmem:[#allocation12 + $0x10] sm:$0xff]  ;;  %s8649_s14 = smov [#allocation19]   ;;  %s7073_s17 = sshll.u32 %s12676_s10, 4  ;;  %s7074_s17 = int_to_ptr.hbm [resolvable:$true] %s7073_s17 }
  0x2e   :  { %283 = vmatpush.msra.mxu0 %v225_v7  ;;  %v317_v13 = vld [vmem:[#allocation9] sm:$0xff]  ;;  %v233_v14 = vld [vmem:[#allocation12 + $0x8] sm:$0xff]  ;;  %v235_v16 = vld [vmem:[#allocation12 + $0x18] sm:$0xff]  ;;  %s7071_s2 = sshll.u32 %s8649_s14, 4  ;;  %s8650_s18 = smov [#allocation21]   ;;  %s7072_s2 = int_to_ptr.vmem [resolvable:$true] %s7071_s2 }
  0x2f   :  { %7158 = vmatmul.msk.f32.vlgmr.msra.gmra.mxu0 %vm243_vm1, %v232_v8  ;;  %344 = vmatpush.msra.mxu1 %v8754_v10  ;;  %v236_v17 = vld [vmem:[#allocation12 + $0x20] sm:$0xff]  ;;  %v237_v18 = vld [vmem:[#allocation12 + $0x28] sm:$0xff]  ;;  %v238_v19 = vld [vmem:[#allocation12 + $0x30] sm:$0xff]  ;;  %s7084_s19 = sshll.u32 %s8650_s18, 4  ;;  %s7086_s22 = sshll.u32 %s12677_s11, 4  ;;  %s7085_s19 = int_to_ptr.vmem [resolvable:$true] %s7084_s19  ;;  %s7087_s22 = int_to_ptr.hbm [resolvable:$true] %s7086_s22 }
  0x30   :  { %790 = vmatpush.msra.mxu2 %v8754_v10  ;;  %v239_v20 = vld [vmem:[#allocation12 + $0x38] sm:$0xff]  ;;  %v318_v1 = vld [vmem:[#allocation10] sm:$0xff]  ;;  %s8651_s10 = smov [#allocation18]   ;;  %s7060_s24 = sshll.u32 %s12675_s9, 4  ;;  %s7061_s24 = int_to_ptr.hbm [resolvable:$true] %s7060_s24 }
  0x31   :  { %345 = vmatpush.msra.mxu1 %v8758_v11  ;;  %v7339_v21 = vld [vmem:[#allocation4] ss:$0 sm:$0xff]  ;;  %v536_v2 = vrot.slane %v318_v1, 1  ;;  %v538_v7 = vrot.slane %v318_v1, 3  ;;  %v537_v8 = vrot.slane %v318_v1, 2  ;;  %s7058_s11 = sshll.u32 %s8651_s10, 4  ;;  %s7059_s11 = int_to_ptr.vmem [resolvable:$true] %s7058_s11 }
  0x32   :  { %791 = vmatpush.msra.mxu2 %v8758_v11 }
  0x33   :  { %346 = vmatpush.msra.mxu1 %v8762_v12 }
  0x34   :  { %7166 = vmatmul.msk.f32.vlgmr.msra.gmra.mxu1 %vm203_vm0, %v317_v13  ;;  %792 = vmatpush.msra.mxu2 %v8762_v12 }
  0x35   :  { %1195 = vmatpush.msrb.mxu1 %v8752_v9 }
  0x36   :  { %2007 = vmatpush.msrb.mxu2 %v8752_v9 }
  0x37   :  { %7159 = vmatmul.msk.f32.gmra.mxu0 %vm243_vm1, %v233_v14  ;;  %1196 = vmatpush.msrb.mxu1 %v8754_v10  ;;  %v542_v14 = vrot.slane %v318_v1, 7 }
  0x38   :  { %2008 = vmatpush.msrb.mxu2 %v8754_v10 }
  0x39   :  { %1197 = vmatpush.msrb.mxu1 %v8758_v11 }
  0x3a   :  { %2009 = vmatpush.msrb.mxu2 %v8758_v11 }
  0x3b   :  { %1198 = vmatpush.msrb.mxu1 %v8762_v12 }
  0x3c   :  { %2010 = vmatpush.msrb.mxu2 %v8762_v12 }
  0x3d   :  { %1601 = vmatpush.msra.mxu1 %v8752_v9 }
  0x3f   :  { %1602 = vmatpush.msra.mxu1 %v8754_v10  ;;  %7160 = vmatmul.msk.f32.gmra.mxu0 %vm243_vm1, %v234_v15  ;;  %v540_v15 = vrot.slane %v318_v1, 5 }
  0x41   :  { %1603 = vmatpush.msra.mxu1 %v8758_v11 }
  0x43   :  { %1604 = vmatpush.msra.mxu1 %v8762_v12 }
  0x47   :  { %7161 = vmatmul.msk.f32.gmra.mxu0 %vm243_vm1, %v235_v16  ;;  %v541_v16 = vrot.slane %v318_v1, 6 }
  0x4f   :  { %7162 = vmatmul.msk.f32.gmra.mxu0 %vm243_vm1, %v236_v17 }
  0x57   :  { %7163 = vmatmul.msk.f32.gmra.mxu0 %vm243_vm1, %v237_v18  ;;  %v539_v18 = vrot.slane %v318_v1, 4 }
  0x5f   :  { %7164 = vmatmul.msk.f32.gmra.mxu0 %vm243_vm1, %v238_v19 }
  0x67   :  { %7165 = vmatmul.msk.f32.gmra.mxu0 %vm243_vm1, %v239_v20 }
  0xac   :  { %v285_v22 = vpop.f32.mrf.mxu0 }
  0xad   :  { %v286_v23 = vadd.f32 %v7339_v21, %v285_v22 }
  0xaf   :  { %309 = vst [vmem:[#allocation11] sm:$0xff] %v286_v23 }
  0xb1   :  { %v8789_v25 = vpop.f32.mrf.mxu1 }
  0xb2   :  { %v352_v29 = vrot.slane %v8789_v25, 1  ;;  %v353_v35 = vrot.slane %v8789_v25, 2  ;;  %v354_v41 = vrot.slane %v8789_v25, 3  ;;  %v355_v47 = vrot.slane %v8789_v25, 4 }
  0xb3   :  { %v356_v55 = vrot.slane %v8789_v25, 5  ;;  %v357_v61 = vrot.slane %v8789_v25, 6  ;;  %v358_v3 = vrot.slane %v8789_v25, 7 }
  0xb4   :  { %v288_v24 = vpop.f32.mrf.mxu0 }
  0xb5   :  { %v289_v26 = vadd.f32 %v7339_v21, %v288_v24 }
  0xb6   :  { %v319_v27 = vld [vmem:[#allocation11] sm:$0x1] }
  0xb7   :  { %310 = vst [vmem:[#allocation11 + $0x8] sm:$0xff] %v289_v26  ;;  %v8792_v28 = vadd.f32 %v8789_v25, %v319_v27 }
  0xb9   :  { %7341 = vtanh.f32 %v8792_v28  ;;  %v7167_v17 = vmul.f32 -1.442695, %v8792_v28 }
  0xbc   :  { %v291_v30 = vpop.f32.mrf.mxu0 }
  0xbd   :  { %v292_v31 = vadd.f32 %v7339_v21, %v291_v30 }
  0xbe   :  { %v320_v32 = vld [vmem:[#allocation11 + $0x8] sm:$0x1] }
  0xbf   :  { %v7342_v33 = vpop.eup %7341  ;;  %311 = vst [vmem:[#allocation11 + $0x10] sm:$0xff] %v292_v31  ;;  %v8796_v34 = vadd.f32 %v352_v29, %v320_v32 }
  0xc0   :  { %583 = vrot.lane.b32.xlu1 %v7342_v33, %s8646_s6 }
  0xc1   :  { %7343 = vtanh.f32 %v8796_v34  ;;  %v7168_v19 = vmul.f32 -1.442695, %v8796_v34 }
  0xc4   :  { %v294_v36 = vpop.f32.mrf.mxu0 }
  0xc5   :  { %v295_v37 = vadd.f32 %v7339_v21, %v294_v36 }
  0xc6   :  { %v321_v38 = vld [vmem:[#allocation11 + $0x10] sm:$0x1] }
  0xc7   :  { %v7344_v39 = vpop.eup %7343  ;;  %312 = vst [vmem:[#allocation11 + $0x18] sm:$0xff] %v295_v37  ;;  %v8801_v40 = vadd.f32 %v353_v35, %v321_v38 }
  0xc8   :  { %585 = vrot.lane.b32.xlu0 %v7344_v39, %s8646_s6 }
  0xc9   :  { %7345 = vtanh.f32 %v8801_v40  ;;  %v7169_v23 = vmul.f32 -1.442695, %v8801_v40 }
  0xcc   :  { %v297_v42 = vpop.f32.mrf.mxu0 }
  0xcd   :  { %v298_v43 = vadd.f32 %v7339_v21, %v297_v42 }
  0xce   :  { %v322_v44 = vld [vmem:[#allocation11 + $0x18] sm:$0x1] }
  0xcf   :  { %v7346_v45 = vpop.eup %7345  ;;  %313 = vst [vmem:[#allocation11 + $0x20] sm:$0xff] %v298_v43  ;;  %v8806_v46 = vadd.f32 %v354_v41, %v322_v44 }
  0xd0   :  { %587 = vrot.lane.b32.xlu0 %v7346_v45, %s8646_s6 }
  0xd1   :  { %7347 = vtanh.f32 %v8806_v46  ;;  %v7170_v30 = vmul.f32 -1.442695, %v8806_v46 }
  0xd4   :  { %v300_v48 = vpop.f32.mrf.mxu0 }
  0xd5   :  { %v301_v49 = vadd.f32 %v7339_v21, %v300_v48 }
  0xd6   :  { %v323_v50 = vld [vmem:[#allocation11 + $0x20] sm:$0x1] }
  0xd7   :  { %v7348_v51 = vpop.eup %7347  ;;  %314 = vst [vmem:[#allocation11 + $0x28] sm:$0xff] %v301_v49  ;;  %v371_v52 = vadd.f32 %v355_v47, %v323_v50 }
  0xd8   :  { %589 = vrot.lane.b32.xlu1 %v7348_v51, %s8646_s6 }
  0xd9   :  { %7349 = vtanh.f32 %v371_v52  ;;  %v7171_v20 = vmul.f32 -1.442695, %v371_v52 }
  0xdc   :  { %v303_v53 = vpop.f32.mrf.mxu0 }
  0xdd   :  { %v304_v54 = vadd.f32 %v7339_v21, %v303_v53 }
  0xde   :  { %v324_v56 = vld [vmem:[#allocation11 + $0x28] sm:$0x1] }
  0xdf   :  { %v7350_v57 = vpop.eup %7349  ;;  %315 = vst [vmem:[#allocation11 + $0x30] sm:$0xff] %v304_v54  ;;  %v372_v58 = vadd.f32 %v356_v55, %v324_v56 }
  0xe0   :  { %591 = vrot.lane.b32.xlu2 %v7350_v57, %s8646_s6 }
  0xe1   :  { %7351 = vtanh.f32 %v372_v58  ;;  %v7172_v24 = vmul.f32 -1.442695, %v372_v58 }
  0xe4   :  { %v306_v59 = vpop.f32.mrf.mxu0 }
  0xe5   :  { %v307_v60 = vadd.f32 %v7339_v21, %v306_v59 }
  0xe6   :  { %v325_v62 = vld [vmem:[#allocation11 + $0x30] sm:$0x1] }
  0xe7   :  { %v7352_v63 = vpop.eup %7351  ;;  %316 = vst [vmem:[#allocation11 + $0x38] sm:$0xff] %v307_v60  ;;  %v8815_v0 = vadd.f32 %v357_v61, %v325_v62 }
  0xe8   :  { %593 = vrot.lane.b32.xlu2 %v7352_v63, %s8646_s6 }
  0xe9   :  { %7353 = vtanh.f32 %v8815_v0 }
  0xee   :  { %v326_v4 = vld [vmem:[#allocation11 + $0x38] sm:$0x1] }
  0xef   :  { %v7354_v5 = vpop.eup %7353  ;;  %v8820_v6 = vadd.f32 %v358_v3, %v326_v4  ;;  %v7173_v4 = vmul.f32 -1.442695, %v8815_v0 }
  0xf0   :  { %545 = vrot.lane.b32.xlu2 %v536_v2, %s8647_s7  ;;  %595 = vrot.lane.b32.xlu0 %v7354_v5, %s8646_s6 }
  0xf1   :  { %7355 = vtanh.f32 %v8820_v6 }
  0xf2   :  { %7357 = vpow2.f32 %v7167_v17 }
  0xf3   :  { %7359 = vpow2.f32 %v7168_v19 }
  0xf4   :  { %7361 = vpow2.f32 %v7171_v20 }
  0xf7   :  { %v7356_v13 = vpop.eup %7355 }
  0xf8   :  { %549 = vrot.lane.b32.xlu2 %v538_v7, %s8647_s7  ;;  %547 = vrot.lane.b32.xlu0 %v537_v8, %s8647_s7  ;;  %v7358_v21 = vpop.eup %7357 }
  0xf9   :  { %597 = vrot.lane.b32.xlu1 %v7356_v13, %s8646_s6  ;;  %v399_v22 = vadd.f32 1.0, %v7358_v21  ;;  %v7360_v25 = vpop.eup %7359 }
  0xfa   :  { %v7362_v26 = vpop.eup %7361  ;;  %v8836_v27 = vadd.f32 1.0, %v7360_v25 }
  0xfb   :  { %7363 = vrcp.f32 %v399_v22  ;;  %v8838_v28 = vadd.f32 1.0, %v7362_v26  ;;  %v418_v49 = vand.u32 2147483648, %v399_v22  ;;  %vm412_vm3 = vweird.f32 %v399_v22 }
  0xfc   :  { %7365 = vpow2.f32 %v7169_v23  ;;  %v416_v50 = vand.u32 2147483647, %v399_v22  ;;  %vm427_vm8 = vweird.f32 %v8836_v27  ;;  %v433_v3 = vand.u32 2147483648, %v8836_v27 }
  0xfd   :  { %7367 = vpow2.f32 %v7172_v24  ;;  %v419_v56 = vor.u32 1.1754944e-38, %v418_v49  ;;  %v478_v2 = vand.u32 2147483648, %v8838_v28  ;;  %vm472_vm9 = vweird.f32 %v8838_v28 }
  0xfe   :  { %7369 = vrcp.f32 %v8836_v27  ;;  %vm417_vm5 = vcmp.eq.f32.partialorder %v416_v50, 8.507059e+37  ;;  %v476_v5 = vand.u32 2147483647, %v8838_v28  ;;  %v431_v8 = vand.u32 2147483647, %v8836_v27 }
  0xff   :  { %7371 = vrcp.f32 %v8838_v28  ;;  %v479_v17 = vor.u32 1.1754944e-38, %v478_v2 }
 0x100   :  { %557 = vrot.lane.b32.xlu2 %v542_v14, %s8647_s7  ;;  %553 = vrot.lane.b32.xlu0 %v540_v15, %s8647_s7  ;;  %7373 = vpow2.f32 %v7170_v30  ;;  %vm477_vm12 = vcmp.eq.f32.partialorder %v476_v5, 8.507059e+37  ;;  %vm432_vm13 = vcmp.eq.f32.partialorder %v431_v8, 8.507059e+37 }
 0x101   :  { %543 = vrot.lane.b32.xlu1 %v318_v1, %s8647_s7  ;;  %v7364_v29 = vpop.eup %7363 }
 0x102   :  { %v7366_v31 = vpop.eup %7365  ;;  %v408_v33 = vmul.f32 %v7364_v29, %v399_v22  ;;  %vm413_vm2 = vweird.f32 %v7364_v29 }
 0x103   :  { %v7368_v32 = vpop.eup %7367  ;;  %v8843_v34 = vadd.f32 1.0, %v7366_v31  ;;  %vm414_vm4 = vmor %vm412_vm3, %vm413_vm2 }
 0x104   :  { %v8845_v35 = vadd.f32 1.0, %v7368_v32  ;;  %v8847_v36 = vpop.eup %7369  ;;  %v409_v37 = vsub.f32 1.0, %v408_v33  ;;  %v7174_v33 = vmul.f32 -1.442695, %v8820_v6 }
 0x105   :  { %v7372_v38 = vpop.eup %7371  ;;  %7375 = vrcp.f32 %v8843_v34  ;;  %v423_v40 = vmul.f32 %v8847_v36, %v8836_v27  ;;  %vm428_vm6 = vweird.f32 %v8847_v36  ;;  %vm442_vm1 = vweird.f32 %v8843_v34 }
 0x106   :  { %v7374_v39 = vpop.eup %7373  ;;  %7377 = vrcp.f32 %v8845_v35  ;;  %v410_v41 = vmul.f32 %v7364_v29, %v409_v37  ;;  %v468_v42 = vmul.f32 %v7372_v38, %v8838_v28  ;;  %vm473_vm7 = vweird.f32 %v7372_v38  ;;  %vm8880_vm10 = vmor %vm427_vm8, %vm428_vm6 }
 0x107   :  { %v8854_v43 = vadd.f32 1.0, %v7374_v39  ;;  %v424_v44 = vsub.f32 1.0, %v423_v40  ;;  %vm474_vm11 = vmor %vm472_vm9, %vm473_vm7  ;;  %v493_v28 = vand.u32 2147483648, %v8845_v35  ;;  %vm487_vm2 = vweird.f32 %v8845_v35 }
 0x108   :  { %555 = vrot.lane.b32.xlu0 %v541_v16, %s8647_s7  ;;  %v411_v46 = vadd.f32 %v7364_v29, %v410_v41  ;;  %v469_v47 = vsub.f32 1.0, %v468_v42  ;;  %v491_v30 = vand.u32 2147483647, %v8845_v35  ;;  %v446_v32 = vand.u32 2147483647, %v8843_v34 }
 0x109   :  { %551 = vrot.lane.b32.xlu1 %v539_v18, %s8647_s7  ;;  %7379 = vrcp.f32 %v8854_v43  ;;  %v425_v51 = vmul.f32 %v8847_v36, %v424_v44  ;;  %v434_v18 = vor.u32 1.1754944e-38, %v433_v3  ;;  %v494_v39 = vor.u32 1.1754944e-38, %v493_v28 }
 0x10a   :  { %v415_v53 = vsel %vm414_vm4, %v7364_v29, %v411_v46  ;;  %v470_v54 = vmul.f32 %v7372_v38, %v469_v47  ;;  %7381 = vpow2.f32 %v7173_v4  ;;  %v448_v29 = vand.u32 2147483648, %v8843_v34 }
 0x10b   :  { %v8856_v45 = vpop.eup %7375  ;;  %v8866_v58 = vsel %vm417_vm5, %v419_v56, %v415_v53  ;;  %v426_v59 = vadd.f32 %v8847_v36, %v425_v51  ;;  %vm492_vm5 = vcmp.eq.f32.partialorder %v491_v30, 8.507059e+37  ;;  %vm447_vm6 = vcmp.eq.f32.partialorder %v446_v32, 8.507059e+37 }
 0x10c   :  { %v8858_v48 = vpop.eup %7377  ;;  %v438_v52 = vmul.f32 %v8856_v45, %v8843_v34  ;;  %v471_v63 = vadd.f32 %v7372_v38, %v470_v54  ;;  %vm443_vm14 = vweird.f32 %v8856_v45  ;;  %v449_v40 = vor.u32 1.1754944e-38, %v448_v29 }
 0x10d   :  { %v483_v55 = vmul.f32 %v8858_v48, %v8845_v35  ;;  %v430_v0 = vsel %vm8880_vm10, %v8847_v36, %v426_v59  ;;  %vm488_vm15 = vweird.f32 %v8858_v48  ;;  %vm8911_vm3 = vmor %vm442_vm1, %vm443_vm14  ;;  %7383 = vpow2.f32 %v7174_v33 }
 0x10e   :  { %v439_v60 = vsub.f32 1.0, %v438_v52  ;;  %v475_v15 = vsel %vm474_vm11, %v7372_v38, %v471_v63  ;;  %v8895_v22 = vsel %vm432_vm13, %v434_v18, %v430_v0  ;;  %vm489_vm4 = vmor %vm487_vm2, %vm488_vm15  ;;  %vm457_vm8 = vweird.f32 %v8854_v43 }
 0x10f   :  { %v8870_v61 = vpop.eup %7379  ;;  %v484_v1 = vsub.f32 1.0, %v483_v55  ;;  %v8893_v20 = vsel %vm477_vm12, %v479_v17, %v475_v15  ;;  %v461_v49 = vand.u32 2147483647, %v8854_v43 }
 0x110   :  { %v440_v13 = vmul.f32 %v8856_v45, %v439_v60  ;;  %v453_v14 = vmul.f32 %v8870_v61, %v8854_v43  ;;  %v7382_v36 = vpop.eup %7381  ;;  %vm458_vm7 = vweird.f32 %v8870_v61 }
 0x111   :  { %v485_v16 = vmul.f32 %v8858_v48, %v484_v1  ;;  %v405_v44 = vadd.f32 1.0, %v7382_v36  ;;  %vm459_vm9 = vmor %vm457_vm8, %vm458_vm7  ;;  %vm462_vm10 = vcmp.eq.f32.partialorder %v461_v49, 8.507059e+37  ;;  %vm762_vm7 = vcmask 1044484  }
 0x112   :  { %v441_v23 = vadd.f32 %v8856_v45, %v440_v13  ;;  %v454_v24 = vsub.f32 1.0, %v453_v14  ;;  %vm765_vm8 = vcmask 1045509  }
 0x113   :  { %v486_v27 = vadd.f32 %v8858_v48, %v485_v16  ;;  %7385 = vrcp.f32 %v405_v44  ;;  %v7384_v51 = vpop.eup %7383  ;;  %v508_v2 = vand.u32 2147483648, %v405_v44  ;;  %vm502_vm12 = vweird.f32 %v405_v44 }
 0x114   :  { %v445_v38 = vsel %vm8911_vm3, %v8856_v45, %v441_v23  ;;  %v455_v35 = vmul.f32 %v8870_v61, %v454_v24  ;;  %v406_v56 = vadd.f32 1.0, %v7384_v51  ;;  %v506_v3 = vand.u32 2147483647, %v405_v44 }
 0x115   :  { %v490_v37 = vsel %vm489_vm4, %v8858_v48, %v486_v27  ;;  %v8924_v42 = vsel %vm447_vm6, %v449_v40, %v445_v38  ;;  %v463_v48 = vand.u32 2147483648, %v8854_v43  ;;  %v509_v7 = vor.u32 1.1754944e-38, %v508_v2 }
 0x116   :  { %v8922_v41 = vsel %vm492_vm5, %v494_v39, %v490_v37  ;;  %v456_v45 = vadd.f32 %v8870_v61, %v455_v35  ;;  %7387 = vrcp.f32 %v406_v56  ;;  %vm507_vm14 = vcmp.eq.f32.partialorder %v506_v3, 8.507059e+37 }
 0x117   :  { %v464_v52 = vor.u32 1.1754944e-38, %v463_v48  ;;  %v523_v0 = vand.u32 2147483648, %v406_v56  ;;  %vm517_vm1 = vweird.f32 %v406_v56  ;;  %v521_v16 = vand.u32 2147483647, %v406_v56 }
 0x118   :  { %v460_v50 = vsel %vm459_vm9, %v8870_v61, %v456_v45  ;;  %vm753_vm4 = vcmask 1041409   ;;  %vm756_vm5 = vcmask 1042434   ;;  %vm759_vm6 = vcmask 1043459  }
 0x119   :  { %v8936_v53 = vsel %vm462_vm10, %v464_v52, %v460_v50  ;;  %v524_v18 = vor.u32 1.1754944e-38, %v523_v0  ;;  %vm522_vm3 = vcmp.eq.f32.partialorder %v521_v16, 8.507059e+37  ;;  %vm768_vm9 = vcmask 1046534  }
 0x11a   :  { %vm771_vm10 = vcmask 1047559  }
 0x132   :  { %v584_v57 = vpop.permute.xlu1 %583 }
 0x133   :  { %v607_v62 = vmul.f32 %v584_v57, %v8866_v58  ;;  %v7386_v57 = vpop.eup %7385 }
 0x134   :  { %v498_v59 = vmul.f32 %v7386_v57, %v405_v44  ;;  %v7388_v43 = vpop.eup %7387  ;;  %vm503_vm11 = vweird.f32 %v7386_v57 }
 0x135   :  { %623 = vrot.lane.b32.xlu1 %v607_v62, %s8647_s7  ;;  %v513_v63 = vmul.f32 %v7388_v43, %v406_v56  ;;  %vm504_vm13 = vmor %vm502_vm12, %vm503_vm11  ;;  %vm518_vm15 = vweird.f32 %v7388_v43 }
 0x136   :  { %v499_v60 = vsub.f32 1.0, %v498_v59  ;;  %vm519_vm2 = vmor %vm517_vm1, %vm518_vm15 }
 0x137   :  { %v514_v61 = vsub.f32 1.0, %v513_v63 }
 0x138   :  { %v500_v62 = vmul.f32 %v7386_v57, %v499_v60 }
 0x139   :  { %v515_v5 = vmul.f32 %v7388_v43, %v514_v61 }
 0x13a   :  { %v592_v19 = vpop.permute.xlu2 %591  ;;  %v586_v21 = vpop.permute.xlu0 %585  ;;  %v501_v1 = vadd.f32 %v7386_v57, %v500_v62 }
 0x13b   :  { %v611_v25 = vmul.f32 %v592_v19, %v8893_v20  ;;  %v608_v26 = vmul.f32 %v586_v21, %v8895_v22  ;;  %v516_v15 = vadd.f32 %v7388_v43, %v515_v5 }
 0x13c   :  { %v505_v4 = vsel %vm504_vm13, %v7386_v57, %v501_v1 }
 0x13d   :  { %625 = vrot.lane.b32.xlu0 %v608_v26, %s8647_s7  ;;  %631 = vrot.lane.b32.xlu1 %v611_v25, %s8647_s7  ;;  %v8940_v8 = vsel %vm507_vm14, %v509_v7, %v505_v4  ;;  %v520_v17 = vsel %vm519_vm2, %v7388_v43, %v516_v15 }
 0x13e   :  { %v8944_v19 = vsel %vm522_vm3, %v524_v18, %v520_v17 }
 0x142   :  { %v594_v34 = vpop.permute.xlu2 %593  ;;  %v588_v6 = vpop.permute.xlu0 %587 }
 0x143   :  { %v612_v46 = vmul.f32 %v594_v34, %v8922_v41  ;;  %v609_v47 = vmul.f32 %v588_v6, %v8924_v42 }
 0x145   :  { %627 = vrot.lane.b32.xlu2 %v609_v47, %s8647_s7  ;;  %633 = vrot.lane.b32.xlu0 %v612_v46, %s8647_s7 }
 0x14a   :  { %v590_v54 = vpop.permute.xlu1 %589  ;;  %v546_v24 = vpop.permute.xlu2 %545 }
 0x14b   :  { %v610_v55 = vmul.f32 %v590_v54, %v8936_v53  ;;  %v568_v40 = vmul.f32 %v546_v24, %v8895_v22 }
 0x14d   :  { %629 = vrot.lane.b32.xlu2 %v610_v55, %s8647_s7 }
 0x152   :  { %v550_v25 = vpop.permute.xlu2 %549 }
 0x153   :  { %v570_v49 = vmul.f32 %v550_v25, %v8936_v53 }
 0x15a   :  { %v558_v28 = vpop.permute.xlu2 %557 }
 0x15b   :  { %v574_v60 = vmul.f32 %v558_v28, %v8944_v19 }
 0x162   :  { %v596_v13 = vpop.permute.xlu0 %595 }
 0x163   :  { %v613_v14 = vmul.f32 %v596_v13, %v8940_v8 }
 0x165   :  { %635 = vrot.lane.b32.xlu1 %v613_v14, %s8647_s7 }
 0x16a   :  { %v548_v26 = vpop.permute.xlu0 %547 }
 0x16b   :  { %v598_v21 = vpop.permute.xlu1 %597  ;;  %v569_v30 = vmul.f32 %v548_v26, %v8924_v42 }
 0x16c   :  { %v614_v23 = vmul.f32 %v598_v21, %v8944_v19 }
 0x16e   :  { %637 = vrot.lane.b32.xlu2 %v614_v23, %s8647_s7 }
 0x172   :  { %v554_v29 = vpop.permute.xlu0 %553 }
 0x173   :  { %v544_v27 = vpop.permute.xlu1 %543  ;;  %v572_v51 = vmul.f32 %v554_v29, %v8922_v41 }
 0x174   :  { %v567_v36 = vmul.f32 %v544_v27, %v8866_v58 }
 0x17a   :  { %v556_v37 = vpop.permute.xlu0 %555 }
 0x17b   :  { %v552_v31 = vpop.permute.xlu1 %551  ;;  %v573_v1 = vmul.f32 %v556_v37, %v8940_v8 }
 0x17c   :  { %v571_v34 = vmul.f32 %v552_v31, %v8893_v20 }
 0x19f   :  { %v628_v32 = vpop.permute.xlu2 %627 }
 0x1a0   :  { %v8949_v33 = vadd.f32 %v628_v32, %v569_v30 }
 0x1a2   :  { %7389 = vtanh.f32 %v8949_v33 }
 0x1a7   :  { %v624_v38 = vpop.permute.xlu1 %623  ;;  %v630_v48 = vpop.permute.xlu2 %629 }
 0x1a8   :  { %v7390_v35 = vpop.eup %7389  ;;  %v8953_v39 = vadd.f32 %v624_v38, %v567_v36  ;;  %v8967_v50 = vadd.f32 %v630_v48, %v570_v49  ;;  %v745_v48 = vld [vmem:[#allocation11 + $0x9] sm:$0x1] }
 0x1a9   :  { %675 = vrot.lane.b32.xlu1 %v7390_v35, %s8646_s6  ;;  %v744_v35 = vld [vmem:[#allocation11 + $0x1] sm:$0x1] }
 0x1aa   :  { %7391 = vtanh.f32 %v8953_v39 }
 0x1af   :  { %v626_v6 = vpop.permute.xlu0 %625  ;;  %v632_v44 = vpop.permute.xlu1 %631 }
 0x1b0   :  { %v8959_v46 = vadd.f32 %v626_v6, %v568_v40  ;;  %v8961_v47 = vadd.f32 %v632_v44, %v571_v34  ;;  %v7392_v45 = vpop.eup %7391  ;;  %v746_v44 = vld [vmem:[#allocation11 + $0x11] sm:$0x1] }
 0x1b1   :  { %671 = vrot.lane.b32.xlu2 %v7392_v45, %s8646_s6 }
 0x1b2   :  { %7393 = vtanh.f32 %v8959_v46 }
 0x1b3   :  { %7395 = vtanh.f32 %v8961_v47 }
 0x1b4   :  { %7397 = vtanh.f32 %v8967_v50 }
 0x1b7   :  { %v634_v52 = vpop.permute.xlu0 %633 }
 0x1b8   :  { %v7394_v54 = vpop.eup %7393  ;;  %v8970_v55 = vadd.f32 %v634_v52, %v572_v51  ;;  %v749_v52 = vld [vmem:[#allocation11 + $0x29] sm:$0x1] }
 0x1b9   :  { %v7396_v56 = vpop.eup %7395  ;;  %673 = vrot.lane.b32.xlu0 %v7394_v54, %s8646_s6 }
 0x1ba   :  { %7399 = vtanh.f32 %v8970_v55  ;;  %679 = vrot.lane.b32.xlu1 %v7396_v56, %s8646_s6  ;;  %v7398_v57 = vpop.eup %7397  ;;  %v748_v56 = vld [vmem:[#allocation11 + $0x21] sm:$0x1] }
 0x1c0   :  { %v7400_v59 = vpop.eup %7399 }
 0x1c1   :  { %677 = vrot.lane.b32.xlu0 %v7398_v57, %s8646_s6  ;;  %681 = vrot.lane.b32.xlu2 %v7400_v59, %s8646_s6  ;;  %v747_v57 = vld [vmem:[#allocation11 + $0x19] sm:$0x1] }
 0x1c8   :  { %v638_v43 = vpop.permute.xlu2 %637 }
 0x1c9   :  { %v8979_v62 = vadd.f32 %v638_v43, %v574_v60 }
 0x1cb   :  { %7401 = vtanh.f32 %v8979_v62 }
 0x1d1   :  { %v7402_v63 = vpop.eup %7401 }
 0x1d2   :  { %685 = vrot.lane.b32.xlu1 %v7402_v63, %s8646_s6 }
 0x1d7   :  { %v636_v61 = vpop.permute.xlu1 %635 }
 0x1d8   :  { %v8984_v2 = vadd.f32 %v636_v61, %v573_v1 }
 0x1da   :  { %7403 = vtanh.f32 %v8984_v2 }
 0x1e0   :  { %v7404_v3 = vpop.eup %7403 }
 0x1e1   :  { %683 = vrot.lane.b32.xlu0 %v7404_v3, %s8646_s6  ;;  %v751_v3 = vld [vmem:[#allocation11 + $0x39] sm:$0x1] }
 0x20b   :  { %v672_v13 = vpop.permute.xlu2 %671 }
 0x20c   :  { %v8999_v18 = vmul.f32 %v672_v13, %v8866_v58 }
 0x21b   :  { %v676_v5 = vpop.permute.xlu1 %675  ;;  %v682_v24 = vpop.permute.xlu2 %681 }
 0x21c   :  { %v8996_v17 = vmul.f32 %v676_v5, %v8924_v42  ;;  %v9010_v26 = vmul.f32 %v682_v24, %v8922_v41  ;;  %v750_v5 = vld [vmem:[#allocation11 + $0x31] sm:$0x1] }
 0x21e   :  { %v755_v23 = vrot.slane %v8996_v17, 6  ;;  %12728 = vst [vmem:[#allocation44_spill] sm:$0xff] %v9010_v26  ;;  %v764_v31 = vrot.slane %v9010_v26, 3 }
 0x22b   :  { %v674_v4 = vpop.permute.xlu0 %673 }
 0x22c   :  { %v8989_v7 = vmul.f32 %v674_v4, %v8895_v22  ;;  %v680_v15 = vpop.permute.xlu1 %679 }
 0x22d   :  { %v9006_v25 = vmul.f32 %v680_v15, %v8893_v20 }
 0x22e   :  { %v752_v0 = vrot.slane %v8989_v7, 7 }
 0x22f   :  { %v761_v27 = vrot.slane %v9006_v25, 4 }
 0x230   :  { %v754_v21 = vsel %vm753_vm4, %v752_v0, %v8999_v18 }
 0x231   :  { %v757_v42 = vsel %vm756_vm5, %v755_v23, %v754_v21 }
 0x233   :  { %v678_v14 = vpop.permute.xlu0 %677 }
 0x234   :  { %v8993_v16 = vmul.f32 %v678_v14, %v8936_v53 }
 0x236   :  { %v758_v22 = vrot.slane %v8993_v16, 5 }
 0x238   :  { %v760_v58 = vsel %vm759_vm6, %v758_v22, %v757_v42 }
 0x239   :  { %v763_v20 = vsel %vm762_vm7, %v761_v27, %v760_v58 }
 0x23a   :  { %v766_v36 = vsel %vm765_vm8, %v764_v31, %v763_v20 }
 0x244   :  { %v686_v53 = vpop.permute.xlu1 %685 }
 0x245   :  { %v9015_v28 = vmul.f32 %v686_v53, %v8944_v19 }
 0x247   :  { %12729 = vst [vmem:[#allocation45_spill] sm:$0xff] %v9015_v28  ;;  %v770_v32 = vrot.slane %v9015_v28, 1 }
 0x253   :  { %v684_v29 = vpop.permute.xlu0 %683 }
 0x254   :  { %v9018_v30 = vmul.f32 %v684_v29, %v8940_v8 }
 0x256   :  { %12730 = vst [vmem:[#allocation46_spill] sm:$0xff] %v9018_v30  ;;  %v767_v41 = vrot.slane %v9018_v30, 2 }
 0x258   :  { %v769_v19 = vsel %vm768_vm9, %v767_v41, %v766_v36 }
 0x259   :  { %v772_v37 = vsel %vm771_vm10, %v770_v32, %v769_v19 }
 0x25a   :  { %773 = vrot.lane.b32.xlu2 %v772_v37, %s8647_s7 }
 0x2b4   :  { %v774_v8 = vpop.permute.xlu2 %773 }
 0x2b5   :  { %7175 = vmatmul.msk.f32.vlgmr.msra.gmra.mxu2 %vm203_vm0, %v774_v8 }
 0x2b6   :  { %2413 = vmatpush.msra.mxu2 %v8752_v9 }
 0x2b8   :  { %2414 = vmatpush.msra.mxu2 %v8754_v10 }
 0x2ba   :  { %2415 = vmatpush.msra.mxu2 %v8758_v11 }
 0x2bc   :  { %2416 = vmatpush.msra.mxu2 %v8762_v12 }
 0x338   :  { %v794_v38 = vpop.f32.mrf.mxu2 }
 0x339   :  { %v813_v40 = vadd.f32 %v794_v38, %v744_v35  ;;  %v799_v34 = vrot.slane %v794_v38, 2  ;;  %v798_v6 = vrot.slane %v794_v38, 1  ;;  %v802_v49 = vrot.slane %v794_v38, 5 }
 0x33a   :  { %v801_v9 = vrot.slane %v794_v38, 4  ;;  %v800_v10 = vrot.slane %v794_v38, 3  ;;  %v804_v63 = vrot.slane %v794_v38, 7  ;;  %v803_v1 = vrot.slane %v794_v38, 6 }
 0x33b   :  { %7405 = vtanh.f32 %v813_v40  ;;  %v815_v45 = vadd.f32 %v799_v34, %v746_v44  ;;  %v814_v51 = vadd.f32 %v798_v6, %v745_v48  ;;  %v818_v54 = vadd.f32 %v802_v49, %v749_v52 }
 0x33c   :  { %v817_v12 = vadd.f32 %v801_v9, %v748_v56  ;;  %v816_v60 = vadd.f32 %v800_v10, %v747_v57  ;;  %v820_v4 = vadd.f32 %v804_v63, %v751_v3  ;;  %v819_v14 = vadd.f32 %v803_v1, %v750_v5 }
 0x33d   :  { %7407 = vtanh.f32 %v815_v45  ;;  %v7176_v22 = vmul.f32 -1.442695, %v813_v40  ;;  %v7181_v23 = vmul.f32 -1.442695, %v818_v54  ;;  %v7178_v20 = vmul.f32 -1.442695, %v815_v45 }
 0x33e   :  { %7409 = vtanh.f32 %v814_v51  ;;  %v7177_v31 = vmul.f32 -1.442695, %v814_v51  ;;  %v7180_v37 = vmul.f32 -1.442695, %v817_v12  ;;  %v7179_v38 = vmul.f32 -1.442695, %v816_v60 }
 0x33f   :  { %7411 = vtanh.f32 %v818_v54  ;;  %v7183_v52 = vmul.f32 -1.442695, %v820_v4  ;;  %v7182_v10 = vmul.f32 -1.442695, %v819_v14 }
 0x340   :  { %7413 = vtanh.f32 %v817_v12 }
 0x341   :  { %v7406_v11 = vpop.eup %7405  ;;  %7415 = vtanh.f32 %v816_v60 }
 0x342   :  { %997 = vrot.lane.b32.xlu2 %v7406_v11, %s8646_s6  ;;  %7417 = vtanh.f32 %v820_v4 }
 0x343   :  { %v7408_v59 = vpop.eup %7407  ;;  %7419 = vtanh.f32 %v819_v14 }
 0x344   :  { %1001 = vrot.lane.b32.xlu1 %v7408_v59, %s8646_s6  ;;  %v7410_v43 = vpop.eup %7409  ;;  %7421 = vpow2.f32 %v7176_v22 }
 0x345   :  { %999 = vrot.lane.b32.xlu0 %v7410_v43, %s8646_s6  ;;  %v7412_v61 = vpop.eup %7411  ;;  %7423 = vpow2.f32 %v7181_v23 }
 0x346   :  { %v7414_v13 = vpop.eup %7413 }
 0x347   :  { %v7416_v15 = vpop.eup %7415 }
 0x348   :  { %v7418_v0 = vpop.eup %7417 }
 0x349   :  { %v7420_v21 = vpop.eup %7419 }
 0x34a   :  { %1007 = vrot.lane.b32.xlu2 %v7412_v61, %s8646_s6  ;;  %v7422_v24 = vpop.eup %7421 }
 0x34b   :  { %v845_v42 = vadd.f32 1.0, %v7422_v24  ;;  %v7424_v53 = vpop.eup %7423 }
 0x34c   :  { %1005 = vrot.lane.b32.xlu1 %v7414_v13, %s8646_s6  ;;  %v850_v58 = vadd.f32 1.0, %v7424_v53 }
 0x34d   :  { %1003 = vrot.lane.b32.xlu0 %v7416_v15, %s8646_s6  ;;  %7425 = vrcp.f32 %v845_v42  ;;  %v864_v6 = vand.u32 2147483648, %v845_v42  ;;  %vm858_vm12 = vweird.f32 %v845_v42  ;;  %v862_v44 = vand.u32 2147483647, %v845_v42 }
 0x34e   :  { %7427 = vrcp.f32 %v850_v58  ;;  %v939_v60 = vand.u32 2147483648, %v850_v58  ;;  %vm933_vm1 = vweird.f32 %v850_v58  ;;  %v937_v43 = vand.u32 2147483647, %v850_v58 }
 0x34f   :  { %7429 = vpow2.f32 %v7178_v20  ;;  %v865_v9 = vor.u32 1.1754944e-38, %v864_v6  ;;  %vm863_vm14 = vcmp.eq.f32.partialorder %v862_v44, 8.507059e+37 }
 0x350   :  { %7431 = vpow2.f32 %v7177_v31  ;;  %v940_v4 = vor.u32 1.1754944e-38, %v939_v60  ;;  %vm938_vm3 = vcmp.eq.f32.partialorder %v937_v43, 8.507059e+37 }
 0x351   :  { %7433 = vpow2.f32 %v7180_v37 }
 0x352   :  { %7435 = vpow2.f32 %v7179_v38 }
 0x353   :  { %v7426_v27 = vpop.eup %7425 }
 0x354   :  { %1011 = vrot.lane.b32.xlu1 %v7418_v0, %s8646_s6  ;;  %v854_v29 = vmul.f32 %v7426_v27, %v845_v42  ;;  %v7428_v32 = vpop.eup %7427  ;;  %vm859_vm11 = vweird.f32 %v7426_v27 }
 0x355   :  { %1009 = vrot.lane.b32.xlu0 %v7420_v21, %s8646_s6  ;;  %v929_v19 = vmul.f32 %v7428_v32, %v850_v58  ;;  %v7430_v8 = vpop.eup %7429  ;;  %vm860_vm13 = vmor %vm858_vm12, %vm859_vm11  ;;  %vm934_vm15 = vweird.f32 %v7428_v32 }
 0x356   :  { %v855_v41 = vsub.f32 1.0, %v854_v29  ;;  %v7432_v34 = vpop.eup %7431  ;;  %v9041_v48 = vadd.f32 1.0, %v7430_v8  ;;  %vm935_vm2 = vmor %vm933_vm1, %vm934_vm15 }
 0x357   :  { %v930_v40 = vsub.f32 1.0, %v929_v19  ;;  %v9043_v51 = vadd.f32 1.0, %v7432_v34  ;;  %v7434_v54 = vpop.eup %7433 }
 0x358   :  { %v856_v36 = vmul.f32 %v7426_v27, %v855_v41  ;;  %7437 = vrcp.f32 %v9041_v48  ;;  %v7436_v59 = vpop.eup %7435  ;;  %v9051_v63 = vadd.f32 1.0, %v7434_v54  ;;  %vm888_vm12 = vweird.f32 %v9041_v48 }
 0x359   :  { %v931_v49 = vmul.f32 %v7428_v32, %v930_v40  ;;  %7439 = vrcp.f32 %v9043_v51  ;;  %v9053_v3 = vadd.f32 1.0, %v7436_v59  ;;  %v894_v8 = vand.u32 2147483648, %v9041_v48 }
 0x35a   :  { %v857_v35 = vadd.f32 %v7426_v27, %v856_v36  ;;  %7441 = vpow2.f32 %v7183_v52  ;;  %v892_v38 = vand.u32 2147483647, %v9041_v48  ;;  %v877_v6 = vand.u32 2147483647, %v9043_v51 }
 0x35b   :  { %v932_v57 = vadd.f32 %v7428_v32, %v931_v49  ;;  %7443 = vpow2.f32 %v7182_v10  ;;  %v879_v44 = vand.u32 2147483648, %v9043_v51  ;;  %vm873_vm15 = vweird.f32 %v9043_v51 }
 0x35c   :  { %v861_v45 = vsel %vm860_vm13, %v7426_v27, %v857_v35  ;;  %7445 = vrcp.f32 %v9051_v63 }
 0x35d   :  { %v9046_v56 = vsel %vm863_vm14, %v865_v9, %v861_v45  ;;  %v936_v61 = vsel %vm935_vm2, %v7428_v32, %v932_v57  ;;  %7447 = vrcp.f32 %v9053_v3  ;;  %v895_v9 = vor.u32 1.1754944e-38, %v894_v8 }
 0x35e   :  { %v7438_v1 = vpop.eup %7437  ;;  %v9056_v15 = vsel %vm938_vm3, %v940_v4, %v936_v61  ;;  %vm893_vm2 = vcmp.eq.f32.partialorder %v892_v38, 8.507059e+37  ;;  %vm878_vm3 = vcmp.eq.f32.partialorder %v877_v6, 8.507059e+37  ;;  %v880_v57 = vor.u32 1.1754944e-38, %v879_v44 }
 0x35f   :  { %v7440_v5 = vpop.eup %7439  ;;  %v884_v0 = vmul.f32 %v7438_v1, %v9041_v48  ;;  %vm889_vm11 = vweird.f32 %v7438_v1  ;;  %v922_v61 = vand.u32 2147483647, %v9051_v63  ;;  %v924_v4 = vand.u32 2147483648, %v9051_v63 }
 0x360   :  { %v7442_v13 = vpop.eup %7441  ;;  %v869_v23 = vmul.f32 %v7440_v5, %v9043_v51  ;;  %vm874_vm13 = vweird.f32 %v7440_v5  ;;  %vm890_vm14 = vmor %vm888_vm12, %vm889_vm11  ;;  %vm918_vm12 = vweird.f32 %v9051_v63 }
 0x361   :  { %v7444_v22 = vpop.eup %7443  ;;  %v9063_v24 = vadd.f32 1.0, %v7442_v13  ;;  %v885_v42 = vsub.f32 1.0, %v884_v0  ;;  %vm875_vm1 = vmor %vm873_vm15, %vm874_vm13  ;;  %v909_v0 = vand.u32 2147483648, %v9053_v3  ;;  %vm903_vm15 = vweird.f32 %v9053_v3 }
 0x362   :  { %v9065_v53 = vpop.eup %7445  ;;  %v9067_v58 = vadd.f32 1.0, %v7444_v22  ;;  %v870_v27 = vsub.f32 1.0, %v869_v23  ;;  %v925_v23 = vor.u32 1.1754944e-38, %v924_v4 }
 0x363   :  { %v9069_v29 = vpop.eup %7447  ;;  %7449 = vrcp.f32 %v9063_v24  ;;  %v886_v20 = vmul.f32 %v7438_v1, %v885_v42  ;;  %v914_v31 = vmul.f32 %v9065_v53, %v9051_v63  ;;  %vm919_vm11 = vweird.f32 %v9065_v53 }
 0x364   :  { %7451 = vrcp.f32 %v9067_v58  ;;  %v871_v41 = vmul.f32 %v7440_v5, %v870_v27  ;;  %v899_v32 = vmul.f32 %v9069_v29, %v9053_v3  ;;  %vm904_vm13 = vweird.f32 %v9069_v29 }
 0x365   :  { %v887_v36 = vadd.f32 %v7438_v1, %v886_v20  ;;  %v915_v19 = vsub.f32 1.0, %v914_v31  ;;  %v907_v63 = vand.u32 2147483647, %v9053_v3  ;;  %v967_v8 = vand.u32 2147483647, %v9063_v24 }
 0x366   :  { %v872_v35 = vadd.f32 %v7440_v5, %v871_v41  ;;  %v900_v40 = vsub.f32 1.0, %v899_v32  ;;  %v910_v41 = vor.u32 1.1754944e-38, %v909_v0  ;;  %v952_v6 = vand.u32 2147483647, %v9067_v58 }
 0x367   :  { %v891_v45 = vsel %vm890_vm14, %v7438_v1, %v887_v36  ;;  %v916_v49 = vmul.f32 %v9065_v53, %v915_v19  ;;  %vm920_vm14 = vmor %vm918_vm12, %vm919_vm11  ;;  %vm963_vm12 = vweird.f32 %v9063_v24 }
 0x368   :  { %v876_v48 = vsel %vm875_vm1, %v7440_v5, %v872_v35  ;;  %v901_v54 = vmul.f32 %v9069_v29, %v900_v40  ;;  %vm905_vm1 = vmor %vm903_vm15, %vm904_vm13  ;;  %v954_v35 = vand.u32 2147483648, %v9067_v58  ;;  %vm948_vm15 = vweird.f32 %v9067_v58 }
 0x369   :  { %v9077_v37 = vpop.eup %7449  ;;  %v917_v59 = vadd.f32 %v9065_v53, %v916_v49  ;;  %v9098_v1 = vsel %vm878_vm3, %v880_v57, %v876_v48  ;;  %vm908_vm3 = vcmp.eq.f32.partialorder %v907_v63, 8.507059e+37 }
 0x36a   :  { %v9082_v34 = vpop.eup %7451  ;;  %v959_v52 = vmul.f32 %v9077_v37, %v9063_v24  ;;  %v902_v13 = vadd.f32 %v9069_v29, %v901_v54  ;;  %vm964_vm11 = vweird.f32 %v9077_v37 }
 0x36b   :  { %v944_v10 = vmul.f32 %v9082_v34, %v9067_v58  ;;  %vm949_vm13 = vweird.f32 %v9082_v34  ;;  %v981_v58 = vmul.f32 %v9046_v56, %v8953_v39 }
 0x36c   :  { %v960_v60 = vsub.f32 1.0, %v959_v52  ;;  %v906_v42 = vsel %vm905_vm1, %v9069_v29, %v902_v13  ;;  %v969_v29 = vand.u32 2147483648, %v9063_v24  ;;  %vm950_vm1 = vmor %vm948_vm15, %vm949_vm13  ;;  %v955_v52 = vor.u32 1.1754944e-38, %v954_v35 }
 0x36d   :  { %v9120_v3 = vsel %vm908_vm3, %v910_v41, %v906_v42  ;;  %vm953_vm3 = vcmp.eq.f32.partialorder %v952_v6, 8.507059e+37 }
 0x36e   :  { %v961_v22 = vmul.f32 %v9077_v37, %v960_v60  ;;  %v970_v44 = vor.u32 1.1754944e-38, %v969_v29  ;;  %v984_v39 = vmul.f32 %v9120_v3, %v8967_v50 }
 0x39c   :  { %v998_v11 = vpop.permute.xlu2 %997 }
 0x39d   :  { %v1021_v12 = vmul.f32 %v998_v11, %v9046_v56 }
 0x39f   :  { %1037 = vrot.lane.b32.xlu1 %v1021_v12, %s8647_s7  ;;  %v9093_v12 = vsel %vm893_vm2, %v895_v9, %v891_v45  ;;  %vm923_vm2 = vcmp.eq.f32.partialorder %v922_v61, 8.507059e+37 }
 0x3a0   :  { %v983_v50 = vmul.f32 %v9093_v12, %v8949_v33 }
 0x3a4   :  { %v1008_v14 = vpop.permute.xlu2 %1007 }
 0x3a5   :  { %v1026_v21 = vmul.f32 %v1008_v14, %v9056_v15  ;;  %v945_v14 = vsub.f32 1.0, %v944_v10 }
 0x3a7   :  { %1047 = vrot.lane.b32.xlu1 %v1026_v21, %s8647_s7  ;;  %v921_v21 = vsel %vm920_vm14, %v9065_v53, %v917_v59  ;;  %v946_v27 = vmul.f32 %v9082_v34, %v945_v14  ;;  %v962_v53 = vadd.f32 %v9077_v37, %v961_v22  ;;  %vm965_vm14 = vmor %vm963_vm12, %vm964_vm11  ;;  %v986_v59 = vmul.f32 %v9056_v15, %v8970_v55 }
 0x3a8   :  { %v9115_v20 = vsel %vm923_vm2, %v925_v23, %v921_v21  ;;  %vm968_vm2 = vcmp.eq.f32.partialorder %v967_v8, 8.507059e+37 }
 0x3a9   :  { %v947_v38 = vadd.f32 %v9082_v34, %v946_v27  ;;  %v966_v40 = vsel %vm965_vm14, %v9077_v37, %v962_v53 }
 0x3aa   :  { %v9135_v45 = vsel %vm968_vm2, %v970_v44, %v966_v40 }
 0x3ab   :  { %v951_v24 = vsel %vm950_vm1, %v9082_v34, %v947_v38  ;;  %v988_v33 = vmul.f32 %v9135_v45, %v8979_v62 }
 0x3ac   :  { %v9138_v48 = vsel %vm953_vm3, %v955_v52, %v951_v24 }
 0x3ad   :  { %v987_v13 = vmul.f32 %v9138_v48, %v8984_v2  ;;  %v985_v2 = vmul.f32 %v9115_v20, %v8961_v47 }
 0x3b6   :  { %v1002_v11 = vpop.permute.xlu1 %1001 }
 0x3b7   :  { %v1023_v51 = vmul.f32 %v1002_v11, %v9093_v12  ;;  %v1000_v43 = vpop.permute.xlu0 %999  ;;  %v982_v11 = vmul.f32 %v9098_v1, %v8959_v46 }
 0x3b8   :  { %v1022_v5 = vmul.f32 %v1000_v43, %v9098_v1 }
 0x3b9   :  { %1041 = vrot.lane.b32.xlu0 %v1023_v51, %s8647_s7 }
 0x3ba   :  { %1039 = vrot.lane.b32.xlu2 %v1022_v5, %s8647_s7 }
 0x3be   :  { %v1006_v31 = vpop.permute.xlu1 %1005 }
 0x3bf   :  { %v1025_v32 = vmul.f32 %v1006_v31, %v9115_v20  ;;  %v1004_v36 = vpop.permute.xlu0 %1003 }
 0x3c0   :  { %v1024_v19 = vmul.f32 %v1004_v36, %v9120_v3 }
 0x3c1   :  { %1045 = vrot.lane.b32.xlu0 %v1025_v32, %s8647_s7 }
 0x3c2   :  { %1043 = vrot.lane.b32.xlu2 %v1024_v19, %s8647_s7 }
 0x3c6   :  { %v1012_v49 = vpop.permute.xlu1 %1011 }
 0x3c7   :  { %v1028_v9 = vmul.f32 %v1012_v49, %v9135_v45  ;;  %v1010_v54 = vpop.permute.xlu0 %1009 }
 0x3c8   :  { %v1027_v37 = vmul.f32 %v1010_v54, %v9138_v48 }
 0x3c9   :  { %1051 = vrot.lane.b32.xlu0 %v1028_v9, %s8647_s7 }
 0x3ca   :  { %1049 = vrot.lane.b32.xlu2 %v1027_v37, %s8647_s7 }
 0x411   :  { %v1038_v34 = vpop.permute.xlu1 %1037 }
 0x412   :  { %v9145_v10 = vadd.f32 %v1038_v34, %v981_v58 }
 0x414   :  { %7453 = vtanh.f32 %v9145_v10  ;;  %v1040_v57 = vpop.permute.xlu2 %1039 }
 0x415   :  { %v9150_v51 = vadd.f32 %v1040_v57, %v982_v11 }
 0x417   :  { %7455 = vtanh.f32 %v9150_v51 }
 0x419   :  { %v1048_v60 = vpop.permute.xlu1 %1047 }
 0x41a   :  { %v7454_v43 = vpop.eup %7453  ;;  %v9155_v61 = vadd.f32 %v1048_v60, %v986_v59 }
 0x41b   :  { %1085 = vrot.lane.b32.xlu0 %v7454_v43, %s8646_s6 }
 0x41c   :  { %7457 = vtanh.f32 %v9155_v61  ;;  %v1044_v46 = vpop.permute.xlu2 %1043 }
 0x41d   :  { %v7456_v4 = vpop.eup %7455  ;;  %v9161_v5 = vadd.f32 %v1044_v46, %v984_v39  ;;  %v8366_v46 = vld [vmem:[#allocation3 + $0x10] sm:$0xff] }
 0x41e   :  { %1087 = vrot.lane.b32.xlu1 %v7456_v4, %s8646_s6  ;;  %v8367_v4 = vld [vmem:[#allocation3 + $0x8] sm:$0xff] }
 0x41f   :  { %7459 = vtanh.f32 %v9161_v5 }
 0x422   :  { %v7458_v55 = vpop.eup %7457 }
 0x423   :  { %1095 = vrot.lane.b32.xlu0 %v7458_v55, %s8646_s6  ;;  %v8368_v55 = vld [vmem:[#allocation3] sm:$0xff] }
 0x424   :  { %v1050_v14 = vpop.permute.xlu2 %1049 }
 0x425   :  { %v7460_v0 = vpop.eup %7459  ;;  %v9168_v21 = vadd.f32 %v1050_v14, %v987_v13  ;;  %v1157_v14 = vld [vmem:[#allocation11 + $0x2] sm:$0x1] }
 0x426   :  { %1091 = vrot.lane.b32.xlu1 %v7460_v0, %s8646_s6 }
 0x427   :  { %7461 = vtanh.f32 %v9168_v21 }
 0x42b   :  { %v1042_v63 = vpop.permute.xlu0 %1041 }
 0x42c   :  { %v9174_v22 = vadd.f32 %v1042_v63, %v983_v50 }
 0x42d   :  { %v7462_v23 = vpop.eup %7461 }
 0x42e   :  { %7463 = vtanh.f32 %v9174_v22  ;;  %1097 = vrot.lane.b32.xlu1 %v7462_v23, %s8646_s6  ;;  %v1159_v23 = vld [vmem:[#allocation11 + $0x12] sm:$0x1] }
 0x433   :  { %v1046_v42 = vpop.permute.xlu0 %1045 }
 0x434   :  { %v7464_v27 = vpop.eup %7463  ;;  %v9180_v31 = vadd.f32 %v1046_v42, %v985_v2  ;;  %v1158_v42 = vld [vmem:[#allocation11 + $0xa] sm:$0x1] }
 0x435   :  { %1089 = vrot.lane.b32.xlu2 %v7464_v27, %s8646_s6 }
 0x436   :  { %7465 = vtanh.f32 %v9180_v31 }
 0x43b   :  { %v1052_v41 = vpop.permute.xlu0 %1051 }
 0x43c   :  { %v7466_v32 = vpop.eup %7465  ;;  %v9186_v53 = vadd.f32 %v1052_v41, %v988_v33  ;;  %v1162_v41 = vld [vmem:[#allocation11 + $0x2a] sm:$0x1] }
 0x43d   :  { %1093 = vrot.lane.b32.xlu2 %v7466_v32, %s8646_s6 }
 0x43e   :  { %7467 = vtanh.f32 %v9186_v53 }
 0x444   :  { %v7468_v47 = vpop.eup %7467 }
 0x445   :  { %1099 = vrot.lane.b32.xlu2 %v7468_v47, %s8646_s6 }
 0x48d   :  { %v1086_v19 = vpop.permute.xlu0 %1085 }
 0x48e   :  { %v9199_v40 = vmul.f32 %v1086_v19, %v9046_v56  ;;  %v1161_v19 = vld [vmem:[#allocation11 + $0x22] sm:$0x1] }
 0x48f   :  { %v1090_v36 = vpop.permute.xlu2 %1089 }
 0x490   :  { %v1088_v29 = vpop.permute.xlu1 %1087  ;;  %v9195_v38 = vmul.f32 %v1090_v36, %v9093_v12 }
 0x491   :  { %v9192_v8 = vmul.f32 %v1088_v29, %v9098_v1 }
 0x492   :  { %v1167_v44 = vrot.slane %v9195_v38, 6 }
 0x493   :  { %v1165_v62 = vrot.slane %v9192_v8, 7 }
 0x495   :  { %v1166_v1 = vsel %vm753_vm4, %v1165_v62, %v9199_v40  ;;  %v1096_v12 = vpop.permute.xlu0 %1095 }
 0x496   :  { %v1168_v56 = vsel %vm756_vm5, %v1167_v44, %v1166_v1  ;;  %v9214_v54 = vmul.f32 %v1096_v12, %v9056_v15 }
 0x497   :  { %v1094_v35 = vpop.permute.xlu2 %1093 }
 0x498   :  { %v1092_v6 = vpop.permute.xlu1 %1091  ;;  %v9203_v24 = vmul.f32 %v1094_v35, %v9115_v20  ;;  %12731 = vst [vmem:[#allocation47_spill] sm:$0xff] %v9214_v54  ;;  %v1173_v57 = vrot.slane %v9214_v54, 3  ;;  %v1160_v35 = vld [vmem:[#allocation11 + $0x1a] sm:$0x1] }
 0x499   :  { %v9206_v49 = vmul.f32 %v1092_v6, %v9120_v3 }
 0x49a   :  { %v1171_v9 = vrot.slane %v9203_v24, 4 }
 0x49b   :  { %v1169_v52 = vrot.slane %v9206_v49, 5 }
 0x49d   :  { %v1170_v37 = vsel %vm759_vm6, %v1169_v52, %v1168_v56  ;;  %v1164_v56 = vld [vmem:[#allocation11 + $0x3a] sm:$0x1] }
 0x49e   :  { %v1172_v11 = vsel %vm762_vm7, %v1171_v9, %v1170_v37 }
 0x49f   :  { %v1100_v20 = vpop.permute.xlu2 %1099  ;;  %v1174_v15 = vsel %vm765_vm8, %v1173_v57, %v1172_v11 }
 0x4a0   :  { %v9218_v58 = vmul.f32 %v1100_v20, %v9135_v45  ;;  %v1098_v3 = vpop.permute.xlu1 %1097  ;;  %v1163_v20 = vld [vmem:[#allocation11 + $0x32] sm:$0x1] }
 0x4a1   :  { %v9221_v34 = vmul.f32 %v1098_v3, %v9138_v48  ;;  %v8365_v48 = vld [vmem:[#allocation3 + $0x18] sm:$0xff] }
 0x4a2   :  { %12732 = vst [vmem:[#allocation48_spill] sm:$0xff] %v9218_v58  ;;  %v1177_v59 = vrot.slane %v9218_v58, 1 }
 0x4a3   :  { %12733 = vst [vmem:[#allocation49_spill] sm:$0xff] %v9221_v34  ;;  %v1175_v60 = vrot.slane %v9221_v34, 2 }
 0x4a5   :  { %v1176_v43 = vsel %vm768_vm9, %v1175_v60, %v1174_v15 }
 0x4a6   :  { %v1178_v39 = vsel %vm771_vm10, %v1177_v59, %v1176_v43 }
 0x4a7   :  { %1179 = vrot.lane.b32.xlu0 %v1178_v39, %s8647_s7 }
 0x519   :  { %v1180_v45 = vpop.permute.xlu0 %1179 }
 0x51a   :  { %7184 = vmatmul.msk.f32.vlgmr.msrb.gmra.mxu1 %vm203_vm0, %v1180_v45 }
 0x51b   :  { %2819 = vmatpush.msrb.mxu1 %v8365_v48 }
 0x51d   :  { %2820 = vmatpush.msrb.mxu1 %v8366_v46 }
 0x51f   :  { %2821 = vmatpush.msrb.mxu1 %v8367_v4 }
 0x521   :  { %2822 = vmatpush.msrb.mxu1 %v8368_v55 }
 0x597   :  { %v1200_v13 = vpop.f32.mrf.mxu1 }
 0x598   :  { %v1219_v0 = vadd.f32 %v1200_v13, %v1157_v14  ;;  %v1205_v50 = vrot.slane %v1200_v13, 2  ;;  %v1204_v63 = vrot.slane %v1200_v13, 1  ;;  %v1208_v27 = vrot.slane %v1200_v13, 5 }
 0x599   :  { %v1207_v32 = vrot.slane %v1200_v13, 4  ;;  %v1206_v36 = vrot.slane %v1200_v13, 3  ;;  %v1210_v12 = vrot.slane %v1200_v13, 7  ;;  %v1209_v52 = vrot.slane %v1200_v13, 6 }
 0x59a   :  { %7469 = vtanh.f32 %v1219_v0  ;;  %v1221_v2 = vadd.f32 %v1205_v50, %v1159_v23  ;;  %v1220_v33 = vadd.f32 %v1204_v63, %v1158_v42  ;;  %v1224_v47 = vadd.f32 %v1208_v27, %v1162_v41 }
 0x59b   :  { %v1223_v62 = vadd.f32 %v1207_v32, %v1161_v19  ;;  %v1222_v44 = vadd.f32 %v1206_v36, %v1160_v35  ;;  %v1226_v37 = vadd.f32 %v1210_v12, %v1164_v56  ;;  %v1225_v11 = vadd.f32 %v1209_v52, %v1163_v20 }
 0x59c   :  { %7471 = vtanh.f32 %v1221_v2  ;;  %v7187_v15 = vmul.f32 -1.442695, %v1221_v2  ;;  %v7185_v4 = vmul.f32 -1.442695, %v1219_v0  ;;  %v7186_v50 = vmul.f32 -1.442695, %v1220_v33 }
 0x59d   :  { %7473 = vtanh.f32 %v1220_v33  ;;  %v7189_v43 = vmul.f32 -1.442695, %v1223_v62  ;;  %v7192_v48 = vmul.f32 -1.442695, %v1226_v37  ;;  %v7190_v23 = vmul.f32 -1.442695, %v1224_v47 }
 0x59e   :  { %7475 = vtanh.f32 %v1224_v47  ;;  %v7188_v32 = vmul.f32 -1.442695, %v1222_v44 }
 0x59f   :  { %7477 = vtanh.f32 %v1223_v62 }
 0x5a0   :  { %v7470_v29 = vpop.eup %7469  ;;  %7479 = vtanh.f32 %v1222_v44  ;;  %v7191_v44 = vmul.f32 -1.442695, %v1225_v11 }
 0x5a1   :  { %1403 = vrot.lane.b32.xlu0 %v7470_v29, %s8646_s6  ;;  %7481 = vtanh.f32 %v1226_v37 }
 0x5a2   :  { %v7472_v6 = vpop.eup %7471  ;;  %7483 = vtanh.f32 %v1225_v11 }
 0x5a3   :  { %1407 = vrot.lane.b32.xlu2 %v7472_v6, %s8646_s6  ;;  %v7474_v1 = vpop.eup %7473  ;;  %7485 = vpow2.f32 %v7187_v15 }
 0x5a4   :  { %1405 = vrot.lane.b32.xlu1 %v7474_v1, %s8646_s6  ;;  %v7476_v9 = vpop.eup %7475  ;;  %7487 = vpow2.f32 %v7189_v43 }
 0x5a5   :  { %v7478_v3 = vpop.eup %7477 }
 0x5a6   :  { %v7480_v57 = vpop.eup %7479 }
 0x5a7   :  { %v7482_v59 = vpop.eup %7481 }
 0x5a8   :  { %v7484_v60 = vpop.eup %7483 }
 0x5a9   :  { %1413 = vrot.lane.b32.xlu0 %v7476_v9, %s8646_s6  ;;  %v7486_v39 = vpop.eup %7485 }
 0x5aa   :  { %v1253_v45 = vadd.f32 1.0, %v7486_v39  ;;  %v7488_v46 = vpop.eup %7487 }
 0x5ab   :  { %1411 = vrot.lane.b32.xlu2 %v7478_v3, %s8646_s6  ;;  %v9240_v55 = vadd.f32 1.0, %v7488_v46 }
 0x5ac   :  { %1409 = vrot.lane.b32.xlu1 %v7480_v57, %s8646_s6  ;;  %7489 = vrcp.f32 %v1253_v45  ;;  %v1300_v6 = vand.u32 2147483648, %v1253_v45  ;;  %vm1294_vm12 = vweird.f32 %v1253_v45  ;;  %v1298_v12 = vand.u32 2147483647, %v1253_v45 }
 0x5ad   :  { %7491 = vpow2.f32 %v7192_v48  ;;  %v1330_v39 = vand.u32 2147483648, %v9240_v55  ;;  %vm1324_vm1 = vweird.f32 %v9240_v55  ;;  %v1328_v46 = vand.u32 2147483647, %v9240_v55 }
 0x5ae   :  { %7493 = vpow2.f32 %v7185_v4  ;;  %v1301_v3 = vor.u32 1.1754944e-38, %v1300_v6  ;;  %vm1299_vm14 = vcmp.eq.f32.partialorder %v1298_v12, 8.507059e+37 }
 0x5af   :  { %7495 = vrcp.f32 %v9240_v55  ;;  %vm1329_vm3 = vcmp.eq.f32.partialorder %v1328_v46, 8.507059e+37 }
 0x5b0   :  { %7497 = vpow2.f32 %v7186_v50 }
 0x5b1   :  { %7499 = vpow2.f32 %v7190_v23  ;;  %v1331_v23 = vor.u32 1.1754944e-38, %v1330_v39 }
 0x5b2   :  { %v7490_v13 = vpop.eup %7489 }
 0x5b3   :  { %1417 = vrot.lane.b32.xlu2 %v7482_v59, %s8646_s6  ;;  %v7492_v14 = vpop.eup %7491  ;;  %v1290_v63 = vmul.f32 %v7490_v13, %v1253_v45  ;;  %vm1295_vm11 = vweird.f32 %v7490_v13 }
 0x5b4   :  { %1415 = vrot.lane.b32.xlu1 %v7484_v60, %s8646_s6  ;;  %v9243_v2 = vadd.f32 1.0, %v7492_v14  ;;  %v7494_v42 = vpop.eup %7493  ;;  %vm1296_vm13 = vmor %vm1294_vm12, %vm1295_vm11 }
 0x5b5   :  { %v1291_v27 = vsub.f32 1.0, %v1290_v63  ;;  %v7496_v41 = vpop.eup %7495  ;;  %v9247_v29 = vadd.f32 1.0, %v7494_v42 }
 0x5b6   :  { %7501 = vrcp.f32 %v9243_v2  ;;  %v1320_v36 = vmul.f32 %v7496_v41, %v9240_v55  ;;  %v7498_v19 = vpop.eup %7497  ;;  %vm1325_vm15 = vweird.f32 %v7496_v41  ;;  %vm1369_vm12 = vweird.f32 %v9243_v2 }
 0x5b7   :  { %v1292_v0 = vmul.f32 %v7490_v13, %v1291_v27  ;;  %7503 = vpow2.f32 %v7188_v32  ;;  %v7500_v33 = vpop.eup %7499  ;;  %v9252_v1 = vadd.f32 1.0, %v7498_v19  ;;  %vm1326_vm2 = vmor %vm1324_vm1, %vm1325_vm15  ;;  %vm1264_vm1 = vweird.f32 %v9247_v29 }
 0x5b8   :  { %v1321_v47 = vsub.f32 1.0, %v1320_v36  ;;  %7505 = vrcp.f32 %v9247_v29  ;;  %v9254_v52 = vadd.f32 1.0, %v7500_v33 }
 0x5b9   :  { %v1293_v62 = vadd.f32 %v7490_v13, %v1292_v0  ;;  %7507 = vrcp.f32 %v9252_v1 }
 0x5ba   :  { %v1322_v56 = vmul.f32 %v7496_v41, %v1321_v47  ;;  %7509 = vpow2.f32 %v7191_v44  ;;  %v1373_v47 = vand.u32 2147483647, %v9243_v2 }
 0x5bb   :  { %v1297_v9 = vsel %vm1296_vm13, %v7490_v13, %v1293_v62  ;;  %7511 = vrcp.f32 %v9254_v52 }
 0x5bc   :  { %v9250_v35 = vpop.eup %7501  ;;  %v9261_v11 = vsel %vm1299_vm14, %v1301_v3, %v1297_v9  ;;  %v1323_v15 = vadd.f32 %v7496_v41, %v1322_v56  ;;  %vm1374_vm15 = vcmp.eq.f32.partialorder %v1373_v47, 8.507059e+37 }
 0x5bd   :  { %v1365_v37 = vmul.f32 %v9250_v35, %v9243_v2  ;;  %v7504_v20 = vpop.eup %7503  ;;  %vm1370_vm11 = vweird.f32 %v9250_v35 }
 0x5be   :  { %v9259_v57 = vpop.eup %7505  ;;  %v9268_v48 = vadd.f32 1.0, %v7504_v20  ;;  %v1327_v14 = vsel %vm1326_vm2, %v7496_v41, %v1323_v15  ;;  %v1375_v41 = vand.u32 2147483648, %v9243_v2  ;;  %vm1371_vm13 = vmor %vm1369_vm12, %vm1370_vm11  ;;  %v1270_v20 = vand.u32 2147483648, %v9247_v29 }
 0x5bf   :  { %v1366_v43 = vsub.f32 1.0, %v1365_v37  ;;  %v1260_v45 = vmul.f32 %v9259_v57, %v9247_v29  ;;  %v9273_v4 = vpop.eup %7507  ;;  %v9281_v32 = vsel %vm1329_vm3, %v1331_v23, %v1327_v14  ;;  %vm1265_vm14 = vweird.f32 %v9259_v57 }
 0x5c0   :  { %v7510_v13 = vpop.eup %7509  ;;  %7513 = vrcp.f32 %v9268_v48  ;;  %v1275_v27 = vmul.f32 %v9273_v4, %v9252_v1  ;;  %v1376_v9 = vor.u32 1.1754944e-38, %v1375_v41  ;;  %vm1266_vm2 = vmor %vm1264_vm1, %vm1265_vm14  ;;  %vm1280_vm3 = vweird.f32 %v9273_v4 }
 0x5c1   :  { %v1367_v50 = vmul.f32 %v9250_v35, %v1366_v43  ;;  %v9276_v63 = vpop.eup %7511  ;;  %v1261_v42 = vsub.f32 1.0, %v1260_v45  ;;  %v9290_v62 = vadd.f32 1.0, %v7510_v13  ;;  %v1271_v45 = vor.u32 1.1754944e-38, %v1270_v20 }
 0x5c2   :  { %v1335_v33 = vmul.f32 %v9276_v63, %v9254_v52  ;;  %v1276_v6 = vsub.f32 1.0, %v1275_v27  ;;  %vm1279_vm12 = vweird.f32 %v9252_v1  ;;  %vm1340_vm14 = vweird.f32 %v9276_v63 }
 0x5c3   :  { %v1368_v36 = vadd.f32 %v9250_v35, %v1367_v50  ;;  %v1262_v19 = vmul.f32 %v9259_v57, %v1261_v42  ;;  %7515 = vrcp.f32 %v9290_v62  ;;  %v1285_v50 = vand.u32 2147483648, %v9252_v1 }
 0x5c4   :  { %v1336_v37 = vsub.f32 1.0, %v1335_v33  ;;  %v1277_v3 = vmul.f32 %v9273_v4, %v1276_v6 }
 0x5c5   :  { %v1372_v12 = vsel %vm1371_vm13, %v9250_v35, %v1368_v36  ;;  %v1263_v56 = vadd.f32 %v9259_v57, %v1262_v19  ;;  %v1268_v35 = vand.u32 2147483647, %v9247_v29  ;;  %vm1281_vm13 = vmor %vm1279_vm12, %vm1280_vm3  ;;  %v1286_v19 = vor.u32 1.1754944e-38, %v1285_v50 }
 0x5c6   :  { %v9295_v44 = vpop.eup %7513  ;;  %v1337_v39 = vmul.f32 %v9276_v63, %v1336_v37  ;;  %v1278_v46 = vadd.f32 %v9273_v4, %v1277_v3  ;;  %v1315_v37 = vand.u32 2147483648, %v9268_v48  ;;  %vm1309_vm12 = vweird.f32 %v9268_v48 }
 0x5c7   :  { %v1305_v2 = vmul.f32 %v9295_v44, %v9268_v48  ;;  %v1267_v43 = vsel %vm1266_vm2, %v9259_v57, %v1263_v56  ;;  %vm1269_vm11 = vcmp.eq.f32.partialorder %v1268_v35, 8.507059e+37  ;;  %v1283_v57 = vand.u32 2147483647, %v9252_v1 }
 0x5c8   :  { %v9316_v23 = vsel %vm1269_vm11, %v1271_v45, %v1267_v43  ;;  %v1338_v27 = vadd.f32 %v9276_v63, %v1337_v39  ;;  %v1343_v1 = vand.u32 2147483647, %v9254_v52  ;;  %vm1310_vm3 = vweird.f32 %v9295_v44 }
 0x5c9   :  { %v1306_v13 = vsub.f32 1.0, %v1305_v2  ;;  %v7516_v14 = vpop.eup %7515  ;;  %vm1284_vm1 = vcmp.eq.f32.partialorder %v1283_v57, 8.507059e+37  ;;  %v1316_v35 = vor.u32 1.1754944e-38, %v1315_v37 }
 0x5ca   :  { %v1350_v41 = vmul.f32 %v7516_v14, %v9290_v62  ;;  %vm1344_vm11 = vcmp.eq.f32.partialorder %v1343_v1, 8.507059e+37 }
 0x5cb   :  { %v1307_v36 = vmul.f32 %v9295_v44, %v1306_v13 }
 0x5cc   :  { %v1351_v56 = vsub.f32 1.0, %v1350_v41 }
 0x5fd   :  { %v1408_v59 = vpop.permute.xlu2 %1407 }
 0x5fe   :  { %v1429_v60 = vmul.f32 %v1408_v59, %v9261_v11  ;;  %v9305_v59 = vsel %vm1374_vm15, %v1376_v9, %v1372_v12  ;;  %vm1339_vm15 = vweird.f32 %v9254_v52  ;;  %v1308_v9 = vadd.f32 %v9295_v44, %v1307_v36 }
 0x5ff   :  { %vm1341_vm2 = vmor %vm1339_vm15, %vm1340_vm14  ;;  %vm1355_vm15 = vweird.f32 %v7516_v14 }
 0x600   :  { %1447 = vrot.lane.b32.xlu1 %v1429_v60, %s8647_s7  ;;  %v1342_v6 = vsel %vm1341_vm2, %v9276_v63, %v1338_v27  ;;  %v1313_v63 = vand.u32 2147483647, %v9268_v48  ;;  %v1358_v48 = vand.u32 2147483647, %v9290_v62 }
 0x602   :  { %vm1314_vm14 = vcmp.eq.f32.partialorder %v1313_v63, 8.507059e+37 }
 0x605   :  { %v1412_v55 = vpop.permute.xlu2 %1411 }
 0x606   :  { %v1431_v0 = vmul.f32 %v1412_v55, %v9281_v32  ;;  %v1345_v55 = vand.u32 2147483648, %v9254_v52 }
 0x608   :  { %1451 = vrot.lane.b32.xlu1 %v1431_v0, %s8647_s7  ;;  %v1282_v0 = vsel %vm1281_vm13, %v9273_v4, %v1278_v46  ;;  %v1346_v12 = vor.u32 1.1754944e-38, %v1345_v55  ;;  %vm1311_vm13 = vmor %vm1309_vm12, %vm1310_vm3  ;;  %v1360_v46 = vand.u32 2147483648, %v9290_v62  ;;  %vm1359_vm3 = vcmp.eq.f32.partialorder %v1358_v48, 8.507059e+37 }
 0x609   :  { %v9330_v47 = vsel %vm1284_vm1, %v1286_v19, %v1282_v0  ;;  %v1312_v2 = vsel %vm1311_vm13, %v9295_v44, %v1308_v9  ;;  %vm1354_vm1 = vweird.f32 %v9290_v62  ;;  %v1389_v62 = vmul.f32 %v9261_v11, %v9174_v22 }
 0x60a   :  { %v9338_v20 = vsel %vm1344_vm11, %v1346_v12, %v1342_v6  ;;  %vm1356_vm2 = vmor %vm1354_vm1, %vm1355_vm15  ;;  %v1361_v13 = vor.u32 1.1754944e-38, %v1360_v46  ;;  %v1394_v12 = vmul.f32 %v9305_v59, %v9186_v53  ;;  %v1388_v37 = vmul.f32 %v9330_v47, %v9150_v51 }
 0x60b   :  { %v1392_v36 = vmul.f32 %v9338_v20, %v9155_v61 }
 0x60d   :  { %v1418_v60 = vpop.permute.xlu2 %1417 }
 0x60e   :  { %v1434_v15 = vmul.f32 %v1418_v60, %v9305_v59  ;;  %v1352_v60 = vmul.f32 %v7516_v14, %v1351_v56 }
 0x610   :  { %1457 = vrot.lane.b32.xlu1 %v1434_v15, %s8647_s7  ;;  %v9345_v15 = vsel %vm1314_vm14, %v1316_v35, %v1312_v2  ;;  %v1353_v45 = vadd.f32 %v7516_v14, %v1352_v60 }
 0x611   :  { %v1390_v53 = vmul.f32 %v9345_v15, %v9161_v5 }
 0x612   :  { %v1357_v44 = vsel %vm1356_vm2, %v7516_v14, %v1353_v45 }
 0x613   :  { %v1404_v29 = vpop.permute.xlu0 %1403  ;;  %v9352_v50 = vsel %vm1359_vm3, %v1361_v13, %v1357_v44 }
 0x614   :  { %v1427_v42 = vmul.f32 %v1404_v29, %v9316_v23  ;;  %v1393_v51 = vmul.f32 %v9352_v50, %v9168_v21 }
 0x616   :  { %1443 = vrot.lane.b32.xlu2 %v1427_v42, %s8647_s7  ;;  %v1406_v33 = vpop.permute.xlu1 %1405  ;;  %v1387_v42 = vmul.f32 %v9316_v23, %v9145_v10  ;;  %v1391_v10 = vmul.f32 %v9281_v32, %v9180_v31 }
 0x617   :  { %v1428_v4 = vmul.f32 %v1406_v33, %v9330_v47 }
 0x619   :  { %1445 = vrot.lane.b32.xlu0 %v1428_v4, %s8647_s7 }
 0x61b   :  { %v1414_v52 = vpop.permute.xlu0 %1413 }
 0x61c   :  { %v1432_v3 = vmul.f32 %v1414_v52, %v9338_v20 }
 0x61e   :  { %1453 = vrot.lane.b32.xlu2 %v1432_v3, %s8647_s7  ;;  %v1410_v43 = vpop.permute.xlu1 %1409 }
 0x61f   :  { %v1430_v39 = vmul.f32 %v1410_v43, %v9345_v15 }
 0x621   :  { %1449 = vrot.lane.b32.xlu0 %v1430_v39, %s8647_s7 }
 0x626   :  { %v1416_v29 = vpop.permute.xlu1 %1415 }
 0x627   :  { %v1433_v57 = vmul.f32 %v1416_v29, %v9352_v50 }
 0x629   :  { %1455 = vrot.lane.b32.xlu0 %v1433_v57, %s8647_s7 }
 0x670   :  { %v1444_v27 = vpop.permute.xlu2 %1443 }
 0x671   :  { %v9358_v55 = vadd.f32 %v1444_v27, %v1387_v42 }
 0x672   :  { %v1448_v14 = vpop.permute.xlu1 %1447 }
 0x673   :  { %7517 = vtanh.f32 %v9358_v55  ;;  %v9363_v0 = vadd.f32 %v1448_v14, %v1389_v62 }
 0x675   :  { %7519 = vtanh.f32 %v9363_v0 }
 0x678   :  { %v1454_v41 = vpop.permute.xlu2 %1453 }
 0x679   :  { %v7518_v19 = vpop.eup %7517  ;;  %v9368_v1 = vadd.f32 %v1454_v41, %v1392_v36 }
 0x67a   :  { %1491 = vrot.lane.b32.xlu1 %v7518_v19, %s8646_s6  ;;  %v1452_v22 = vpop.permute.xlu1 %1451 }
 0x67b   :  { %7521 = vtanh.f32 %v9368_v1  ;;  %v7520_v33 = vpop.eup %7519  ;;  %v9374_v6 = vadd.f32 %v1452_v22, %v1391_v10 }
 0x67c   :  { %1495 = vrot.lane.b32.xlu0 %v7520_v33, %s8646_s6 }
 0x67d   :  { %7523 = vtanh.f32 %v9374_v6 }
 0x681   :  { %v7522_v61 = vpop.eup %7521 }
 0x682   :  { %1501 = vrot.lane.b32.xlu1 %v7522_v61, %s8646_s6  ;;  %v1458_v4 = vpop.permute.xlu1 %1457 }
 0x683   :  { %v7524_v9 = vpop.eup %7523  ;;  %v9381_v56 = vadd.f32 %v1458_v4, %v1394_v12 }
 0x684   :  { %1499 = vrot.lane.b32.xlu0 %v7524_v9, %s8646_s6 }
 0x685   :  { %7525 = vtanh.f32 %v9381_v56 }
 0x68b   :  { %v7526_v31 = vpop.eup %7525  ;;  %v1446_v52 = vpop.permute.xlu0 %1445 }
 0x68c   :  { %1505 = vrot.lane.b32.xlu0 %v7526_v31, %s8646_s6  ;;  %v9388_v63 = vadd.f32 %v1446_v52, %v1388_v37  ;;  %v1563_v52 = vld [vmem:[#allocation11 + $0x3] sm:$0x1] }
 0x68e   :  { %7527 = vtanh.f32 %v9388_v63 }
 0x693   :  { %v1450_v3 = vpop.permute.xlu0 %1449 }
 0x694   :  { %v7528_v2 = vpop.eup %7527  ;;  %v9393_v60 = vadd.f32 %v1450_v3, %v1390_v53 }
 0x695   :  { %1493 = vrot.lane.b32.xlu2 %v7528_v2, %s8646_s6 }
 0x696   :  { %7529 = vtanh.f32 %v9393_v60 }
 0x69b   :  { %v1456_v35 = vpop.permute.xlu0 %1455 }
 0x69c   :  { %v7530_v43 = vpop.eup %7529  ;;  %v9399_v39 = vadd.f32 %v1456_v35, %v1393_v51  ;;  %v1565_v51 = vld [vmem:[#allocation11 + $0x13] sm:$0x1] }
 0x69d   :  { %1497 = vrot.lane.b32.xlu2 %v7530_v43, %s8646_s6  ;;  %v1564_v43 = vld [vmem:[#allocation11 + $0xb] sm:$0x1] }
 0x69e   :  { %7531 = vtanh.f32 %v9399_v39 }
 0x6a4   :  { %v7532_v5 = vpop.eup %7531 }
 0x6a5   :  { %1503 = vrot.lane.b32.xlu2 %v7532_v5, %s8646_s6 }
 0x6ec   :  { %v1492_v48 = vpop.permute.xlu1 %1491 }
 0x6ed   :  { %v9412_v57 = vmul.f32 %v1492_v48, %v9316_v23 }
 0x6ee   :  { %v1496_v45 = vpop.permute.xlu0 %1495 }
 0x6ef   :  { %v1494_v46 = vpop.permute.xlu2 %1493  ;;  %v9408_v13 = vmul.f32 %v1496_v45, %v9261_v11 }
 0x6f0   :  { %v9405_v44 = vmul.f32 %v1494_v46, %v9330_v47  ;;  %v1568_v46 = vld [vmem:[#allocation11 + $0x2b] sm:$0x1] }
 0x6f1   :  { %v1573_v27 = vrot.slane %v9408_v13, 6 }
 0x6f2   :  { %v1571_v21 = vrot.slane %v9405_v44, 7 }
 0x6f4   :  { %v1572_v47 = vsel %vm753_vm4, %v1571_v21, %v9412_v57  ;;  %v1502_v11 = vpop.permute.xlu1 %1501 }
 0x6f5   :  { %v1574_v23 = vsel %vm756_vm5, %v1573_v27, %v1572_v47  ;;  %v9427_v19 = vmul.f32 %v1502_v11, %v9338_v20  ;;  %v1567_v27 = vld [vmem:[#allocation11 + $0x23] sm:$0x1]  ;;  %v1566_v11 = vld [vmem:[#allocation11 + $0x1b] sm:$0x1] }
 0x6f6   :  { %v1500_v29 = vpop.permute.xlu0 %1499 }
 0x6f7   :  { %v1498_v42 = vpop.permute.xlu2 %1497  ;;  %v9416_v62 = vmul.f32 %v1500_v29, %v9281_v32  ;;  %12734 = vst [vmem:[#allocation50_spill] sm:$0xff] %v9427_v19  ;;  %v1579_v12 = vrot.slane %v9427_v19, 3 }
 0x6f8   :  { %v9419_v14 = vmul.f32 %v1498_v42, %v9345_v15 }
 0x6f9   :  { %v1577_v41 = vrot.slane %v9416_v62, 4 }
 0x6fa   :  { %v1575_v36 = vrot.slane %v9419_v14, 5 }
 0x6fc   :  { %v1576_v10 = vsel %vm759_vm6, %v1575_v36, %v1574_v23 }
 0x6fd   :  { %v1578_v61 = vsel %vm762_vm7, %v1577_v41, %v1576_v10 }
 0x6fe   :  { %v1506_v32 = vpop.permute.xlu0 %1505  ;;  %v1580_v20 = vsel %vm765_vm8, %v1579_v12, %v1578_v61  ;;  %v1570_v61 = vld [vmem:[#allocation11 + $0x3b] sm:$0x1] }
 0x6ff   :  { %v9431_v22 = vmul.f32 %v1506_v32, %v9305_v59  ;;  %v1504_v15 = vpop.permute.xlu2 %1503 }
 0x700   :  { %v9434_v33 = vmul.f32 %v1504_v15, %v9352_v50 }
 0x701   :  { %12735 = vst [vmem:[#allocation51_spill] sm:$0xff] %v9431_v22  ;;  %v1583_v4 = vrot.slane %v9431_v22, 1 }
 0x702   :  { %12736 = vst [vmem:[#allocation52_spill] sm:$0xff] %v9434_v33  ;;  %v1581_v9 = vrot.slane %v9434_v33, 2 }
 0x704   :  { %v1582_v31 = vsel %vm768_vm9, %v1581_v9, %v1580_v20 }
 0x705   :  { %v1584_v37 = vsel %vm771_vm10, %v1583_v4, %v1582_v31  ;;  %v1569_v4 = vld [vmem:[#allocation11 + $0x33] sm:$0x1] }
 0x706   :  { %1585 = vrot.lane.b32.xlu1 %v1584_v37, %s8647_s7 }
 0x778   :  { %v1586_v59 = vpop.permute.xlu1 %1585 }
 0x779   :  { %7193 = vmatmul.msk.f32.vlgmr.msra.gmra.mxu1 %vm203_vm0, %v1586_v59 }
 0x7f6   :  { %v1606_v50 = vpop.f32.mrf.mxu1 }
 0x7f7   :  { %v1625_v53 = vadd.f32 %v1606_v50, %v1563_v52  ;;  %v1611_v3 = vrot.slane %v1606_v50, 2  ;;  %v1610_v2 = vrot.slane %v1606_v50, 1  ;;  %v1614_v5 = vrot.slane %v1606_v50, 5 }
 0x7f8   :  { %v1613_v48 = vrot.slane %v1606_v50, 4  ;;  %v1612_v29 = vrot.slane %v1606_v50, 3  ;;  %v1616_v10 = vrot.slane %v1606_v50, 7  ;;  %v1615_v32 = vrot.slane %v1606_v50, 6 }
 0x7f9   :  { %7533 = vtanh.f32 %v1625_v53  ;;  %v1627_v35 = vadd.f32 %v1611_v3, %v1565_v51  ;;  %v1626_v45 = vadd.f32 %v1610_v2, %v1564_v43  ;;  %v1630_v21 = vadd.f32 %v1614_v5, %v1568_v46 }
 0x7fa   :  { %v1629_v47 = vadd.f32 %v1613_v48, %v1567_v27  ;;  %v1628_v41 = vadd.f32 %v1612_v29, %v1566_v11  ;;  %v1632_v12 = vadd.f32 %v1616_v10, %v1570_v61  ;;  %v1631_v20 = vadd.f32 %v1615_v32, %v1569_v4 }
 0x7fb   :  { %7535 = vtanh.f32 %v1627_v35  ;;  %v7195_v50 = vmul.f32 -1.442695, %v1626_v45  ;;  %v7194_v5 = vmul.f32 -1.442695, %v1625_v53  ;;  %v7196_v48 = vmul.f32 -1.442695, %v1627_v35 }
 0x7fc   :  { %7537 = vtanh.f32 %v1626_v45  ;;  %v7197_v52 = vmul.f32 -1.442695, %v1628_v41  ;;  %v7200_v51 = vmul.f32 -1.442695, %v1631_v20  ;;  %v7199_v27 = vmul.f32 -1.442695, %v1630_v21 }
 0x7fd   :  { %7539 = vtanh.f32 %v1630_v21  ;;  %v7201_v4 = vmul.f32 -1.442695, %v1632_v12 }
 0x7fe   :  { %7541 = vtanh.f32 %v1629_v47 }
 0x7ff   :  { %v7534_v42 = vpop.eup %7533  ;;  %7543 = vtanh.f32 %v1628_v41  ;;  %v7198_v41 = vmul.f32 -1.442695, %v1629_v47 }
 0x800   :  { %1809 = vrot.lane.b32.xlu1 %v7534_v42, %s8646_s6  ;;  %7545 = vtanh.f32 %v1632_v12 }
 0x801   :  { %v7536_v36 = vpop.eup %7535  ;;  %7547 = vtanh.f32 %v1631_v20 }
 0x802   :  { %1813 = vrot.lane.b32.xlu0 %v7536_v36, %s8646_s6  ;;  %v7538_v23 = vpop.eup %7537  ;;  %7549 = vpow2.f32 %v7195_v50 }
 0x803   :  { %1811 = vrot.lane.b32.xlu2 %v7538_v23, %s8646_s6  ;;  %v7540_v15 = vpop.eup %7539  ;;  %7551 = vpow2.f32 %v7197_v52 }
 0x804   :  { %v7542_v9 = vpop.eup %7541 }
 0x805   :  { %v7544_v31 = vpop.eup %7543 }
 0x806   :  { %v7546_v37 = vpop.eup %7545 }
 0x807   :  { %v7548_v59 = vpop.eup %7547 }
 0x808   :  { %1819 = vrot.lane.b32.xlu1 %v7540_v15, %s8646_s6  ;;  %v7550_v3 = vpop.eup %7549 }
 0x809   :  { %v1658_v2 = vadd.f32 1.0, %v7550_v3  ;;  %v7552_v43 = vpop.eup %7551 }
 0x80a   :  { %1817 = vrot.lane.b32.xlu0 %v7542_v9, %s8646_s6  ;;  %v9453_v46 = vadd.f32 1.0, %v7552_v43 }
 0x80b   :  { %1815 = vrot.lane.b32.xlu2 %v7544_v31, %s8646_s6  ;;  %7553 = vrcp.f32 %v1658_v2  ;;  %v1691_v31 = vand.u32 2147483648, %v1658_v2  ;;  %vm1685_vm12 = vweird.f32 %v1658_v2 }
 0x80c   :  { %7555 = vpow2.f32 %v7200_v51  ;;  %vm1715_vm1 = vweird.f32 %v9453_v46 }
 0x80d   :  { %7557 = vpow2.f32 %v7194_v5  ;;  %v1692_v43 = vor.u32 1.1754944e-38, %v1691_v31 }
 0x80e   :  { %7559 = vrcp.f32 %v9453_v46 }
 0x80f   :  { %7561 = vpow2.f32 %v7196_v48 }
 0x810   :  { %7563 = vpow2.f32 %v7199_v27 }
 0x811   :  { %v7554_v29 = vpop.eup %7553 }
 0x812   :  { %1823 = vrot.lane.b32.xlu0 %v7546_v37, %s8646_s6  ;;  %v7556_v42 = vpop.eup %7555  ;;  %v1681_v45 = vmul.f32 %v7554_v29, %v1658_v2  ;;  %vm1686_vm11 = vweird.f32 %v7554_v29 }
 0x813   :  { %1821 = vrot.lane.b32.xlu2 %v7548_v59, %s8646_s6  ;;  %v7558_v11 = vpop.eup %7557  ;;  %v9456_v36 = vadd.f32 1.0, %v7556_v42  ;;  %v1689_v59 = vand.u32 2147483647, %v1658_v2  ;;  %vm1687_vm13 = vmor %vm1685_vm12, %vm1686_vm11 }
 0x814   :  { %v1682_v23 = vsub.f32 1.0, %v1681_v45  ;;  %v7560_v10 = vpop.eup %7559  ;;  %v9458_v32 = vadd.f32 1.0, %v7558_v11 }
 0x815   :  { %v7562_v53 = vpop.eup %7561  ;;  %7565 = vrcp.f32 %v9456_v36  ;;  %v1711_v15 = vmul.f32 %v7560_v10, %v9453_v46  ;;  %vm1690_vm14 = vcmp.eq.f32.partialorder %v1689_v59, 8.507059e+37  ;;  %vm1716_vm15 = vweird.f32 %v7560_v10 }
 0x816   :  { %7567 = vpow2.f32 %v7198_v41  ;;  %v1683_v35 = vmul.f32 %v7554_v29, %v1682_v23  ;;  %v9462_v61 = vadd.f32 1.0, %v7562_v53  ;;  %v7564_v21 = vpop.eup %7563  ;;  %v1721_v41 = vand.u32 2147483648, %v9453_v46  ;;  %vm1717_vm2 = vmor %vm1715_vm1, %vm1716_vm15 }
 0x817   :  { %7569 = vrcp.f32 %v9458_v32  ;;  %v1712_v47 = vsub.f32 1.0, %v1711_v15  ;;  %v9468_v50 = vadd.f32 1.0, %v7564_v21  ;;  %v1719_v53 = vand.u32 2147483647, %v9453_v46 }
 0x818   :  { %v1684_v9 = vadd.f32 %v7554_v29, %v1683_v35  ;;  %7571 = vrcp.f32 %v9462_v61  ;;  %vm1760_vm12 = vweird.f32 %v9456_v36  ;;  %vm1670_vm15 = vweird.f32 %v9458_v32 }
 0x819   :  { %7573 = vpow2.f32 %v7201_v4  ;;  %v1713_v51 = vmul.f32 %v7560_v10, %v1712_v47  ;;  %v1722_v47 = vor.u32 1.1754944e-38, %v1721_v41  ;;  %vm1720_vm3 = vcmp.eq.f32.partialorder %v1719_v53, 8.507059e+37 }
 0x81a   :  { %v1688_v3 = vsel %vm1687_vm13, %v7554_v29, %v1684_v9  ;;  %7575 = vrcp.f32 %v9468_v50 }
 0x81b   :  { %v9465_v20 = vpop.eup %7565  ;;  %v9479_v42 = vsel %vm1690_vm14, %v1692_v43, %v1688_v3  ;;  %v1714_v27 = vadd.f32 %v7560_v10, %v1713_v51 }
 0x81c   :  { %v7568_v37 = vpop.eup %7567  ;;  %v1756_v12 = vmul.f32 %v9465_v20, %v9456_v36  ;;  %vm1761_vm11 = vweird.f32 %v9465_v20 }
 0x81d   :  { %v9470_v52 = vpop.eup %7569  ;;  %v9474_v5 = vadd.f32 1.0, %v7568_v37  ;;  %v1718_v4 = vsel %vm1717_vm2, %v7560_v10, %v1714_v27  ;;  %vm9514_vm13 = vmor %vm1760_vm12, %vm1761_vm11  ;;  %vm1700_vm11 = vweird.f32 %v9462_v61 }
 0x81e   :  { %v9477_v48 = vpop.eup %7571  ;;  %v1666_v45 = vmul.f32 %v9470_v52, %v9458_v32  ;;  %v1757_v11 = vsub.f32 1.0, %v1756_v12  ;;  %v9498_v3 = vsel %vm1720_vm3, %v1722_v47, %v1718_v4  ;;  %vm1671_vm14 = vweird.f32 %v9470_v52 }
 0x81f   :  { %7577 = vrcp.f32 %v9474_v5  ;;  %v7574_v23 = vpop.eup %7573  ;;  %v1696_v35 = vmul.f32 %v9477_v48, %v9462_v61  ;;  %vm9526_vm2 = vmor %vm1670_vm15, %vm1671_vm14  ;;  %vm1701_vm3 = vweird.f32 %v9477_v48 }
 0x820   :  { %v1667_v15 = vsub.f32 1.0, %v1666_v45  ;;  %v9491_v21 = vpop.eup %7575  ;;  %v1758_v9 = vmul.f32 %v9465_v20, %v1757_v11  ;;  %v9494_v31 = vadd.f32 1.0, %v7574_v23  ;;  %v1764_v45 = vand.u32 2147483647, %v9456_v36 }
 0x821   :  { %v1697_v37 = vsub.f32 1.0, %v1696_v35  ;;  %v1741_v12 = vmul.f32 %v9491_v21, %v9468_v50  ;;  %vm1746_vm14 = vweird.f32 %v9491_v21 }
 0x822   :  { %v1668_v51 = vmul.f32 %v9470_v52, %v1667_v15  ;;  %v1759_v10 = vadd.f32 %v9465_v20, %v1758_v9  ;;  %7579 = vrcp.f32 %v9494_v31  ;;  %v1674_v15 = vand.u32 2147483647, %v9458_v32 }
 0x823   :  { %v1742_v23 = vsub.f32 1.0, %v1741_v12  ;;  %vm1765_vm1 = vcmp.eq.f32.partialorder %v1764_v45, 8.507059e+37 }
 0x824   :  { %v1669_v41 = vadd.f32 %v9470_v52, %v1668_v51  ;;  %v1763_v53 = vsel %vm9514_vm13, %v9465_v20, %v1759_v10  ;;  %vm1675_vm12 = vcmp.eq.f32.partialorder %v1674_v15, 8.507059e+37  ;;  %vm1702_vm13 = vmor %vm1700_vm11, %vm1701_vm3  ;;  %vm1730_vm11 = vweird.f32 %v9474_v5 }
 0x825   :  { %v9496_v59 = vpop.eup %7577  ;;  %v1743_v12 = vmul.f32 %v9491_v21, %v1742_v23 }
 0x826   :  { %v1726_v27 = vmul.f32 %v9496_v59, %v9474_v5  ;;  %v1673_v51 = vsel %vm9526_vm2, %v9470_v52, %v1669_v41  ;;  %vm1731_vm3 = vweird.f32 %v9496_v59 }
 0x828   :  { %v1727_v47 = vsub.f32 1.0, %v1726_v27 }
 0x82a   :  { %v1728_v27 = vmul.f32 %v9496_v59, %v1727_v47 }
 0x82c   :  { %v1729_v4 = vadd.f32 %v9496_v59, %v1728_v27 }
 0x85d   :  { %v1812_v2 = vpop.permute.xlu2 %1811 }
 0x85e   :  { %v1834_v29 = vmul.f32 %v1812_v2, %v9479_v42  ;;  %v1766_v2 = vand.u32 2147483648, %v9456_v36  ;;  %v1676_v36 = vand.u32 2147483648, %v9458_v32  ;;  %v1706_v32 = vand.u32 2147483648, %v9462_v61 }
 0x860   :  { %1851 = vrot.lane.b32.xlu1 %v1834_v29, %s8647_s7  ;;  %v1698_v29 = vmul.f32 %v9477_v48, %v1697_v37  ;;  %v1767_v35 = vor.u32 1.1754944e-38, %v1766_v2  ;;  %v9532_v37 = vpop.eup %7579  ;;  %v1677_v10 = vor.u32 1.1754944e-38, %v1676_v36  ;;  %v1704_v2 = vand.u32 2147483647, %v9462_v61 }
 0x861   :  { %v1771_v11 = vmul.f32 %v9532_v37, %v9494_v31  ;;  %v1707_v23 = vor.u32 1.1754944e-38, %v1706_v32  ;;  %v1751_v61 = vand.u32 2147483648, %v9468_v50  ;;  %v1734_v32 = vand.u32 2147483647, %v9474_v5 }
 0x862   :  { %v1699_v9 = vadd.f32 %v9477_v48, %v1698_v29  ;;  %v9534_v20 = vsel %vm1765_vm1, %v1767_v35, %v1763_v53  ;;  %v9545_v29 = vsel %vm1675_vm12, %v1677_v10, %v1673_v51  ;;  %v1744_v53 = vadd.f32 %v9491_v21, %v1743_v12 }
 0x863   :  { %vm1705_vm15 = vcmp.eq.f32.partialorder %v1704_v2, 8.507059e+37  ;;  %vm1745_vm1 = vweird.f32 %v9468_v50  ;;  %v1752_v51 = vor.u32 1.1754944e-38, %v1751_v61 }
 0x864   :  { %v1703_v52 = vsel %vm1702_vm13, %v9477_v48, %v1699_v9  ;;  %v1749_v48 = vand.u32 2147483647, %v9468_v50  ;;  %vm1747_vm2 = vmor %vm1745_vm1, %vm1746_vm14  ;;  %v1772_v9 = vsub.f32 1.0, %v1771_v11  ;;  %vm1735_vm14 = vcmp.eq.f32.partialorder %v1734_v32, 8.507059e+37 }
 0x865   :  { %v1816_v46 = vpop.permute.xlu2 %1815  ;;  %v9555_v35 = vsel %vm1705_vm15, %v1707_v23, %v1703_v52  ;;  %v1748_v47 = vsel %vm1747_vm2, %v9491_v21, %v1744_v53  ;;  %vm1732_vm13 = vmor %vm1730_vm11, %vm1731_vm3  ;;  %vm1776_vm15 = vweird.f32 %v9532_v37  ;;  %v1781_v11 = vand.u32 2147483648, %v9494_v31 }
 0x866   :  { %v1836_v43 = vmul.f32 %v1816_v46, %v9498_v3  ;;  %vm1750_vm12 = vcmp.eq.f32.partialorder %v1749_v48, 8.507059e+37  ;;  %v1773_v10 = vmul.f32 %v9532_v37, %v1772_v9  ;;  %vm1775_vm1 = vweird.f32 %v9494_v31 }
 0x867   :  { %v9568_v12 = vsel %vm1750_vm12, %v1752_v51, %v1748_v47  ;;  %vm1777_vm2 = vmor %vm1775_vm1, %vm1776_vm15  ;;  %v1782_v23 = vor.u32 1.1754944e-38, %v1781_v11  ;;  %v1795_v48 = vmul.f32 %v9555_v35, %v9363_v0  ;;  %v1796_v0 = vmul.f32 %v9498_v3, %v9393_v60 }
 0x868   :  { %1855 = vrot.lane.b32.xlu1 %v1836_v43, %s8647_s7  ;;  %v1774_v27 = vadd.f32 %v9532_v37, %v1773_v10  ;;  %v1799_v60 = vmul.f32 %v9534_v20, %v9399_v39 }
 0x86d   :  { %v1822_v46 = vpop.permute.xlu2 %1821 }
 0x86e   :  { %v1839_v43 = vmul.f32 %v1822_v46, %v9534_v20  ;;  %v1736_v46 = vand.u32 2147483648, %v9474_v5 }
 0x870   :  { %1861 = vrot.lane.b32.xlu1 %v1839_v43, %s8647_s7  ;;  %v1733_v43 = vsel %vm1732_vm13, %v9496_v59, %v1729_v4  ;;  %v1737_v2 = vor.u32 1.1754944e-38, %v1736_v46  ;;  %v1779_v59 = vand.u32 2147483647, %v9494_v31  ;;  %v1794_v31 = vmul.f32 %v9479_v42, %v9388_v63 }
 0x872   :  { %v1810_v45 = vpop.permute.xlu1 %1809  ;;  %vm1780_vm3 = vcmp.eq.f32.partialorder %v1779_v59, 8.507059e+37 }
 0x873   :  { %v1833_v41 = vmul.f32 %v1810_v45, %v9545_v29  ;;  %v9573_v45 = vsel %vm1735_vm14, %v1737_v2, %v1733_v43 }
 0x874   :  { %v1814_v36 = vpop.permute.xlu0 %1813  ;;  %v1797_v47 = vmul.f32 %v9573_v45, %v9374_v6 }
 0x875   :  { %1849 = vrot.lane.b32.xlu0 %v1833_v41, %s8647_s7  ;;  %v1835_v15 = vmul.f32 %v1814_v36, %v9555_v35  ;;  %v1778_v41 = vsel %vm1777_vm2, %v9532_v37, %v1774_v27 }
 0x876   :  { %v9584_v53 = vsel %vm1780_vm3, %v1782_v23, %v1778_v41  ;;  %v1798_v23 = vmul.f32 %v9568_v12, %v9368_v1 }
 0x877   :  { %1853 = vrot.lane.b32.xlu2 %v1835_v15, %s8647_s7  ;;  %v1800_v6 = vmul.f32 %v9584_v53, %v9381_v56  ;;  %v1793_v56 = vmul.f32 %v9545_v29, %v9358_v55 }
 0x87a   :  { %v1820_v50 = vpop.permute.xlu1 %1819 }
 0x87b   :  { %v1838_v21 = vmul.f32 %v1820_v50, %v9568_v12 }
 0x87c   :  { %v1818_v52 = vpop.permute.xlu0 %1817 }
 0x87d   :  { %1859 = vrot.lane.b32.xlu0 %v1838_v21, %s8647_s7  ;;  %v1837_v5 = vmul.f32 %v1818_v52, %v9573_v45 }
 0x87f   :  { %1857 = vrot.lane.b32.xlu2 %v1837_v5, %s8647_s7 }
 0x884   :  { %v1824_v61 = vpop.permute.xlu0 %1823 }
 0x885   :  { %v1840_v36 = vmul.f32 %v1824_v61, %v9584_v53 }
 0x887   :  { %1863 = vrot.lane.b32.xlu2 %v1840_v36, %s8647_s7 }
 0x8d1   :  { %v1854_v15 = vpop.permute.xlu2 %1853 }
 0x8d2   :  { %v9590_v4 = vadd.f32 %v1854_v15, %v1795_v48  ;;  %v1852_v9 = vpop.permute.xlu1 %1851 }
 0x8d3   :  { %v9595_v37 = vadd.f32 %v1852_v9, %v1794_v31 }
 0x8d4   :  { %7581 = vtanh.f32 %v9590_v4 }
 0x8d5   :  { %7583 = vtanh.f32 %v9595_v37 }
 0x8d9   :  { %v1858_v46 = vpop.permute.xlu2 %1857 }
 0x8da   :  { %v7582_v51 = vpop.eup %7581  ;;  %v9600_v32 = vadd.f32 %v1858_v46, %v1797_v47  ;;  %v1856_v50 = vpop.permute.xlu1 %1855 }
 0x8db   :  { %1901 = vrot.lane.b32.xlu1 %v7582_v51, %s8646_s6  ;;  %v7584_v63 = vpop.eup %7583  ;;  %v9606_v43 = vadd.f32 %v1856_v50, %v1796_v0 }
 0x8dc   :  { %7585 = vtanh.f32 %v9600_v32  ;;  %1899 = vrot.lane.b32.xlu0 %v7584_v63, %s8646_s6 }
 0x8dd   :  { %7587 = vtanh.f32 %v9606_v43 }
 0x8e1   :  { %v1864_v10 = vpop.permute.xlu2 %1863 }
 0x8e2   :  { %v7586_v21 = vpop.eup %7585  ;;  %v9612_v2 = vadd.f32 %v1864_v10, %v1800_v6  ;;  %v1862_v52 = vpop.permute.xlu1 %1861 }
 0x8e3   :  { %1905 = vrot.lane.b32.xlu1 %v7586_v21, %s8646_s6  ;;  %v7588_v5 = vpop.eup %7587  ;;  %v9618_v27 = vadd.f32 %v1862_v52, %v1799_v60 }
 0x8e4   :  { %7589 = vtanh.f32 %v9612_v2  ;;  %1903 = vrot.lane.b32.xlu0 %v7588_v5, %s8646_s6 }
 0x8e5   :  { %7591 = vtanh.f32 %v9618_v27 }
 0x8e7   :  { %v1850_v11 = vpop.permute.xlu0 %1849 }
 0x8e8   :  { %v9624_v59 = vadd.f32 %v1850_v11, %v1793_v56 }
 0x8ea   :  { %7593 = vtanh.f32 %v9624_v59  ;;  %v7590_v39 = vpop.eup %7589 }
 0x8eb   :  { %1911 = vrot.lane.b32.xlu1 %v7590_v39, %s8646_s6  ;;  %v7592_v41 = vpop.eup %7591 }
 0x8ec   :  { %1909 = vrot.lane.b32.xlu0 %v7592_v41, %s8646_s6 }
 0x8ef   :  { %v1860_v61 = vpop.permute.xlu0 %1859 }
 0x8f0   :  { %v7594_v36 = vpop.eup %7593  ;;  %v9631_v48 = vadd.f32 %v1860_v61, %v1798_v23 }
 0x8f1   :  { %1897 = vrot.lane.b32.xlu2 %v7594_v36, %s8646_s6 }
 0x8f2   :  { %7595 = vtanh.f32 %v9631_v48 }
 0x8f8   :  { %v7596_v55 = vpop.eup %7595 }
 0x8f9   :  { %1907 = vrot.lane.b32.xlu2 %v7596_v55, %s8646_s6 }
 0x94b   :  { %v1898_v9 = vpop.permute.xlu2 %1897 }
 0x94c   :  { %v9644_v0 = vmul.f32 %v1898_v9, %v9545_v29  ;;  %v8372_v9 = vld [vmem:[#allocation3] sm:$0xff] }
 0x94d   :  { %v1902_v15 = vpop.permute.xlu1 %1901 }
 0x94e   :  { %v1900_v31 = vpop.permute.xlu0 %1899  ;;  %v9640_v46 = vmul.f32 %v1902_v15, %v9555_v35  ;;  %v8370_v15 = vld [vmem:[#allocation3 + $0x10] sm:$0xff] }
 0x94f   :  { %v9637_v47 = vmul.f32 %v1900_v31, %v9479_v42  ;;  %v8371_v31 = vld [vmem:[#allocation3 + $0x8] sm:$0xff] }
 0x950   :  { %v1979_v63 = vrot.slane %v9640_v46, 6 }
 0x951   :  { %v1977_v1 = vrot.slane %v9637_v47, 7 }
 0x953   :  { %v1978_v42 = vsel %vm753_vm4, %v1977_v1, %v9644_v0  ;;  %v1908_v35 = vpop.permute.xlu2 %1907 }
 0x954   :  { %v1980_v29 = vsel %vm756_vm5, %v1979_v63, %v1978_v42  ;;  %v9659_v52 = vmul.f32 %v1908_v35, %v9568_v12  ;;  %v1971_v35 = vld [vmem:[#allocation11 + $0x14] sm:$0x1] }
 0x955   :  { %v1906_v51 = vpop.permute.xlu1 %1905 }
 0x956   :  { %v1904_v50 = vpop.permute.xlu0 %1903  ;;  %v9648_v6 = vmul.f32 %v1906_v51, %v9573_v45  ;;  %12742 = vst [vmem:[#allocation54_spill] sm:$0xff] %v9659_v52  ;;  %v1985_v41 = vrot.slane %v9659_v52, 3  ;;  %v1969_v51 = vld [vmem:[#allocation11 + $0x4] sm:$0x1] }
 0x957   :  { %v9651_v10 = vmul.f32 %v1904_v50, %v9498_v3 }
 0x958   :  { %12741 = vst [vmem:[#allocation53_spill] sm:$0xff] %v9648_v6  ;;  %v1983_v60 = vrot.slane %v9648_v6, 4 }
 0x959   :  { %v1981_v21 = vrot.slane %v9651_v10, 5 }
 0x95b   :  { %v1982_v5 = vsel %vm759_vm6, %v1981_v21, %v1980_v29 }
 0x95c   :  { %v1984_v39 = vsel %vm762_vm7, %v1983_v60, %v1982_v5  ;;  %v1970_v60 = vld [vmem:[#allocation11 + $0xc] sm:$0x1] }
 0x95d   :  { %v1912_v45 = vpop.permute.xlu1 %1911  ;;  %v1986_v12 = vsel %vm765_vm8, %v1985_v41, %v1984_v39 }
 0x95e   :  { %v9663_v56 = vmul.f32 %v1912_v45, %v9584_v53  ;;  %v1910_v3 = vpop.permute.xlu0 %1909  ;;  %v1974_v45 = vld [vmem:[#allocation11 + $0x2c] sm:$0x1] }
 0x95f   :  { %v9666_v11 = vmul.f32 %v1910_v3, %v9534_v20  ;;  %v8369_v20 = vld [vmem:[#allocation3 + $0x18] sm:$0xff] }
 0x960   :  { %12743 = vst [vmem:[#allocation55_spill] sm:$0xff] %v9663_v56  ;;  %v1989_v23 = vrot.slane %v9663_v56, 1 }
 0x961   :  { %12744 = vst [vmem:[#allocation56_spill] sm:$0xff] %v9666_v11  ;;  %v1987_v61 = vrot.slane %v9666_v11, 2 }
 0x963   :  { %v1988_v36 = vsel %vm768_vm9, %v1987_v61, %v1986_v12  ;;  %v1973_v61 = vld [vmem:[#allocation11 + $0x24] sm:$0x1] }
 0x964   :  { %v1990_v55 = vsel %vm771_vm10, %v1989_v23, %v1988_v36  ;;  %v1972_v36 = vld [vmem:[#allocation11 + $0x1c] sm:$0x1] }
 0x965   :  { %1991 = vrot.lane.b32.xlu2 %v1990_v55, %s8647_s7 }
 0x9bf   :  { %v1992_v53 = vpop.permute.xlu2 %1991 }
 0x9c0   :  { %7202 = vmatmul.msk.f32.vlgmr.msrb.gmra.mxu2 %vm203_vm0, %v1992_v53 }
 0x9c1   :  { %3225 = vmatpush.msrb.mxu2 %v8369_v20 }
 0x9c3   :  { %3226 = vmatpush.msrb.mxu2 %v8370_v15 }
 0x9c5   :  { %3227 = vmatpush.msrb.mxu2 %v8371_v31 }
 0x9c7   :  { %3228 = vmatpush.msrb.mxu2 %v8372_v9 }
 0xa43   :  { %v2012_v1 = vpop.f32.mrf.mxu2 }
 0xa44   :  { %v2031_v50 = vadd.f32 %v2012_v1, %v1969_v51  ;;  %v2017_v63 = vrot.slane %v2012_v1, 2  ;;  %v2016_v42 = vrot.slane %v2012_v1, 1  ;;  %v2020_v29 = vrot.slane %v2012_v1, 5  ;;  %v1976_v51 = vld [vmem:[#allocation11 + $0x3c] sm:$0x1] }
 0xa45   :  { %v2019_v3 = vrot.slane %v2012_v1, 4  ;;  %v2018_v41 = vrot.slane %v2012_v1, 3  ;;  %v2022_v15 = vrot.slane %v2012_v1, 7  ;;  %v2021_v31 = vrot.slane %v2012_v1, 6 }
 0xa46   :  { %7597 = vtanh.f32 %v2031_v50  ;;  %v2033_v21 = vadd.f32 %v2017_v63, %v1971_v35  ;;  %v2032_v5 = vadd.f32 %v2016_v42, %v1970_v60  ;;  %v2036_v39 = vadd.f32 %v2020_v29, %v1974_v45  ;;  %v1975_v42 = vld [vmem:[#allocation11 + $0x34] sm:$0x1] }
 0xa47   :  { %v2035_v12 = vadd.f32 %v2019_v3, %v1973_v61  ;;  %v2034_v53 = vadd.f32 %v2018_v41, %v1972_v36  ;;  %v2038_v63 = vadd.f32 %v2022_v15, %v1976_v51  ;;  %v2037_v60 = vadd.f32 %v2021_v31, %v1975_v42 }
 0xa48   :  { %7599 = vtanh.f32 %v2033_v21  ;;  %v7203_v1 = vmul.f32 -1.442695, %v2031_v50  ;;  %v7208_v41 = vmul.f32 -1.442695, %v2036_v39  ;;  %v7205_v31 = vmul.f32 -1.442695, %v2033_v21 }
 0xa49   :  { %7601 = vtanh.f32 %v2032_v5  ;;  %v7207_v50 = vmul.f32 -1.442695, %v2035_v12 }
 0xa4a   :  { %7603 = vtanh.f32 %v2036_v39  ;;  %v7206_v39 = vmul.f32 -1.442695, %v2034_v53 }
 0xa4b   :  { %7605 = vtanh.f32 %v2035_v12 }
 0xa4c   :  { %v7598_v23 = vpop.eup %7597  ;;  %7607 = vtanh.f32 %v2034_v53 }
 0xa4d   :  { %2215 = vrot.lane.b32.xlu2 %v7598_v23, %s8646_s6  ;;  %7609 = vtanh.f32 %v2038_v63 }
 0xa4e   :  { %v7600_v55 = vpop.eup %7599  ;;  %7611 = vtanh.f32 %v2037_v60 }
 0xa4f   :  { %2219 = vrot.lane.b32.xlu1 %v7600_v55, %s8646_s6  ;;  %v7602_v20 = vpop.eup %7601  ;;  %7613 = vpow2.f32 %v7203_v1 }
 0xa50   :  { %2217 = vrot.lane.b32.xlu0 %v7602_v20, %s8646_s6  ;;  %v7604_v9 = vpop.eup %7603  ;;  %7615 = vpow2.f32 %v7208_v41 }
 0xa51   :  { %v7606_v35 = vpop.eup %7605 }
 0xa52   :  { %v7608_v29 = vpop.eup %7607 }
 0xa53   :  { %v7610_v45 = vpop.eup %7609 }
 0xa54   :  { %v7612_v3 = vpop.eup %7611 }
 0xa55   :  { %2225 = vrot.lane.b32.xlu2 %v7604_v9, %s8646_s6  ;;  %v7614_v23 = vpop.eup %7613  ;;  %v7204_v9 = vmul.f32 -1.442695, %v2032_v5 }
 0xa56   :  { %v2063_v61 = vadd.f32 1.0, %v7614_v23  ;;  %v7616_v36 = vpop.eup %7615 }
 0xa57   :  { %2223 = vrot.lane.b32.xlu1 %v7606_v35, %s8646_s6  ;;  %v2068_v55 = vadd.f32 1.0, %v7616_v36 }
 0xa58   :  { %2221 = vrot.lane.b32.xlu0 %v7608_v29, %s8646_s6  ;;  %7617 = vrcp.f32 %v2063_v61  ;;  %v2082_v23 = vand.u32 2147483648, %v2063_v61  ;;  %vm2076_vm12 = vweird.f32 %v2063_v61  ;;  %v2080_v36 = vand.u32 2147483647, %v2063_v61 }
 0xa59   :  { %7619 = vrcp.f32 %v2068_v55  ;;  %vm2151_vm1 = vweird.f32 %v2068_v55 }
 0xa5a   :  { %7621 = vpow2.f32 %v7205_v31  ;;  %v7210_v31 = vmul.f32 -1.442695, %v2038_v63  ;;  %v2083_v12 = vor.u32 1.1754944e-38, %v2082_v23  ;;  %vm2081_vm14 = vcmp.eq.f32.partialorder %v2080_v36, 8.507059e+37 }
 0xa5b   :  { %7623 = vpow2.f32 %v7204_v9  ;;  %v7209_v9 = vmul.f32 -1.442695, %v2037_v60  ;;  %v2155_v63 = vand.u32 2147483647, %v2068_v55 }
 0xa5c   :  { %7625 = vpow2.f32 %v7207_v50  ;;  %v2157_v50 = vand.u32 2147483648, %v2068_v55 }
 0xa5d   :  { %7627 = vpow2.f32 %v7206_v39  ;;  %vm2156_vm3 = vcmp.eq.f32.partialorder %v2155_v63, 8.507059e+37 }
 0xa5e   :  { %v7618_v20 = vpop.eup %7617 }
 0xa5f   :  { %2229 = vrot.lane.b32.xlu1 %v7610_v45, %s8646_s6  ;;  %v2072_v15 = vmul.f32 %v7618_v20, %v2063_v61  ;;  %v7620_v42 = vpop.eup %7619  ;;  %vm2077_vm11 = vweird.f32 %v7618_v20 }
 0xa60   :  { %2227 = vrot.lane.b32.xlu0 %v7612_v3, %s8646_s6  ;;  %v2147_v29 = vmul.f32 %v7620_v42, %v2068_v55  ;;  %v7622_v45 = vpop.eup %7621  ;;  %vm2078_vm13 = vmor %vm2076_vm12, %vm2077_vm11  ;;  %vm2152_vm15 = vweird.f32 %v7620_v42 }
 0xa61   :  { %v2073_v51 = vsub.f32 1.0, %v2072_v15  ;;  %v7624_v41 = vpop.eup %7623  ;;  %v9685_v56 = vadd.f32 1.0, %v7622_v45  ;;  %vm2153_vm2 = vmor %vm2151_vm1, %vm2152_vm15 }
 0xa62   :  { %v2148_v1 = vsub.f32 1.0, %v2147_v29  ;;  %v9687_v15 = vadd.f32 1.0, %v7624_v41  ;;  %v7626_v53 = vpop.eup %7625 }
 0xa63   :  { %v2074_v35 = vmul.f32 %v7618_v20, %v2073_v51  ;;  %7629 = vrcp.f32 %v9685_v56  ;;  %v9695_v45 = vadd.f32 1.0, %v7626_v53  ;;  %vm2106_vm12 = vweird.f32 %v9685_v56 }
 0xa64   :  { %v2149_v5 = vmul.f32 %v7620_v42, %v2148_v1  ;;  %7631 = vrcp.f32 %v9687_v15  ;;  %v2158_v1 = vor.u32 1.1754944e-38, %v2157_v50  ;;  %vm2091_vm15 = vweird.f32 %v9687_v15 }
 0xa65   :  { %v2075_v3 = vadd.f32 %v7618_v20, %v2074_v35  ;;  %7633 = vpow2.f32 %v7210_v31 }
 0xa66   :  { %v2150_v29 = vadd.f32 %v7620_v42, %v2149_v5  ;;  %7635 = vpow2.f32 %v7209_v9 }
 0xa67   :  { %v2079_v21 = vsel %vm2078_vm13, %v7618_v20, %v2075_v3  ;;  %v7628_v20 = vpop.eup %7627  ;;  %7637 = vrcp.f32 %v9695_v45 }
 0xa68   :  { %v9690_v35 = vsel %vm2081_vm14, %v2083_v12, %v2079_v21  ;;  %v2154_v39 = vsel %vm2153_vm2, %v7620_v42, %v2150_v29  ;;  %v9697_v3 = vadd.f32 1.0, %v7628_v20 }
 0xa69   :  { %v7630_v60 = vpop.eup %7629  ;;  %v9700_v21 = vsel %vm2156_vm3, %v2158_v1, %v2154_v39 }
 0xa6a   :  { %v7632_v41 = vpop.eup %7631  ;;  %v2102_v5 = vmul.f32 %v7630_v60, %v9685_v56  ;;  %7639 = vrcp.f32 %v9697_v3  ;;  %vm2107_vm11 = vweird.f32 %v7630_v60 }
 0xa6b   :  { %v7634_v23 = vpop.eup %7633  ;;  %v2087_v42 = vmul.f32 %v7632_v41, %v9687_v15  ;;  %vm2092_vm13 = vweird.f32 %v7632_v41  ;;  %vm2108_vm14 = vmor %vm2106_vm12, %vm2107_vm11  ;;  %vm2136_vm12 = vweird.f32 %v9695_v45 }
 0xa6c   :  { %v7636_v31 = vpop.eup %7635  ;;  %v9707_v12 = vadd.f32 1.0, %v7634_v23  ;;  %v2103_v53 = vsub.f32 1.0, %v2102_v5  ;;  %v2112_v5 = vand.u32 2147483648, %v9685_v56  ;;  %vm2093_vm1 = vmor %vm2091_vm15, %vm2092_vm13  ;;  %vm2121_vm15 = vweird.f32 %v9697_v3 }
 0xa6d   :  { %v9709_v9 = vpop.eup %7637 }
 0xa6e   :  { %7641 = vrcp.f32 %v9707_v12  ;;  %v2104_v20 = vmul.f32 %v7630_v60, %v2103_v53  ;;  %v2132_v50 = vmul.f32 %v9709_v9, %v9695_v45  ;;  %v2113_v22 = vor.u32 1.1754944e-38, %v2112_v5 }
 0xa6f   :  { %vm2137_vm11 = vweird.f32 %v9709_v9 }
 0xa70   :  { %v9713_v29 = vpop.eup %7639  ;;  %v2105_v1 = vadd.f32 %v7630_v60, %v2104_v20  ;;  %v2133_v23 = vsub.f32 1.0, %v2132_v50  ;;  %v2097_v20 = vand.u32 2147483648, %v9687_v15 }
 0xa71   :  { %v2117_v39 = vmul.f32 %v9713_v29, %v9697_v3  ;;  %vm2122_vm13 = vweird.f32 %v9713_v29 }
 0xa72   :  { %v2109_v28 = vsel %vm2108_vm14, %v7630_v60, %v2105_v1  ;;  %v2134_v50 = vmul.f32 %v9709_v9, %v2133_v23  ;;  %v2098_v60 = vor.u32 1.1754944e-38, %v2097_v20  ;;  %vm2138_vm14 = vmor %vm2136_vm12, %vm2137_vm11  ;;  %vm2181_vm12 = vweird.f32 %v9707_v12 }
 0xa74   :  { %v2135_v1 = vadd.f32 %v9709_v9, %v2134_v50 }
 0xaa7   :  { %v2216_v51 = vpop.permute.xlu2 %2215 }
 0xaa8   :  { %v2239_v61 = vmul.f32 %v2216_v51, %v9690_v35  ;;  %v9711_v51 = vadd.f32 1.0, %v7636_v31 }
 0xaaa   :  { %2255 = vrot.lane.b32.xlu1 %v2239_v61, %s8647_s7  ;;  %v2088_v61 = vsub.f32 1.0, %v2087_v42  ;;  %7643 = vrcp.f32 %v9711_v51  ;;  %v2118_v42 = vsub.f32 1.0, %v2117_v39 }
 0xaac   :  { %v2089_v63 = vmul.f32 %v7632_v41, %v2088_v61  ;;  %v2095_v61 = vand.u32 2147483647, %v9687_v15 }
 0xaae   :  { %v2090_v31 = vadd.f32 %v7632_v41, %v2089_v63  ;;  %v2119_v63 = vmul.f32 %v9713_v29, %v2118_v42  ;;  %vm2096_vm3 = vcmp.eq.f32.partialorder %v2095_v61, 8.507059e+37  ;;  %v2139_v42 = vsel %vm2138_vm14, %v9709_v9, %v2135_v1 }
 0xaaf   :  { %v2226_v36 = vpop.permute.xlu2 %2225 }
 0xab0   :  { %v2244_v55 = vmul.f32 %v2226_v36, %v9700_v21  ;;  %v9721_v36 = vpop.eup %7641 }
 0xab1   :  { %v9726_v53 = vpop.eup %7643  ;;  %v2177_v58 = vmul.f32 %v9721_v36, %v9707_v12  ;;  %vm2182_vm11 = vweird.f32 %v9721_v36 }
 0xab2   :  { %2265 = vrot.lane.b32.xlu1 %v2244_v55, %s8647_s7  ;;  %v2110_v55 = vand.u32 2147483647, %v9685_v56  ;;  %v2094_v56 = vsel %vm2093_vm1, %v7632_v41, %v2090_v31  ;;  %v2162_v39 = vmul.f32 %v9726_v53, %v9711_v51  ;;  %v2140_v41 = vand.u32 2147483647, %v9695_v45  ;;  %vm2123_vm1 = vmor %vm2121_vm15, %vm2122_vm13 }
 0xab3   :  { %v2178_v23 = vsub.f32 1.0, %v2177_v58  ;;  %v2142_v31 = vand.u32 2147483648, %v9695_v45  ;;  %v2127_v58 = vand.u32 2147483648, %v9697_v3  ;;  %v2125_v45 = vand.u32 2147483647, %v9697_v3  ;;  %vm2183_vm14 = vmor %vm2181_vm12, %vm2182_vm11 }
 0xab4   :  { %vm2111_vm2 = vcmp.eq.f32.partialorder %v2110_v55, 8.507059e+37  ;;  %v9742_v55 = vsel %vm2096_vm3, %v2098_v60, %v2094_v56  ;;  %vm2167_vm13 = vweird.f32 %v9726_v53  ;;  %vm2166_vm15 = vweird.f32 %v9711_v51 }
 0xab5   :  { %v9737_v33 = vsel %vm2111_vm2, %v2113_v22, %v2109_v28  ;;  %v2120_v22 = vadd.f32 %v9713_v29, %v2119_v63  ;;  %v2179_v61 = vmul.f32 %v9721_v36, %v2178_v23  ;;  %v2143_v20 = vor.u32 1.1754944e-38, %v2142_v31 }
 0xab6   :  { %vm2141_vm2 = vcmp.eq.f32.partialorder %v2140_v41, 8.507059e+37  ;;  %v2128_v60 = vor.u32 1.1754944e-38, %v2127_v58  ;;  %vm2126_vm3 = vcmp.eq.f32.partialorder %v2125_v45, 8.507059e+37  ;;  %v2172_v31 = vand.u32 2147483648, %v9711_v51 }
 0xab7   :  { %v2124_v50 = vsel %vm2123_vm1, %v9713_v29, %v2120_v22  ;;  %v9759_v63 = vsel %vm2141_vm2, %v2143_v20, %v2139_v42  ;;  %v2180_v9 = vadd.f32 %v9721_v36, %v2179_v61  ;;  %v2187_v29 = vand.u32 2147483648, %v9707_v12  ;;  %vm2168_vm1 = vmor %vm2166_vm15, %vm2167_vm13 }
 0xab8   :  { %v9764_v3 = vsel %vm2126_vm3, %v2128_v60, %v2124_v50  ;;  %v2170_v22 = vand.u32 2147483647, %v9711_v51  ;;  %v2173_v45 = vor.u32 1.1754944e-38, %v2172_v31  ;;  %v2199_v51 = vmul.f32 %v9690_v35, %v9624_v59 }
 0xab9   :  { %v2202_v59 = vmul.f32 %v9764_v3, %v9606_v43  ;;  %v2201_v43 = vmul.f32 %v9737_v33, %v9590_v4 }
 0xaba   :  { %vm2171_vm3 = vcmp.eq.f32.partialorder %v2170_v22, 8.507059e+37 }
 0xac1   :  { %v2220_v11 = vpop.permute.xlu1 %2219 }
 0xac2   :  { %v2241_v15 = vmul.f32 %v2220_v11, %v9737_v33  ;;  %v2218_v5 = vpop.permute.xlu0 %2217  ;;  %v2163_v11 = vsub.f32 1.0, %v2162_v39 }
 0xac3   :  { %v2240_v28 = vmul.f32 %v2218_v5, %v9742_v55  ;;  %v2185_v5 = vand.u32 2147483647, %v9707_v12 }
 0xac4   :  { %2259 = vrot.lane.b32.xlu0 %v2241_v15, %s8647_s7  ;;  %v2164_v56 = vmul.f32 %v9726_v53, %v2163_v11  ;;  %v2188_v11 = vor.u32 1.1754944e-38, %v2187_v29 }
 0xac5   :  { %2257 = vrot.lane.b32.xlu2 %v2240_v28, %s8647_s7  ;;  %v2184_v28 = vsel %vm2183_vm14, %v9721_v36, %v2180_v9  ;;  %vm2186_vm2 = vcmp.eq.f32.partialorder %v2185_v5, 8.507059e+37  ;;  %v2204_v9 = vmul.f32 %v9700_v21, %v9631_v48 }
 0xac6   :  { %v2165_v41 = vadd.f32 %v9726_v53, %v2164_v56  ;;  %v9779_v58 = vsel %vm2186_vm2, %v2188_v11, %v2184_v28 }
 0xac7   :  { %v2206_v4 = vmul.f32 %v9779_v58, %v9612_v2 }
 0xac8   :  { %v2169_v12 = vsel %vm2168_vm1, %v9726_v53, %v2165_v41 }
 0xac9   :  { %v2224_v39 = vpop.permute.xlu1 %2223  ;;  %v9782_v20 = vsel %vm2171_vm3, %v2173_v45, %v2169_v12 }
 0xaca   :  { %v2243_v15 = vmul.f32 %v2224_v39, %v9759_v63  ;;  %v2222_v1 = vpop.permute.xlu0 %2221  ;;  %v2200_v39 = vmul.f32 %v9742_v55, %v9595_v37  ;;  %v2205_v31 = vmul.f32 %v9782_v20, %v9618_v27  ;;  %v2203_v27 = vmul.f32 %v9759_v63, %v9600_v32 }
 0xacb   :  { %v2242_v23 = vmul.f32 %v2222_v1, %v9764_v3 }
 0xacc   :  { %2263 = vrot.lane.b32.xlu0 %v2243_v15, %s8647_s7 }
 0xacd   :  { %2261 = vrot.lane.b32.xlu2 %v2242_v23, %s8647_s7 }
 0xad1   :  { %v2230_v42 = vpop.permute.xlu1 %2229 }
 0xad2   :  { %v2246_v61 = vmul.f32 %v2230_v42, %v9779_v58  ;;  %v2228_v50 = vpop.permute.xlu0 %2227 }
 0xad3   :  { %v2245_v36 = vmul.f32 %v2228_v50, %v9782_v20 }
 0xad4   :  { %2269 = vrot.lane.b32.xlu0 %v2246_v61, %s8647_s7 }
 0xad5   :  { %2267 = vrot.lane.b32.xlu2 %v2245_v36, %s8647_s7 }
 0xb1c   :  { %v2256_v53 = vpop.permute.xlu1 %2255 }
 0xb1d   :  { %v9789_v56 = vadd.f32 %v2256_v53, %v2199_v51 }
 0xb1f   :  { %7645 = vtanh.f32 %v9789_v56  ;;  %v2258_v60 = vpop.permute.xlu2 %2257 }
 0xb20   :  { %v9794_v15 = vadd.f32 %v2258_v60, %v2200_v39 }
 0xb22   :  { %7647 = vtanh.f32 %v9794_v15 }
 0xb24   :  { %v2266_v1 = vpop.permute.xlu1 %2265 }
 0xb25   :  { %v7646_v29 = vpop.eup %7645  ;;  %v9799_v23 = vadd.f32 %v2266_v1, %v2204_v9 }
 0xb26   :  { %2303 = vrot.lane.b32.xlu0 %v7646_v29, %s8646_s6 }
 0xb27   :  { %7649 = vtanh.f32 %v9799_v23  ;;  %v2262_v37 = vpop.permute.xlu2 %2261 }
 0xb28   :  { %v7648_v5 = vpop.eup %7647  ;;  %v9805_v41 = vadd.f32 %v2262_v37, %v2202_v59 }
 0xb29   :  { %2305 = vrot.lane.b32.xlu1 %v7648_v5, %s8646_s6 }
 0xb2a   :  { %7651 = vtanh.f32 %v9805_v41 }
 0xb2d   :  { %v7650_v48 = vpop.eup %7649 }
 0xb2e   :  { %2313 = vrot.lane.b32.xlu0 %v7650_v48, %s8646_s6 }
 0xb2f   :  { %v2268_v28 = vpop.permute.xlu2 %2267 }
 0xb30   :  { %v7652_v22 = vpop.eup %7651  ;;  %v9812_v11 = vadd.f32 %v2268_v28, %v2205_v31 }
 0xb31   :  { %2309 = vrot.lane.b32.xlu1 %v7652_v22, %s8646_s6 }
 0xb32   :  { %7653 = vtanh.f32 %v9812_v11 }
 0xb36   :  { %v2260_v12 = vpop.permute.xlu0 %2259 }
 0xb37   :  { %v9818_v42 = vadd.f32 %v2260_v12, %v2201_v43 }
 0xb38   :  { %v7654_v45 = vpop.eup %7653 }
 0xb39   :  { %7655 = vtanh.f32 %v9818_v42  ;;  %2315 = vrot.lane.b32.xlu1 %v7654_v45, %s8646_s6 }
 0xb3e   :  { %v2264_v61 = vpop.permute.xlu0 %2263 }
 0xb3f   :  { %v7656_v50 = vpop.eup %7655  ;;  %v9824_v36 = vadd.f32 %v2264_v61, %v2203_v27 }
 0xb40   :  { %2307 = vrot.lane.b32.xlu2 %v7656_v50, %s8646_s6 }
 0xb41   :  { %7657 = vtanh.f32 %v9824_v36 }
 0xb46   :  { %v2270_v51 = vpop.permute.xlu0 %2269 }
 0xb47   :  { %v7658_v53 = vpop.eup %7657  ;;  %v9830_v39 = vadd.f32 %v2270_v51, %v2206_v4 }
 0xb48   :  { %2311 = vrot.lane.b32.xlu2 %v7658_v53, %s8646_s6 }
 0xb49   :  { %7659 = vtanh.f32 %v9830_v39 }
 0xb4f   :  { %v7660_v32 = vpop.eup %7659 }
 0xb50   :  { %2317 = vrot.lane.b32.xlu2 %v7660_v32, %s8646_s6 }
 0xb98   :  { %v2304_v1 = vpop.permute.xlu0 %2303 }
 0xb99   :  { %v9843_v5 = vmul.f32 %v2304_v1, %v9690_v35  ;;  %v2375_v1 = vld [vmem:[#allocation11 + $0x5] sm:$0x1] }
 0xb9a   :  { %v2308_v60 = vpop.permute.xlu2 %2307 }
 0xb9b   :  { %v2306_v9 = vpop.permute.xlu1 %2305  ;;  %v9839_v59 = vmul.f32 %v2308_v60, %v9737_v33 }
 0xb9c   :  { %v9836_v29 = vmul.f32 %v2306_v9, %v9742_v55 }
 0xb9d   :  { %v2385_v31 = vrot.slane %v9839_v59, 6 }
 0xb9e   :  { %v2383_v2 = vrot.slane %v9836_v29, 7 }
 0xba0   :  { %v2384_v55 = vsel %vm753_vm4, %v2383_v2, %v9843_v5  ;;  %v2314_v33 = vpop.permute.xlu0 %2313 }
 0xba1   :  { %v2386_v35 = vsel %vm756_vm5, %v2385_v31, %v2384_v55  ;;  %v9858_v45 = vmul.f32 %v2314_v33, %v9700_v21  ;;  %v2377_v31 = vld [vmem:[#allocation11 + $0x15] sm:$0x1]  ;;  %v2376_v33 = vld [vmem:[#allocation11 + $0xd] sm:$0x1] }
 0xba2   :  { %v2312_v37 = vpop.permute.xlu2 %2311 }
 0xba3   :  { %v2310_v48 = vpop.permute.xlu1 %2309  ;;  %v9847_v28 = vmul.f32 %v2312_v37, %v9759_v63  ;;  %12745 = vst [vmem:[#allocation57_spill] sm:$0xff] %v9858_v45  ;;  %v2391_v51 = vrot.slane %v9858_v45, 3 }
 0xba4   :  { %v9850_v22 = vmul.f32 %v2310_v48, %v9764_v3 }
 0xba5   :  { %v2389_v12 = vrot.slane %v9847_v28, 4 }
 0xba6   :  { %v2387_v43 = vrot.slane %v9850_v22, 5 }
 0xba8   :  { %v2388_v27 = vsel %vm759_vm6, %v2387_v43, %v2386_v35  ;;  %v2380_v35 = vld [vmem:[#allocation11 + $0x2d] sm:$0x1] }
 0xba9   :  { %v2390_v4 = vsel %vm762_vm7, %v2389_v12, %v2388_v27 }
 0xbaa   :  { %v2318_v63 = vpop.permute.xlu2 %2317  ;;  %v2392_v21 = vsel %vm765_vm8, %v2391_v51, %v2390_v4  ;;  %v2379_v51 = vld [vmem:[#allocation11 + $0x25] sm:$0x1] }
 0xbab   :  { %v9862_v61 = vmul.f32 %v2318_v63, %v9779_v58  ;;  %v2316_v3 = vpop.permute.xlu1 %2315 }
 0xbac   :  { %v9865_v50 = vmul.f32 %v2316_v3, %v9782_v20 }
 0xbad   :  { %12746 = vst [vmem:[#allocation58_spill] sm:$0xff] %v9862_v61  ;;  %v2395_v53 = vrot.slane %v9862_v61, 1 }
 0xbae   :  { %12747 = vst [vmem:[#allocation59_spill] sm:$0xff] %v9865_v50  ;;  %v2393_v32 = vrot.slane %v9865_v50, 2 }
 0xbb0   :  { %v2394_v60 = vsel %vm768_vm9, %v2393_v32, %v2392_v21  ;;  %v2378_v32 = vld [vmem:[#allocation11 + $0x1d] sm:$0x1] }
 0xbb1   :  { %v2396_v9 = vsel %vm771_vm10, %v2395_v53, %v2394_v60 }
 0xbb2   :  { %2397 = vrot.lane.b32.xlu0 %v2396_v9, %s8647_s7 }
 0xc24   :  { %v2398_v58 = vpop.permute.xlu0 %2397 }
 0xc25   :  { %7211 = vmatmul.msk.f32.vlgmr.msra.gmra.mxu2 %vm203_vm0, %v2398_v58 }
 0xca8   :  { %v2418_v20 = vpop.f32.mrf.mxu2 }
 0xca9   :  { %v2437_v2 = vadd.f32 %v2418_v20, %v2375_v1  ;;  %v2423_v37 = vrot.slane %v2418_v20, 2  ;;  %v2422_v48 = vrot.slane %v2418_v20, 1  ;;  %v2426_v43 = vrot.slane %v2418_v20, 5 }
 0xcaa   :  { %v2425_v27 = vrot.slane %v2418_v20, 4  ;;  %v2424_v3 = vrot.slane %v2418_v20, 3  ;;  %v2428_v58 = vrot.slane %v2418_v20, 7  ;;  %v2427_v1 = vrot.slane %v2418_v20, 6 }
 0xcab   :  { %7661 = vtanh.f32 %v2437_v2  ;;  %v2439_v55 = vadd.f32 %v2423_v37, %v2377_v31  ;;  %v2438_v12 = vadd.f32 %v2422_v48, %v2376_v33  ;;  %v2442_v63 = vadd.f32 %v2426_v43, %v2380_v35  ;;  %v2382_v48 = vld [vmem:[#allocation11 + $0x3d] sm:$0x1]  ;;  %v2381_v33 = vld [vmem:[#allocation11 + $0x35] sm:$0x1] }
 0xcac   :  { %v2441_v53 = vadd.f32 %v2425_v27, %v2379_v51  ;;  %v2440_v60 = vadd.f32 %v2424_v3, %v2378_v32  ;;  %v2444_v31 = vadd.f32 %v2428_v58, %v2382_v48  ;;  %v2443_v35 = vadd.f32 %v2427_v1, %v2381_v33 }
 0xcad   :  { %7663 = vtanh.f32 %v2439_v55  ;;  %v7214_v20 = vmul.f32 -1.442695, %v2439_v55  ;;  %v7212_v1 = vmul.f32 -1.442695, %v2437_v2  ;;  %v7217_v55 = vmul.f32 -1.442695, %v2442_v63 }
 0xcae   :  { %7665 = vtanh.f32 %v2438_v12  ;;  %v7216_v51 = vmul.f32 -1.442695, %v2441_v53 }
 0xcaf   :  { %7667 = vtanh.f32 %v2442_v63 }
 0xcb0   :  { %7669 = vtanh.f32 %v2441_v53 }
 0xcb1   :  { %v7662_v4 = vpop.eup %7661  ;;  %7671 = vtanh.f32 %v2440_v60 }
 0xcb2   :  { %2621 = vrot.lane.b32.xlu0 %v7662_v4, %s8646_s6  ;;  %7673 = vtanh.f32 %v2444_v31 }
 0xcb3   :  { %v7664_v21 = vpop.eup %7663  ;;  %7675 = vtanh.f32 %v2443_v35 }
 0xcb4   :  { %2625 = vrot.lane.b32.xlu2 %v7664_v21, %s8646_s6  ;;  %v7666_v9 = vpop.eup %7665  ;;  %7677 = vpow2.f32 %v7214_v20  ;;  %v7215_v20 = vmul.f32 -1.442695, %v2440_v60  ;;  %v7218_v60 = vmul.f32 -1.442695, %v2443_v35 }
 0xcb5   :  { %2623 = vrot.lane.b32.xlu1 %v7666_v9, %s8646_s6  ;;  %v7668_v37 = vpop.eup %7667  ;;  %7679 = vpow2.f32 %v7216_v51  ;;  %v7219_v9 = vmul.f32 -1.442695, %v2444_v31 }
 0xcb6   :  { %v7670_v43 = vpop.eup %7669 }
 0xcb7   :  { %v7672_v27 = vpop.eup %7671 }
 0xcb8   :  { %v7674_v3 = vpop.eup %7673 }
 0xcb9   :  { %v7676_v4 = vpop.eup %7675 }
 0xcba   :  { %2631 = vrot.lane.b32.xlu0 %v7668_v37, %s8646_s6  ;;  %v7678_v32 = vpop.eup %7677 }
 0xcbb   :  { %v2471_v21 = vadd.f32 1.0, %v7678_v32  ;;  %v7680_v58 = vpop.eup %7679 }
 0xcbc   :  { %2629 = vrot.lane.b32.xlu2 %v7670_v43, %s8646_s6  ;;  %v9884_v37 = vadd.f32 1.0, %v7680_v58  ;;  %v7213_v43 = vmul.f32 -1.442695, %v2438_v12 }
 0xcbd   :  { %2627 = vrot.lane.b32.xlu1 %v7672_v27, %s8646_s6  ;;  %7681 = vrcp.f32 %v2471_v21  ;;  %vm2512_vm12 = vweird.f32 %v2471_v21 }
 0xcbe   :  { %7683 = vpow2.f32 %v7219_v9  ;;  %vm2542_vm1 = vweird.f32 %v9884_v37 }
 0xcbf   :  { %7685 = vpow2.f32 %v7212_v1 }
 0xcc0   :  { %7687 = vrcp.f32 %v9884_v37 }
 0xcc1   :  { %7689 = vpow2.f32 %v7213_v43 }
 0xcc2   :  { %7691 = vpow2.f32 %v7217_v55 }
 0xcc3   :  { %v7682_v48 = vpop.eup %7681 }
 0xcc4   :  { %2635 = vrot.lane.b32.xlu2 %v7674_v3, %s8646_s6  ;;  %v7684_v33 = vpop.eup %7683  ;;  %v2508_v27 = vmul.f32 %v7682_v48, %v2471_v21  ;;  %vm2513_vm11 = vweird.f32 %v7682_v48 }
 0xcc5   :  { %2633 = vrot.lane.b32.xlu1 %v7676_v4, %s8646_s6  ;;  %v9887_v3 = vadd.f32 1.0, %v7684_v33  ;;  %v7686_v53 = vpop.eup %7685  ;;  %v2518_v33 = vand.u32 2147483648, %v2471_v21  ;;  %vm2514_vm13 = vmor %vm2512_vm12, %vm2513_vm11 }
 0xcc6   :  { %v2509_v4 = vsub.f32 1.0, %v2508_v27  ;;  %v7688_v31 = vpop.eup %7687  ;;  %v9891_v32 = vadd.f32 1.0, %v7686_v53  ;;  %v2516_v27 = vand.u32 2147483647, %v2471_v21 }
 0xcc7   :  { %7693 = vrcp.f32 %v9887_v3  ;;  %v2538_v51 = vmul.f32 %v7688_v31, %v9884_v37  ;;  %v7690_v9 = vpop.eup %7689  ;;  %vm2543_vm15 = vweird.f32 %v7688_v31  ;;  %vm2587_vm12 = vweird.f32 %v9887_v3 }
 0xcc8   :  { %v2510_v2 = vmul.f32 %v7682_v48, %v2509_v4  ;;  %7695 = vpow2.f32 %v7215_v20  ;;  %v7692_v12 = vpop.eup %7691  ;;  %v9896_v43 = vadd.f32 1.0, %v7690_v9  ;;  %vm2517_vm14 = vcmp.eq.f32.partialorder %v2516_v27, 8.507059e+37  ;;  %vm2544_vm2 = vmor %vm2542_vm1, %vm2543_vm15 }
 0xcc9   :  { %v2539_v63 = vsub.f32 1.0, %v2538_v51  ;;  %7697 = vrcp.f32 %v9891_v32  ;;  %v9898_v55 = vadd.f32 1.0, %v7692_v12  ;;  %v2519_v51 = vor.u32 1.1754944e-38, %v2518_v33 }
 0xcca   :  { %v2511_v58 = vadd.f32 %v7682_v48, %v2510_v2  ;;  %7699 = vrcp.f32 %v9896_v43  ;;  %vm2482_vm1 = vweird.f32 %v9891_v32 }
 0xccb   :  { %v2540_v4 = vmul.f32 %v7688_v31, %v2539_v63  ;;  %7701 = vpow2.f32 %v7218_v60  ;;  %v2546_v60 = vand.u32 2147483647, %v9884_v37 }
 0xccc   :  { %v2515_v53 = vsel %vm2514_vm13, %v7682_v48, %v2511_v58  ;;  %7703 = vrcp.f32 %v9898_v55  ;;  %v2548_v58 = vand.u32 2147483648, %v9884_v37 }
 0xccd   :  { %v9894_v1 = vpop.eup %7693  ;;  %v9905_v35 = vsel %vm2517_vm14, %v2519_v51, %v2515_v53  ;;  %v2541_v48 = vadd.f32 %v7688_v31, %v2540_v4  ;;  %vm2547_vm3 = vcmp.eq.f32.partialorder %v2546_v60, 8.507059e+37 }
 0xcce   :  { %v2583_v20 = vmul.f32 %v9894_v1, %v9887_v3  ;;  %v7696_v2 = vpop.eup %7695  ;;  %vm2588_vm11 = vweird.f32 %v9894_v1 }
 0xccf   :  { %v9903_v61 = vpop.eup %7697  ;;  %v9912_v33 = vadd.f32 1.0, %v7696_v2  ;;  %v2545_v4 = vsel %vm2544_vm2, %v7688_v31, %v2541_v48  ;;  %v2593_v31 = vand.u32 2147483648, %v9887_v3  ;;  %vm2589_vm13 = vmor %vm2587_vm12, %vm2588_vm11  ;;  %vm2497_vm12 = vweird.f32 %v9896_v43 }
 0xcd0   :  { %v2584_v12 = vsub.f32 1.0, %v2583_v20  ;;  %v2478_v63 = vmul.f32 %v9903_v61, %v9891_v32  ;;  %v9917_v27 = vpop.eup %7699  ;;  %vm2483_vm14 = vweird.f32 %v9903_v61 }
 0xcd1   :  { %v7702_v53 = vpop.eup %7701  ;;  %7705 = vrcp.f32 %v9912_v33  ;;  %v2493_v2 = vmul.f32 %v9917_v27, %v9896_v43  ;;  %vm2484_vm2 = vmor %vm2482_vm1, %vm2483_vm14 }
 0xcd2   :  { %v2585_v20 = vmul.f32 %v9894_v1, %v2584_v12  ;;  %v9920_v51 = vpop.eup %7703  ;;  %v2479_v50 = vsub.f32 1.0, %v2478_v63  ;;  %v2591_v63 = vand.u32 2147483647, %v9887_v3 }
 0xcd3   :  { %v2553_v12 = vmul.f32 %v9920_v51, %v9898_v55  ;;  %v2494_v60 = vsub.f32 1.0, %v2493_v2  ;;  %vm2558_vm14 = vweird.f32 %v9920_v51 }
 0xcd4   :  { %v2586_v30 = vadd.f32 %v9894_v1, %v2585_v20  ;;  %v2480_v48 = vmul.f32 %v9903_v61, %v2479_v50  ;;  %vm2592_vm15 = vcmp.eq.f32.partialorder %v2591_v63, 8.507059e+37 }
 0xcd6   :  { %v2590_v20 = vsel %vm2589_vm13, %v9894_v1, %v2586_v30  ;;  %v2481_v50 = vadd.f32 %v9903_v61, %v2480_v48  ;;  %v2486_v30 = vand.u32 2147483647, %v9891_v32 }
 0xcd8   :  { %vm2487_vm11 = vcmp.eq.f32.partialorder %v2486_v30, 8.507059e+37 }
 0xd0e   :  { %v2626_v9 = vpop.permute.xlu2 %2625 }
 0xd0f   :  { %v2647_v21 = vmul.f32 %v2626_v9, %v9905_v35  ;;  %v2549_v9 = vor.u32 1.1754944e-38, %v2548_v58  ;;  %v9934_v58 = vadd.f32 1.0, %v7702_v53  ;;  %v2495_v53 = vmul.f32 %v9917_v27, %v2494_v60 }
 0xd11   :  { %2665 = vrot.lane.b32.xlu1 %v2647_v21, %s8647_s7  ;;  %v9925_v21 = vsel %vm2547_vm3, %v2549_v9, %v2545_v4  ;;  %v9939_v4 = vpop.eup %7705  ;;  %v2594_v9 = vor.u32 1.1754944e-38, %v2593_v31  ;;  %7707 = vrcp.f32 %v9934_v58  ;;  %v2485_v31 = vsel %vm2484_vm2, %v9903_v61, %v2481_v50 }
 0xd12   :  { %v2523_v3 = vmul.f32 %v9939_v4, %v9912_v33  ;;  %v2496_v63 = vadd.f32 %v9917_v27, %v2495_v53  ;;  %vm2498_vm3 = vweird.f32 %v9917_v27 }
 0xd13   :  { %v9949_v2 = vsel %vm2592_vm15, %v2594_v9, %v2590_v20  ;;  %v2503_v9 = vand.u32 2147483648, %v9896_v43  ;;  %vm2499_vm13 = vmor %vm2497_vm12, %vm2498_vm3  ;;  %vm2557_vm15 = vweird.f32 %v9898_v55  ;;  %vm2528_vm3 = vweird.f32 %v9939_v4 }
 0xd14   :  { %v2524_v60 = vsub.f32 1.0, %v2523_v3  ;;  %vm2559_vm2 = vmor %vm2557_vm15, %vm2558_vm14  ;;  %vm2527_vm12 = vweird.f32 %v9912_v33 }
 0xd15   :  { %v2504_v30 = vor.u32 1.1754944e-38, %v2503_v9  ;;  %v2533_v9 = vand.u32 2147483648, %v9912_v33 }
 0xd16   :  { %v2630_v37 = vpop.permute.xlu2 %2629  ;;  %v2525_v53 = vmul.f32 %v9939_v4, %v2524_v60 }
 0xd17   :  { %v2649_v34 = vmul.f32 %v2630_v37, %v9925_v21  ;;  %v2554_v37 = vsub.f32 1.0, %v2553_v12  ;;  %v7708_v20 = vpop.eup %7707 }
 0xd18   :  { %v2568_v3 = vmul.f32 %v7708_v20, %v9934_v58  ;;  %vm2573_vm15 = vweird.f32 %v7708_v20 }
 0xd19   :  { %2669 = vrot.lane.b32.xlu1 %v2649_v34, %s8647_s7  ;;  %v2488_v34 = vand.u32 2147483648, %v9891_v32  ;;  %v2555_v48 = vmul.f32 %v9920_v51, %v2554_v37  ;;  %v2563_v37 = vand.u32 2147483648, %v9898_v55 }
 0xd1a   :  { %v2569_v60 = vsub.f32 1.0, %v2568_v3 }
 0xd1b   :  { %v2489_v12 = vor.u32 1.1754944e-38, %v2488_v34  ;;  %v2556_v50 = vadd.f32 %v9920_v51, %v2555_v48  ;;  %v2500_v34 = vsel %vm2499_vm13, %v9917_v27, %v2496_v63  ;;  %v2526_v63 = vadd.f32 %v9939_v4, %v2525_v53  ;;  %vm2529_vm13 = vmor %vm2527_vm12, %vm2528_vm3 }
 0xd1d   :  { %v9960_v19 = vsel %vm2487_vm11, %v2489_v12, %v2485_v31  ;;  %v2560_v48 = vsel %vm2559_vm2, %v9920_v51, %v2556_v50  ;;  %v2564_v12 = vor.u32 1.1754944e-38, %v2563_v37  ;;  %v2531_v51 = vand.u32 2147483647, %v9912_v33 }
 0xd1e   :  { %v2636_v52 = vpop.permute.xlu2 %2635  ;;  %v2570_v50 = vmul.f32 %v7708_v20, %v2569_v60  ;;  %v2534_v37 = vor.u32 1.1754944e-38, %v2533_v9  ;;  %v2576_v33 = vand.u32 2147483647, %v9934_v58 }
 0xd1f   :  { %v2652_v1 = vmul.f32 %v2636_v52, %v9949_v2  ;;  %v2501_v52 = vand.u32 2147483647, %v9896_v43  ;;  %v2561_v43 = vand.u32 2147483647, %v9898_v55  ;;  %vm2532_vm14 = vcmp.eq.f32.partialorder %v2531_v51, 8.507059e+37 }
 0xd20   :  { %vm2577_vm3 = vcmp.eq.f32.partialorder %v2576_v33, 8.507059e+37 }
 0xd21   :  { %2675 = vrot.lane.b32.xlu1 %v2652_v1, %s8647_s7  ;;  %vm2502_vm1 = vcmp.eq.f32.partialorder %v2501_v52, 8.507059e+37  ;;  %vm2562_vm11 = vcmp.eq.f32.partialorder %v2561_v43, 8.507059e+37  ;;  %v2578_v43 = vand.u32 2147483648, %v9934_v58 }
 0xd22   :  { %v9974_v31 = vsel %vm2502_vm1, %v2504_v30, %v2500_v34  ;;  %v2571_v30 = vadd.f32 %v7708_v20, %v2570_v50  ;;  %vm2572_vm1 = vweird.f32 %v9934_v58  ;;  %v2607_v58 = vmul.f32 %v9905_v35, %v9818_v42 }
 0xd23   :  { %vm2574_vm2 = vmor %vm2572_vm1, %vm2573_vm15 }
 0xd24   :  { %v2622_v32 = vpop.permute.xlu0 %2621 }
 0xd25   :  { %v2645_v61 = vmul.f32 %v2622_v32, %v9960_v19  ;;  %v9982_v32 = vsel %vm2562_vm11, %v2564_v12, %v2560_v48 }
 0xd26   :  { %v2610_v51 = vmul.f32 %v9982_v32, %v9799_v23 }
 0xd27   :  { %2661 = vrot.lane.b32.xlu2 %v2645_v61, %s8647_s7  ;;  %v2624_v1 = vpop.permute.xlu1 %2623  ;;  %v2530_v61 = vsel %vm2529_vm13, %v9939_v4, %v2526_v63  ;;  %v2575_v4 = vsel %vm2574_vm2, %v7708_v20, %v2571_v30  ;;  %v2605_v63 = vmul.f32 %v9960_v19, %v9789_v56  ;;  %v2609_v56 = vmul.f32 %v9925_v21, %v9824_v36 }
 0xd28   :  { %v2646_v27 = vmul.f32 %v2624_v1, %v9974_v31  ;;  %v9989_v34 = vsel %vm2532_vm14, %v2534_v37, %v2530_v61  ;;  %v2579_v1 = vor.u32 1.1754944e-38, %v2578_v43 }
 0xd2a   :  { %2663 = vrot.lane.b32.xlu0 %v2646_v27, %s8647_s7  ;;  %v9996_v48 = vsel %vm2577_vm3, %v2579_v1, %v2575_v4  ;;  %v2606_v4 = vmul.f32 %v9974_v31, %v9794_v15 }
 0xd2b   :  { %v2611_v15 = vmul.f32 %v9996_v48, %v9812_v11 }
 0xd2c   :  { %v2632_v55 = vpop.permute.xlu0 %2631 }
 0xd2d   :  { %v2650_v52 = vmul.f32 %v2632_v55, %v9982_v32 }
 0xd2f   :  { %2671 = vrot.lane.b32.xlu2 %v2650_v52, %s8647_s7  ;;  %v2628_v53 = vpop.permute.xlu1 %2627 }
 0xd30   :  { %v2648_v3 = vmul.f32 %v2628_v53, %v9989_v34 }
 0xd32   :  { %2667 = vrot.lane.b32.xlu0 %v2648_v3, %s8647_s7  ;;  %v2612_v3 = vmul.f32 %v9949_v2, %v9830_v39  ;;  %v2608_v39 = vmul.f32 %v9989_v34, %v9805_v41 }
 0xd37   :  { %v2634_v12 = vpop.permute.xlu1 %2633 }
 0xd38   :  { %v2651_v27 = vmul.f32 %v2634_v12, %v9996_v48 }
 0xd3a   :  { %2673 = vrot.lane.b32.xlu0 %v2651_v27, %s8647_s7 }
 0xd81   :  { %v2662_v60 = vpop.permute.xlu2 %2661 }
 0xd82   :  { %v10002_v9 = vadd.f32 %v2662_v60, %v2605_v63 }
 0xd83   :  { %v2666_v20 = vpop.permute.xlu1 %2665 }
 0xd84   :  { %7709 = vtanh.f32 %v10002_v9  ;;  %v10007_v55 = vadd.f32 %v2666_v20, %v2607_v58 }
 0xd86   :  { %7711 = vtanh.f32 %v10007_v55 }
 0xd89   :  { %v2672_v52 = vpop.permute.xlu2 %2671 }
 0xd8a   :  { %v7710_v61 = vpop.eup %7709  ;;  %v10012_v50 = vadd.f32 %v2672_v52, %v2610_v51 }
 0xd8b   :  { %2709 = vrot.lane.b32.xlu1 %v7710_v61, %s8646_s6  ;;  %v2670_v42 = vpop.permute.xlu1 %2669 }
 0xd8c   :  { %7713 = vtanh.f32 %v10012_v50  ;;  %v7712_v37 = vpop.eup %7711  ;;  %v10018_v53 = vadd.f32 %v2670_v42, %v2609_v56 }
 0xd8d   :  { %2713 = vrot.lane.b32.xlu0 %v7712_v37, %s8646_s6 }
 0xd8e   :  { %7715 = vtanh.f32 %v10018_v53 }
 0xd92   :  { %v7714_v23 = vpop.eup %7713 }
 0xd93   :  { %2719 = vrot.lane.b32.xlu1 %v7714_v23, %s8646_s6  ;;  %v2676_v30 = vpop.permute.xlu1 %2675 }
 0xd94   :  { %v7716_v43 = vpop.eup %7715  ;;  %v10025_v33 = vadd.f32 %v2676_v30, %v2612_v3 }
 0xd95   :  { %2717 = vrot.lane.b32.xlu0 %v7716_v43, %s8646_s6 }
 0xd96   :  { %7717 = vtanh.f32 %v10025_v33 }
 0xd9c   :  { %v7718_v36 = vpop.eup %7717  ;;  %v2664_v1 = vpop.permute.xlu0 %2663 }
 0xd9d   :  { %2723 = vrot.lane.b32.xlu0 %v7718_v36, %s8646_s6  ;;  %v10032_v12 = vadd.f32 %v2664_v1, %v2606_v4 }
 0xd9f   :  { %7719 = vtanh.f32 %v10032_v12 }
 0xda4   :  { %v2668_v27 = vpop.permute.xlu0 %2667 }
 0xda5   :  { %v7720_v63 = vpop.eup %7719  ;;  %v10037_v60 = vadd.f32 %v2668_v27, %v2608_v39 }
 0xda6   :  { %2711 = vrot.lane.b32.xlu2 %v7720_v63, %s8646_s6 }
 0xda7   :  { %7721 = vtanh.f32 %v10037_v60 }
 0xdac   :  { %v2674_v58 = vpop.permute.xlu0 %2673 }
 0xdad   :  { %v7722_v20 = vpop.eup %7721  ;;  %v10043_v51 = vadd.f32 %v2674_v58, %v2611_v15 }
 0xdae   :  { %2715 = vrot.lane.b32.xlu2 %v7722_v20, %s8646_s6 }
 0xdaf   :  { %7723 = vtanh.f32 %v10043_v51 }
 0xdb5   :  { %v7724_v41 = vpop.eup %7723 }
 0xdb6   :  { %2721 = vrot.lane.b32.xlu2 %v7724_v41, %s8646_s6 }
 0xdfd   :  { %v2710_v56 = vpop.permute.xlu1 %2709 }
 0xdfe   :  { %v10056_v3 = vmul.f32 %v2710_v56, %v9960_v19 }
 0xdff   :  { %v2714_v52 = vpop.permute.xlu0 %2713 }
 0xe00   :  { %v2712_v61 = vpop.permute.xlu2 %2711  ;;  %v10052_v37 = vmul.f32 %v2714_v52, %v9905_v35 }
 0xe01   :  { %v10049_v42 = vmul.f32 %v2712_v61, %v9974_v31 }
 0xe02   :  { %v2791_v43 = vrot.slane %v10052_v37, 6 }
 0xe03   :  { %v2789_v11 = vrot.slane %v10049_v42, 7 }
 0xe05   :  { %v2790_v31 = vsel %vm753_vm4, %v2789_v11, %v10056_v3  ;;  %v2720_v35 = vpop.permute.xlu1 %2719 }
 0xe06   :  { %v2792_v19 = vsel %vm756_vm5, %v2791_v43, %v2790_v31  ;;  %v10071_v27 = vmul.f32 %v2720_v35, %v9982_v32  ;;  %v2782_v31 = vld [vmem:[#allocation11 + $0xe] sm:$0x1]  ;;  %v2783_v35 = vld [vmem:[#allocation11 + $0x16] sm:$0x1] }
 0xe07   :  { %v2718_v23 = vpop.permute.xlu0 %2717 }
 0xe08   :  { %v2716_v30 = vpop.permute.xlu2 %2715  ;;  %v10060_v36 = vmul.f32 %v2718_v23, %v9925_v21  ;;  %12749 = vst [vmem:[#allocation61_spill] sm:$0xff] %v10071_v27  ;;  %v2797_v41 = vrot.slane %v10071_v27, 3  ;;  %v2781_v23 = vld [vmem:[#allocation11 + $0x6] sm:$0x1] }
 0xe09   :  { %v10063_v4 = vmul.f32 %v2716_v30, %v9989_v34 }
 0xe0a   :  { %12748 = vst [vmem:[#allocation60_spill] sm:$0xff] %v10060_v36  ;;  %v2795_v39 = vrot.slane %v10060_v36, 4 }
 0xe0b   :  { %v2793_v1 = vrot.slane %v10063_v4, 5 }
 0xe0d   :  { %v2794_v63 = vsel %vm759_vm6, %v2793_v1, %v2792_v19 }
 0xe0e   :  { %v2796_v20 = vsel %vm762_vm7, %v2795_v39, %v2794_v63 }
 0xe0f   :  { %v2724_v21 = vpop.permute.xlu0 %2723  ;;  %v2798_v32 = vsel %vm765_vm8, %v2797_v41, %v2796_v20  ;;  %v2786_v20 = vld [vmem:[#allocation11 + $0x2e] sm:$0x1]  ;;  %v2784_v41 = vld [vmem:[#allocation11 + $0x1e] sm:$0x1] }
 0xe10   :  { %v10075_v15 = vmul.f32 %v2724_v21, %v9949_v2  ;;  %v2722_v34 = vpop.permute.xlu2 %2721 }
 0xe11   :  { %v10078_v58 = vmul.f32 %v2722_v34, %v9996_v48 }
 0xe12   :  { %12750 = vst [vmem:[#allocation62_spill] sm:$0xff] %v10075_v15  ;;  %v2801_v52 = vrot.slane %v10075_v15, 1 }
 0xe13   :  { %12751 = vst [vmem:[#allocation63_spill] sm:$0xff] %v10078_v58  ;;  %v2799_v61 = vrot.slane %v10078_v58, 2 }
 0xe15   :  { %v2800_v56 = vsel %vm768_vm9, %v2799_v61, %v2798_v32  ;;  %v2785_v61 = vld [vmem:[#allocation11 + $0x26] sm:$0x1] }
 0xe16   :  { %v2802_v11 = vsel %vm771_vm10, %v2801_v52, %v2800_v56 }
 0xe17   :  { %2803 = vrot.lane.b32.xlu1 %v2802_v11, %s8647_s7 }
 0xe89   :  { %v2804_v2 = vpop.permute.xlu1 %2803 }
 0xe8a   :  { %7220 = vmatmul.msk.f32.vlgmr.msrb.gmra.mxu1 %vm203_vm0, %v2804_v2 }
 0xf07   :  { %v2824_v48 = vpop.f32.mrf.mxu1 }
 0xf08   :  { %v2828_v30 = vrot.slane %v2824_v48, 1  ;;  %v2829_v43 = vrot.slane %v2824_v48, 2  ;;  %v2843_v1 = vadd.f32 %v2824_v48, %v2781_v23  ;;  %v2832_v63 = vrot.slane %v2824_v48, 5 }
 0xf09   :  { %v2830_v21 = vrot.slane %v2824_v48, 3  ;;  %v2831_v34 = vrot.slane %v2824_v48, 4  ;;  %v2833_v23 = vrot.slane %v2824_v48, 6 }
 0xf0a   :  { %v2844_v39 = vadd.f32 %v2828_v30, %v2782_v31  ;;  %v2845_v19 = vadd.f32 %v2829_v43, %v2783_v35  ;;  %7725 = vtanh.f32 %v2843_v1  ;;  %v2848_v52 = vadd.f32 %v2832_v63, %v2786_v20  ;;  %v2787_v43 = vld [vmem:[#allocation11 + $0x36] sm:$0x1]  ;;  %v2788_v31 = vld [vmem:[#allocation11 + $0x3e] sm:$0x1] }
 0xf0b   :  { %v2846_v32 = vadd.f32 %v2830_v21, %v2784_v41  ;;  %v2847_v11 = vadd.f32 %v2831_v34, %v2785_v61  ;;  %v2834_v30 = vrot.slane %v2824_v48, 7  ;;  %v2849_v35 = vadd.f32 %v2833_v23, %v2787_v43 }
 0xf0c   :  { %7727 = vtanh.f32 %v2844_v39 }
 0xf0d   :  { %7729 = vtanh.f32 %v2845_v19  ;;  %v2850_v21 = vadd.f32 %v2834_v30, %v2788_v31  ;;  %v7224_v48 = vmul.f32 -1.442695, %v2846_v32  ;;  %v7227_v23 = vmul.f32 -1.442695, %v2849_v35 }
 0xf0e   :  { %7731 = vtanh.f32 %v2848_v52 }
 0xf0f   :  { %7733 = vtanh.f32 %v2846_v32 }
 0xf10   :  { %v7726_v56 = vpop.eup %7725  ;;  %7735 = vtanh.f32 %v2847_v11 }
 0xf11   :  { %3027 = vrot.lane.b32.xlu1 %v7726_v56, %s8646_s6  ;;  %7737 = vtanh.f32 %v2849_v35 }
 0xf12   :  { %v7728_v2 = vpop.eup %7727  ;;  %7739 = vtanh.f32 %v2850_v21 }
 0xf13   :  { %v7730_v15 = vpop.eup %7729  ;;  %3029 = vrot.lane.b32.xlu2 %v7728_v2, %s8646_s6 }
 0xf14   :  { %3031 = vrot.lane.b32.xlu0 %v7730_v15, %s8646_s6  ;;  %v7732_v63 = vpop.eup %7731  ;;  %v7222_v15 = vmul.f32 -1.442695, %v2844_v39 }
 0xf15   :  { %v7734_v20 = vpop.eup %7733 }
 0xf16   :  { %v7736_v34 = vpop.eup %7735  ;;  %7741 = vpow2.f32 %v7222_v15  ;;  %v7226_v15 = vmul.f32 -1.442695, %v2848_v52 }
 0xf17   :  { %v7738_v41 = vpop.eup %7737  ;;  %7743 = vpow2.f32 %v7224_v48  ;;  %v7225_v48 = vmul.f32 -1.442695, %v2847_v11 }
 0xf18   :  { %v7740_v61 = vpop.eup %7739 }
 0xf19   :  { %3037 = vrot.lane.b32.xlu1 %v7732_v63, %s8646_s6  ;;  %v7221_v63 = vmul.f32 -1.442695, %v2843_v1 }
 0xf1b   :  { %3033 = vrot.lane.b32.xlu2 %v7734_v20, %s8646_s6  ;;  %v7223_v20 = vmul.f32 -1.442695, %v2845_v19 }
 0xf1c   :  { %3035 = vrot.lane.b32.xlu0 %v7736_v34, %s8646_s6  ;;  %v7742_v56 = vpop.eup %7741 }
 0xf1d   :  { %v2876_v2 = vadd.f32 1.0, %v7742_v56  ;;  %v7744_v30 = vpop.eup %7743 }
 0xf1e   :  { %v10097_v43 = vadd.f32 1.0, %v7744_v30 }
 0xf1f   :  { %7745 = vrcp.f32 %v2876_v2  ;;  %v2909_v52 = vand.u32 2147483648, %v2876_v2  ;;  %vm2903_vm12 = vweird.f32 %v2876_v2 }
 0xf20   :  { %7747 = vpow2.f32 %v7227_v23  ;;  %v2939_v26 = vand.u32 2147483648, %v10097_v43  ;;  %vm2933_vm1 = vweird.f32 %v10097_v43 }
 0xf21   :  { %7749 = vrcp.f32 %v10097_v43 }
 0xf22   :  { %7751 = vpow2.f32 %v7221_v63 }
 0xf23   :  { %3039 = vrot.lane.b32.xlu2 %v7738_v41, %s8646_s6  ;;  %7753 = vpow2.f32 %v7223_v20 }
 0xf24   :  { %3041 = vrot.lane.b32.xlu0 %v7740_v61, %s8646_s6 }
 0xf25   :  { %v7746_v31 = vpop.eup %7745 }
 0xf26   :  { %v7748_v34 = vpop.eup %7747  ;;  %v2899_v41 = vmul.f32 %v7746_v31, %v2876_v2  ;;  %vm2904_vm11 = vweird.f32 %v7746_v31 }
 0xf27   :  { %v10100_v39 = vadd.f32 1.0, %v7748_v34  ;;  %v7750_v61 = vpop.eup %7749  ;;  %vm2905_vm13 = vmor %vm2903_vm12, %vm2904_vm11 }
 0xf28   :  { %v2900_v32 = vsub.f32 1.0, %v2899_v41  ;;  %v7752_v35 = vpop.eup %7751  ;;  %v2929_v23 = vmul.f32 %v7750_v61, %v10097_v43  ;;  %v2907_v41 = vand.u32 2147483647, %v2876_v2  ;;  %vm2934_vm15 = vweird.f32 %v7750_v61 }
 0xf29   :  { %7755 = vrcp.f32 %v10100_v39  ;;  %v7754_v1 = vpop.eup %7753  ;;  %v10104_v30 = vadd.f32 1.0, %v7752_v35  ;;  %vm2935_vm2 = vmor %vm2933_vm1, %vm2934_vm15  ;;  %vm2978_vm12 = vweird.f32 %v10100_v39 }
 0xf2a   :  { %v2901_v56 = vmul.f32 %v7746_v31, %v2900_v32  ;;  %7757 = vpow2.f32 %v7226_v15  ;;  %v2930_v63 = vsub.f32 1.0, %v2929_v23  ;;  %v10106_v34 = vadd.f32 1.0, %v7754_v1 }
 0xf2b   :  { %7759 = vpow2.f32 %v7225_v48  ;;  %v7228_v32 = vmul.f32 -1.442695, %v2850_v21  ;;  %vm2908_vm14 = vcmp.eq.f32.partialorder %v2907_v41, 8.507059e+37  ;;  %vm2888_vm1 = vweird.f32 %v10104_v30 }
 0xf2c   :  { %v2902_v19 = vadd.f32 %v7746_v31, %v2901_v56  ;;  %7761 = vrcp.f32 %v10104_v30  ;;  %v2931_v15 = vmul.f32 %v7750_v61, %v2930_v63  ;;  %v2910_v56 = vor.u32 1.1754944e-38, %v2909_v52 }
 0xf2d   :  { %7763 = vrcp.f32 %v10106_v34 }
 0xf2e   :  { %v2906_v58 = vsel %vm2905_vm13, %v7746_v31, %v2902_v19  ;;  %7765 = vpow2.f32 %v7228_v32  ;;  %v2932_v31 = vadd.f32 %v7750_v61, %v2931_v15  ;;  %v2940_v15 = vor.u32 1.1754944e-38, %v2939_v26 }
 0xf2f   :  { %v10108_v20 = vpop.eup %7755  ;;  %v10116_v27 = vsel %vm2908_vm14, %v2910_v56, %v2906_v58  ;;  %v2937_v58 = vand.u32 2147483647, %v10097_v43  ;;  %v2984_v26 = vand.u32 2147483648, %v10100_v39 }
 0xf30   :  { %v7758_v11 = vpop.eup %7757  ;;  %v2974_v35 = vmul.f32 %v10108_v20, %v10100_v39  ;;  %v2936_v41 = vsel %vm2935_vm2, %v7750_v61, %v2932_v31  ;;  %vm2979_vm11 = vweird.f32 %v10108_v20 }
 0xf31   :  { %v7760_v48 = vpop.eup %7759  ;;  %v10114_v23 = vadd.f32 1.0, %v7758_v11  ;;  %vm2938_vm3 = vcmp.eq.f32.partialorder %v2937_v58, 8.507059e+37  ;;  %v2982_v58 = vand.u32 2147483647, %v10100_v39  ;;  %vm2980_vm13 = vmor %vm2978_vm12, %vm2979_vm11  ;;  %vm2918_vm11 = vweird.f32 %v10106_v34 }
 0xf32   :  { %v10118_v2 = vpop.eup %7761  ;;  %v2975_v19 = vsub.f32 1.0, %v2974_v35  ;;  %v10121_v63 = vadd.f32 1.0, %v7760_v48  ;;  %v10136_v48 = vsel %vm2938_vm3, %v2940_v15, %v2936_v41 }
 0xf33   :  { %v10124_v36 = vpop.eup %7763  ;;  %7767 = vrcp.f32 %v10114_v23  ;;  %v2884_v52 = vmul.f32 %v10118_v2, %v10104_v30  ;;  %vm2983_vm14 = vcmp.eq.f32.partialorder %v2982_v58, 8.507059e+37  ;;  %vm2889_vm15 = vweird.f32 %v10118_v2 }
 0xf34   :  { %v2976_v11 = vmul.f32 %v10108_v20, %v2975_v19  ;;  %7769 = vrcp.f32 %v10121_v63  ;;  %v7766_v32 = vpop.eup %7765  ;;  %v2914_v35 = vmul.f32 %v10124_v36, %v10106_v34  ;;  %vm2919_vm2 = vweird.f32 %v10124_v36  ;;  %vm2890_vm3 = vmor %vm2888_vm1, %vm2889_vm15 }
 0xf35   :  { %v2885_v56 = vsub.f32 1.0, %v2884_v52  ;;  %v10143_v31 = vadd.f32 1.0, %v7766_v32  ;;  %v2985_v32 = vor.u32 1.1754944e-38, %v2984_v26  ;;  %vm2920_vm12 = vmor %vm2918_vm11, %vm2919_vm2  ;;  %vm2963_vm1 = vweird.f32 %v10114_v23 }
 0xf36   :  { %v2977_v61 = vadd.f32 %v10108_v20, %v2976_v11  ;;  %v2915_v19 = vsub.f32 1.0, %v2914_v35  ;;  %vm2948_vm11 = vweird.f32 %v10121_v63 }
 0xf37   :  { %v2886_v52 = vmul.f32 %v10118_v2, %v2885_v56  ;;  %7771 = vrcp.f32 %v10143_v31 }
 0xf38   :  { %v2981_v11 = vsel %vm2980_vm13, %v10108_v20, %v2977_v61  ;;  %v2916_v15 = vmul.f32 %v10124_v36, %v2915_v19  ;;  %v2894_v20 = vand.u32 2147483648, %v10104_v30  ;;  %v2892_v61 = vand.u32 2147483647, %v10104_v30 }
 0xf3a   :  { %v2917_v26 = vadd.f32 %v10124_v36, %v2916_v15  ;;  %vm2893_vm13 = vcmp.eq.f32.partialorder %v2892_v61, 8.507059e+37  ;;  %v2969_v61 = vand.u32 2147483648, %v10114_v23 }
 0xf3c   :  { %v2921_v15 = vsel %vm2920_vm12, %v10124_v36, %v2917_v26  ;;  %v2967_v36 = vand.u32 2147483647, %v10114_v23 }
 0xf6d   :  { %v3030_v1 = vpop.permute.xlu2 %3029 }
 0xf6e   :  { %v3052_v21 = vmul.f32 %v3030_v1, %v10116_v27  ;;  %v10138_v1 = vpop.eup %7767 }
 0xf6f   :  { %v10146_v45 = vpop.eup %7769  ;;  %v2959_v41 = vmul.f32 %v10138_v1, %v10114_v23  ;;  %vm2964_vm15 = vweird.f32 %v10138_v1  ;;  %v2952_v23 = vand.u32 2147483647, %v10121_v63 }
 0xf70   :  { %3069 = vrot.lane.b32.xlu1 %v3052_v21, %s8647_s7  ;;  %v2944_v35 = vmul.f32 %v10146_v45, %v10121_v63  ;;  %v10169_v58 = vpop.eup %7771  ;;  %vm2949_vm2 = vweird.f32 %v10146_v45 }
 0xf71   :  { %v2960_v56 = vsub.f32 1.0, %v2959_v41  ;;  %vm2950_vm12 = vmor %vm2948_vm11, %vm2949_vm2  ;;  %vm12698_vm11 = vcmask 253952  }
 0xf72   :  { %v2945_v19 = vsub.f32 1.0, %v2944_v35 }
 0xf73   :  { %v2961_v30 = vmul.f32 %v10138_v1, %v2960_v56 }
 0xf74   :  { %v2946_v35 = vmul.f32 %v10146_v45, %v2945_v19 }
 0xf75   :  { %v3034_v43 = vpop.permute.xlu2 %3033 }
 0xf76   :  { %v3054_v21 = vmul.f32 %v3034_v43, %v10136_v48  ;;  %v10159_v43 = vsel %vm2983_vm14, %v2985_v32, %v2981_v11  ;;  %v2922_v11 = vand.u32 2147483647, %v10106_v34  ;;  %v2895_v32 = vor.u32 1.1754944e-38, %v2894_v20 }
 0xf77   :  { %v2947_v19 = vadd.f32 %v10146_v45, %v2946_v35 }
 0xf78   :  { %3073 = vrot.lane.b32.xlu1 %v3054_v21, %s8647_s7  ;;  %v2887_v21 = vadd.f32 %v10118_v2, %v2886_v52  ;;  %v2924_v52 = vand.u32 2147483648, %v10106_v34  ;;  %vm2923_vm14 = vcmp.eq.f32.partialorder %v2922_v11, 8.507059e+37  ;;  %v2962_v34 = vadd.f32 %v10138_v1, %v2961_v30 }
 0xf79   :  { %v2970_v30 = vor.u32 1.1754944e-38, %v2969_v61 }
 0xf7a   :  { %v2891_v41 = vsel %vm2890_vm3, %v10118_v2, %v2887_v21  ;;  %v2925_v2 = vor.u32 1.1754944e-38, %v2924_v52  ;;  %vm2965_vm3 = vmor %vm2963_vm1, %vm2964_vm15  ;;  %vm2994_vm15 = vweird.f32 %v10169_v58  ;;  %vm2993_vm1 = vweird.f32 %v10143_v31 }
 0xf7b   :  { %v10181_v6 = vsel %vm2893_vm13, %v2895_v32, %v2891_v41  ;;  %v2954_v41 = vand.u32 2147483648, %v10121_v63  ;;  %v2966_v11 = vsel %vm2965_vm3, %v10138_v1, %v2962_v34  ;;  %vm2968_vm13 = vcmp.eq.f32.partialorder %v2967_v36, 8.507059e+37  ;;  %vm2995_vm2 = vmor %vm2993_vm1, %vm2994_vm15 }
 0xf7c   :  { %v10186_v20 = vsel %vm2923_vm14, %v2925_v2, %v2921_v15  ;;  %v2951_v32 = vsel %vm2950_vm12, %v10146_v45, %v2947_v19  ;;  %vm2953_vm14 = vcmp.eq.f32.partialorder %v2952_v23, 8.507059e+37  ;;  %v2999_v45 = vand.u32 2147483648, %v10143_v31 }
 0xf7d   :  { %v3040_v39 = vpop.permute.xlu2 %3039 }
 0xf7e   :  { %v3057_v54 = vmul.f32 %v3040_v39, %v10159_v43  ;;  %v3000_v61 = vor.u32 1.1754944e-38, %v2999_v45 }
 0xf80   :  { %3079 = vrot.lane.b32.xlu1 %v3057_v54, %s8647_s7  ;;  %v2989_v54 = vmul.f32 %v10169_v58, %v10143_v31 }
 0xf82   :  { %v2990_v52 = vsub.f32 1.0, %v2989_v54  ;;  %v10202_v54 = vsel %vm2968_vm13, %v2970_v30, %v2966_v11  ;;  %v3013_v11 = vmul.f32 %v10186_v20, %v10007_v55 }
 0xf83   :  { %v3028_v39 = vpop.permute.xlu1 %3027 }
 0xf84   :  { %v3051_v21 = vmul.f32 %v3028_v39, %v10181_v6  ;;  %v2991_v15 = vmul.f32 %v10169_v58, %v2990_v52  ;;  %v2955_v39 = vor.u32 1.1754944e-38, %v2954_v41  ;;  %v3012_v41 = vmul.f32 %v10116_v27, %v10032_v12 }
 0xf86   :  { %v3032_v56 = vpop.permute.xlu0 %3031  ;;  %3067 = vrot.lane.b32.xlu0 %v3051_v21, %s8647_s7  ;;  %v10205_v21 = vsel %vm2953_vm14, %v2955_v39, %v2951_v32  ;;  %v2992_v63 = vadd.f32 %v10169_v58, %v2991_v15  ;;  %v3014_v32 = vmul.f32 %v10136_v48, %v10037_v60  ;;  %v3017_v60 = vmul.f32 %v10159_v43, %v10043_v51 }
 0xf87   :  { %v3053_v26 = vmul.f32 %v3032_v56, %v10186_v20  ;;  %v2997_v56 = vand.u32 2147483647, %v10143_v31  ;;  %v3015_v15 = vmul.f32 %v10205_v21, %v10018_v53  ;;  %v3011_v51 = vmul.f32 %v10181_v6, %v10002_v9 }
 0xf88   :  { %v2996_v36 = vsel %vm2995_vm2, %v10169_v58, %v2992_v63 }
 0xf89   :  { %3071 = vrot.lane.b32.xlu2 %v3053_v26, %s8647_s7  ;;  %vm2998_vm3 = vcmp.eq.f32.partialorder %v2997_v56, 8.507059e+37 }
 0xf8a   :  { %v10216_v26 = vsel %vm2998_vm3, %v3000_v61, %v2996_v36 }
 0xf8b   :  { %v3038_v35 = vpop.permute.xlu1 %3037  ;;  %v3018_v53 = vmul.f32 %v10216_v26, %v10025_v33 }
 0xf8c   :  { %v3056_v2 = vmul.f32 %v3038_v35, %v10202_v54 }
 0xf8e   :  { %v3036_v1 = vpop.permute.xlu0 %3035  ;;  %3077 = vrot.lane.b32.xlu0 %v3056_v2, %s8647_s7 }
 0xf8f   :  { %v3055_v34 = vmul.f32 %v3036_v1, %v10205_v21 }
 0xf91   :  { %3075 = vrot.lane.b32.xlu2 %v3055_v34, %s8647_s7 }
 0xf96   :  { %v3042_v19 = vpop.permute.xlu0 %3041 }
 0xf97   :  { %v3058_v52 = vmul.f32 %v3042_v19, %v10216_v26 }
 0xf99   :  { %3081 = vrot.lane.b32.xlu2 %v3058_v52, %s8647_s7 }
 0xfe2   :  { %v3070_v23 = vpop.permute.xlu1 %3069 }
 0xfe3   :  { %v3072_v31 = vpop.permute.xlu2 %3071  ;;  %v10224_v30 = vadd.f32 %v3070_v23, %v3012_v41 }
 0xfe4   :  { %v10226_v58 = vadd.f32 %v3072_v31, %v3013_v11  ;;  %v3016_v11 = vmul.f32 %v10202_v54, %v10012_v50 }
 0xfe5   :  { %7773 = vtanh.f32 %v10224_v30 }
 0xfe6   :  { %7775 = vtanh.f32 %v10226_v58 }
 0xfea   :  { %v3074_v12 = vpop.permute.xlu1 %3073 }
 0xfeb   :  { %v7774_v35 = vpop.eup %7773  ;;  %v3076_v39 = vpop.permute.xlu2 %3075  ;;  %v10234_v55 = vadd.f32 %v3074_v12, %v3014_v32 }
 0xfec   :  { %v7776_v2 = vpop.eup %7775  ;;  %v10236_v1 = vadd.f32 %v3076_v39, %v3015_v15  ;;  %3117 = vrot.lane.b32.xlu0 %v7774_v35, %s8646_s6 }
 0xfed   :  { %7777 = vtanh.f32 %v10234_v55  ;;  %3119 = vrot.lane.b32.xlu1 %v7776_v2, %s8646_s6 }
 0xfee   :  { %7779 = vtanh.f32 %v10236_v1 }
 0xff2   :  { %v3080_v34 = vpop.permute.xlu1 %3079 }
 0xff3   :  { %v7778_v63 = vpop.eup %7777  ;;  %v3082_v45 = vpop.permute.xlu2 %3081  ;;  %v10246_v56 = vadd.f32 %v3080_v34, %v3017_v60 }
 0xff4   :  { %v7780_v36 = vpop.eup %7779  ;;  %v10248_v61 = vadd.f32 %v3082_v45, %v3018_v53  ;;  %3121 = vrot.lane.b32.xlu0 %v7778_v63, %s8646_s6 }
 0xff5   :  { %7781 = vtanh.f32 %v10246_v56  ;;  %3123 = vrot.lane.b32.xlu1 %v7780_v36, %s8646_s6 }
 0xff6   :  { %7783 = vtanh.f32 %v10248_v61 }
 0xff8   :  { %v3068_v33 = vpop.permute.xlu0 %3067 }
 0xff9   :  { %v10256_v19 = vadd.f32 %v3068_v33, %v3011_v51 }
 0xffb   :  { %v7782_v52 = vpop.eup %7781  ;;  %7785 = vtanh.f32 %v10256_v19 }
 0xffc   :  { %v7784_v41 = vpop.eup %7783  ;;  %3127 = vrot.lane.b32.xlu0 %v7782_v52, %s8646_s6 }
 0xffd   :  { %3129 = vrot.lane.b32.xlu1 %v7784_v41, %s8646_s6 }
0x1000   :  { %v3078_v23 = vpop.permute.xlu0 %3077 }
0x1001   :  { %v7786_v31 = vpop.eup %7785  ;;  %v10263_v32 = vadd.f32 %v3078_v23, %v3016_v11 }
0x1002   :  { %3115 = vrot.lane.b32.xlu2 %v7786_v31, %s8646_s6 }
0x1003   :  { %7787 = vtanh.f32 %v10263_v32 }
0x1004   :  { %1531 = vrot.lane.b32.xlu0 %v9412_v57, %s8647_s7 }
0x1005   :  { %711 = vrot.lane.b32.xlu1 %v8999_v18, %s8647_s7 }
0x1009   :  { %v7788_v9 = vpop.eup %7787 }
0x100a   :  { %3125 = vrot.lane.b32.xlu2 %v7788_v9, %s8646_s6 }
0x100c   :  { %2749 = vrot.lane.b32.xlu0 %v10056_v3, %s8647_s7 }
0x100d   :  { %1937 = vrot.lane.b32.xlu1 %v9644_v0, %s8647_s7 }
0x1014   :  { %1533 = vrot.lane.b32.xlu0 %v9405_v44, %s8647_s7 }
0x101c   :  { %2751 = vrot.lane.b32.xlu0 %v10049_v42, %s8647_s7 }
0x105c   :  { %v3116_v50 = vpop.permute.xlu2 %3115 }
0x105d   :  { %v3139_v57 = vmul.f32 %v3116_v50, %v10181_v6 }
0x105e   :  { %v3118_v15 = vpop.permute.xlu0 %3117 }
0x105f   :  { %v3120_v18 = vpop.permute.xlu1 %3119  ;;  %v10282_v12 = vmul.f32 %v3118_v15, %v10116_v27  ;;  %3155 = vrot.lane.b32.xlu1 %v3139_v57, %s8647_s7 }
0x1060   :  { %v10286_v3 = vmul.f32 %v3120_v18, %v10186_v20 }
0x1061   :  { %v3195_v0 = vrot.slane %v10282_v12, 7 }
0x1062   :  { %v3197_v44 = vrot.slane %v10286_v3, 6 }
0x1063   :  { %v3196_v6 = vsel %vm753_vm4, %v3195_v0, %v3139_v57 }
0x1064   :  { %v3126_v27 = vpop.permute.xlu2 %3125  ;;  %v3198_v53 = vsel %vm756_vm5, %v3197_v44, %v3196_v6  ;;  %v3188_v6 = vld [vmem:[#allocation11 + $0xf] sm:$0x1] }
0x1065   :  { %v10303_v34 = vmul.f32 %v3126_v27, %v10202_v54  ;;  %v3189_v27 = vld [vmem:[#allocation11 + $0x17] sm:$0x1] }
0x1066   :  { %v3122_v35 = vpop.permute.xlu0 %3121 }
0x1067   :  { %v3124_v39 = vpop.permute.xlu1 %3123  ;;  %v10291_v42 = vmul.f32 %v3122_v35, %v10136_v48  ;;  %713 = vrot.lane.b32.xlu1 %v8989_v7, %s8647_s7  ;;  %v3203_v7 = vrot.slane %v10303_v34, 3  ;;  %v3187_v35 = vld [vmem:[#allocation11 + $0x7] sm:$0x1] }
0x1068   :  { %v10295_v2 = vmul.f32 %v3124_v39, %v10205_v21 }
0x1069   :  { %v3199_v20 = vrot.slane %v10291_v42, 5 }
0x106a   :  { %v3201_v60 = vrot.slane %v10295_v2, 4 }
0x106b   :  { %v3200_v48 = vsel %vm759_vm6, %v3199_v20, %v3198_v53 }
0x106c   :  { %v3202_v36 = vsel %vm762_vm7, %v3201_v60, %v3200_v48 }
0x106d   :  { %v3204_v52 = vsel %vm765_vm8, %v3203_v7, %v3202_v36 }
0x106e   :  { %v3128_v63 = vpop.permute.xlu0 %3127 }
0x106f   :  { %v3130_v45 = vpop.permute.xlu1 %3129  ;;  %v10307_v21 = vmul.f32 %v3128_v63, %v10159_v43  ;;  %1939 = vrot.lane.b32.xlu1 %v9637_v47, %s8647_s7 }
0x1070   :  { %v10312_v51 = vmul.f32 %v3130_v45, %v10216_v26 }
0x1071   :  { %v3205_v54 = vrot.slane %v10307_v21, 2 }
0x1072   :  { %v3207_v33 = vrot.slane %v10312_v51, 1 }
0x1073   :  { %v3206_v41 = vsel %vm768_vm9, %v3205_v54, %v3204_v52  ;;  %v3190_v54 = vld [vmem:[#allocation11 + $0x1f] sm:$0x1]  ;;  %v3192_v52 = vld [vmem:[#allocation11 + $0x2f] sm:$0x1] }
0x1074   :  { %v3208_v43 = vsel %vm771_vm10, %v3207_v33, %v3206_v41 }
0x1075   :  { %3209 = vrot.lane.b32.xlu2 %v3208_v43, %s8647_s7 }
0x1076   :  { %v1532_v11 = vpop.permute.xlu0 %1531 }
0x1077   :  { %v712_v23 = vpop.permute.xlu1 %711  ;;  %1555 = vst.msk [vmem:[#allocation18 + $0x2] sm:$0x1] %vm12698_vm11, %v1532_v11  ;;  %v3191_v11 = vld [vmem:[#allocation11 + $0x27] sm:$0x1] }
0x1078   :  { %736 = vst.msk [vmem:[#allocation18] sm:$0x1] %vm12698_vm11, %v712_v23 }
0x107d   :  { %1125 = vrot.lane.b32.xlu2 %v9199_v40, %s8647_s7 }
0x107e   :  { %v2750_v47 = vpop.permute.xlu0 %2749 }
0x107f   :  { %v1938_v26 = vpop.permute.xlu1 %1937  ;;  %2773 = vst.msk [vmem:[#allocation18 + $0x5] sm:$0x1] %vm12698_vm11, %v2750_v47 }
0x1080   :  { %1961 = vst.msk [vmem:[#allocation18 + $0x3] sm:$0x1] %vm12698_vm11, %v1938_v26 }
0x1085   :  { %2343 = vrot.lane.b32.xlu2 %v9843_v5, %s8647_s7 }
0x1086   :  { %v1534_v31 = vpop.permute.xlu0 %1533 }
0x1087   :  { %1556 = vst.msk [vmem:[#allocation18 + $0xa] sm:$0x1] %vm12698_vm11, %v1534_v31 }
0x108d   :  { %1127 = vrot.lane.b32.xlu2 %v9192_v8, %s8647_s7 }
0x108e   :  { %v2752_v9 = vpop.permute.xlu0 %2751 }
0x108f   :  { %2774 = vst.msk [vmem:[#allocation18 + $0xd] sm:$0x1] %vm12698_vm11, %v2752_v9 }
0x1095   :  { %2345 = vrot.lane.b32.xlu2 %v9836_v29, %s8647_s7 }
0x109d   :  { %1129 = vrot.lane.b32.xlu2 %v9195_v38, %s8647_s7 }
0x10cf   :  { %v3210_v40 = vpop.permute.xlu2 %3209 }
0x10d0   :  { %7229 = vmatmul.msk.f32.vlgmr.msrb.gmra.mxu2 %vm203_vm0, %v3210_v40  ;;  %v3193_v40 = vld [vmem:[#allocation11 + $0x37] sm:$0x1] }
0x10d1   :  { %v3156_v50 = vpop.permute.xlu1 %3155 }
0x10d2   :  { %3179 = vst.msk [vmem:[#allocation18 + $0x6] sm:$0x1] %vm12698_vm11, %v3156_v50 }
0x10d7   :  { %v1126_v5 = vpop.permute.xlu2 %1125 }
0x10d8   :  { %1149 = vst.msk [vmem:[#allocation18 + $0x1] sm:$0x1] %vm12698_vm11, %v1126_v5 }
0x10d9   :  { %v714_v57 = vpop.permute.xlu1 %713 }
0x10da   :  { %737 = vst.msk [vmem:[#allocation18 + $0x8] sm:$0x1] %vm12698_vm11, %v714_v57 }
0x10df   :  { %v2344_v8 = vpop.permute.xlu2 %2343 }
0x10e0   :  { %2367 = vst.msk [vmem:[#allocation18 + $0x4] sm:$0x1] %vm12698_vm11, %v2344_v8 }
0x10e1   :  { %v1940_v15 = vpop.permute.xlu1 %1939 }
0x10e2   :  { %1962 = vst.msk [vmem:[#allocation18 + $0xb] sm:$0x1] %vm12698_vm11, %v1940_v15 }
0x10e7   :  { %v1128_v29 = vpop.permute.xlu2 %1127 }
0x10e8   :  { %1150 = vst.msk [vmem:[#allocation18 + $0x9] sm:$0x1] %vm12698_vm11, %v1128_v29 }
0x10ef   :  { %v2346_v38 = vpop.permute.xlu2 %2345 }
0x10f0   :  { %2368 = vst.msk [vmem:[#allocation18 + $0xc] sm:$0x1] %vm12698_vm11, %v2346_v38 }
0x10f7   :  { %v1130_v18 = vpop.permute.xlu2 %1129 }
0x10f8   :  { %1151 = vst.msk [vmem:[#allocation18 + $0x11] sm:$0x1] %vm12698_vm11, %v1130_v18 }
0x1153   :  { %v3230_v0 = vpop.f32.mrf.mxu2 }
0x1154   :  { %v3234_v44 = vrot.slane %v3230_v0, 1  ;;  %v3235_v39 = vrot.slane %v3230_v0, 2  ;;  %v3249_v20 = vadd.f32 %v3230_v0, %v3187_v35  ;;  %v3236_v36 = vrot.slane %v3230_v0, 3 }
0x1155   :  { %v3238_v7 = vrot.slane %v3230_v0, 5  ;;  %v3237_v43 = vrot.slane %v3230_v0, 4  ;;  %v3240_v31 = vrot.slane %v3230_v0, 7  ;;  %v3239_v9 = vrot.slane %v3230_v0, 6 }
0x1156   :  { %v3250_v60 = vadd.f32 %v3234_v44, %v3188_v6  ;;  %v3251_v53 = vadd.f32 %v3235_v39, %v3189_v27  ;;  %7789 = vtanh.f32 %v3249_v20  ;;  %v3252_v33 = vadd.f32 %v3236_v36, %v3190_v54 }
0x1157   :  { %v3254_v41 = vadd.f32 %v3238_v7, %v3192_v52  ;;  %v10356_v23 = vadd.f32 %v3237_v43, %v3191_v11  ;;  %v10369_v50 = vadd.f32 %v3239_v9, %v3193_v40  ;;  %v7230_v15 = vmul.f32 -1.442695, %v3249_v20 }
0x1158   :  { %7791 = vtanh.f32 %v3250_v60  ;;  %v7231_v38 = vmul.f32 -1.442695, %v3250_v60  ;;  %v7233_v60 = vmul.f32 -1.442695, %v3252_v33 }
0x1159   :  { %7793 = vtanh.f32 %v3251_v53  ;;  %v7235_v18 = vmul.f32 -1.442695, %v3254_v41 }
0x115a   :  { %7795 = vtanh.f32 %v3252_v33 }
0x115b   :  { %7797 = vtanh.f32 %v3254_v41 }
0x115c   :  { %v7790_v48 = vpop.eup %7789  ;;  %7799 = vtanh.f32 %v10356_v23 }
0x115d   :  { %3433 = vrot.lane.b32.xlu0 %v7790_v48, %s8646_s6 }
0x115e   :  { %v7792_v63 = vpop.eup %7791 }
0x115f   :  { %v7794_v45 = vpop.eup %7793  ;;  %3435 = vrot.lane.b32.xlu1 %v7792_v63, %s8646_s6 }
0x1160   :  { %3437 = vrot.lane.b32.xlu2 %v7794_v45, %s8646_s6  ;;  %v7796_v47 = vpop.eup %7795 }
0x1161   :  { %v7798_v26 = vpop.eup %7797 }
0x1165   :  { %1535 = vrot.lane.b32.xlu0 %v9408_v13, %s8647_s7  ;;  %v3194_v13 = vld [vmem:[#allocation11 + $0x3f] sm:$0x1] }
0x1167   :  { %3157 = vrot.lane.b32.xlu1 %v10282_v12, %s8647_s7  ;;  %v10363_v12 = vadd.f32 %v3240_v31, %v3194_v13 }
0x1168   :  { %2347 = vrot.lane.b32.xlu2 %v9839_v59, %s8647_s7  ;;  %v7800_v59 = vpop.eup %7799 }
0x1169   :  { %7801 = vtanh.f32 %v10363_v12 }
0x116a   :  { %7803 = vtanh.f32 %v10369_v50 }
0x116d   :  { %3439 = vrot.lane.b32.xlu0 %v7796_v47, %s8646_s6  ;;  %v7234_v47 = vmul.f32 -1.442695, %v10356_v23 }
0x116f   :  { %715 = vrot.lane.b32.xlu1 %v8996_v17, %s8647_s7  ;;  %v7802_v17 = vpop.eup %7801 }
0x1170   :  { %3443 = vrot.lane.b32.xlu2 %v7798_v26, %s8646_s6  ;;  %v7804_v5 = vpop.eup %7803 }
0x1175   :  { %2753 = vrot.lane.b32.xlu0 %v10052_v37, %s8647_s7  ;;  %v7232_v37 = vmul.f32 -1.442695, %v3251_v53 }
0x1177   :  { %3441 = vrot.lane.b32.xlu1 %v7800_v59, %s8646_s6  ;;  %7805 = vpow2.f32 %v7232_v37  ;;  %v7237_v37 = vmul.f32 -1.442695, %v10363_v12  ;;  %v7236_v12 = vmul.f32 -1.442695, %v10369_v50 }
0x117d   :  { %3447 = vrot.lane.b32.xlu0 %v7802_v17, %s8646_s6  ;;  %v7806_v57 = vpop.eup %7805 }
0x117e   :  { %v3283_v8 = vadd.f32 1.0, %v7806_v57 }
0x117f   :  { %1941 = vrot.lane.b32.xlu1 %v9640_v46, %s8647_s7 }
0x1180   :  { %7807 = vrcp.f32 %v3283_v8  ;;  %v3330_v20 = vand.u32 2147483648, %v3283_v8  ;;  %vm3324_vm13 = vweird.f32 %v3283_v8  ;;  %v3328_v45 = vand.u32 2147483647, %v3283_v8 }
0x1181   :  { %7809 = vpow2.f32 %v7230_v15 }
0x1182   :  { %7811 = vpow2.f32 %v7231_v38  ;;  %v3331_v7 = vor.u32 1.1754944e-38, %v3330_v20  ;;  %vm3329_vm15 = vcmp.eq.f32.partialorder %v3328_v45, 8.507059e+37 }
0x1183   :  { %7813 = vpow2.f32 %v7235_v18 }
0x1186   :  { %v7808_v29 = vpop.eup %7807 }
0x1187   :  { %3445 = vrot.lane.b32.xlu1 %v7804_v5, %s8646_s6  ;;  %v3320_v0 = vmul.f32 %v7808_v29, %v3283_v8  ;;  %v7810_v46 = vpop.eup %7809  ;;  %vm3325_vm12 = vweird.f32 %v7808_v29 }
0x1188   :  { %v7812_v44 = vpop.eup %7811  ;;  %v10376_v27 = vadd.f32 1.0, %v7810_v46  ;;  %vm3326_vm14 = vmor %vm3324_vm13, %vm3325_vm12 }
0x1189   :  { %v3321_v35 = vsub.f32 1.0, %v3320_v0  ;;  %v7814_v39 = vpop.eup %7813  ;;  %v10378_v53 = vadd.f32 1.0, %v7812_v44 }
0x118a   :  { %v10380_v48 = vadd.f32 1.0, %v7814_v39  ;;  %7815 = vrcp.f32 %v10376_v27  ;;  %vm3294_vm2 = vweird.f32 %v10376_v27  ;;  %v3298_v44 = vand.u32 2147483647, %v10376_v27 }
0x118b   :  { %v3322_v6 = vmul.f32 %v7808_v29, %v3321_v35  ;;  %7817 = vrcp.f32 %v10378_v53  ;;  %v3315_v39 = vand.u32 2147483648, %v10378_v53 }
0x118c   :  { %7819 = vrcp.f32 %v10380_v48  ;;  %v3375_v50 = vand.u32 2147483648, %v10380_v48 }
0x118d   :  { %v3323_v63 = vadd.f32 %v7808_v29, %v3322_v6  ;;  %7821 = vpow2.f32 %v7233_v60  ;;  %v3373_v60 = vand.u32 2147483647, %v10380_v48 }
0x118e   :  { %7823 = vpow2.f32 %v7234_v47 }
0x118f   :  { %v3327_v36 = vsel %vm3326_vm14, %v7808_v29, %v3323_v63  ;;  %vm3309_vm14 = vweird.f32 %v10378_v53  ;;  %v3313_v63 = vand.u32 2147483647, %v10378_v53 }
0x1190   :  { %v10385_v54 = vpop.eup %7815  ;;  %v10387_v52 = vsel %vm3329_vm15, %v3331_v7, %v3327_v36  ;;  %vm3369_vm15 = vweird.f32 %v10380_v48 }
0x1191   :  { %v10389_v43 = vpop.eup %7817  ;;  %v3290_v26 = vmul.f32 %v10385_v54, %v10376_v27  ;;  %vm3295_vm1 = vweird.f32 %v10385_v54 }
0x1192   :  { %v10392_v11 = vpop.eup %7819  ;;  %v3305_v13 = vmul.f32 %v10389_v43, %v10378_v53  ;;  %vm3310_vm3 = vweird.f32 %v10389_v43  ;;  %vm10428_vm13 = vmor %vm3294_vm2, %vm3295_vm1 }
0x1193   :  { %v7822_v31 = vpop.eup %7821  ;;  %v3365_v59 = vmul.f32 %v10392_v11, %v10380_v48  ;;  %v3291_v9 = vsub.f32 1.0, %v3290_v26  ;;  %vm3370_vm12 = vweird.f32 %v10392_v11  ;;  %vm10443_vm1 = vmor %vm3309_vm14, %vm3310_vm3  ;;  %vm3299_vm3 = vcmp.eq.f32.partialorder %v3298_v44, 8.507059e+37 }
0x1194   :  { %v10402_v40 = vadd.f32 1.0, %v7822_v31  ;;  %v3306_v5 = vsub.f32 1.0, %v3305_v13  ;;  %v7824_v8 = vpop.eup %7823  ;;  %vm10448_vm2 = vmor %vm3369_vm15, %vm3370_vm12  ;;  %vm3314_vm12 = vcmp.eq.f32.partialorder %v3313_v63, 8.507059e+37 }
0x1195   :  { %v3366_v23 = vsub.f32 1.0, %v3365_v59  ;;  %v3292_v57 = vmul.f32 %v10385_v54, %v3291_v9  ;;  %v10414_v18 = vadd.f32 1.0, %v7824_v8 }
0x1196   :  { %7825 = vrcp.f32 %v10402_v40  ;;  %v3307_v15 = vmul.f32 %v10389_v43, %v3306_v5  ;;  %vm3339_vm15 = vweird.f32 %v10402_v40  ;;  %v3343_v44 = vand.u32 2147483647, %v10402_v40 }
0x1197   :  { %v3367_v29 = vmul.f32 %v10392_v11, %v3366_v23  ;;  %7827 = vpow2.f32 %v7237_v37  ;;  %v3293_v38 = vadd.f32 %v10385_v54, %v3292_v57  ;;  %v3358_v45 = vand.u32 2147483647, %v10414_v18 }
0x1198   :  { %v3308_v0 = vadd.f32 %v10389_v43, %v3307_v15  ;;  %7829 = vrcp.f32 %v10414_v18 }
0x1199   :  { %v3368_v46 = vadd.f32 %v10392_v11, %v3367_v29  ;;  %7831 = vpow2.f32 %v7236_v12 }
0x119b   :  { %v3372_v7 = vsel %vm10448_vm2, %v10392_v11, %v3368_v46  ;;  %v3345_v46 = vand.u32 2147483648, %v10402_v40  ;;  %vm3344_vm2 = vcmp.eq.f32.partialorder %v3343_v44, 8.507059e+37 }
0x119c   :  { %v10421_v35 = vpop.eup %7825 }
0x119d   :  { %v7828_v20 = vpop.eup %7827  ;;  %v3335_v36 = vmul.f32 %v10421_v35, %v10402_v40  ;;  %vm3340_vm14 = vweird.f32 %v10421_v35  ;;  %v3346_v6 = vor.u32 1.1754944e-38, %v3345_v46 }
0x119e   :  { %v10462_v31 = vadd.f32 1.0, %v7828_v20  ;;  %v7830_v5 = vpop.eup %7829 }
0x119f   :  { %v7832_v37 = vpop.eup %7831  ;;  %v3350_v8 = vmul.f32 %v7830_v5, %v10414_v18 }
0x11a0   :  { %7833 = vrcp.f32 %v10462_v31 }
0x11a6   :  { %v7834_v12 = vpop.eup %7833 }
0x11ba   :  { %v3438_v41 = vpop.permute.xlu2 %3437 }
0x11bb   :  { %v3459_v33 = vmul.f32 %v3438_v41, %v10387_v52  ;;  %v3376_v41 = vor.u32 1.1754944e-38, %v3375_v50 }
0x11bd   :  { %3477 = vrot.lane.b32.xlu1 %v3459_v33, %s8647_s7 }
0x11c2   :  { %v2348_v17 = vpop.permute.xlu2 %2347 }
0x11c3   :  { %2369 = vst.msk [vmem:[#allocation18 + $0x14] sm:$0x1] %vm12698_vm11, %v2348_v17  ;;  %v3336_v17 = vsub.f32 1.0, %v3335_v36 }
0x11c5   :  { %3159 = vrot.lane.b32.xlu1 %v10286_v3, %s8647_s7  ;;  %v3300_v3 = vand.u32 2147483648, %v10376_v27  ;;  %v3297_v27 = vsel %vm10428_vm13, %v10385_v54, %v3293_v38  ;;  %v3316_v54 = vor.u32 1.1754944e-38, %v3315_v39  ;;  %vm3374_vm13 = vcmp.eq.f32.partialorder %v3373_v60, 8.507059e+37 }
0x11c6   :  { %v10467_v9 = vsel %vm3374_vm13, %v3376_v41, %v3372_v7  ;;  %v3337_v57 = vmul.f32 %v10421_v35, %v3336_v17  ;;  %v10478_v38 = vadd.f32 1.0, %v7832_v37  ;;  %v3395_v39 = vmul.f32 %v7834_v12, %v10462_v31 }
0x11c7   :  { %v3301_v48 = vor.u32 1.1754944e-38, %v3300_v3 }
0x11c8   :  { %v3338_v3 = vadd.f32 %v10421_v35, %v3337_v57  ;;  %7835 = vrcp.f32 %v10478_v38  ;;  %v3396_v60 = vsub.f32 1.0, %v3395_v39 }
0x11c9   :  { %v10460_v47 = vsel %vm3299_vm3, %v3301_v48, %v3297_v27  ;;  %vm3355_vm3 = vweird.f32 %v7830_v5 }
0x11ca   :  { %v3444_v33 = vpop.permute.xlu2 %3443  ;;  %v3397_v53 = vmul.f32 %v7834_v12, %v3396_v60 }
0x11cb   :  { %v3462_v23 = vmul.f32 %v3444_v33, %v10467_v9 }
0x11cc   :  { %v3398_v41 = vadd.f32 %v7834_v12, %v3397_v53 }
0x11cd   :  { %1131 = vrot.lane.b32.xlu1 %v9206_v49, %s8647_s7  ;;  %v3312_v49 = vsel %vm10443_vm1, %v10389_v43, %v3308_v0  ;;  %v3351_v0 = vsub.f32 1.0, %v3350_v8  ;;  %vm3341_vm1 = vmor %vm3339_vm15, %vm3340_vm14  ;;  %vm3359_vm14 = vcmp.eq.f32.partialorder %v3358_v45, 8.507059e+37  ;;  %vm3400_vm15 = vweird.f32 %v7834_v12 }
0x11ce   :  { %v10465_v59 = vsel %vm3314_vm12, %v3316_v54, %v3312_v49  ;;  %v3342_v50 = vsel %vm3341_vm1, %v10421_v35, %v3338_v3  ;;  %v7836_v27 = vpop.eup %7835  ;;  %v3360_v35 = vand.u32 2147483648, %v10414_v18  ;;  %vm3354_vm12 = vweird.f32 %v10414_v18 }
0x11cf   :  { %v3434_v26 = vpop.permute.xlu0 %3433  ;;  %v10495_v20 = vsel %vm3344_vm2, %v3346_v6, %v3342_v50  ;;  %vm3356_vm13 = vmor %vm3354_vm12, %vm3355_vm3  ;;  %v3380_v49 = vmul.f32 %v7836_v27, %v10478_v38  ;;  %vm3399_vm1 = vweird.f32 %v10462_v31  ;;  %vm3385_vm12 = vweird.f32 %v7836_v27 }
0x11d0   :  { %v3457_v43 = vmul.f32 %v3434_v26, %v10460_v47  ;;  %v3361_v36 = vor.u32 1.1754944e-38, %v3360_v35  ;;  %v3405_v26 = vand.u32 2147483648, %v10462_v31  ;;  %vm3401_vm2 = vmor %vm3399_vm1, %vm3400_vm15 }
0x11d1   :  { %v3436_v13 = vpop.permute.xlu1 %3435  ;;  %v3381_v18 = vsub.f32 1.0, %v3380_v49 }
0x11d2   :  { %v3458_v11 = vmul.f32 %v3436_v13, %v10465_v59  ;;  %3473 = vrot.lane.b32.xlu0 %v3457_v43, %s8647_s7  ;;  %v3403_v43 = vand.u32 2147483647, %v10462_v31  ;;  %v3402_v13 = vsel %vm3401_vm2, %v7834_v12, %v3398_v41  ;;  %v3390_v31 = vand.u32 2147483648, %v10478_v38  ;;  %v12760_v41 = vld [vmem:[#allocation57_spill] sm:$0xff] }
0x11d3   :  { %v3382_v17 = vmul.f32 %v7836_v27, %v3381_v18 }
0x11d4   :  { %3475 = vrot.lane.b32.xlu2 %v3458_v11, %s8647_s7  ;;  %v3406_v11 = vor.u32 1.1754944e-38, %v3405_v26  ;;  %vm3404_vm3 = vcmp.eq.f32.partialorder %v3403_v43, 8.507059e+37 }
0x11d5   :  { %3483 = vrot.lane.b32.xlu1 %v3462_v23, %s8647_s7  ;;  %v3383_v8 = vadd.f32 %v7836_v27, %v3382_v17 }
0x11d7   :  { %v1536_v15 = vpop.permute.xlu0 %1535 }
0x11d8   :  { %1557 = vst.msk [vmem:[#allocation18 + $0x12] sm:$0x1] %vm12698_vm11, %v1536_v15 }
0x11d9   :  { %v3158_v29 = vpop.permute.xlu1 %3157 }
0x11da   :  { %3180 = vst.msk [vmem:[#allocation18 + $0xe] sm:$0x1] %vm12698_vm11, %v3158_v29  ;;  %717 = vrot.lane.b32.xlu0 %v8993_v16, %s8647_s7  ;;  %v3352_v16 = vmul.f32 %v7830_v5, %v3351_v0  ;;  %v3391_v29 = vor.u32 1.1754944e-38, %v3390_v31 }
0x11dc   :  { %1537 = vrot.lane.b32.xlu2 %v9419_v14, %s8647_s7 }
0x11dd   :  { %2349 = vrot.lane.b32.xlu1 %v9850_v22, %s8647_s7  ;;  %v3353_v22 = vadd.f32 %v7830_v5, %v3352_v16 }
0x11df   :  { %v3440_v63 = vpop.permute.xlu0 %3439  ;;  %v3357_v48 = vsel %vm3356_vm13, %v7830_v5, %v3353_v22  ;;  %v10516_v5 = vsel %vm3404_vm3, %v3406_v11, %v3402_v13  ;;  %vm3384_vm13 = vweird.f32 %v10478_v38  ;;  %v12762_v13 = vld [vmem:[#allocation44_spill] sm:$0xff]  ;;  %v3422_v11 = vmul.f32 %v10467_v9, %v10263_v32 }
0x11e0   :  { %v3460_v40 = vmul.f32 %v3440_v63, %v10495_v20  ;;  %v10507_v54 = vsel %vm3359_vm14, %v3361_v36, %v3357_v48  ;;  %vm3386_vm14 = vmor %vm3384_vm13, %vm3385_vm12 }
0x11e1   :  { %v716_v14 = vpop.permute.xlu1 %715  ;;  %v3387_v15 = vsel %vm3386_vm14, %v7836_v27, %v3383_v8 }
0x11e2   :  { %738 = vst.msk [vmem:[#allocation18 + $0x10] sm:$0x1] %vm12698_vm11, %v716_v14  ;;  %1943 = vrot.lane.b32.xlu0 %v9651_v10, %s8647_s7  ;;  %v3417_v14 = vmul.f32 %v10460_v47, %v10256_v19 }
0x11e4   :  { %3479 = vrot.lane.b32.xlu2 %v3460_v40, %s8647_s7 }
0x11e7   :  { %v2754_v7 = vpop.permute.xlu0 %2753 }
0x11e8   :  { %2775 = vst.msk [vmem:[#allocation18 + $0x15] sm:$0x1] %vm12698_vm11, %v2754_v7 }
0x11e9   :  { %v3442_v10 = vpop.permute.xlu1 %3441 }
0x11ea   :  { %v3461_v33 = vmul.f32 %v3442_v10, %v10507_v54 }
0x11ec   :  { %3481 = vrot.lane.b32.xlu0 %v3461_v33, %s8647_s7  ;;  %2755 = vrot.lane.b32.xlu2 %v10063_v4, %s8647_s7  ;;  %v3388_v4 = vand.u32 2147483647, %v10478_v38  ;;  %v12761_v33 = vld [vmem:[#allocation60_spill] sm:$0xff] }
0x11ee   :  { %vm3389_vm15 = vcmp.eq.f32.partialorder %v3388_v4, 8.507059e+37  ;;  %v12763_v4 = vld [vmem:[#allocation50_spill] sm:$0xff] }
0x11ef   :  { %v3448_v23 = vpop.permute.xlu0 %3447  ;;  %v10528_v12 = vsel %vm3389_vm15, %v3391_v29, %v3387_v15  ;;  %v12764_v29 = vld [vmem:[#allocation54_spill] sm:$0xff] }
0x11f0   :  { %v3464_v37 = vmul.f32 %v3448_v23, %v10516_v5  ;;  %v3423_v17 = vmul.f32 %v10528_v12, %v10246_v56  ;;  %v3421_v23 = vmul.f32 %v10507_v54, %v10236_v1  ;;  %v3424_v1 = vmul.f32 %v10516_v5, %v10248_v61 }
0x11f1   :  { %v1942_v57 = vpop.permute.xlu1 %1941 }
0x11f2   :  { %1963 = vst.msk [vmem:[#allocation18 + $0x13] sm:$0x1] %vm12698_vm11, %v1942_v57  ;;  %3487 = vrot.lane.b32.xlu1 %v3464_v37, %s8647_s7 }
0x11f4   :  { %3161 = vrot.lane.b32.xlu0 %v10291_v42, %s8647_s7  ;;  %719 = vrot.lane.b32.xlu2 %v9006_v25, %s8647_s7  ;;  %v12758_v25 = vld [vmem:[#allocation53_spill] sm:$0xff]  ;;  %v3418_v42 = vmul.f32 %v10465_v59, %v10224_v30  ;;  %v3419_v30 = vmul.f32 %v10387_v52, %v10226_v58  ;;  %v12759_v58 = vld [vmem:[#allocation47_spill] sm:$0xff] }
0x11f9   :  { %v3446_v3 = vpop.permute.xlu1 %3445 }
0x11fa   :  { %v3463_v0 = vmul.f32 %v3446_v3, %v10528_v12  ;;  %1539 = vrot.lane.b32.xlu1 %v9416_v62, %s8647_s7 }
0x11fc   :  { %1133 = vrot.lane.b32.xlu0 %v9203_v24, %s8647_s7  ;;  %3485 = vrot.lane.b32.xlu2 %v3463_v0, %s8647_s7  ;;  %v3420_v24 = vmul.f32 %v10495_v20, %v10234_v55 }
0x1204   :  { %2351 = vrot.lane.b32.xlu0 %v9847_v28, %s8647_s7  ;;  %1945 = vrot.lane.b32.xlu2 %v12758_v25, %s8647_s7 }
0x122e   :  { %v3476_v38 = vpop.permute.xlu2 %3475 }
0x122f   :  { %v3478_v46 = vpop.permute.xlu1 %3477  ;;  %v3498_v44 = vadd.f32 %v3476_v38, %v3418_v42 }
0x1230   :  { %v3499_v63 = vadd.f32 %v3478_v46, %v3419_v30 }
0x1231   :  { %7837 = vtanh.f32 %v3498_v44  ;;  %v3619_v40 = vrot.slane %v3498_v44, 7 }
0x1232   :  { %v3621_v35 = vrot.slane %v3499_v63, 6 }
0x1236   :  { %v1538_v39 = vpop.permute.xlu2 %1537 }
0x1237   :  { %v7838_v62 = vpop.eup %7837  ;;  %v3160_v50 = vpop.permute.xlu1 %3159  ;;  %1558 = vst.msk [vmem:[#allocation18 + $0x1a] sm:$0x1] %vm12698_vm11, %v1538_v39 }
0x1238   :  { %3181 = vst.msk [vmem:[#allocation18 + $0x16] sm:$0x1] %vm12698_vm11, %v3160_v50  ;;  %3523 = vrot.lane.b32.xlu2 %v7838_v62, %s8646_s6  ;;  %v12765_v62 = vld [vmem:[#allocation61_spill] sm:$0xff] }
0x123e   :  { %v3480_v28 = vpop.permute.xlu2 %3479 }
0x123f   :  { %v1132_v16 = vpop.permute.xlu1 %1131  ;;  %v3500_v6 = vadd.f32 %v3480_v28, %v3420_v24 }
0x1240   :  { %1152 = vst.msk [vmem:[#allocation18 + $0x19] sm:$0x1] %vm12698_vm11, %v1132_v16  ;;  %3163 = vrot.lane.b32.xlu2 %v10295_v2, %s8647_s7  ;;  %v12766_v16 = vld [vmem:[#allocation46_spill] sm:$0xff] }
0x1241   :  { %7839 = vtanh.f32 %v3500_v6  ;;  %v3623_v53 = vrot.slane %v3500_v6, 5  ;;  %v12767_v6 = vld [vmem:[#allocation49_spill] sm:$0xff] }
0x1244   :  { %v3474_v60 = vpop.permute.xlu0 %3473 }
0x1245   :  { %v3497_v22 = vadd.f32 %v3474_v60, %v3417_v14 }
0x1246   :  { %v2756_v55 = vpop.permute.xlu2 %2755 }
0x1247   :  { %v7840_v27 = vpop.eup %7839  ;;  %v3484_v45 = vpop.permute.xlu1 %3483  ;;  %2776 = vst.msk [vmem:[#allocation18 + $0x1d] sm:$0x1] %vm12698_vm11, %v2756_v55  ;;  %7841 = vtanh.f32 %v3497_v22  ;;  %v3620_v2 = vsel %vm753_vm4, %v3619_v40, %v3497_v22  ;;  %v12769_v40 = vld [vmem:[#allocation56_spill] sm:$0xff] }
0x1248   :  { %1135 = vrot.lane.b32.xlu2 %v12759_v58, %s8647_s7  ;;  %3527 = vrot.lane.b32.xlu1 %v7840_v27, %s8646_s6  ;;  %v3622_v19 = vsel %vm756_vm5, %v3621_v35, %v3620_v2  ;;  %7843 = vtanh.f32 %v3499_v63  ;;  %v3502_v37 = vadd.f32 %v3484_v45, %v3422_v11 }
0x1249   :  { %v3624_v48 = vsel %vm759_vm6, %v3623_v53, %v3622_v19 }
0x124a   :  { %v3627_v3 = vrot.slane %v3502_v37, 3 }
0x124c   :  { %v718_v49 = vpop.permute.xlu0 %717 }
0x124d   :  { %v7842_v36 = vpop.eup %7841  ;;  %739 = vst.msk [vmem:[#allocation18 + $0x18] sm:$0x1] %vm12698_vm11, %v718_v49 }
0x124e   :  { %v720_v7 = vpop.permute.xlu2 %719  ;;  %3521 = vrot.lane.b32.xlu0 %v7842_v36, %s8646_s6  ;;  %v7844_v18 = vpop.eup %7843 }
0x124f   :  { %v2350_v10 = vpop.permute.xlu1 %2349  ;;  %740 = vst.msk [vmem:[#allocation18 + $0x20] sm:$0x1] %vm12698_vm11, %v720_v7 }
0x1250   :  { %2370 = vst.msk [vmem:[#allocation18 + $0x1c] sm:$0x1] %vm12698_vm11, %v2350_v10  ;;  %2353 = vrot.lane.b32.xlu2 %v12760_v41, %s8647_s7  ;;  %2757 = vrot.lane.b32.xlu1 %v12761_v33, %s8647_s7 }
0x1254   :  { %v1944_v26 = vpop.permute.xlu0 %1943 }
0x1255   :  { %1964 = vst.msk [vmem:[#allocation18 + $0x1b] sm:$0x1] %vm12698_vm11, %v1944_v26  ;;  %v12771_v26 = vld [vmem:[#allocation51_spill] sm:$0xff] }
0x1256   :  { %v3486_v43 = vpop.permute.xlu2 %3485  ;;  %3525 = vrot.lane.b32.xlu0 %v7844_v18, %s8646_s6  ;;  %v12772_v18 = vld [vmem:[#allocation48_spill] sm:$0xff] }
0x1257   :  { %v3503_v31 = vadd.f32 %v3486_v43, %v3423_v17 }
0x1258   :  { %721 = vrot.lane.b32.xlu1 %v12762_v13, %s8647_s7 }
0x1259   :  { %v3629_v56 = vrot.slane %v3503_v31, 2 }
0x125e   :  { %v1946_v57 = vpop.permute.xlu2 %1945  ;;  %v3482_v8 = vpop.permute.xlu0 %3481  ;;  %1541 = vrot.lane.b32.xlu0 %v12763_v4, %s8647_s7 }
0x125f   :  { %1965 = vst.msk [vmem:[#allocation18 + $0x23] sm:$0x1] %vm12698_vm11, %v1946_v57  ;;  %v3501_v15 = vadd.f32 %v3482_v8, %v3421_v23 }
0x1260   :  { %1947 = vrot.lane.b32.xlu1 %v12764_v29, %s8647_s7  ;;  %v12775_v29 = vld [vmem:[#allocation45_spill] sm:$0xff] }
0x1261   :  { %7845 = vtanh.f32 %v3501_v15  ;;  %v3625_v32 = vrot.slane %v3501_v15, 4 }
0x1262   :  { %7847 = vtanh.f32 %v3502_v37  ;;  %v12773_v37 = vld [vmem:[#allocation58_spill] sm:$0xff] }
0x1263   :  { %v3626_v0 = vsel %vm762_vm7, %v3625_v32, %v3624_v48  ;;  %7849 = vtanh.f32 %v3503_v31  ;;  %v12774_v31 = vld [vmem:[#allocation63_spill] sm:$0xff] }
0x1264   :  { %v3628_v25 = vsel %vm765_vm8, %v3627_v3, %v3626_v0  ;;  %v3488_v42 = vpop.permute.xlu1 %3487 }
0x1265   :  { %v3630_v38 = vsel %vm768_vm9, %v3629_v56, %v3628_v25  ;;  %v3504_v46 = vadd.f32 %v3488_v42, %v3424_v1 }
0x1266   :  { %v3162_v44 = vpop.permute.xlu0 %3161  ;;  %2759 = vrot.lane.b32.xlu0 %v12765_v62, %s8647_s7  ;;  %v12777_v62 = vld [vmem:[#allocation62_spill] sm:$0xff] }
0x1267   :  { %v7846_v39 = vpop.eup %7845  ;;  %3182 = vst.msk [vmem:[#allocation18 + $0x1e] sm:$0x1] %vm12698_vm11, %v3162_v44  ;;  %v3631_v50 = vrot.slane %v3504_v46, 1  ;;  %7851 = vtanh.f32 %v3504_v46 }
0x1268   :  { %3165 = vrot.lane.b32.xlu1 %v10303_v34, %s8647_s7  ;;  %3529 = vrot.lane.b32.xlu2 %v7846_v39, %s8646_s6  ;;  %v12768_v34 = vld [vmem:[#allocation52_spill] sm:$0xff]  ;;  %v7848_v30 = vpop.eup %7847 }
0x1269   :  { %v10596_v61 = vsel %vm771_vm10, %v3631_v50, %v3630_v38  ;;  %v7850_v14 = vpop.eup %7849  ;;  %v12776_v38 = vld [vmem:[#allocation55_spill] sm:$0xff] }
0x126a   :  { %v3640_v50 = vld [vmem:[#allocation5 + $0x18] sm:$0xff] }
0x126b   :  { %3693 = vmatpush.msra.mxu3 %v3640_v50 }
0x126c   :  { %v1540_v24 = vpop.permute.xlu1 %1539 }
0x126d   :  { %1559 = vst.msk [vmem:[#allocation18 + $0x22] sm:$0x1] %vm12698_vm11, %v1540_v24  ;;  %v7852_v60 = vpop.eup %7851  ;;  %v3639_v24 = vld [vmem:[#allocation5 + $0x10] sm:$0xff] }
0x126e   :  { %v1134_v28 = vpop.permute.xlu0 %1133  ;;  %723 = vrot.lane.b32.xlu0 %v12766_v16, %s8647_s7  ;;  %v3638_v16 = vld [vmem:[#allocation5 + $0x8] sm:$0xff]  ;;  %3694 = vmatpush.msra.mxu3 %v3639_v24 }
0x126f   :  { %1153 = vst.msk [vmem:[#allocation18 + $0x21] sm:$0x1] %vm12698_vm11, %v1134_v28 }
0x1270   :  { %1137 = vrot.lane.b32.xlu1 %v12767_v6, %s8647_s7  ;;  %1543 = vrot.lane.b32.xlu2 %v12768_v34, %s8647_s7  ;;  %v10671_v6 = vld [vmem:[#allocation6 + $0x18] sm:$0xff]  ;;  %v10674_v34 = vld [vmem:[#allocation6 + $0x10] sm:$0xff] }
0x1271   :  { %3695 = vmatpush.msra.mxu3 %v3638_v16  ;;  %3757 = vmatpush.msra.mxu1 %v10671_v6 }
0x1272   :  { %4195 = vmatpush.msra.mxu2 %v10671_v6 }
0x1273   :  { %3758 = vmatpush.msra.mxu1 %v10674_v34 }
0x1274   :  { %4196 = vmatpush.msra.mxu2 %v10674_v34 }
0x1276   :  { %v2352_v63 = vpop.permute.xlu0 %2351  ;;  %3531 = vrot.lane.b32.xlu0 %v7848_v30, %s8646_s6  ;;  %v10677_v30 = vld [vmem:[#allocation6 + $0x8] sm:$0xff] }
0x1277   :  { %2371 = vst.msk [vmem:[#allocation18 + $0x24] sm:$0x1] %vm12698_vm11, %v2352_v63  ;;  %v10681_v63 = vld [vmem:[#allocation6] sm:$0xff]  ;;  %3759 = vmatpush.msra.mxu1 %v10677_v30  ;;  %4197 = vmatpush.msra.mxu2 %v10677_v30 }
0x1279   :  { %3760 = vmatpush.msra.mxu1 %v10681_v63  ;;  %4198 = vmatpush.msra.mxu2 %v10681_v63 }
0x127b   :  { %4601 = vmatpush.msrb.mxu1 %v10671_v6  ;;  %5007 = vmatpush.msrb.mxu2 %v10671_v6 }
0x127d   :  { %4602 = vmatpush.msrb.mxu1 %v10674_v34  ;;  %5008 = vmatpush.msrb.mxu2 %v10674_v34 }
0x127e   :  { %3533 = vrot.lane.b32.xlu0 %v7850_v14, %s8646_s6  ;;  %v3731_v14 = vld [vmem:[#allocation9 + $0x8] sm:$0xff] }
0x127f   :  { %7246 = vmatmul.msk.f32.vlgmr.msra.gmra.mxu1 %vm203_vm0, %v3731_v14  ;;  %5009 = vmatpush.msrb.mxu2 %v10677_v30 }
0x1280   :  { %4603 = vmatpush.msrb.mxu1 %v10677_v30 }
0x1281   :  { %5010 = vmatpush.msrb.mxu2 %v10681_v63 }
0x1282   :  { %4604 = vmatpush.msrb.mxu1 %v10681_v63 }
0x1284   :  { %5413 = vmatpush.msra.mxu1 %v10671_v6 }
0x1286   :  { %3535 = vrot.lane.b32.xlu0 %v7852_v60, %s8646_s6  ;;  %5414 = vmatpush.msra.mxu1 %v10674_v34 }
0x1288   :  { %5415 = vmatpush.msra.mxu1 %v10677_v30 }
0x128a   :  { %5416 = vmatpush.msra.mxu1 %v10681_v63 }
0x128e   :  { %1949 = vrot.lane.b32.xlu0 %v12769_v40, %s8647_s7 }
0x1292   :  { %v3524_v22 = vpop.permute.xlu2 %3523 }
0x1293   :  { %v3546_v2 = vmul.f32 %v3524_v22, %v10465_v59 }
0x1295   :  { %v3593_v19 = vrot.slane %v3546_v2, 7 }
0x1296   :  { %3167 = vrot.lane.b32.xlu0 %v10307_v21, %s8647_s7 }
0x129a   :  { %v3164_v55 = vpop.permute.xlu2 %3163 }
0x129b   :  { %3183 = vst.msk [vmem:[#allocation18 + $0x26] sm:$0x1] %vm12698_vm11, %v3164_v55 }
0x12a2   :  { %v1136_v27 = vpop.permute.xlu2 %1135 }
0x12a3   :  { %1154 = vst.msk [vmem:[#allocation18 + $0x29] sm:$0x1] %vm12698_vm11, %v1136_v27 }
0x12aa   :  { %v2354_v35 = vpop.permute.xlu2 %2353 }
0x12ab   :  { %2372 = vst.msk [vmem:[#allocation18 + $0x2c] sm:$0x1] %vm12698_vm11, %v2354_v35 }
0x12ba   :  { %v3528_v45 = vpop.permute.xlu1 %3527 }
0x12bb   :  { %v3548_v53 = vmul.f32 %v3528_v45, %v10495_v20  ;;  %v12770_v20 = vld [vmem:[#allocation59_spill] sm:$0xff] }
0x12bd   :  { %3567 = vrot.lane.b32.xlu1 %v3548_v53, %s8647_s7 }
0x12c0   :  { %v3522_v58 = vpop.permute.xlu0 %3521 }
0x12c1   :  { %v3545_v21 = vmul.f32 %v3522_v58, %v10460_v47 }
0x12c2   :  { %v2758_v48 = vpop.permute.xlu1 %2757  ;;  %v3530_v49 = vpop.permute.xlu2 %3529 }
0x12c3   :  { %2777 = vst.msk [vmem:[#allocation18 + $0x25] sm:$0x1] %vm12698_vm11, %v2758_v48  ;;  %v3549_v36 = vmul.f32 %v3530_v49, %v10507_v54  ;;  %v3594_v7 = vsel %vm753_vm4, %v3593_v19, %v3545_v21  ;;  %3561 = vrot.lane.b32.xlu2 %v3545_v21, %s8647_s7  ;;  %v3597_v54 = vrot.slane %v3548_v53, 5 }
0x12c5   :  { %2355 = vrot.lane.b32.xlu1 %v12770_v20, %s8647_s7  ;;  %3569 = vrot.lane.b32.xlu0 %v3549_v36, %s8647_s7  ;;  %v3599_v43 = vrot.slane %v3549_v36, 4 }
0x12c8   :  { %v3526_v59 = vpop.permute.xlu0 %3525 }
0x12c9   :  { %v3547_v10 = vmul.f32 %v3526_v59, %v10387_v52 }
0x12ca   :  { %v722_v41 = vpop.permute.xlu1 %721  ;;  %v1544_v47 = vpop.permute.xlu2 %1543 }
0x12cb   :  { %741 = vst.msk [vmem:[#allocation18 + $0x28] sm:$0x1] %vm12698_vm11, %v722_v41  ;;  %v3595_v33 = vrot.slane %v3547_v10, 6  ;;  %3563 = vrot.lane.b32.xlu2 %v3546_v2, %s8647_s7 }
0x12cc   :  { %1561 = vst.msk [vmem:[#allocation18 + $0x32] sm:$0x1] %vm12698_vm11, %v1544_v47 }
0x12cd   :  { %1545 = vrot.lane.b32.xlu1 %v12771_v26, %s8647_s7  ;;  %1139 = vrot.lane.b32.xlu0 %v12772_v18, %s8647_s7  ;;  %v3596_v13 = vsel %vm756_vm5, %v3595_v33, %v3594_v7 }
0x12ce   :  { %v3598_v52 = vsel %vm759_vm6, %v3597_v54, %v3596_v13 }
0x12cf   :  { %v3600_v11 = vsel %vm762_vm7, %v3599_v43, %v3598_v52  ;;  %v10725_v43 = vld [vmem:[#allocation7] ss:$0 sm:$0xff] }
0x12d0   :  { %v1542_v17 = vpop.permute.xlu0 %1541 }
0x12d1   :  { %1560 = vst.msk [vmem:[#allocation18 + $0x2a] sm:$0x1] %vm12698_vm11, %v1542_v17 }
0x12d2   :  { %v1948_v23 = vpop.permute.xlu1 %1947 }
0x12d3   :  { %1966 = vst.msk [vmem:[#allocation18 + $0x2b] sm:$0x1] %vm12698_vm11, %v1948_v23  ;;  %3565 = vrot.lane.b32.xlu2 %v3547_v10, %s8647_s7 }
0x12d5   :  { %2357 = vrot.lane.b32.xlu0 %v12773_v37, %s8647_s7 }
0x12d8   :  { %v2760_v57 = vpop.permute.xlu0 %2759 }
0x12d9   :  { %2778 = vst.msk [vmem:[#allocation18 + $0x2d] sm:$0x1] %vm12698_vm11, %v2760_v57 }
0x12da   :  { %v3166_v8 = vpop.permute.xlu1 %3165 }
0x12db   :  { %3184 = vst.msk [vmem:[#allocation18 + $0x2e] sm:$0x1] %vm12698_vm11, %v3166_v8  ;;  %2761 = vrot.lane.b32.xlu2 %v12774_v31, %s8647_s7 }
0x12e0   :  { %v724_v4 = vpop.permute.xlu0 %723 }
0x12e1   :  { %742 = vst.msk [vmem:[#allocation18 + $0x30] sm:$0x1] %vm12698_vm11, %v724_v4 }
0x12e2   :  { %v1138_v15 = vpop.permute.xlu1 %1137 }
0x12e3   :  { %1155 = vst.msk [vmem:[#allocation18 + $0x31] sm:$0x1] %vm12698_vm11, %v1138_v15  ;;  %725 = vrot.lane.b32.xlu2 %v12775_v29, %s8647_s7 }
0x12e8   :  { %v3532_v32 = vpop.permute.xlu0 %3531 }
0x12e9   :  { %v3550_v3 = vmul.f32 %v3532_v32, %v10467_v9 }
0x12eb   :  { %v3601_v56 = vrot.slane %v3550_v3, 3  ;;  %3571 = vrot.lane.b32.xlu2 %v3550_v3, %s8647_s7 }
0x12ed   :  { %v3602_v0 = vsel %vm765_vm8, %v3601_v56, %v3600_v11 }
0x12f0   :  { %v3534_v1 = vpop.permute.xlu0 %3533 }
0x12f1   :  { %v3551_v25 = vmul.f32 %v3534_v1, %v10528_v12 }
0x12f3   :  { %v3603_v42 = vrot.slane %v3551_v25, 2  ;;  %1951 = vrot.lane.b32.xlu2 %v12776_v38, %s8647_s7  ;;  %3573 = vrot.lane.b32.xlu1 %v3551_v25, %s8647_s7 }
0x12f5   :  { %v3604_v46 = vsel %vm768_vm9, %v3603_v42, %v3602_v0 }
0x12f8   :  { %v3536_v44 = vpop.permute.xlu0 %3535 }
0x12f9   :  { %v3552_v39 = vmul.f32 %v3536_v44, %v10516_v5  ;;  %v3637_v5 = vld [vmem:[#allocation5] sm:$0xff] }
0x12fa   :  { %3696 = vmatpush.msra.mxu3 %v3637_v5 }
0x12fb   :  { %v3605_v9 = vrot.slane %v3552_v39, 1  ;;  %3169 = vrot.lane.b32.xlu2 %v10312_v51, %s8647_s7  ;;  %2763 = vrot.lane.b32.xlu1 %v12777_v62, %s8647_s7 }
0x12fc   :  { %3575 = vrot.lane.b32.xlu0 %v3552_v39, %s8647_s7  ;;  %v10728_v17 = vpop.f32.mrf.mxu1 }
0x12fd   :  { %v10667_v12 = vsel %vm771_vm10, %v3605_v9, %v3604_v46  ;;  %v3766_v8 = vrot.slane %v10728_v17, 1  ;;  %v3767_v3 = vrot.slane %v10728_v17, 2  ;;  %v3768_v38 = vrot.slane %v10728_v17, 3 }
0x12fe   :  { %v3769_v50 = vrot.slane %v10728_v17, 4  ;;  %v3770_v14 = vrot.slane %v10728_v17, 5 }
0x1300   :  { %v1950_v28 = vpop.permute.xlu0 %1949 }
0x1301   :  { %1967 = vst.msk [vmem:[#allocation18 + $0x33] sm:$0x1] %vm12698_vm11, %v1950_v28 }
0x1308   :  { %v3168_v51 = vpop.permute.xlu0 %3167 }
0x1309   :  { %3185 = vst.msk [vmem:[#allocation18 + $0x36] sm:$0x1] %vm12698_vm11, %v3168_v51 }
0x131d   :  { %v3562_v60 = vpop.permute.xlu2 %3561 }
0x131e   :  { %3585 = vst.msk [vmem:[#allocation18 + $0x7] sm:$0x1] %vm12698_vm11, %v3562_v60 }
0x1325   :  { %v3564_v40 = vpop.permute.xlu2 %3563  ;;  %v3646_v22 = vld [vmem:[#allocation18] sm:$0xff] }
0x1326   :  { %3586 = vst.msk [vmem:[#allocation18 + $0xf] sm:$0x1] %vm12698_vm11, %v3564_v40  ;;  %7238 = vmatmul.msk.f32.vlgmr.msra.gmra.mxu3 %vm203_vm0, %v3646_v22 }
0x132d   :  { %v3566_v55 = vpop.permute.xlu2 %3565  ;;  %v3647_v27 = vld [vmem:[#allocation18 + $0x8] sm:$0xff] }
0x132e   :  { %3587 = vst.msk [vmem:[#allocation18 + $0x17] sm:$0x1] %vm12698_vm11, %v3566_v55  ;;  %7239 = vmatmul.msk.f32.gmra.mxu3 %vm203_vm0, %v3647_v27  ;;  %v3733_v27 = vld [vmem:[#allocation10 + $0x8] sm:$0xff] }
0x132f   :  { %v3568_v35 = vpop.permute.xlu1 %3567 }
0x1330   :  { %3588 = vst.msk [vmem:[#allocation18 + $0x1f] sm:$0x1] %vm12698_vm11, %v3568_v35  ;;  %v3950_v35 = vrot.slane %v3733_v27, 1 }
0x1335   :  { %v2762_v45 = vpop.permute.xlu2 %2761  ;;  %v3648_v53 = vld [vmem:[#allocation18 + $0x10] sm:$0xff] }
0x1336   :  { %2779 = vst.msk [vmem:[#allocation18 + $0x35] sm:$0x1] %vm12698_vm11, %v2762_v45  ;;  %7240 = vmatmul.msk.f32.gmra.mxu3 %vm203_vm0, %v3648_v53  ;;  %v3952_v53 = vrot.slane %v3733_v27, 3 }
0x1337   :  { %v2356_v2 = vpop.permute.xlu1 %2355  ;;  %v3570_v58 = vpop.permute.xlu0 %3569  ;;  %v3649_v21 = vld [vmem:[#allocation18 + $0x18] sm:$0xff] }
0x1338   :  { %2373 = vst.msk [vmem:[#allocation18 + $0x34] sm:$0x1] %vm12698_vm11, %v2356_v2 }
0x1339   :  { %3589 = vst.msk [vmem:[#allocation18 + $0x27] sm:$0x1] %vm12698_vm11, %v3570_v58  ;;  %v3956_v58 = vrot.slane %v3733_v27, 7 }
0x133d   :  { %v726_v19 = vpop.permute.xlu2 %725 }
0x133e   :  { %743 = vst.msk [vmem:[#allocation18 + $0x38] sm:$0x1] %vm12698_vm11, %v726_v19  ;;  %7241 = vmatmul.msk.f32.gmra.mxu3 %vm203_vm0, %v3649_v21  ;;  %v3771_v21 = vrot.slane %v10728_v17, 6 }
0x133f   :  { %v1546_v48 = vpop.permute.xlu1 %1545  ;;  %v1140_v49 = vpop.permute.xlu0 %1139 }
0x1340   :  { %1562 = vst.msk [vmem:[#allocation18 + $0x3a] sm:$0x1] %vm12698_vm11, %v1546_v48  ;;  %v3650_v7 = vld [vmem:[#allocation18 + $0x20] sm:$0xff] }
0x1341   :  { %1156 = vst.msk [vmem:[#allocation18 + $0x39] sm:$0x1] %vm12698_vm11, %v1140_v49 }
0x1345   :  { %v3572_v36 = vpop.permute.xlu2 %3571 }
0x1346   :  { %3590 = vst.msk [vmem:[#allocation18 + $0x2f] sm:$0x1] %vm12698_vm11, %v3572_v36  ;;  %7242 = vmatmul.msk.f32.gmra.mxu3 %vm203_vm0, %v3650_v7 }
0x1347   :  { %v2358_v20 = vpop.permute.xlu0 %2357 }
0x1348   :  { %2374 = vst.msk [vmem:[#allocation18 + $0x3c] sm:$0x1] %vm12698_vm11, %v2358_v20 }
0x134d   :  { %v1952_v59 = vpop.permute.xlu2 %1951  ;;  %v3651_v10 = vld [vmem:[#allocation18 + $0x28] sm:$0xff] }
0x134e   :  { %1968 = vst.msk [vmem:[#allocation18 + $0x3b] sm:$0x1] %vm12698_vm11, %v1952_v59  ;;  %7243 = vmatmul.msk.f32.gmra.mxu3 %vm203_vm0, %v3651_v10  ;;  %v3772_v10 = vrot.slane %v10728_v17, 7 }
0x1355   :  { %v3170_v41 = vpop.permute.xlu2 %3169 }
0x1356   :  { %3186 = vst.msk [vmem:[#allocation18 + $0x3e] sm:$0x1] %vm12698_vm11, %v3170_v41 }
0x1365   :  { %v3574_v47 = vpop.permute.xlu1 %3573 }
0x1366   :  { %3591 = vst.msk [vmem:[#allocation18 + $0x37] sm:$0x1] %vm12698_vm11, %v3574_v47 }
0x136d   :  { %v2764_v33 = vpop.permute.xlu1 %2763  ;;  %v3652_v54 = vld [vmem:[#allocation18 + $0x30] sm:$0xff] }
0x136e   :  { %2780 = vst.msk [vmem:[#allocation18 + $0x3d] sm:$0x1] %vm12698_vm11, %v2764_v33  ;;  %v3576_v26 = vpop.permute.xlu0 %3575  ;;  %7244 = vmatmul.msk.f32.gmra.mxu3 %vm203_vm0, %v3652_v54 }
0x136f   :  { %3592 = vst.msk [vmem:[#allocation18 + $0x3f] sm:$0x1] %vm12698_vm11, %v3576_v26  ;;  %v3951_v26 = vrot.slane %v3733_v27, 2 }
0x1376   :  { %v3653_v18 = vld [vmem:[#allocation18 + $0x38] sm:$0xff] }
0x1377   :  { %7245 = vmatmul.msk.f32.gmra.mxu3 %vm203_vm0, %v3653_v18 }
0x13a9   :  { %v3698_v13 = vpop.f32.mrf.mxu3 }
0x13aa   :  { %v3699_v52 = vadd.f32 %v10725_v43, %v3698_v13 }
0x13ac   :  { %3722 = vst [vmem:[#allocation11] sm:$0xff] %v3699_v52 }
0x13b1   :  { %v3701_v11 = vpop.f32.mrf.mxu3 }
0x13b2   :  { %v3702_v23 = vadd.f32 %v10725_v43, %v3701_v11 }
0x13b3   :  { %v3734_v37 = vld [vmem:[#allocation11] sm:$0x1] }
0x13b4   :  { %3723 = vst [vmem:[#allocation11 + $0x8] sm:$0xff] %v3702_v23  ;;  %v10732_v57 = vadd.f32 %v10728_v17, %v3734_v37  ;;  %v3954_v23 = vrot.slane %v3733_v27, 5 }
0x13b6   :  { %7853 = vtanh.f32 %v10732_v57  ;;  %v7247_v20 = vmul.f32 -1.442695, %v10732_v57 }
0x13b9   :  { %v3704_v31 = vpop.f32.mrf.mxu3 }
0x13ba   :  { %v3705_v4 = vadd.f32 %v10725_v43, %v3704_v31 }
0x13bb   :  { %v3735_v15 = vld [vmem:[#allocation11 + $0x8] sm:$0x1] }
0x13bc   :  { %v7854_v29 = vpop.eup %7853  ;;  %v10737_v32 = vadd.f32 %v3766_v8, %v3735_v15  ;;  %3724 = vst [vmem:[#allocation11 + $0x10] sm:$0xff] %v3705_v4 }
0x13bd   :  { %3997 = vrot.lane.b32.xlu0 %v7854_v29, %s8646_s6 }
0x13be   :  { %7855 = vtanh.f32 %v10737_v32  ;;  %v7248_v18 = vmul.f32 -1.442695, %v10737_v32  ;;  %v3955_v32 = vrot.slane %v3733_v27, 6 }
0x13c1   :  { %v3707_v56 = vpop.f32.mrf.mxu3 }
0x13c2   :  { %v3708_v0 = vadd.f32 %v10725_v43, %v3707_v56 }
0x13c3   :  { %v3736_v1 = vld [vmem:[#allocation11 + $0x10] sm:$0x1] }
0x13c4   :  { %v7856_v25 = vpop.eup %7855  ;;  %3725 = vst [vmem:[#allocation11 + $0x18] sm:$0xff] %v3708_v0  ;;  %v3783_v42 = vadd.f32 %v3767_v3, %v3736_v1  ;;  %v3953_v3 = vrot.slane %v3733_v27, 4 }
0x13c5   :  { %3999 = vrot.lane.b32.xlu1 %v7856_v25, %s8646_s6 }
0x13c6   :  { %7857 = vtanh.f32 %v3783_v42  ;;  %v7249_v19 = vmul.f32 -1.442695, %v3783_v42 }
0x13c9   :  { %v3710_v46 = vpop.f32.mrf.mxu3 }
0x13ca   :  { %v3711_v44 = vadd.f32 %v10725_v43, %v3710_v46 }
0x13cb   :  { %v3737_v39 = vld [vmem:[#allocation11 + $0x18] sm:$0x1] }
0x13cc   :  { %v7858_v9 = vpop.eup %7857  ;;  %3726 = vst [vmem:[#allocation11 + $0x20] sm:$0xff] %v3711_v44  ;;  %v10746_v62 = vadd.f32 %v3768_v38, %v3737_v39 }
0x13cd   :  { %4001 = vrot.lane.b32.xlu2 %v7858_v9, %s8646_s6 }
0x13ce   :  { %7859 = vtanh.f32 %v10746_v62  ;;  %v7250_v56 = vmul.f32 -1.442695, %v10746_v62 }
0x13d1   :  { %v3713_v24 = vpop.f32.mrf.mxu3 }
0x13d2   :  { %v3714_v28 = vadd.f32 %v10725_v43, %v3713_v24 }
0x13d3   :  { %v3738_v16 = vld [vmem:[#allocation11 + $0x20] sm:$0x1] }
0x13d4   :  { %v7860_v5 = vpop.eup %7859  ;;  %3727 = vst [vmem:[#allocation11 + $0x28] sm:$0xff] %v3714_v28  ;;  %v3785_v51 = vadd.f32 %v3769_v50, %v3738_v16 }
0x13d5   :  { %4003 = vrot.lane.b32.xlu1 %v7860_v5, %s8646_s6 }
0x13d6   :  { %7861 = vtanh.f32 %v3785_v51 }
0x13db   :  { %v3739_v60 = vld [vmem:[#allocation11 + $0x28] sm:$0x1] }
0x13dc   :  { %v7862_v40 = vpop.eup %7861  ;;  %v10754_v22 = vadd.f32 %v3770_v14, %v3739_v60 }
0x13dd   :  { %4005 = vrot.lane.b32.xlu2 %v7862_v40, %s8646_s6 }
0x13de   :  { %7863 = vtanh.f32 %v10754_v22 }
0x13df   :  { %7865 = vpow2.f32 %v7249_v19 }
0x13e4   :  { %v7864_v55 = vpop.eup %7863 }
0x13e5   :  { %4007 = vrot.lane.b32.xlu0 %v7864_v55, %s8646_s6  ;;  %v7866_v59 = vpop.eup %7865 }
0x13e6   :  { %v3815_v54 = vadd.f32 1.0, %v7866_v59 }
0x13e8   :  { %v3862_v44 = vand.u32 2147483648, %v3815_v54  ;;  %vm3856_vm2 = vweird.f32 %v3815_v54  ;;  %v3860_v39 = vand.u32 2147483647, %v3815_v54 }
0x13ea   :  { %v3863_v16 = vor.u32 1.1754944e-38, %v3862_v44  ;;  %vm3861_vm12 = vcmp.eq.f32.partialorder %v3860_v39, 8.507059e+37 }
0x13ed   :  { %3959 = vrot.lane.b32.xlu0 %v3950_v35, %s8647_s7 }
0x13f1   :  { %v3716_v45 = vpop.f32.mrf.mxu3 }
0x13f2   :  { %v3717_v2 = vadd.f32 %v10725_v43, %v3716_v45 }
0x13f4   :  { %3728 = vst [vmem:[#allocation11 + $0x30] sm:$0xff] %v3717_v2 }
0x13f5   :  { %3963 = vrot.lane.b32.xlu0 %v3952_v53, %s8647_s7  ;;  %v7252_v53 = vmul.f32 -1.442695, %v10754_v22 }
0x13fa   :  { %v3719_v48 = vpop.f32.mrf.mxu3 }
0x13fb   :  { %v3720_v49 = vadd.f32 %v10725_v43, %v3719_v48  ;;  %v3740_v36 = vld [vmem:[#allocation11 + $0x30] sm:$0x1]  ;;  %v7251_v43 = vmul.f32 -1.442695, %v3785_v51 }
0x13fc   :  { %v10764_v7 = vadd.f32 %v3771_v21, %v3740_v36 }
0x13fd   :  { %3729 = vst [vmem:[#allocation11 + $0x38] sm:$0xff] %v3720_v49  ;;  %3971 = vrot.lane.b32.xlu0 %v3956_v58, %s8647_s7 }
0x13fe   :  { %7867 = vtanh.f32 %v10764_v7 }
0x13ff   :  { %7869 = vpow2.f32 %v7247_v20 }
0x1404   :  { %v7868_v41 = vpop.eup %7867  ;;  %v3741_v47 = vld [vmem:[#allocation11 + $0x38] sm:$0x1] }
0x1405   :  { %4009 = vrot.lane.b32.xlu1 %v7868_v41, %s8646_s6  ;;  %v10771_v33 = vadd.f32 %v3772_v10, %v3741_v47  ;;  %v7870_v13 = vpop.eup %7869 }
0x1406   :  { %v3813_v11 = vadd.f32 1.0, %v7870_v13 }
0x1407   :  { %7871 = vtanh.f32 %v10771_v33 }
0x1408   :  { %7873 = vrcp.f32 %v3815_v54  ;;  %v3832_v35 = vand.u32 2147483648, %v3813_v11  ;;  %vm3826_vm14 = vweird.f32 %v3813_v11  ;;  %v3830_v45 = vand.u32 2147483647, %v3813_v11 }
0x1409   :  { %7875 = vpow2.f32 %v7248_v18 }
0x140a   :  { %7877 = vpow2.f32 %v7251_v43  ;;  %v3833_v21 = vor.u32 1.1754944e-38, %v3832_v35 }
0x140b   :  { %7879 = vrcp.f32 %v3813_v11 }
0x140d   :  { %v7872_v52 = vpop.eup %7871  ;;  %3961 = vrot.lane.b32.xlu1 %v3951_v26, %s8647_s7 }
0x140e   :  { %4011 = vrot.lane.b32.xlu2 %v7872_v52, %s8646_s6  ;;  %v7874_v17 = vpop.eup %7873 }
0x140f   :  { %v7876_v37 = vpop.eup %7875  ;;  %v3852_v8 = vmul.f32 %v7874_v17, %v3815_v54  ;;  %vm3857_vm1 = vweird.f32 %v7874_v17 }
0x1410   :  { %v7878_v57 = vpop.eup %7877  ;;  %v10779_v31 = vadd.f32 1.0, %v7876_v37  ;;  %vm3858_vm3 = vmor %vm3856_vm2, %vm3857_vm1  ;;  %vm3831_vm1 = vcmp.eq.f32.partialorder %v3830_v45, 8.507059e+37 }
0x1411   :  { %v10781_v4 = vadd.f32 1.0, %v7878_v57  ;;  %v3853_v15 = vsub.f32 1.0, %v3852_v8  ;;  %v7880_v29 = vpop.eup %7879 }
0x1412   :  { %7881 = vrcp.f32 %v10779_v31  ;;  %v3822_v1 = vmul.f32 %v7880_v29, %v3813_v11  ;;  %vm3827_vm13 = vweird.f32 %v7880_v29  ;;  %v3847_v10 = vand.u32 2147483648, %v10779_v31 }
0x1413   :  { %7883 = vrcp.f32 %v10781_v4  ;;  %v3854_v0 = vmul.f32 %v7874_v17, %v3853_v15  ;;  %vm3828_vm15 = vmor %vm3826_vm14, %vm3827_vm13  ;;  %v3892_v41 = vand.u32 2147483648, %v10781_v4  ;;  %v3845_v47 = vand.u32 2147483647, %v10779_v31 }
0x1414   :  { %7885 = vpow2.f32 %v7250_v56  ;;  %v3823_v38 = vsub.f32 1.0, %v3822_v1  ;;  %vm3886_vm14 = vweird.f32 %v10781_v4  ;;  %v3890_v54 = vand.u32 2147483647, %v10781_v4 }
0x1415   :  { %3967 = vrot.lane.b32.xlu1 %v3954_v23, %s8647_s7  ;;  %v3855_v42 = vadd.f32 %v7874_v17, %v3854_v0  ;;  %v3848_v52 = vor.u32 1.1754944e-38, %v3847_v10  ;;  %v3893_v11 = vor.u32 1.1754944e-38, %v3892_v41 }
0x1416   :  { %3957 = vrot.lane.b32.xlu2 %v3733_v27, %s8647_s7  ;;  %v3824_v50 = vmul.f32 %v7880_v29, %v3823_v38  ;;  %vm3891_vm11 = vcmp.eq.f32.partialorder %v3890_v54, 8.507059e+37 }
0x1417   :  { %v3859_v62 = vsel %vm3858_vm3, %v7874_v17, %v3855_v42 }
0x1418   :  { %v10788_v25 = vpop.eup %7881  ;;  %v10796_v5 = vsel %vm3861_vm12, %v3863_v16, %v3859_v62  ;;  %v3825_v40 = vadd.f32 %v7880_v29, %v3824_v50  ;;  %vm3841_vm12 = vweird.f32 %v10779_v31  ;;  %v7253_v50 = vmul.f32 -1.442695, %v10764_v7 }
0x1419   :  { %v10790_v46 = vpop.eup %7883  ;;  %v3837_v24 = vmul.f32 %v10788_v25, %v10779_v31  ;;  %vm3842_vm2 = vweird.f32 %v10788_v25 }
0x141a   :  { %v7886_v9 = vpop.eup %7885  ;;  %v3882_v28 = vmul.f32 %v10790_v46, %v10781_v4  ;;  %v3829_v2 = vsel %vm3828_vm15, %v7880_v29, %v3825_v40  ;;  %vm3887_vm3 = vweird.f32 %v10790_v46  ;;  %vm3843_vm13 = vmor %vm3841_vm12, %vm3842_vm2  ;;  %v7254_v29 = vmul.f32 -1.442695, %v10771_v33 }
0x141b   :  { %v10798_v14 = vadd.f32 1.0, %v7886_v9  ;;  %v3838_v55 = vsub.f32 1.0, %v3837_v24  ;;  %v10806_v48 = vsel %vm3831_vm1, %v3833_v21, %v3829_v2  ;;  %vm3888_vm15 = vmor %vm3886_vm14, %vm3887_vm3  ;;  %vm3846_vm1 = vcmp.eq.f32.partialorder %v3845_v47, 8.507059e+37 }
0x141c   :  { %v3883_v27 = vsub.f32 1.0, %v3882_v28 }
0x141d   :  { %3969 = vrot.lane.b32.xlu1 %v3955_v32, %s8647_s7  ;;  %7887 = vrcp.f32 %v10798_v14  ;;  %v3839_v58 = vmul.f32 %v10788_v25, %v3838_v55  ;;  %v3877_v0 = vand.u32 2147483648, %v10798_v14  ;;  %v3875_v1 = vand.u32 2147483647, %v10798_v14 }
0x141e   :  { %3965 = vrot.lane.b32.xlu2 %v3953_v3, %s8647_s7  ;;  %v3884_v19 = vmul.f32 %v10790_v46, %v3883_v27  ;;  %7889 = vpow2.f32 %v7252_v53 }
0x141f   :  { %v3840_v22 = vadd.f32 %v10788_v25, %v3839_v58  ;;  %vm3876_vm12 = vcmp.eq.f32.partialorder %v3875_v1, 8.507059e+37 }
0x1420   :  { %v3885_v20 = vadd.f32 %v10790_v46, %v3884_v19 }
0x1421   :  { %v3844_v18 = vsel %vm3843_vm13, %v10788_v25, %v3840_v22 }
0x1422   :  { %v3889_v43 = vsel %vm3888_vm15, %v10790_v46, %v3885_v20  ;;  %v10823_v17 = vsel %vm3846_vm1, %v3848_v52, %v3844_v18  ;;  %v3878_v46 = vor.u32 1.1754944e-38, %v3877_v0 }
0x1423   :  { %v7888_v59 = vpop.eup %7887  ;;  %v10825_v57 = vsel %vm3891_vm11, %v3893_v11, %v3889_v43  ;;  %vm3871_vm11 = vweird.f32 %v10798_v14 }
0x1424   :  { %v7890_v26 = vpop.eup %7889  ;;  %v3867_v13 = vmul.f32 %v7888_v59, %v10798_v14  ;;  %vm3872_vm2 = vweird.f32 %v7888_v59 }
0x1425   :  { %v3818_v8 = vadd.f32 1.0, %v7890_v26  ;;  %vm3873_vm3 = vmor %vm3871_vm11, %vm3872_vm2 }
0x1426   :  { %v3868_v15 = vsub.f32 1.0, %v3867_v13 }
0x1427   :  { %v4002_v51 = vpop.permute.xlu2 %4001  ;;  %7891 = vrcp.f32 %v3818_v8  ;;  %v3907_v16 = vand.u32 2147483648, %v3818_v8  ;;  %vm3901_vm14 = vweird.f32 %v3818_v8  ;;  %v3905_v14 = vand.u32 2147483647, %v3818_v8 }
0x1428   :  { %v4023_v60 = vmul.f32 %v4002_v51, %v10796_v5  ;;  %v3869_v32 = vmul.f32 %v7888_v59, %v3868_v15  ;;  %7893 = vpow2.f32 %v7254_v29 }
0x1429   :  { %v3908_v55 = vor.u32 1.1754944e-38, %v3907_v16  ;;  %vm3906_vm1 = vcmp.eq.f32.partialorder %v3905_v14, 8.507059e+37 }
0x142a   :  { %4041 = vrot.lane.b32.xlu0 %v4023_v60, %s8647_s7  ;;  %v3870_v3 = vadd.f32 %v7888_v59, %v3869_v32 }
0x142c   :  { %v3874_v25 = vsel %vm3873_vm3, %v7888_v59, %v3870_v3 }
0x142d   :  { %v7892_v56 = vpop.eup %7891  ;;  %v10835_v44 = vsel %vm3876_vm12, %v3878_v46, %v3874_v25 }
0x142e   :  { %v3897_v42 = vmul.f32 %v7892_v56, %v3818_v8  ;;  %v7894_v38 = vpop.eup %7893  ;;  %vm3902_vm13 = vweird.f32 %v7892_v56 }
0x142f   :  { %v3998_v49 = vpop.permute.xlu0 %3997  ;;  %v3820_v62 = vadd.f32 1.0, %v7894_v38  ;;  %vm3903_vm15 = vmor %vm3901_vm14, %vm3902_vm13 }
0x1430   :  { %v4021_v36 = vmul.f32 %v3998_v49, %v10806_v48  ;;  %v3898_v9 = vsub.f32 1.0, %v3897_v42 }
0x1431   :  { %7895 = vrcp.f32 %v3820_v62  ;;  %v3937_v49 = vand.u32 2147483648, %v3820_v62  ;;  %vm3931_vm11 = vweird.f32 %v3820_v62 }
0x1432   :  { %4037 = vrot.lane.b32.xlu2 %v4021_v36, %s8647_s7  ;;  %v3899_v24 = vmul.f32 %v7892_v56, %v3898_v9  ;;  %7897 = vpow2.f32 %v7253_v50  ;;  %v3935_v36 = vand.u32 2147483647, %v3820_v62 }
0x1433   :  { %v3938_v59 = vor.u32 1.1754944e-38, %v3937_v49 }
0x1434   :  { %v3900_v28 = vadd.f32 %v7892_v56, %v3899_v24  ;;  %vm3936_vm12 = vcmp.eq.f32.partialorder %v3935_v36, 8.507059e+37 }
0x1436   :  { %v3904_v40 = vsel %vm3903_vm15, %v7892_v56, %v3900_v28 }
0x1437   :  { %v4000_v23 = vpop.permute.xlu1 %3999  ;;  %v4006_v37 = vpop.permute.xlu2 %4005  ;;  %v10840_v35 = vsel %vm3906_vm1, %v3908_v55, %v3904_v40 }
0x1438   :  { %v4022_v31 = vmul.f32 %v4000_v23, %v10823_v17  ;;  %v4025_v4 = vmul.f32 %v4006_v37, %v10825_v57  ;;  %v7896_v51 = vpop.eup %7895 }
0x1439   :  { %v7898_v60 = vpop.eup %7897  ;;  %v3927_v27 = vmul.f32 %v7896_v51, %v3820_v62  ;;  %vm3932_vm2 = vweird.f32 %v7896_v51 }
0x143a   :  { %4039 = vrot.lane.b32.xlu1 %v4022_v31, %s8647_s7  ;;  %4045 = vrot.lane.b32.xlu2 %v4025_v4, %s8647_s7  ;;  %v3819_v53 = vadd.f32 1.0, %v7898_v60  ;;  %vm3933_vm3 = vmor %vm3931_vm11, %vm3932_vm2 }
0x143b   :  { %v3928_v2 = vsub.f32 1.0, %v3927_v27 }
0x143c   :  { %7899 = vrcp.f32 %v3819_v53  ;;  %v3922_v43 = vand.u32 2147483648, %v3819_v53  ;;  %vm3916_vm14 = vweird.f32 %v3819_v53  ;;  %v3920_v13 = vand.u32 2147483647, %v3819_v53 }
0x143d   :  { %v3929_v58 = vmul.f32 %v7896_v51, %v3928_v2 }
0x143e   :  { %v3923_v11 = vor.u32 1.1754944e-38, %v3922_v43  ;;  %vm3921_vm1 = vcmp.eq.f32.partialorder %v3920_v13, 8.507059e+37 }
0x143f   :  { %v3930_v21 = vadd.f32 %v7896_v51, %v3929_v58 }
0x1441   :  { %v3934_v20 = vsel %vm3933_vm3, %v7896_v51, %v3930_v21 }
0x1442   :  { %v7900_v19 = vpop.eup %7899  ;;  %v10844_v41 = vsel %vm3936_vm12, %v3938_v59, %v3934_v20 }
0x1443   :  { %v3912_v22 = vmul.f32 %v7900_v19, %v3819_v53  ;;  %vm3917_vm13 = vweird.f32 %v7900_v19 }
0x1444   :  { %vm3918_vm15 = vmor %vm3916_vm14, %vm3917_vm13 }
0x1445   :  { %v3913_v47 = vsub.f32 1.0, %v3912_v22 }
0x1447   :  { %v4004_v33 = vpop.permute.xlu1 %4003  ;;  %v3914_v26 = vmul.f32 %v7900_v19, %v3913_v47 }
0x1448   :  { %v4024_v39 = vmul.f32 %v4004_v33, %v10835_v44 }
0x1449   :  { %v3915_v18 = vadd.f32 %v7900_v19, %v3914_v26 }
0x144a   :  { %4043 = vrot.lane.b32.xlu0 %v4024_v39, %s8647_s7 }
0x144b   :  { %v3919_v52 = vsel %vm3918_vm15, %v7900_v19, %v3915_v18 }
0x144c   :  { %v10848_v37 = vsel %vm3921_vm1, %v3923_v11, %v3919_v52 }
0x1457   :  { %v4008_v45 = vpop.permute.xlu0 %4007 }
0x1458   :  { %v4026_v7 = vmul.f32 %v4008_v45, %v10840_v35 }
0x145a   :  { %4047 = vrot.lane.b32.xlu1 %v4026_v7, %s8647_s7 }
0x145f   :  { %v3960_v4 = vpop.permute.xlu0 %3959 }
0x1460   :  { %v3982_v28 = vmul.f32 %v3960_v4, %v10823_v17 }
0x1467   :  { %v3964_v29 = vpop.permute.xlu0 %3963 }
0x1468   :  { %v4012_v10 = vpop.permute.xlu2 %4011  ;;  %v3984_v40 = vmul.f32 %v3964_v29, %v10835_v44 }
0x1469   :  { %v4028_v54 = vmul.f32 %v4012_v10, %v10844_v41 }
0x146b   :  { %4051 = vrot.lane.b32.xlu0 %v4028_v54, %s8647_s7 }
0x146f   :  { %v3972_v1 = vpop.permute.xlu0 %3971 }
0x1470   :  { %v3958_v31 = vpop.permute.xlu2 %3957  ;;  %v3988_v36 = vmul.f32 %v3972_v1, %v10844_v41 }
0x1471   :  { %v3981_v32 = vmul.f32 %v3958_v31, %v10806_v48 }
0x1477   :  { %v4010_v23 = vpop.permute.xlu1 %4009 }
0x1478   :  { %v4027_v8 = vmul.f32 %v4010_v23, %v10848_v37  ;;  %v3966_v15 = vpop.permute.xlu2 %3965 }
0x1479   :  { %v3985_v9 = vmul.f32 %v3966_v15, %v10825_v57 }
0x147a   :  { %4049 = vrot.lane.b32.xlu2 %v4027_v8, %s8647_s7 }
0x147f   :  { %v3962_v0 = vpop.permute.xlu1 %3961 }
0x1480   :  { %v3983_v38 = vmul.f32 %v3962_v0, %v10796_v5 }
0x1487   :  { %v3968_v42 = vpop.permute.xlu1 %3967 }
0x1488   :  { %v3986_v53 = vmul.f32 %v3968_v42, %v10840_v35 }
0x148c   :  { %v4038_v3 = vpop.permute.xlu2 %4037 }
0x148d   :  { %v10853_v56 = vadd.f32 %v4038_v3, %v3981_v32 }
0x148f   :  { %7901 = vtanh.f32 %v10853_v56  ;;  %v3970_v50 = vpop.permute.xlu1 %3969 }
0x1490   :  { %v3987_v58 = vmul.f32 %v3970_v50, %v10848_v37  ;;  %v4157_v50 = vld [vmem:[#allocation11 + $0x1] sm:$0x1] }
0x1494   :  { %v4046_v39 = vpop.permute.xlu2 %4045 }
0x1495   :  { %v7902_v25 = vpop.eup %7901  ;;  %v10862_v62 = vadd.f32 %v4046_v39, %v3985_v9 }
0x1496   :  { %4085 = vrot.lane.b32.xlu0 %v7902_v25, %s8646_s6 }
0x149c   :  { %v4042_v46 = vpop.permute.xlu0 %4041 }
0x149d   :  { %v10858_v33 = vadd.f32 %v4042_v46, %v3983_v38 }
0x149f   :  { %7903 = vtanh.f32 %v10858_v33 }
0x14a0   :  { %7905 = vtanh.f32 %v10862_v62 }
0x14a5   :  { %v7904_v24 = vpop.eup %7903 }
0x14a6   :  { %4089 = vrot.lane.b32.xlu2 %v7904_v24, %s8646_s6  ;;  %v7906_v51 = vpop.eup %7905 }
0x14ac   :  { %v4040_v16 = vpop.permute.xlu1 %4039 }
0x14ad   :  { %v10867_v14 = vadd.f32 %v4040_v16, %v3982_v28  ;;  %v4158_v16 = vld [vmem:[#allocation11 + $0x9] sm:$0x1] }
0x14ae   :  { %4093 = vrot.lane.b32.xlu2 %v7906_v51, %s8646_s6  ;;  %v4159_v51 = vld [vmem:[#allocation11 + $0x11] sm:$0x1] }
0x14af   :  { %7907 = vtanh.f32 %v10867_v14 }
0x14b5   :  { %v7908_v60 = vpop.eup %7907 }
0x14b6   :  { %4087 = vrot.lane.b32.xlu1 %v7908_v60, %s8646_s6 }
0x14bc   :  { %v4044_v55 = vpop.permute.xlu0 %4043 }
0x14bd   :  { %v10873_v27 = vadd.f32 %v4044_v55, %v3984_v40 }
0x14bf   :  { %7909 = vtanh.f32 %v10873_v27 }
0x14c5   :  { %v7910_v45 = vpop.eup %7909 }
0x14c6   :  { %4091 = vrot.lane.b32.xlu1 %v7910_v45, %s8646_s6 }
0x14cc   :  { %v4048_v7 = vpop.permute.xlu1 %4047 }
0x14cd   :  { %v10878_v2 = vadd.f32 %v4048_v7, %v3986_v53  ;;  %v4160_v7 = vld [vmem:[#allocation11 + $0x19] sm:$0x1] }
0x14cf   :  { %7911 = vtanh.f32 %v10878_v2 }
0x14d4   :  { %v4050_v19 = vpop.permute.xlu2 %4049 }
0x14d5   :  { %v7912_v21 = vpop.eup %7911  ;;  %v10882_v49 = vadd.f32 %v4050_v19, %v3987_v58  ;;  %v4161_v58 = vld [vmem:[#allocation11 + $0x21] sm:$0x1] }
0x14d6   :  { %4095 = vrot.lane.b32.xlu0 %v7912_v21, %s8646_s6 }
0x14d7   :  { %7913 = vtanh.f32 %v10882_v49 }
0x14dd   :  { %v7914_v22 = vpop.eup %7913  ;;  %v4052_v20 = vpop.permute.xlu0 %4051 }
0x14de   :  { %v10887_v59 = vadd.f32 %v4052_v20, %v3988_v36  ;;  %4097 = vrot.lane.b32.xlu1 %v7914_v22, %s8646_s6 }
0x14e0   :  { %7915 = vtanh.f32 %v10887_v59 }
0x14e6   :  { %v7916_v10 = vpop.eup %7915 }
0x14e7   :  { %4099 = vrot.lane.b32.xlu2 %v7916_v10, %s8646_s6 }
0x1500   :  { %v4090_v47 = vpop.permute.xlu2 %4089 }
0x1501   :  { %v10900_v23 = vmul.f32 %v4090_v47, %v10796_v5  ;;  %v4163_v47 = vld [vmem:[#allocation11 + $0x31] sm:$0x1] }
0x1503   :  { %v4167_v29 = vrot.slane %v10900_v23, 6 }
0x1508   :  { %v4086_v26 = vpop.permute.xlu0 %4085  ;;  %v4094_v43 = vpop.permute.xlu2 %4093 }
0x1509   :  { %v10903_v31 = vmul.f32 %v4086_v26, %v10806_v48 }
0x1528   :  { %v4088_v54 = vpop.permute.xlu1 %4087 }
0x1529   :  { %v10893_v18 = vmul.f32 %v4088_v54, %v10823_v17  ;;  %v4164_v54 = vld [vmem:[#allocation11 + $0x39] sm:$0x1] }
0x152b   :  { %v4165_v52 = vrot.slane %v10893_v18, 7 }
0x152d   :  { %v4166_v4 = vsel %vm753_vm4, %v4165_v52, %v10903_v31 }
0x152e   :  { %v4168_v5 = vsel %vm756_vm5, %v4167_v29, %v4166_v4 }
0x1538   :  { %v4092_v13 = vpop.permute.xlu1 %4091 }
0x1539   :  { %v10897_v11 = vmul.f32 %v4092_v13, %v10835_v44  ;;  %v10913_v44 = vmul.f32 %v4094_v43, %v10825_v57 }
0x153b   :  { %v4169_v17 = vrot.slane %v10897_v11, 5  ;;  %v4171_v25 = vrot.slane %v10913_v44, 4 }
0x153d   :  { %v4170_v3 = vsel %vm759_vm6, %v4169_v17, %v4168_v5 }
0x153e   :  { %v4172_v57 = vsel %vm762_vm7, %v4171_v25, %v4170_v3 }
0x1541   :  { %v4100_v32 = vpop.permute.xlu2 %4099 }
0x1542   :  { %v10918_v48 = vmul.f32 %v4100_v32, %v10844_v41 }
0x1544   :  { %v4177_v38 = vrot.slane %v10918_v48, 1 }
0x1548   :  { %v4096_v8 = vpop.permute.xlu0 %4095 }
0x1549   :  { %v10909_v15 = vmul.f32 %v4096_v8, %v10840_v35 }
0x154b   :  { %v4173_v0 = vrot.slane %v10909_v15, 3 }
0x154d   :  { %v4174_v46 = vsel %vm765_vm8, %v4173_v0, %v4172_v57 }
0x1550   :  { %v4098_v1 = vpop.permute.xlu1 %4097 }
0x1551   :  { %v10923_v35 = vmul.f32 %v4098_v1, %v10848_v37 }
0x1553   :  { %v4175_v42 = vrot.slane %v10923_v35, 2 }
0x1555   :  { %v4176_v39 = vsel %vm768_vm9, %v4175_v42, %v4174_v46 }
0x1556   :  { %v4178_v41 = vsel %vm771_vm10, %v4177_v38, %v4176_v39 }
0x1557   :  { %4179 = vrot.lane.b32.xlu0 %v4178_v41, %s8647_s7 }
0x15c9   :  { %v4180_v9 = vpop.permute.xlu0 %4179 }
0x15ca   :  { %7255 = vmatmul.msk.f32.vlgmr.msra.gmra.mxu2 %vm203_vm0, %v4180_v9 }
0x15cb   :  { %5819 = vmatpush.msra.mxu2 %v10671_v6 }
0x15cd   :  { %5820 = vmatpush.msra.mxu2 %v10674_v34  ;;  %v4162_v34 = vld [vmem:[#allocation11 + $0x29] sm:$0x1] }
0x15cf   :  { %5821 = vmatpush.msra.mxu2 %v10677_v30 }
0x15d1   :  { %5822 = vmatpush.msra.mxu2 %v10681_v63 }
0x164d   :  { %v4200_v37 = vpop.f32.mrf.mxu2 }
0x164e   :  { %v4204_v24 = vrot.slane %v4200_v37, 1  ;;  %v4205_v28 = vrot.slane %v4200_v37, 2  ;;  %v4219_v60 = vadd.f32 %v4200_v37, %v4157_v50  ;;  %v4208_v45 = vrot.slane %v4200_v37, 5 }
0x164f   :  { %v4206_v53 = vrot.slane %v4200_v37, 3  ;;  %v4207_v6 = vrot.slane %v4200_v37, 4  ;;  %v4209_v20 = vrot.slane %v4200_v37, 6  ;;  %v4210_v10 = vrot.slane %v4200_v37, 7 }
0x1650   :  { %v4220_v40 = vadd.f32 %v4204_v24, %v4158_v16  ;;  %v4221_v55 = vadd.f32 %v4205_v28, %v4159_v51  ;;  %7917 = vtanh.f32 %v4219_v60  ;;  %v4224_v30 = vadd.f32 %v4208_v45, %v4162_v34 }
0x1651   :  { %v4222_v63 = vadd.f32 %v4206_v53, %v4160_v7  ;;  %v4223_v21 = vadd.f32 %v4207_v6, %v4161_v58  ;;  %v4225_v26 = vadd.f32 %v4209_v20, %v4163_v47  ;;  %v4226_v13 = vadd.f32 %v4210_v10, %v4164_v54 }
0x1652   :  { %7919 = vtanh.f32 %v4220_v40  ;;  %v7258_v29 = vmul.f32 -1.442695, %v4221_v55  ;;  %v7256_v42 = vmul.f32 -1.442695, %v4219_v60  ;;  %v7257_v38 = vmul.f32 -1.442695, %v4220_v40 }
0x1653   :  { %7921 = vtanh.f32 %v4221_v55  ;;  %v7260_v32 = vmul.f32 -1.442695, %v4223_v21  ;;  %v7263_v0 = vmul.f32 -1.442695, %v4226_v13  ;;  %v7261_v37 = vmul.f32 -1.442695, %v4224_v30 }
0x1654   :  { %7923 = vtanh.f32 %v4224_v30  ;;  %v7259_v24 = vmul.f32 -1.442695, %v4222_v63  ;;  %v7262_v7 = vmul.f32 -1.442695, %v4225_v26 }
0x1655   :  { %7925 = vtanh.f32 %v4222_v63 }
0x1656   :  { %v7918_v19 = vpop.eup %7917  ;;  %7927 = vtanh.f32 %v4223_v21 }
0x1657   :  { %4403 = vrot.lane.b32.xlu0 %v7918_v19, %s8646_s6  ;;  %7929 = vtanh.f32 %v4225_v26 }
0x1658   :  { %v7920_v36 = vpop.eup %7919  ;;  %7931 = vtanh.f32 %v4226_v13 }
0x1659   :  { %v7922_v22 = vpop.eup %7921  ;;  %4405 = vrot.lane.b32.xlu1 %v7920_v36, %s8646_s6  ;;  %7933 = vpow2.f32 %v7258_v29 }
0x165a   :  { %4407 = vrot.lane.b32.xlu2 %v7922_v22, %s8646_s6  ;;  %v7924_v43 = vpop.eup %7923  ;;  %7935 = vpow2.f32 %v7260_v32 }
0x165b   :  { %v7926_v52 = vpop.eup %7925 }
0x165c   :  { %v7928_v8 = vpop.eup %7927 }
0x165d   :  { %v7930_v4 = vpop.eup %7929 }
0x165e   :  { %v7932_v17 = vpop.eup %7931 }
0x165f   :  { %4413 = vrot.lane.b32.xlu0 %v7924_v43, %s8646_s6  ;;  %v7934_v5 = vpop.eup %7933 }
0x1660   :  { %v4253_v3 = vadd.f32 1.0, %v7934_v5  ;;  %v7936_v1 = vpop.eup %7935 }
0x1661   :  { %4409 = vrot.lane.b32.xlu1 %v7926_v52, %s8646_s6  ;;  %v10945_v25 = vadd.f32 1.0, %v7936_v1 }
0x1662   :  { %4411 = vrot.lane.b32.xlu2 %v7928_v8, %s8646_s6  ;;  %7937 = vrcp.f32 %v4253_v3  ;;  %v4300_v34 = vand.u32 2147483648, %v4253_v3  ;;  %vm4294_vm11 = vweird.f32 %v4253_v3  ;;  %v4298_v58 = vand.u32 2147483647, %v4253_v3 }
0x1663   :  { %7939 = vpow2.f32 %v7263_v0  ;;  %vm4324_vm14 = vweird.f32 %v10945_v25 }
0x1664   :  { %7941 = vrcp.f32 %v10945_v25  ;;  %v4301_v22 = vor.u32 1.1754944e-38, %v4300_v34  ;;  %vm4299_vm12 = vcmp.eq.f32.partialorder %v4298_v58, 8.507059e+37 }
0x1665   :  { %7943 = vpow2.f32 %v7256_v42 }
0x1666   :  { %7945 = vpow2.f32 %v7257_v38 }
0x1668   :  { %v7938_v57 = vpop.eup %7937 }
0x1669   :  { %4415 = vrot.lane.b32.xlu1 %v7930_v4, %s8646_s6  ;;  %v7940_v46 = vpop.eup %7939  ;;  %v4290_v39 = vmul.f32 %v7938_v57, %v4253_v3  ;;  %vm4295_vm2 = vweird.f32 %v7938_v57  ;;  %v4330_v4 = vand.u32 2147483648, %v10945_v25 }
0x166a   :  { %4417 = vrot.lane.b32.xlu2 %v7932_v17, %s8646_s6  ;;  %v10948_v41 = vadd.f32 1.0, %v7940_v46  ;;  %v7942_v50 = vpop.eup %7941  ;;  %vm4296_vm3 = vmor %vm4294_vm11, %vm4295_vm2  ;;  %v4328_v17 = vand.u32 2147483647, %v10945_v25 }
0x166b   :  { %v4291_v9 = vsub.f32 1.0, %v4290_v39  ;;  %v7944_v28 = vpop.eup %7943  ;;  %v4320_v60 = vmul.f32 %v7942_v50, %v10945_v25  ;;  %vm4325_vm13 = vweird.f32 %v7942_v50  ;;  %v4331_v1 = vor.u32 1.1754944e-38, %v4330_v4 }
0x166c   :  { %v7946_v16 = vpop.eup %7945  ;;  %7947 = vrcp.f32 %v10948_v41  ;;  %v10952_v40 = vadd.f32 1.0, %v7944_v28  ;;  %vm4326_vm15 = vmor %vm4324_vm14, %vm4325_vm13  ;;  %vm4329_vm1 = vcmp.eq.f32.partialorder %v4328_v17, 8.507059e+37  ;;  %vm4369_vm11 = vweird.f32 %v10948_v41 }
0x166d   :  { %v4292_v51 = vmul.f32 %v7938_v57, %v4291_v9  ;;  %7949 = vpow2.f32 %v7261_v37  ;;  %v10954_v55 = vadd.f32 1.0, %v7946_v16  ;;  %v4321_v53 = vsub.f32 1.0, %v4320_v60 }
0x166e   :  { %7951 = vpow2.f32 %v7259_v24  ;;  %v4373_v28 = vand.u32 2147483647, %v10948_v41 }
0x166f   :  { %v4293_v45 = vadd.f32 %v7938_v57, %v4292_v51  ;;  %7953 = vrcp.f32 %v10952_v40  ;;  %v4322_v21 = vmul.f32 %v7942_v50, %v4321_v53 }
0x1670   :  { %7955 = vrcp.f32 %v10954_v55 }
0x1671   :  { %v4297_v19 = vsel %vm4296_vm3, %v7938_v57, %v4293_v45  ;;  %7957 = vpow2.f32 %v7262_v7  ;;  %v4323_v52 = vadd.f32 %v7942_v50, %v4322_v21  ;;  %v4270_v7 = vand.u32 2147483648, %v10952_v40 }
0x1672   :  { %v10956_v6 = vpop.eup %7947  ;;  %v10968_v26 = vsel %vm4299_vm12, %v4301_v22, %v4297_v19  ;;  %vm4374_vm12 = vcmp.eq.f32.partialorder %v4373_v28, 8.507059e+37  ;;  %v4268_v22 = vand.u32 2147483647, %v10952_v40 }
0x1673   :  { %v7950_v30 = vpop.eup %7949  ;;  %v4365_v36 = vmul.f32 %v10956_v6, %v10948_v41  ;;  %v4327_v3 = vsel %vm4326_vm15, %v7942_v50, %v4323_v52  ;;  %vm4370_vm2 = vweird.f32 %v10956_v6  ;;  %v4375_v50 = vand.u32 2147483648, %v10948_v41 }
0x1674   :  { %v7952_v63 = vpop.eup %7951  ;;  %v10962_v20 = vadd.f32 1.0, %v7950_v30  ;;  %v10988_v25 = vsel %vm4329_vm1, %v4331_v1, %v4327_v3  ;;  %vm4371_vm3 = vmor %vm4369_vm11, %vm4370_vm2  ;;  %vm4264_vm15 = vweird.f32 %v10952_v40  ;;  %vm4279_vm2 = vweird.f32 %v10954_v55 }
0x1675   :  { %v10964_v10 = vadd.f32 1.0, %v7952_v63  ;;  %v10966_v47 = vpop.eup %7953  ;;  %v4366_v8 = vsub.f32 1.0, %v4365_v36  ;;  %v4376_v34 = vor.u32 1.1754944e-38, %v4375_v50  ;;  %v4271_v4 = vor.u32 1.1754944e-38, %v4270_v7 }
0x1676   :  { %v10970_v43 = vpop.eup %7955  ;;  %7959 = vrcp.f32 %v10962_v20  ;;  %v4260_v29 = vmul.f32 %v10966_v47, %v10952_v40  ;;  %vm4265_vm13 = vweird.f32 %v10966_v47 }
0x1677   :  { %7961 = vrcp.f32 %v10964_v10  ;;  %v7958_v32 = vpop.eup %7957  ;;  %v4275_v5 = vmul.f32 %v10970_v43, %v10954_v55  ;;  %v4367_v0 = vmul.f32 %v10956_v6, %v4366_v8  ;;  %vm4280_vm14 = vweird.f32 %v10970_v43  ;;  %vm4266_vm1 = vmor %vm4264_vm15, %vm4265_vm13 }
0x1678   :  { %v4261_v42 = vsub.f32 1.0, %v4260_v29  ;;  %v10984_v57 = vadd.f32 1.0, %v7958_v32  ;;  %vm4281_vm11 = vmor %vm4279_vm2, %vm4280_vm14  ;;  %vm4339_vm15 = vweird.f32 %v10962_v20  ;;  %vm4309_vm2 = vweird.f32 %v10964_v10 }
0x1679   :  { %v4276_v39 = vsub.f32 1.0, %v4275_v5  ;;  %v4368_v24 = vadd.f32 %v10956_v6, %v4367_v0  ;;  %v4313_v50 = vand.u32 2147483647, %v10964_v10 }
0x167a   :  { %v4262_v16 = vmul.f32 %v10966_v47, %v4261_v42  ;;  %7963 = vrcp.f32 %v10984_v57 }
0x167b   :  { %v4277_v60 = vmul.f32 %v10970_v43, %v4276_v39  ;;  %v4372_v53 = vsel %vm4371_vm3, %v10956_v6, %v4368_v24  ;;  %vm4269_vm3 = vcmp.eq.f32.partialorder %v4268_v22, 8.507059e+37  ;;  %v4315_v24 = vand.u32 2147483648, %v10964_v10 }
0x167c   :  { %v10986_v38 = vpop.eup %7959  ;;  %v4263_v41 = vadd.f32 %v10966_v47, %v4262_v16  ;;  %v11010_v58 = vsel %vm4374_vm12, %v4376_v34, %v4372_v53 }
0x167d   :  { %v10990_v9 = vpop.eup %7961  ;;  %v4335_v51 = vmul.f32 %v10986_v38, %v10962_v20  ;;  %v4278_v19 = vadd.f32 %v10970_v43, %v4277_v60  ;;  %vm4340_vm13 = vweird.f32 %v10986_v38 }
0x167e   :  { %v4305_v45 = vmul.f32 %v10990_v9, %v10964_v10  ;;  %v4267_v52 = vsel %vm4266_vm1, %v10966_v47, %v4263_v41  ;;  %vm4310_vm14 = vweird.f32 %v10990_v9  ;;  %vm4341_vm1 = vmor %vm4339_vm15, %vm4340_vm13 }
0x167f   :  { %v4336_v30 = vsub.f32 1.0, %v4335_v51  ;;  %v4282_v17 = vsel %vm4281_vm11, %v10970_v43, %v4278_v19  ;;  %v11029_v3 = vsel %vm4269_vm3, %v4271_v4, %v4267_v52  ;;  %vm4311_vm11 = vmor %vm4309_vm2, %vm4310_vm14  ;;  %vm4354_vm14 = vweird.f32 %v10984_v57 }
0x1680   :  { %v4306_v21 = vsub.f32 1.0, %v4305_v45  ;;  %v11014_v36 = vpop.eup %7963  ;;  %v4316_v45 = vor.u32 1.1754944e-38, %v4315_v24 }
0x1681   :  { %v4337_v8 = vmul.f32 %v10986_v38, %v4336_v30  ;;  %v4350_v40 = vmul.f32 %v11014_v36, %v10984_v57  ;;  %vm4355_vm13 = vweird.f32 %v11014_v36  ;;  %v4358_v30 = vand.u32 2147483647, %v10984_v57 }
0x1682   :  { %v4307_v29 = vmul.f32 %v10990_v9, %v4306_v21  ;;  %vm4356_vm15 = vmor %vm4354_vm14, %vm4355_vm13 }
0x1683   :  { %v4338_v43 = vadd.f32 %v10986_v38, %v4337_v8  ;;  %v4351_v39 = vsub.f32 1.0, %v4350_v40 }
0x1685   :  { %v4342_v28 = vsel %vm4341_vm1, %v10986_v38, %v4338_v43  ;;  %v4352_v60 = vmul.f32 %v11014_v36, %v4351_v39  ;;  %vm4359_vm1 = vcmp.eq.f32.partialorder %v4358_v30, 8.507059e+37 }
0x1687   :  { %v4353_v38 = vadd.f32 %v11014_v36, %v4352_v60 }
0x16b4   :  { %v4408_v54 = vpop.permute.xlu2 %4407 }
0x16b5   :  { %v4429_v13 = vmul.f32 %v4408_v54, %v10968_v26  ;;  %v4285_v54 = vand.u32 2147483648, %v10954_v55 }
0x16b7   :  { %4447 = vrot.lane.b32.xlu1 %v4429_v13, %s8647_s7  ;;  %v4283_v13 = vand.u32 2147483647, %v10954_v55  ;;  %v4286_v32 = vor.u32 1.1754944e-38, %v4285_v54  ;;  %v4345_v55 = vand.u32 2147483648, %v10962_v20  ;;  %v4387_v54 = vmul.f32 %v11029_v3, %v10853_v56 }
0x16b8   :  { %v4391_v56 = vmul.f32 %v10988_v25, %v10862_v62 }
0x16b9   :  { %vm4284_vm12 = vcmp.eq.f32.partialorder %v4283_v13, 8.507059e+37  ;;  %v4346_v16 = vor.u32 1.1754944e-38, %v4345_v55  ;;  %v4394_v55 = vmul.f32 %v11010_v58, %v10887_v59 }
0x16ba   :  { %v11033_v1 = vsel %vm4284_vm12, %v4286_v32, %v4282_v17  ;;  %vm4314_vm12 = vcmp.eq.f32.partialorder %v4313_v50, 8.507059e+37 }
0x16bb   :  { %v4388_v43 = vmul.f32 %v11033_v1, %v10867_v14 }
0x16bc   :  { %v4412_v46 = vpop.permute.xlu2 %4411 }
0x16bd   :  { %v4431_v37 = vmul.f32 %v4412_v46, %v10988_v25  ;;  %v4308_v46 = vadd.f32 %v10990_v9, %v4307_v29 }
0x16bf   :  { %4451 = vrot.lane.b32.xlu1 %v4431_v37, %s8647_s7  ;;  %v4343_v37 = vand.u32 2147483647, %v10962_v20  ;;  %v4312_v51 = vsel %vm4311_vm11, %v10990_v9, %v4308_v46  ;;  %v4360_v9 = vand.u32 2147483648, %v10984_v57  ;;  %v4389_v57 = vmul.f32 %v10968_v26, %v10858_v33 }
0x16c0   :  { %v11053_v7 = vsel %vm4314_vm12, %v4316_v45, %v4312_v51 }
0x16c1   :  { %vm4344_vm3 = vcmp.eq.f32.partialorder %v4343_v37, 8.507059e+37  ;;  %v4361_v19 = vor.u32 1.1754944e-38, %v4360_v9  ;;  %v4390_v59 = vmul.f32 %v11053_v7, %v10873_v27 }
0x16c2   :  { %v11050_v53 = vsel %vm4344_vm3, %v4346_v16, %v4342_v28 }
0x16c3   :  { %v4392_v4 = vmul.f32 %v11050_v53, %v10878_v2 }
0x16c4   :  { %v4418_v63 = vpop.permute.xlu2 %4417 }
0x16c5   :  { %v4434_v6 = vmul.f32 %v4418_v63, %v11010_v58  ;;  %v4357_v63 = vsel %vm4356_vm15, %v11014_v36, %v4353_v38 }
0x16c6   :  { %v11064_v21 = vsel %vm4359_vm1, %v4361_v19, %v4357_v63 }
0x16c7   :  { %4457 = vrot.lane.b32.xlu1 %v4434_v6, %s8647_s7  ;;  %v4393_v14 = vmul.f32 %v11064_v21, %v10882_v49 }
0x16c9   :  { %v4404_v5 = vpop.permute.xlu0 %4403 }
0x16ca   :  { %v4427_v47 = vmul.f32 %v4404_v5, %v11029_v3 }
0x16cb   :  { %v4406_v0 = vpop.permute.xlu1 %4405 }
0x16cc   :  { %v4428_v42 = vmul.f32 %v4406_v0, %v11033_v1  ;;  %4443 = vrot.lane.b32.xlu2 %v4427_v47, %s8647_s7 }
0x16ce   :  { %4445 = vrot.lane.b32.xlu0 %v4428_v42, %s8647_s7 }
0x16d1   :  { %v4414_v20 = vpop.permute.xlu0 %4413 }
0x16d2   :  { %v4432_v34 = vmul.f32 %v4414_v20, %v11050_v53 }
0x16d3   :  { %v4410_v41 = vpop.permute.xlu1 %4409 }
0x16d4   :  { %v4430_v10 = vmul.f32 %v4410_v41, %v11053_v7  ;;  %4453 = vrot.lane.b32.xlu2 %v4432_v34, %s8647_s7 }
0x16d6   :  { %4449 = vrot.lane.b32.xlu0 %v4430_v10, %s8647_s7 }
0x16db   :  { %v4416_v6 = vpop.permute.xlu1 %4415 }
0x16dc   :  { %v4433_v22 = vmul.f32 %v4416_v6, %v11064_v21 }
0x16de   :  { %4455 = vrot.lane.b32.xlu0 %v4433_v22, %s8647_s7 }
0x1726   :  { %v4444_v13 = vpop.permute.xlu2 %4443 }
0x1727   :  { %v11070_v52 = vadd.f32 %v4444_v13, %v4387_v54 }
0x1729   :  { %v4448_v8 = vpop.permute.xlu1 %4447  ;;  %7965 = vtanh.f32 %v11070_v52 }
0x172a   :  { %v11075_v36 = vadd.f32 %v4448_v8, %v4389_v57 }
0x172c   :  { %7967 = vtanh.f32 %v11075_v36 }
0x172e   :  { %v4454_v17 = vpop.permute.xlu2 %4453 }
0x172f   :  { %v7966_v29 = vpop.eup %7965  ;;  %v11080_v40 = vadd.f32 %v4454_v17, %v4392_v4 }
0x1730   :  { %4491 = vrot.lane.b32.xlu1 %v7966_v29, %s8646_s6 }
0x1731   :  { %v4452_v33 = vpop.permute.xlu1 %4451  ;;  %7969 = vtanh.f32 %v11080_v40 }
0x1732   :  { %v7968_v32 = vpop.eup %7967  ;;  %v11086_v5 = vadd.f32 %v4452_v33, %v4391_v56 }
0x1733   :  { %4495 = vrot.lane.b32.xlu0 %v7968_v32, %s8646_s6 }
0x1734   :  { %7971 = vtanh.f32 %v11086_v5 }
0x1737   :  { %v7970_v2 = vpop.eup %7969 }
0x1738   :  { %4501 = vrot.lane.b32.xlu1 %v7970_v2, %s8646_s6  ;;  %v11157_v2 = vld [vmem:[#allocation6 + $0x18] sm:$0xff] }
0x1739   :  { %v4458_v47 = vpop.permute.xlu1 %4457 }
0x173a   :  { %v7972_v62 = vpop.eup %7971  ;;  %v11093_v0 = vadd.f32 %v4458_v47, %v4394_v55  ;;  %v11163_v55 = vld [vmem:[#allocation6 + $0x8] sm:$0xff]  ;;  %v11166_v47 = vld [vmem:[#allocation6] sm:$0xff] }
0x173b   :  { %4499 = vrot.lane.b32.xlu0 %v7972_v62, %s8646_s6 }
0x173c   :  { %7973 = vtanh.f32 %v11093_v0 }
0x1740   :  { %v4446_v42 = vpop.permute.xlu0 %4445 }
0x1741   :  { %v11099_v46 = vadd.f32 %v4446_v42, %v4388_v43  ;;  %v4563_v43 = vld [vmem:[#allocation11 + $0x2] sm:$0x1] }
0x1742   :  { %v7974_v39 = vpop.eup %7973 }
0x1743   :  { %7975 = vtanh.f32 %v11099_v46  ;;  %4505 = vrot.lane.b32.xlu0 %v7974_v39, %s8646_s6 }
0x1748   :  { %v4450_v37 = vpop.permute.xlu0 %4449 }
0x1749   :  { %v7976_v24 = vpop.eup %7975  ;;  %v11105_v50 = vadd.f32 %v4450_v37, %v4390_v59  ;;  %v4564_v59 = vld [vmem:[#allocation11 + $0xa] sm:$0x1]  ;;  %v4565_v37 = vld [vmem:[#allocation11 + $0x12] sm:$0x1] }
0x174a   :  { %4493 = vrot.lane.b32.xlu2 %v7976_v24, %s8646_s6 }
0x174b   :  { %7977 = vtanh.f32 %v11105_v50 }
0x1750   :  { %v4456_v28 = vpop.permute.xlu0 %4455 }
0x1751   :  { %v7978_v16 = vpop.eup %7977  ;;  %v11111_v51 = vadd.f32 %v4456_v28, %v4393_v14 }
0x1752   :  { %4497 = vrot.lane.b32.xlu2 %v7978_v16, %s8646_s6 }
0x1753   :  { %7979 = vtanh.f32 %v11111_v51 }
0x1759   :  { %v7980_v27 = vpop.eup %7979 }
0x175a   :  { %4503 = vrot.lane.b32.xlu2 %v7980_v27, %s8646_s6 }
0x17a2   :  { %v4492_v45 = vpop.permute.xlu1 %4491 }
0x17a3   :  { %v11124_v10 = vmul.f32 %v4492_v45, %v11029_v3  ;;  %v4568_v45 = vld [vmem:[#allocation11 + $0x2a] sm:$0x1] }
0x17a4   :  { %v4494_v60 = vpop.permute.xlu2 %4493 }
0x17a5   :  { %v4496_v20 = vpop.permute.xlu0 %4495  ;;  %v11117_v34 = vmul.f32 %v4494_v60, %v11033_v1 }
0x17a6   :  { %v11120_v41 = vmul.f32 %v4496_v20, %v10968_v26  ;;  %v4566_v20 = vld [vmem:[#allocation11 + $0x1a] sm:$0x1] }
0x17a7   :  { %v4571_v49 = vrot.slane %v11117_v34, 7 }
0x17a8   :  { %v4573_v9 = vrot.slane %v11120_v41, 6 }
0x17a9   :  { %v4572_v19 = vsel %vm753_vm4, %v4571_v49, %v11124_v10 }
0x17aa   :  { %v4502_v26 = vpop.permute.xlu1 %4501  ;;  %v4574_v3 = vsel %vm756_vm5, %v4573_v9, %v4572_v19 }
0x17ab   :  { %v11139_v54 = vmul.f32 %v4502_v26, %v11050_v53 }
0x17ac   :  { %v4498_v38 = vpop.permute.xlu2 %4497 }
0x17ad   :  { %v4500_v30 = vpop.permute.xlu0 %4499  ;;  %v11128_v63 = vmul.f32 %v4498_v38, %v11053_v7  ;;  %v4579_v4 = vrot.slane %v11139_v54, 3  ;;  %v4567_v38 = vld [vmem:[#allocation11 + $0x22] sm:$0x1] }
0x17ae   :  { %v11133_v1 = vmul.f32 %v4500_v30, %v10988_v25 }
0x17af   :  { %v4575_v6 = vrot.slane %v11128_v63, 5 }
0x17b0   :  { %v4577_v22 = vrot.slane %v11133_v1, 4 }
0x17b1   :  { %v4576_v13 = vsel %vm759_vm6, %v4575_v6, %v4574_v3 }
0x17b2   :  { %v4578_v25 = vsel %vm762_vm7, %v4577_v22, %v4576_v13  ;;  %v4569_v13 = vld [vmem:[#allocation11 + $0x32] sm:$0x1] }
0x17b3   :  { %v4580_v53 = vsel %vm765_vm8, %v4579_v4, %v4578_v25 }
0x17b4   :  { %v4504_v7 = vpop.permute.xlu2 %4503 }
0x17b5   :  { %v4506_v57 = vpop.permute.xlu0 %4505  ;;  %v11143_v8 = vmul.f32 %v4504_v7, %v11064_v21  ;;  %v4570_v7 = vld [vmem:[#allocation11 + $0x3a] sm:$0x1] }
0x17b6   :  { %v11148_v17 = vmul.f32 %v4506_v57, %v11010_v58  ;;  %v11160_v58 = vld [vmem:[#allocation6 + $0x10] sm:$0xff] }
0x17b7   :  { %v4581_v29 = vrot.slane %v11143_v8, 2 }
0x17b8   :  { %12778 = vst [vmem:[#allocation53_spill] sm:$0xff] %v11148_v17  ;;  %v4583_v56 = vrot.slane %v11148_v17, 1 }
0x17b9   :  { %v4582_v33 = vsel %vm768_vm9, %v4581_v29, %v4580_v53 }
0x17ba   :  { %v4584_v32 = vsel %vm771_vm10, %v4583_v56, %v4582_v33 }
0x17bb   :  { %4585 = vrot.lane.b32.xlu1 %v4584_v32, %s8647_s7 }
0x182d   :  { %v4586_v21 = vpop.permute.xlu1 %4585 }
0x182e   :  { %7264 = vmatmul.msk.f32.vlgmr.msrb.gmra.mxu1 %vm203_vm0, %v4586_v21 }
0x182f   :  { %6225 = vmatpush.msrb.mxu1 %v11157_v2 }
0x1831   :  { %6226 = vmatpush.msrb.mxu1 %v11160_v58 }
0x1833   :  { %6227 = vmatpush.msrb.mxu1 %v11163_v55 }
0x1835   :  { %6228 = vmatpush.msrb.mxu1 %v11166_v47 }
0x18ab   :  { %v4606_v62 = vpop.f32.mrf.mxu1 }
0x18ac   :  { %v4610_v42 = vrot.slane %v4606_v62, 1  ;;  %v4611_v39 = vrot.slane %v4606_v62, 2  ;;  %v4625_v24 = vadd.f32 %v4606_v62, %v4563_v43  ;;  %v4614_v16 = vrot.slane %v4606_v62, 5 }
0x18ad   :  { %v4612_v27 = vrot.slane %v4606_v62, 3  ;;  %v4613_v60 = vrot.slane %v4606_v62, 4  ;;  %v4615_v22 = vrot.slane %v4606_v62, 6  ;;  %v4616_v3 = vrot.slane %v4606_v62, 7 }
0x18ae   :  { %v4626_v14 = vadd.f32 %v4610_v42, %v4564_v59  ;;  %v4627_v28 = vadd.f32 %v4611_v39, %v4565_v37  ;;  %7981 = vtanh.f32 %v4625_v24  ;;  %v4630_v49 = vadd.f32 %v4614_v16, %v4568_v45 }
0x18af   :  { %v4628_v9 = vadd.f32 %v4612_v27, %v4566_v20  ;;  %v4629_v19 = vadd.f32 %v4613_v60, %v4567_v38  ;;  %v4631_v57 = vadd.f32 %v4615_v22, %v4569_v13  ;;  %v4632_v4 = vadd.f32 %v4616_v3, %v4570_v7 }
0x18b0   :  { %7983 = vtanh.f32 %v4626_v14  ;;  %v7266_v32 = vmul.f32 -1.442695, %v4626_v14  ;;  %v7265_v16 = vmul.f32 -1.442695, %v4625_v24  ;;  %v7267_v27 = vmul.f32 -1.442695, %v4627_v28 }
0x18b1   :  { %7985 = vtanh.f32 %v4627_v28  ;;  %v7268_v21 = vmul.f32 -1.442695, %v4628_v9  ;;  %v7271_v42 = vmul.f32 -1.442695, %v4631_v57 }
0x18b2   :  { %7987 = vtanh.f32 %v4630_v49 }
0x18b3   :  { %7989 = vtanh.f32 %v4628_v9  ;;  %v7270_v9 = vmul.f32 -1.442695, %v4630_v49 }
0x18b4   :  { %v7982_v30 = vpop.eup %7981  ;;  %7991 = vtanh.f32 %v4629_v19 }
0x18b5   :  { %4809 = vrot.lane.b32.xlu1 %v7982_v30, %s8646_s6  ;;  %7993 = vtanh.f32 %v4631_v57 }
0x18b6   :  { %v7984_v26 = vpop.eup %7983  ;;  %7995 = vtanh.f32 %v4632_v4 }
0x18b7   :  { %v7986_v6 = vpop.eup %7985  ;;  %4811 = vrot.lane.b32.xlu2 %v7984_v26, %s8646_s6  ;;  %7997 = vpow2.f32 %v7266_v32  ;;  %v7269_v26 = vmul.f32 -1.442695, %v4629_v19 }
0x18b8   :  { %4813 = vrot.lane.b32.xlu0 %v7986_v6, %s8646_s6  ;;  %v7988_v25 = vpop.eup %7987  ;;  %7999 = vpow2.f32 %v7268_v21 }
0x18b9   :  { %v7990_v29 = vpop.eup %7989 }
0x18ba   :  { %v7992_v56 = vpop.eup %7991 }
0x18bb   :  { %v7994_v53 = vpop.eup %7993 }
0x18bc   :  { %v7996_v33 = vpop.eup %7995 }
0x18bd   :  { %4819 = vrot.lane.b32.xlu1 %v7988_v25, %s8646_s6  ;;  %v7998_v62 = vpop.eup %7997 }
0x18be   :  { %v4658_v43 = vadd.f32 1.0, %v7998_v62  ;;  %v8000_v39 = vpop.eup %7999 }
0x18bf   :  { %4815 = vrot.lane.b32.xlu2 %v7990_v29, %s8646_s6  ;;  %v11177_v59 = vadd.f32 1.0, %v8000_v39  ;;  %v7272_v29 = vmul.f32 -1.442695, %v4632_v4 }
0x18c0   :  { %4817 = vrot.lane.b32.xlu0 %v7992_v56, %s8646_s6  ;;  %8001 = vrcp.f32 %v4658_v43  ;;  %v4691_v49 = vand.u32 2147483648, %v4658_v43  ;;  %vm4685_vm11 = vweird.f32 %v4658_v43  ;;  %v4689_v25 = vand.u32 2147483647, %v4658_v43 }
0x18c1   :  { %8003 = vpow2.f32 %v7271_v42  ;;  %vm4715_vm14 = vweird.f32 %v11177_v59 }
0x18c2   :  { %8005 = vrcp.f32 %v11177_v59  ;;  %v4692_v21 = vor.u32 1.1754944e-38, %v4691_v49  ;;  %vm4690_vm12 = vcmp.eq.f32.partialorder %v4689_v25, 8.507059e+37 }
0x18c3   :  { %8007 = vpow2.f32 %v7265_v16 }
0x18c4   :  { %8009 = vpow2.f32 %v7267_v27 }
0x18c6   :  { %v8002_v37 = vpop.eup %8001 }
0x18c7   :  { %4821 = vrot.lane.b32.xlu2 %v7994_v53, %s8646_s6  ;;  %v8004_v60 = vpop.eup %8003  ;;  %v4681_v45 = vmul.f32 %v8002_v37, %v4658_v43  ;;  %vm4686_vm2 = vweird.f32 %v8002_v37 }
0x18c8   :  { %4823 = vrot.lane.b32.xlu0 %v7996_v33, %s8646_s6  ;;  %v11180_v14 = vadd.f32 1.0, %v8004_v60  ;;  %v8006_v38 = vpop.eup %8005  ;;  %vm4687_vm3 = vmor %vm4685_vm11, %vm4686_vm2  ;;  %v4721_v60 = vand.u32 2147483648, %v11177_v59 }
0x18c9   :  { %v4682_v20 = vsub.f32 1.0, %v4681_v45  ;;  %v8008_v30 = vpop.eup %8007  ;;  %v4711_v22 = vmul.f32 %v8006_v38, %v11177_v59  ;;  %vm4716_vm13 = vweird.f32 %v8006_v38 }
0x18ca   :  { %8011 = vrcp.f32 %v11180_v14  ;;  %v8010_v24 = vpop.eup %8009  ;;  %v11184_v3 = vadd.f32 1.0, %v8008_v30  ;;  %vm4717_vm15 = vmor %vm4715_vm14, %vm4716_vm13  ;;  %vm4760_vm11 = vweird.f32 %v11180_v14 }
0x18cb   :  { %v4683_v6 = vmul.f32 %v8002_v37, %v4682_v20  ;;  %8013 = vpow2.f32 %v7270_v9  ;;  %v4712_v13 = vsub.f32 1.0, %v4711_v22  ;;  %v11186_v7 = vadd.f32 1.0, %v8010_v24 }
0x18cc   :  { %8015 = vpow2.f32 %v7269_v26  ;;  %v4719_v20 = vand.u32 2147483647, %v11177_v59  ;;  %v4722_v22 = vor.u32 1.1754944e-38, %v4721_v60  ;;  %vm4670_vm14 = vweird.f32 %v11184_v3 }
0x18cd   :  { %v4684_v28 = vadd.f32 %v8002_v37, %v4683_v6  ;;  %8017 = vrcp.f32 %v11184_v3  ;;  %v4713_v53 = vmul.f32 %v8006_v38, %v4712_v13 }
0x18ce   :  { %8019 = vrcp.f32 %v11186_v7  ;;  %vm4720_vm1 = vcmp.eq.f32.partialorder %v4719_v20, 8.507059e+37 }
0x18cf   :  { %v4688_v56 = vsel %vm4687_vm3, %v8002_v37, %v4684_v28  ;;  %8021 = vpow2.f32 %v7272_v29  ;;  %v4714_v37 = vadd.f32 %v8006_v38, %v4713_v53  ;;  %v4766_v29 = vand.u32 2147483648, %v11180_v14 }
0x18d0   :  { %v11188_v57 = vpop.eup %8011  ;;  %v11196_v39 = vsel %vm4690_vm12, %v4692_v21, %v4688_v56 }
0x18d1   :  { %v8014_v19 = vpop.eup %8013  ;;  %v4756_v33 = vmul.f32 %v11188_v57, %v11180_v14  ;;  %v4718_v30 = vsel %vm4717_vm15, %v8006_v38, %v4714_v37  ;;  %vm4761_vm2 = vweird.f32 %v11188_v57 }
0x18d2   :  { %v8016_v32 = vpop.eup %8015  ;;  %v11194_v62 = vadd.f32 1.0, %v8014_v19  ;;  %v11216_v28 = vsel %vm4720_vm1, %v4722_v22, %v4718_v30  ;;  %vm4762_vm3 = vmor %vm4760_vm11, %vm4761_vm2  ;;  %vm4700_vm2 = vweird.f32 %v11186_v7 }
0x18d3   :  { %v11198_v43 = vpop.eup %8017  ;;  %v4757_v16 = vsub.f32 1.0, %v4756_v33  ;;  %v11201_v27 = vadd.f32 1.0, %v8016_v32  ;;  %v4764_v33 = vand.u32 2147483647, %v11180_v14 }
0x18d4   :  { %v11204_v45 = vpop.eup %8019  ;;  %8023 = vrcp.f32 %v11194_v62  ;;  %v4666_v9 = vmul.f32 %v11198_v43, %v11184_v3  ;;  %vm4671_vm13 = vweird.f32 %v11198_v43 }
0x18d5   :  { %v4758_v26 = vmul.f32 %v11188_v57, %v4757_v16  ;;  %8025 = vrcp.f32 %v11201_v27  ;;  %v8022_v6 = vpop.eup %8021  ;;  %v4696_v24 = vmul.f32 %v11204_v45, %v11186_v7  ;;  %vm4765_vm12 = vcmp.eq.f32.partialorder %v4764_v33, 8.507059e+37  ;;  %vm4672_vm1 = vmor %vm4670_vm14, %vm4671_vm13 }
0x18d6   :  { %v4667_v13 = vsub.f32 1.0, %v4666_v9  ;;  %v11223_v19 = vadd.f32 1.0, %v8022_v6  ;;  %vm4701_vm15 = vweird.f32 %v11204_v45  ;;  %vm4745_vm14 = vweird.f32 %v11194_v62 }
0x18d7   :  { %v4759_v38 = vadd.f32 %v11188_v57, %v4758_v26  ;;  %v4697_v56 = vsub.f32 1.0, %v4696_v24  ;;  %v4674_v26 = vand.u32 2147483647, %v11184_v3  ;;  %vm4702_vm11 = vmor %vm4700_vm2, %vm4701_vm15  ;;  %vm4730_vm2 = vweird.f32 %v11201_v27 }
0x18d8   :  { %v4668_v32 = vmul.f32 %v11198_v43, %v4667_v13  ;;  %8027 = vrcp.f32 %v11223_v19 }
0x18d9   :  { %v4698_v37 = vmul.f32 %v11204_v45, %v4697_v56 }
0x18da   :  { %v11218_v49 = vpop.eup %8023  ;;  %v4669_v20 = vadd.f32 %v11198_v43, %v4668_v32 }
0x18db   :  { %v11226_v53 = vpop.eup %8025  ;;  %v4741_v21 = vmul.f32 %v11218_v49, %v11194_v62  ;;  %v4699_v6 = vadd.f32 %v11204_v45, %v4698_v37  ;;  %vm4746_vm13 = vweird.f32 %v11218_v49 }
0x18dc   :  { %v4726_v16 = vmul.f32 %v11226_v53, %v11201_v27  ;;  %v4673_v13 = vsel %vm4672_vm1, %v11198_v43, %v4669_v20  ;;  %vm4731_vm15 = vweird.f32 %v11226_v53  ;;  %vm4747_vm1 = vmor %vm4745_vm14, %vm4746_vm13  ;;  %vm4775_vm14 = vweird.f32 %v11223_v19 }
0x18dd   :  { %v4742_v9 = vsub.f32 1.0, %v4741_v21 }
0x18de   :  { %v4727_v22 = vsub.f32 1.0, %v4726_v16  ;;  %v11249_v24 = vpop.eup %8027  ;;  %v4751_v16 = vand.u32 2147483648, %v11194_v62 }
0x18df   :  { %v4771_v33 = vmul.f32 %v11249_v24, %v11223_v19  ;;  %vm4776_vm13 = vweird.f32 %v11249_v24 }
0x18e0   :  { %v4728_v56 = vmul.f32 %v11226_v53, %v4727_v22 }
0x18e2   :  { %v4729_v20 = vadd.f32 %v11226_v53, %v4728_v56  ;;  %v4779_v56 = vand.u32 2147483647, %v11223_v19 }
0x1911   :  { %v4812_v42 = vpop.permute.xlu2 %4811 }
0x1912   :  { %v4834_v4 = vmul.f32 %v4812_v42, %v11196_v39  ;;  %v4763_v42 = vsel %vm4762_vm3, %v11188_v57, %v4759_v38  ;;  %v4676_v57 = vand.u32 2147483648, %v11184_v3  ;;  %v4743_v3 = vmul.f32 %v11218_v49, %v4742_v9 }
0x1913   :  { %vm4675_vm3 = vcmp.eq.f32.partialorder %v4674_v26, 8.507059e+37  ;;  %v4772_v9 = vsub.f32 1.0, %v4771_v33  ;;  %v4752_v26 = vor.u32 1.1754944e-38, %v4751_v16 }
0x1914   :  { %4851 = vrot.lane.b32.xlu1 %v4834_v4, %s8647_s7  ;;  %v4767_v4 = vor.u32 1.1754944e-38, %v4766_v29  ;;  %v4677_v38 = vor.u32 1.1754944e-38, %v4676_v57  ;;  %v4703_v29 = vsel %vm4702_vm11, %v11204_v45, %v4699_v6  ;;  %v4749_v45 = vand.u32 2147483647, %v11194_v62  ;;  %vm4732_vm11 = vmor %vm4730_vm2, %vm4731_vm15 }
0x1915   :  { %v4734_v62 = vand.u32 2147483647, %v11201_v27  ;;  %v4733_v6 = vsel %vm4732_vm11, %v11226_v53, %v4729_v20  ;;  %v4773_v22 = vmul.f32 %v11249_v24, %v4772_v9  ;;  %v4781_v53 = vand.u32 2147483648, %v11223_v19  ;;  %vm4777_vm15 = vmor %vm4775_vm14, %vm4776_vm13 }
0x1916   :  { %v11239_v60 = vsel %vm4765_vm12, %v4767_v4, %v4763_v42  ;;  %v11261_v21 = vsel %vm4675_vm3, %v4677_v38, %v4673_v13  ;;  %vm4750_vm3 = vcmp.eq.f32.partialorder %v4749_v45, 8.507059e+37  ;;  %v4796_v20 = vmul.f32 %v11216_v28, %v11105_v50 }
0x1917   :  { %v4799_v50 = vmul.f32 %v11239_v60, %v11111_v51  ;;  %v4793_v51 = vmul.f32 %v11261_v21, %v11070_v52 }
0x1919   :  { %v4816_v59 = vpop.permute.xlu2 %4815 }
0x191a   :  { %v4836_v25 = vmul.f32 %v4816_v59, %v11216_v28  ;;  %v4706_v59 = vand.u32 2147483648, %v11186_v7 }
0x191c   :  { %4855 = vrot.lane.b32.xlu1 %v4836_v25, %s8647_s7  ;;  %v4704_v25 = vand.u32 2147483647, %v11186_v7  ;;  %v4707_v43 = vor.u32 1.1754944e-38, %v4706_v59  ;;  %v4744_v7 = vadd.f32 %v11218_v49, %v4743_v3 }
0x191e   :  { %vm4705_vm12 = vcmp.eq.f32.partialorder %v4704_v25, 8.507059e+37  ;;  %v4748_v57 = vsel %vm4747_vm1, %v11218_v49, %v4744_v7  ;;  %vm4780_vm1 = vcmp.eq.f32.partialorder %v4779_v56, 8.507059e+37 }
0x191f   :  { %v11266_v37 = vsel %vm4705_vm12, %v4707_v43, %v4703_v29  ;;  %v11282_v13 = vsel %vm4750_vm3, %v4752_v26, %v4748_v57  ;;  %vm4735_vm12 = vcmp.eq.f32.partialorder %v4734_v62, 8.507059e+37 }
0x1920   :  { %v4795_v45 = vmul.f32 %v11266_v37, %v11075_v36  ;;  %v4798_v56 = vmul.f32 %v11282_v13, %v11080_v40 }
0x1921   :  { %v4822_v14 = vpop.permute.xlu2 %4821 }
0x1922   :  { %v4839_v30 = vmul.f32 %v4822_v14, %v11239_v60 }
0x1924   :  { %4861 = vrot.lane.b32.xlu1 %v4839_v30, %s8647_s7  ;;  %v4736_v30 = vand.u32 2147483648, %v11201_v27  ;;  %v4774_v27 = vadd.f32 %v11249_v24, %v4773_v22 }
0x1926   :  { %v4737_v25 = vor.u32 1.1754944e-38, %v4736_v30  ;;  %v4778_v33 = vsel %vm4777_vm15, %v11249_v24, %v4774_v27 }
0x1927   :  { %v4810_v32 = vpop.permute.xlu1 %4809 }
0x1928   :  { %v4833_v42 = vmul.f32 %v4810_v32, %v11261_v21  ;;  %v11285_v38 = vsel %vm4735_vm12, %v4737_v25, %v4733_v6  ;;  %v4782_v32 = vor.u32 1.1754944e-38, %v4781_v53 }
0x1929   :  { %v4797_v9 = vmul.f32 %v11285_v38, %v11086_v5 }
0x192a   :  { %v4814_v4 = vpop.permute.xlu0 %4813  ;;  %4849 = vrot.lane.b32.xlu0 %v4833_v42, %s8647_s7  ;;  %v11296_v43 = vsel %vm4780_vm1, %v4782_v32, %v4778_v33 }
0x192b   :  { %v4835_v14 = vmul.f32 %v4814_v4, %v11266_v37  ;;  %v4794_v4 = vmul.f32 %v11196_v39, %v11099_v46  ;;  %v4800_v5 = vmul.f32 %v11296_v43, %v11093_v0 }
0x192d   :  { %4853 = vrot.lane.b32.xlu2 %v4835_v14, %s8647_s7 }
0x192f   :  { %v4820_v59 = vpop.permute.xlu1 %4819 }
0x1930   :  { %v4838_v3 = vmul.f32 %v4820_v59, %v11282_v13 }
0x1932   :  { %v4818_v49 = vpop.permute.xlu0 %4817  ;;  %4859 = vrot.lane.b32.xlu0 %v4838_v3, %s8647_s7 }
0x1933   :  { %v4837_v29 = vmul.f32 %v4818_v49, %v11285_v38 }
0x1935   :  { %4857 = vrot.lane.b32.xlu2 %v4837_v29, %s8647_s7 }
0x193a   :  { %v4824_v42 = vpop.permute.xlu0 %4823 }
0x193b   :  { %v4840_v7 = vmul.f32 %v4824_v42, %v11296_v43 }
0x193d   :  { %4863 = vrot.lane.b32.xlu2 %v4840_v7, %s8647_s7 }
0x1986   :  { %v4852_v16 = vpop.permute.xlu1 %4851 }
0x1987   :  { %v4854_v19 = vpop.permute.xlu2 %4853  ;;  %v11304_v14 = vadd.f32 %v4852_v16, %v4794_v4 }
0x1988   :  { %v11306_v24 = vadd.f32 %v4854_v19, %v4795_v45 }
0x1989   :  { %8029 = vtanh.f32 %v11304_v14 }
0x198a   :  { %8031 = vtanh.f32 %v11306_v24 }
0x198e   :  { %v4856_v46 = vpop.permute.xlu1 %4855 }
0x198f   :  { %v8030_v30 = vpop.eup %8029  ;;  %v4858_v57 = vpop.permute.xlu2 %4857  ;;  %v11314_v36 = vadd.f32 %v4856_v46, %v4796_v20 }
0x1990   :  { %v8032_v62 = vpop.eup %8031  ;;  %v11316_v26 = vadd.f32 %v4858_v57, %v4797_v9  ;;  %4899 = vrot.lane.b32.xlu0 %v8030_v30, %s8646_s6 }
0x1991   :  { %8033 = vtanh.f32 %v11314_v36  ;;  %4901 = vrot.lane.b32.xlu1 %v8032_v62, %s8646_s6 }
0x1992   :  { %8035 = vtanh.f32 %v11316_v26 }
0x1996   :  { %v4862_v6 = vpop.permute.xlu1 %4861 }
0x1997   :  { %v8034_v22 = vpop.eup %8033  ;;  %v4864_v59 = vpop.permute.xlu2 %4863  ;;  %v11326_v25 = vadd.f32 %v4862_v6, %v4799_v50 }
0x1998   :  { %v8036_v3 = vpop.eup %8035  ;;  %v11328_v49 = vadd.f32 %v4864_v59, %v4800_v5  ;;  %4903 = vrot.lane.b32.xlu0 %v8034_v22, %s8646_s6 }
0x1999   :  { %8037 = vtanh.f32 %v11326_v25  ;;  %4905 = vrot.lane.b32.xlu1 %v8036_v3, %s8646_s6 }
0x199a   :  { %8039 = vtanh.f32 %v11328_v49 }
0x199c   :  { %v4850_v0 = vpop.permute.xlu0 %4849 }
0x199d   :  { %v11336_v29 = vadd.f32 %v4850_v0, %v4793_v51 }
0x199f   :  { %v8038_v27 = vpop.eup %8037  ;;  %8041 = vtanh.f32 %v11336_v29 }
0x19a0   :  { %v8040_v53 = vpop.eup %8039  ;;  %4909 = vrot.lane.b32.xlu0 %v8038_v27, %s8646_s6 }
0x19a1   :  { %4911 = vrot.lane.b32.xlu1 %v8040_v53, %s8646_s6 }
0x19a4   :  { %v4860_v33 = vpop.permute.xlu0 %4859 }
0x19a5   :  { %v8042_v32 = vpop.eup %8041  ;;  %v11343_v42 = vadd.f32 %v4860_v33, %v4798_v56 }
0x19a6   :  { %4897 = vrot.lane.b32.xlu2 %v8042_v32, %s8646_s6  ;;  %v4969_v32 = vld [vmem:[#allocation11 + $0x3] sm:$0x1] }
0x19a7   :  { %8043 = vtanh.f32 %v11343_v42 }
0x19ad   :  { %v8044_v52 = vpop.eup %8043 }
0x19ae   :  { %4907 = vrot.lane.b32.xlu2 %v8044_v52, %s8646_s6 }
0x1a00   :  { %v4898_v4 = vpop.permute.xlu2 %4897 }
0x1a01   :  { %v11356_v20 = vmul.f32 %v4898_v4, %v11261_v21  ;;  %v4970_v4 = vld [vmem:[#allocation11 + $0xb] sm:$0x1] }
0x1a02   :  { %v4900_v7 = vpop.permute.xlu0 %4899 }
0x1a03   :  { %v4902_v45 = vpop.permute.xlu1 %4901  ;;  %v11349_v16 = vmul.f32 %v4900_v7, %v11196_v39 }
0x1a04   :  { %v11352_v19 = vmul.f32 %v4902_v45, %v11266_v37  ;;  %v4971_v45 = vld [vmem:[#allocation11 + $0x13] sm:$0x1] }
0x1a05   :  { %v4977_v40 = vrot.slane %v11349_v16, 7 }
0x1a06   :  { %12779 = vst [vmem:[#allocation47_spill] sm:$0xff] %v11352_v19  ;;  %v4979_v46 = vrot.slane %v11352_v19, 6 }
0x1a07   :  { %v4978_v62 = vsel %vm753_vm4, %v4977_v40, %v11356_v20 }
0x1a08   :  { %v4908_v37 = vpop.permute.xlu2 %4907  ;;  %v4980_v21 = vsel %vm756_vm5, %v4979_v46, %v4978_v62 }
0x1a09   :  { %v11371_v6 = vmul.f32 %v4908_v37, %v11282_v13  ;;  %v4972_v37 = vld [vmem:[#allocation11 + $0x1b] sm:$0x1] }
0x1a0a   :  { %v4904_v9 = vpop.permute.xlu0 %4903 }
0x1a0b   :  { %v4906_v30 = vpop.permute.xlu1 %4905  ;;  %v11360_v57 = vmul.f32 %v4904_v9, %v11216_v28  ;;  %12780 = vst [vmem:[#allocation57_spill] sm:$0xff] %v11371_v6  ;;  %v4985_v51 = vrot.slane %v11371_v6, 3 }
0x1a0c   :  { %v11365_v39 = vmul.f32 %v4906_v30, %v11285_v38 }
0x1a0d   :  { %v4981_v50 = vrot.slane %v11360_v57, 5 }
0x1a0e   :  { %v4983_v5 = vrot.slane %v11365_v39, 4 }
0x1a0f   :  { %v4982_v22 = vsel %vm759_vm6, %v4981_v50, %v4980_v21  ;;  %v4973_v50 = vld [vmem:[#allocation11 + $0x23] sm:$0x1] }
0x1a10   :  { %v4984_v38 = vsel %vm762_vm7, %v4983_v5, %v4982_v22 }
0x1a11   :  { %v4986_v13 = vsel %vm765_vm8, %v4985_v51, %v4984_v38  ;;  %v4975_v51 = vld [vmem:[#allocation11 + $0x33] sm:$0x1] }
0x1a12   :  { %v4910_v28 = vpop.permute.xlu0 %4909 }
0x1a13   :  { %v4912_v59 = vpop.permute.xlu1 %4911  ;;  %v11375_v3 = vmul.f32 %v4910_v28, %v11239_v60 }
0x1a14   :  { %v11380_v0 = vmul.f32 %v4912_v59, %v11296_v43 }
0x1a15   :  { %v4987_v27 = vrot.slane %v11375_v3, 2 }
0x1a16   :  { %v4989_v53 = vrot.slane %v11380_v0, 1 }
0x1a17   :  { %v4988_v56 = vsel %vm768_vm9, %v4987_v27, %v4986_v13  ;;  %v4976_v27 = vld [vmem:[#allocation11 + $0x3b] sm:$0x1] }
0x1a18   :  { %v4990_v33 = vsel %vm771_vm10, %v4989_v53, %v4988_v56 }
0x1a19   :  { %4991 = vrot.lane.b32.xlu2 %v4990_v33, %s8647_s7 }
0x1a73   :  { %v4992_v60 = vpop.permute.xlu2 %4991 }
0x1a74   :  { %7273 = vmatmul.msk.f32.vlgmr.msrb.gmra.mxu2 %vm203_vm0, %v4992_v60 }
0x1a75   :  { %6631 = vmatpush.msrb.mxu2 %v11157_v2 }
0x1a77   :  { %6632 = vmatpush.msrb.mxu2 %v11160_v58  ;;  %v4974_v58 = vld [vmem:[#allocation11 + $0x2b] sm:$0x1] }
0x1a79   :  { %6633 = vmatpush.msrb.mxu2 %v11163_v55 }
0x1a7b   :  { %6634 = vmatpush.msrb.mxu2 %v11166_v47 }
0x1af7   :  { %v5012_v43 = vpop.f32.mrf.mxu2 }
0x1af8   :  { %v5016_v52 = vrot.slane %v5012_v43, 1  ;;  %v5017_v7 = vrot.slane %v5012_v43, 2  ;;  %v5031_v40 = vadd.f32 %v5012_v43, %v4969_v32  ;;  %v5020_v30 = vrot.slane %v5012_v43, 5 }
0x1af9   :  { %v5018_v62 = vrot.slane %v5012_v43, 3  ;;  %v5019_v2 = vrot.slane %v5012_v43, 4  ;;  %v5021_v59 = vrot.slane %v5012_v43, 6  ;;  %v5022_v38 = vrot.slane %v5012_v43, 7 }
0x1afa   :  { %v5032_v9 = vadd.f32 %v5016_v52, %v4970_v4  ;;  %v5033_v46 = vadd.f32 %v5017_v7, %v4971_v45  ;;  %8045 = vtanh.f32 %v5031_v40  ;;  %v5036_v55 = vadd.f32 %v5020_v30, %v4974_v58 }
0x1afb   :  { %v5034_v47 = vadd.f32 %v5018_v62, %v4972_v37  ;;  %v5035_v21 = vadd.f32 %v5019_v2, %v4973_v50  ;;  %v5037_v53 = vadd.f32 %v5021_v59, %v4975_v51  ;;  %v5038_v56 = vadd.f32 %v5022_v38, %v4976_v27 }
0x1afc   :  { %8047 = vtanh.f32 %v5032_v9  ;;  %v7274_v43 = vmul.f32 -1.442695, %v5031_v40  ;;  %v7279_v7 = vmul.f32 -1.442695, %v5036_v55  ;;  %v7275_v58 = vmul.f32 -1.442695, %v5032_v9 }
0x1afd   :  { %8049 = vtanh.f32 %v5033_v46  ;;  %v7276_v50 = vmul.f32 -1.442695, %v5033_v46  ;;  %v7277_v59 = vmul.f32 -1.442695, %v5034_v47 }
0x1afe   :  { %8051 = vtanh.f32 %v5036_v55 }
0x1aff   :  { %8053 = vtanh.f32 %v5034_v47 }
0x1b00   :  { %v8046_v5 = vpop.eup %8045  ;;  %8055 = vtanh.f32 %v5035_v21 }
0x1b01   :  { %5215 = vrot.lane.b32.xlu2 %v8046_v5, %s8646_s6  ;;  %8057 = vtanh.f32 %v5037_v53 }
0x1b02   :  { %v8048_v22 = vpop.eup %8047  ;;  %8059 = vtanh.f32 %v5038_v56 }
0x1b03   :  { %v8050_v28 = vpop.eup %8049  ;;  %5217 = vrot.lane.b32.xlu0 %v8048_v22, %s8646_s6  ;;  %8061 = vpow2.f32 %v7274_v43 }
0x1b04   :  { %5219 = vrot.lane.b32.xlu1 %v8050_v28, %s8646_s6  ;;  %v8052_v13 = vpop.eup %8051  ;;  %8063 = vpow2.f32 %v7279_v7  ;;  %v7278_v28 = vmul.f32 -1.442695, %v5035_v21  ;;  %v7280_v21 = vmul.f32 -1.442695, %v5037_v53 }
0x1b05   :  { %v8054_v33 = vpop.eup %8053 }
0x1b06   :  { %v8056_v60 = vpop.eup %8055 }
0x1b07   :  { %v8058_v32 = vpop.eup %8057 }
0x1b08   :  { %v8060_v52 = vpop.eup %8059 }
0x1b09   :  { %5225 = vrot.lane.b32.xlu2 %v8052_v13, %s8646_s6  ;;  %v8062_v4 = vpop.eup %8061 }
0x1b0a   :  { %v5063_v45 = vadd.f32 1.0, %v8062_v4  ;;  %v8064_v30 = vpop.eup %8063 }
0x1b0b   :  { %5221 = vrot.lane.b32.xlu0 %v8054_v33, %s8646_s6  ;;  %v5068_v62 = vadd.f32 1.0, %v8064_v30 }
0x1b0c   :  { %5223 = vrot.lane.b32.xlu1 %v8056_v60, %s8646_s6  ;;  %8065 = vrcp.f32 %v5063_v45  ;;  %v5082_v9 = vand.u32 2147483648, %v5063_v45  ;;  %vm5076_vm11 = vweird.f32 %v5063_v45  ;;  %v5080_v46 = vand.u32 2147483647, %v5063_v45 }
0x1b0d   :  { %8067 = vrcp.f32 %v5068_v62  ;;  %vm5151_vm14 = vweird.f32 %v5068_v62 }
0x1b0e   :  { %8069 = vpow2.f32 %v7275_v58  ;;  %v5083_v4 = vor.u32 1.1754944e-38, %v5082_v9  ;;  %vm5081_vm12 = vcmp.eq.f32.partialorder %v5080_v46, 8.507059e+37 }
0x1b0f   :  { %8071 = vpow2.f32 %v7276_v50 }
0x1b10   :  { %8073 = vpow2.f32 %v7278_v28 }
0x1b11   :  { %8075 = vpow2.f32 %v7277_v59 }
0x1b12   :  { %v8066_v2 = vpop.eup %8065 }
0x1b13   :  { %5227 = vrot.lane.b32.xlu0 %v8058_v32, %s8646_s6  ;;  %v5072_v37 = vmul.f32 %v8066_v2, %v5063_v45  ;;  %v8068_v22 = vpop.eup %8067  ;;  %vm5077_vm2 = vweird.f32 %v8066_v2  ;;  %v7281_v32 = vmul.f32 -1.442695, %v5038_v56 }
0x1b14   :  { %5229 = vrot.lane.b32.xlu1 %v8060_v52, %s8646_s6  ;;  %v5147_v38 = vmul.f32 %v8068_v22, %v5068_v62  ;;  %v8070_v55 = vpop.eup %8069  ;;  %vm5078_vm3 = vmor %vm5076_vm11, %vm5077_vm2  ;;  %vm5152_vm13 = vweird.f32 %v8068_v22 }
0x1b15   :  { %v5073_v5 = vsub.f32 1.0, %v5072_v37  ;;  %v8072_v51 = vpop.eup %8071  ;;  %v11401_v33 = vadd.f32 1.0, %v8070_v55  ;;  %vm5153_vm15 = vmor %vm5151_vm14, %vm5152_vm13 }
0x1b16   :  { %v5148_v13 = vsub.f32 1.0, %v5147_v38  ;;  %v11403_v60 = vadd.f32 1.0, %v8072_v51  ;;  %v8074_v47 = vpop.eup %8073 }
0x1b17   :  { %v5074_v40 = vmul.f32 %v8066_v2, %v5073_v5  ;;  %8077 = vrcp.f32 %v11401_v33  ;;  %v8076_v7 = vpop.eup %8075  ;;  %v11412_v37 = vadd.f32 1.0, %v8074_v47  ;;  %v5155_v5 = vand.u32 2147483647, %v5068_v62 }
0x1b18   :  { %v5149_v43 = vmul.f32 %v8068_v22, %v5148_v13  ;;  %8079 = vrcp.f32 %v11403_v60  ;;  %v11410_v53 = vadd.f32 1.0, %v8076_v7 }
0x1b19   :  { %v5075_v27 = vadd.f32 %v8066_v2, %v5074_v40  ;;  %8081 = vpow2.f32 %v7281_v32  ;;  %vm5156_vm1 = vcmp.eq.f32.partialorder %v5155_v5, 8.507059e+37 }
0x1b1a   :  { %8083 = vpow2.f32 %v7280_v21  ;;  %v5150_v56 = vadd.f32 %v8068_v22, %v5149_v43 }
0x1b1b   :  { %v5079_v52 = vsel %vm5078_vm3, %v8066_v2, %v5075_v27  ;;  %v5157_v2 = vand.u32 2147483648, %v5068_v62  ;;  %8085 = vrcp.f32 %v11410_v53  ;;  %vm5091_vm3 = vweird.f32 %v11401_v33 }
0x1b1c   :  { %v11407_v58 = vsel %vm5081_vm12, %v5083_v4, %v5079_v52  ;;  %v5154_v40 = vsel %vm5153_vm15, %v8068_v22, %v5150_v56  ;;  %8087 = vrcp.f32 %v11412_v37  ;;  %vm5106_vm12 = vweird.f32 %v11403_v60 }
0x1b1d   :  { %v8078_v50 = vpop.eup %8077  ;;  %v5158_v55 = vor.u32 1.1754944e-38, %v5157_v2 }
0x1b1e   :  { %v8080_v28 = vpop.eup %8079  ;;  %v5087_v51 = vmul.f32 %v8078_v50, %v11401_v33  ;;  %vm5092_vm2 = vweird.f32 %v8078_v50 }
0x1b1f   :  { %v8082_v59 = vpop.eup %8081  ;;  %v5102_v27 = vmul.f32 %v8080_v28, %v11403_v60  ;;  %v11419_v9 = vsel %vm5156_vm1, %v5158_v55, %v5154_v40  ;;  %vm5107_vm11 = vweird.f32 %v8080_v28  ;;  %v5112_v55 = vand.u32 2147483648, %v11403_v60  ;;  %vm5093_vm13 = vmor %vm5091_vm3, %vm5092_vm2 }
0x1b20   :  { %v8084_v38 = vpop.eup %8083  ;;  %v5088_v32 = vsub.f32 1.0, %v5087_v51  ;;  %v11424_v22 = vadd.f32 1.0, %v8082_v59  ;;  %v5097_v59 = vand.u32 2147483648, %v11401_v33  ;;  %v5095_v51 = vand.u32 2147483647, %v11401_v33  ;;  %vm11447_vm14 = vmor %vm5106_vm12, %vm5107_vm11 }
0x1b21   :  { %v11422_v46 = vadd.f32 1.0, %v8084_v38  ;;  %v11426_v21 = vpop.eup %8085  ;;  %v5103_v47 = vsub.f32 1.0, %v5102_v27  ;;  %v5110_v27 = vand.u32 2147483647, %v11403_v60  ;;  %vm5121_vm3 = vweird.f32 %v11410_v53 }
0x1b22   :  { %v11429_v52 = vpop.eup %8087  ;;  %v5089_v43 = vmul.f32 %v8078_v50, %v5088_v32  ;;  %v5117_v7 = vmul.f32 %v11426_v21, %v11410_v53  ;;  %vm5096_vm15 = vcmp.eq.f32.partialorder %v5095_v51, 8.507059e+37  ;;  %vm5122_vm2 = vweird.f32 %v11426_v21 }
0x1b23   :  { %8089 = vrcp.f32 %v11422_v46  ;;  %v5104_v4 = vmul.f32 %v8080_v28, %v5103_v47  ;;  %vm5111_vm1 = vcmp.eq.f32.partialorder %v5110_v27, 8.507059e+37  ;;  %vm5137_vm11 = vweird.f32 %v11429_v52 }
0x1b24   :  { %8091 = vrcp.f32 %v11424_v22  ;;  %v5118_v56 = vsub.f32 1.0, %v5117_v7  ;;  %v5098_v7 = vor.u32 1.1754944e-38, %v5097_v59  ;;  %v5142_v27 = vand.u32 2147483648, %v11412_v37 }
0x1b25   :  { %v5105_v5 = vadd.f32 %v8080_v28, %v5104_v4  ;;  %v5113_v4 = vor.u32 1.1754944e-38, %v5112_v55  ;;  %vm5136_vm12 = vweird.f32 %v11412_v37 }
0x1b26   :  { %v5119_v32 = vmul.f32 %v11426_v21, %v5118_v56 }
0x1b29   :  { %v11437_v2 = vpop.eup %8089 }
0x1b2a   :  { %v11440_v38 = vpop.eup %8091  ;;  %v5162_v47 = vmul.f32 %v11437_v2, %v11422_v46 }
0x1b2b   :  { %v5177_v60 = vmul.f32 %v11440_v38, %v11424_v22 }
0x1b2c   :  { %v5163_v59 = vsub.f32 1.0, %v5162_v47 }
0x1b2d   :  { %v5178_v51 = vsub.f32 1.0, %v5177_v60 }
0x1b2e   :  { %v5164_v47 = vmul.f32 %v11437_v2, %v5163_v59  ;;  %v5170_v59 = vand.u32 2147483647, %v11422_v46 }
0x1b5b   :  { %v5216_v30 = vpop.permute.xlu2 %5215 }
0x1b5c   :  { %v5239_v45 = vmul.f32 %v5216_v30, %v11407_v58  ;;  %v5132_v30 = vmul.f32 %v11429_v52, %v11412_v37 }
0x1b5e   :  { %5255 = vrot.lane.b32.xlu1 %v5239_v45, %s8647_s7  ;;  %v5090_v45 = vadd.f32 %v8078_v50, %v5089_v43  ;;  %v5133_v40 = vsub.f32 1.0, %v5132_v30  ;;  %v5109_v43 = vsel %vm11447_vm14, %v8080_v28, %v5105_v5  ;;  %v5120_v5 = vadd.f32 %v11426_v21, %v5119_v32  ;;  %vm5138_vm14 = vmor %vm5136_vm12, %vm5137_vm11 }
0x1b5f   :  { %v11463_v56 = vsel %vm5111_vm1, %v5113_v4, %v5109_v43  ;;  %vm5182_vm11 = vweird.f32 %v11440_v38  ;;  %vm5181_vm12 = vweird.f32 %v11424_v22 }
0x1b60   :  { %v5134_v33 = vmul.f32 %v11429_v52, %v5133_v40 }
0x1b62   :  { %v5135_v55 = vadd.f32 %v11429_v52, %v5134_v33  ;;  %v5179_v33 = vmul.f32 %v11440_v38, %v5178_v51 }
0x1b63   :  { %v5226_v13 = vpop.permute.xlu2 %5225 }
0x1b64   :  { %v5244_v62 = vmul.f32 %v5226_v13, %v11419_v9  ;;  %v5125_v13 = vand.u32 2147483647, %v11410_v53  ;;  %v5139_v43 = vsel %vm5138_vm14, %v11429_v52, %v5135_v55  ;;  %vm5183_vm14 = vmor %vm5181_vm12, %vm5182_vm11 }
0x1b66   :  { %5265 = vrot.lane.b32.xlu1 %v5244_v62, %s8647_s7  ;;  %v5094_v62 = vsel %vm5093_vm13, %v8078_v50, %v5090_v45  ;;  %v5127_v50 = vand.u32 2147483648, %v11410_v53  ;;  %vm5123_vm13 = vmor %vm5121_vm3, %vm5122_vm2  ;;  %v5143_v53 = vor.u32 1.1754944e-38, %v5142_v27  ;;  %vm5167_vm2 = vweird.f32 %v11437_v2 }
0x1b67   :  { %v11459_v6 = vsel %vm5096_vm15, %v5098_v7, %v5094_v62  ;;  %v5140_v62 = vand.u32 2147483647, %v11412_v37  ;;  %v5124_v32 = vsel %vm5123_vm13, %v11426_v21, %v5120_v5  ;;  %vm5126_vm15 = vcmp.eq.f32.partialorder %v5125_v13, 8.507059e+37 }
0x1b68   :  { %v5128_v7 = vor.u32 1.1754944e-38, %v5127_v50  ;;  %v5165_v21 = vadd.f32 %v11437_v2, %v5164_v47  ;;  %v5180_v50 = vadd.f32 %v11440_v38, %v5179_v33  ;;  %v5187_v5 = vand.u32 2147483648, %v11424_v22 }
0x1b69   :  { %vm5141_vm1 = vcmp.eq.f32.partialorder %v5140_v62, 8.507059e+37  ;;  %vm5166_vm3 = vweird.f32 %v11422_v46 }
0x1b6a   :  { %v11483_v60 = vsel %vm5126_vm15, %v5128_v7, %v5124_v32  ;;  %v11485_v37 = vsel %vm5141_vm1, %v5143_v53, %v5139_v43  ;;  %vm5168_vm13 = vmor %vm5166_vm3, %vm5167_vm2  ;;  %v5184_v51 = vsel %vm5183_vm14, %v11440_v38, %v5180_v50  ;;  %v5188_v13 = vor.u32 1.1754944e-38, %v5187_v5 }
0x1b6b   :  { %v5169_v55 = vsel %vm5168_vm13, %v11437_v2, %v5165_v21  ;;  %vm5171_vm15 = vcmp.eq.f32.partialorder %v5170_v59, 8.507059e+37  ;;  %v5199_v2 = vmul.f32 %v11407_v58, %v11336_v29  ;;  %v5200_v7 = vmul.f32 %v11459_v6, %v11304_v14 }
0x1b6c   :  { %v5202_v29 = vmul.f32 %v11483_v60, %v11314_v36 }
0x1b75   :  { %v5218_v30 = vpop.permute.xlu0 %5217 }
0x1b76   :  { %v5220_v45 = vpop.permute.xlu1 %5219  ;;  %v5240_v28 = vmul.f32 %v5218_v30, %v11459_v6 }
0x1b77   :  { %v5241_v40 = vmul.f32 %v5220_v45, %v11463_v56 }
0x1b78   :  { %5257 = vrot.lane.b32.xlu2 %v5240_v28, %s8647_s7  ;;  %v5172_v28 = vand.u32 2147483648, %v11422_v46 }
0x1b79   :  { %5259 = vrot.lane.b32.xlu0 %v5241_v40, %s8647_s7  ;;  %v5185_v40 = vand.u32 2147483647, %v11424_v22 }
0x1b7a   :  { %v5173_v27 = vor.u32 1.1754944e-38, %v5172_v28 }
0x1b7b   :  { %vm5186_vm1 = vcmp.eq.f32.partialorder %v5185_v40, 8.507059e+37 }
0x1b7c   :  { %v11503_v62 = vsel %vm5171_vm15, %v5173_v27, %v5169_v55  ;;  %v11505_v46 = vsel %vm5186_vm1, %v5188_v13, %v5184_v51  ;;  %v5201_v55 = vmul.f32 %v11463_v56, %v11306_v24 }
0x1b7d   :  { %v5222_v4 = vpop.permute.xlu0 %5221  ;;  %v5206_v24 = vmul.f32 %v11505_v46, %v11328_v49 }
0x1b7e   :  { %v5224_v30 = vpop.permute.xlu1 %5223  ;;  %v5242_v45 = vmul.f32 %v5222_v4, %v11483_v60 }
0x1b7f   :  { %v5243_v52 = vmul.f32 %v5224_v30, %v11485_v37  ;;  %v5204_v30 = vmul.f32 %v11419_v9, %v11343_v42  ;;  %v5205_v42 = vmul.f32 %v11503_v62, %v11326_v25  ;;  %v5203_v25 = vmul.f32 %v11485_v37, %v11316_v26 }
0x1b80   :  { %5261 = vrot.lane.b32.xlu2 %v5242_v45, %s8647_s7 }
0x1b81   :  { %5263 = vrot.lane.b32.xlu0 %v5243_v52, %s8647_s7 }
0x1b85   :  { %v5228_v32 = vpop.permute.xlu0 %5227 }
0x1b86   :  { %v5230_v47 = vpop.permute.xlu1 %5229  ;;  %v5245_v43 = vmul.f32 %v5228_v32, %v11503_v62 }
0x1b87   :  { %v5246_v22 = vmul.f32 %v5230_v47, %v11505_v46 }
0x1b88   :  { %5267 = vrot.lane.b32.xlu2 %v5245_v43, %s8647_s7 }
0x1b89   :  { %5269 = vrot.lane.b32.xlu0 %v5246_v22, %s8647_s7 }
0x1bd0   :  { %v5256_v38 = vpop.permute.xlu1 %5255 }
0x1bd1   :  { %v11515_v33 = vadd.f32 %v5256_v38, %v5199_v2 }
0x1bd2   :  { %v5258_v53 = vpop.permute.xlu2 %5257 }
0x1bd3   :  { %v11517_v4 = vadd.f32 %v5258_v53, %v5200_v7  ;;  %8093 = vtanh.f32 %v11515_v33 }
0x1bd5   :  { %8095 = vtanh.f32 %v11517_v4 }
0x1bd8   :  { %v5266_v45 = vpop.permute.xlu1 %5265 }
0x1bd9   :  { %v8094_v21 = vpop.eup %8093  ;;  %v11525_v52 = vadd.f32 %v5266_v45, %v5204_v30 }
0x1bda   :  { %v5262_v14 = vpop.permute.xlu2 %5261  ;;  %5303 = vrot.lane.b32.xlu0 %v8094_v21, %s8646_s6 }
0x1bdb   :  { %v8096_v50 = vpop.eup %8095  ;;  %v11528_v28 = vadd.f32 %v5262_v14, %v5202_v29  ;;  %8097 = vtanh.f32 %v11525_v52 }
0x1bdc   :  { %5305 = vrot.lane.b32.xlu1 %v8096_v50, %s8646_s6 }
0x1bdd   :  { %8099 = vtanh.f32 %v11528_v28 }
0x1be1   :  { %v8098_v5 = vpop.eup %8097 }
0x1be2   :  { %v5268_v36 = vpop.permute.xlu2 %5267  ;;  %5313 = vrot.lane.b32.xlu0 %v8098_v5, %s8646_s6 }
0x1be3   :  { %v8100_v59 = vpop.eup %8099  ;;  %v11536_v40 = vadd.f32 %v5268_v36, %v5205_v42 }
0x1be4   :  { %5309 = vrot.lane.b32.xlu1 %v8100_v59, %s8646_s6 }
0x1be5   :  { %8101 = vtanh.f32 %v11536_v40 }
0x1beb   :  { %v8102_v51 = vpop.eup %8101  ;;  %v5260_v27 = vpop.permute.xlu0 %5259 }
0x1bec   :  { %v11542_v13 = vadd.f32 %v5260_v27, %v5201_v55  ;;  %5315 = vrot.lane.b32.xlu1 %v8102_v51, %s8646_s6 }
0x1bee   :  { %8103 = vtanh.f32 %v11542_v13 }
0x1bf3   :  { %v5264_v32 = vpop.permute.xlu0 %5263 }
0x1bf4   :  { %v8104_v47 = vpop.eup %8103  ;;  %v11548_v43 = vadd.f32 %v5264_v32, %v5203_v25 }
0x1bf5   :  { %5307 = vrot.lane.b32.xlu2 %v8104_v47, %s8646_s6 }
0x1bf6   :  { %8105 = vtanh.f32 %v11548_v43 }
0x1bfb   :  { %v5270_v22 = vpop.permute.xlu0 %5269 }
0x1bfc   :  { %v8106_v2 = vpop.eup %8105  ;;  %v11554_v38 = vadd.f32 %v5270_v22, %v5206_v24 }
0x1bfd   :  { %5311 = vrot.lane.b32.xlu2 %v8106_v2, %s8646_s6 }
0x1bfe   :  { %8107 = vtanh.f32 %v11554_v38 }
0x1c04   :  { %v8108_v26 = vpop.eup %8107 }
0x1c05   :  { %5317 = vrot.lane.b32.xlu2 %v8108_v26, %s8646_s6 }
0x1c4c   :  { %v5304_v53 = vpop.permute.xlu0 %5303 }
0x1c4d   :  { %v11567_v21 = vmul.f32 %v5304_v53, %v11407_v58 }
0x1c4e   :  { %v5306_v7 = vpop.permute.xlu1 %5305 }
0x1c4f   :  { %v5308_v30 = vpop.permute.xlu2 %5307  ;;  %v11560_v45 = vmul.f32 %v5306_v7, %v11459_v6  ;;  %12783 = vst [vmem:[#allocation60_spill] sm:$0xff] %v11567_v21 }
0x1c50   :  { %v11563_v29 = vmul.f32 %v5308_v30, %v11463_v56  ;;  %v5375_v30 = vld [vmem:[#allocation11 + $0x4] sm:$0x1] }
0x1c51   :  { %v5383_v49 = vrot.slane %v11560_v45, 7 }
0x1c52   :  { %v5385_v50 = vrot.slane %v11563_v29, 6 }
0x1c53   :  { %v5384_v36 = vsel %vm753_vm4, %v5383_v49, %v11567_v21 }
0x1c54   :  { %v5314_v56 = vpop.permute.xlu0 %5313  ;;  %v5386_v58 = vsel %vm756_vm5, %v5385_v50, %v5384_v36  ;;  %v5377_v50 = vld [vmem:[#allocation11 + $0x14] sm:$0x1] }
0x1c55   :  { %v11582_v51 = vmul.f32 %v5314_v56, %v11419_v9 }
0x1c56   :  { %v5310_v14 = vpop.permute.xlu1 %5309 }
0x1c57   :  { %v5312_v42 = vpop.permute.xlu2 %5311  ;;  %v11571_v5 = vmul.f32 %v5310_v14, %v11483_v60  ;;  %12786 = vst [vmem:[#allocation54_spill] sm:$0xff] %v11582_v51  ;;  %v5391_v47 = vrot.slane %v11582_v51, 3  ;;  %v5376_v14 = vld [vmem:[#allocation11 + $0xc] sm:$0x1] }
0x1c58   :  { %v11576_v6 = vmul.f32 %v5312_v42, %v11485_v37 }
0x1c59   :  { %12784 = vst [vmem:[#allocation44_spill] sm:$0xff] %v11571_v5  ;;  %v5387_v59 = vrot.slane %v11571_v5, 5 }
0x1c5a   :  { %12785 = vst [vmem:[#allocation50_spill] sm:$0xff] %v11576_v6  ;;  %v5389_v55 = vrot.slane %v11576_v6, 4 }
0x1c5b   :  { %v5388_v27 = vsel %vm759_vm6, %v5387_v59, %v5386_v58 }
0x1c5c   :  { %v5390_v37 = vsel %vm762_vm7, %v5389_v55, %v5388_v27  ;;  %v5380_v27 = vld [vmem:[#allocation11 + $0x2c] sm:$0x1] }
0x1c5d   :  { %v5392_v9 = vsel %vm765_vm8, %v5391_v47, %v5390_v37  ;;  %v5379_v37 = vld [vmem:[#allocation11 + $0x24] sm:$0x1] }
0x1c5e   :  { %v5316_v60 = vpop.permute.xlu1 %5315 }
0x1c5f   :  { %v5318_v25 = vpop.permute.xlu2 %5317  ;;  %v11586_v32 = vmul.f32 %v5316_v60, %v11503_v62  ;;  %v5378_v60 = vld [vmem:[#allocation11 + $0x1c] sm:$0x1] }
0x1c60   :  { %v11591_v24 = vmul.f32 %v5318_v25, %v11505_v46 }
0x1c61   :  { %12787 = vst [vmem:[#allocation61_spill] sm:$0xff] %v11586_v32  ;;  %v5393_v22 = vrot.slane %v11586_v32, 2 }
0x1c62   :  { %12788 = vst [vmem:[#allocation46_spill] sm:$0xff] %v11591_v24  ;;  %v5395_v2 = vrot.slane %v11591_v24, 1 }
0x1c63   :  { %v5394_v26 = vsel %vm768_vm9, %v5393_v22, %v5392_v9 }
0x1c64   :  { %v5396_v7 = vsel %vm771_vm10, %v5395_v2, %v5394_v26 }
0x1c65   :  { %5397 = vrot.lane.b32.xlu0 %v5396_v7, %s8647_s7 }
0x1cd7   :  { %v5398_v62 = vpop.permute.xlu0 %5397 }
0x1cd8   :  { %7282 = vmatmul.msk.f32.vlgmr.msra.gmra.mxu1 %vm203_vm0, %v5398_v62 }
0x1d55   :  { %v5418_v53 = vpop.f32.mrf.mxu1 }
0x1d56   :  { %v5422_v49 = vrot.slane %v5418_v53, 1  ;;  %v5423_v46 = vrot.slane %v5418_v53, 2  ;;  %v5437_v42 = vadd.f32 %v5418_v53, %v5375_v30  ;;  %v5426_v59 = vrot.slane %v5418_v53, 5  ;;  %v5381_v30 = vld [vmem:[#allocation11 + $0x34] sm:$0x1] }
0x1d57   :  { %v5424_v55 = vrot.slane %v5418_v53, 3  ;;  %v5425_v58 = vrot.slane %v5418_v53, 4  ;;  %v5427_v7 = vrot.slane %v5418_v53, 6  ;;  %v5428_v62 = vrot.slane %v5418_v53, 7 }
0x1d58   :  { %v5438_v36 = vadd.f32 %v5422_v49, %v5376_v14  ;;  %v5439_v56 = vadd.f32 %v5423_v46, %v5377_v50  ;;  %8109 = vtanh.f32 %v5437_v42  ;;  %v5442_v25 = vadd.f32 %v5426_v59, %v5380_v27  ;;  %v5382_v49 = vld [vmem:[#allocation11 + $0x3c] sm:$0x1] }
0x1d59   :  { %v5440_v47 = vadd.f32 %v5424_v55, %v5378_v60  ;;  %v5441_v2 = vadd.f32 %v5425_v58, %v5379_v37  ;;  %v5443_v46 = vadd.f32 %v5427_v7, %v5381_v30  ;;  %v5444_v50 = vadd.f32 %v5428_v62, %v5382_v49 }
0x1d5a   :  { %8111 = vtanh.f32 %v5438_v36  ;;  %v7285_v53 = vmul.f32 -1.442695, %v5439_v56  ;;  %v7283_v62 = vmul.f32 -1.442695, %v5437_v42  ;;  %v7284_v49 = vmul.f32 -1.442695, %v5438_v36 }
0x1d5b   :  { %8113 = vtanh.f32 %v5439_v56  ;;  %v7287_v60 = vmul.f32 -1.442695, %v5441_v2 }
0x1d5c   :  { %8115 = vtanh.f32 %v5442_v25 }
0x1d5d   :  { %8117 = vtanh.f32 %v5440_v47 }
0x1d5e   :  { %v8110_v22 = vpop.eup %8109  ;;  %8119 = vtanh.f32 %v5441_v2 }
0x1d5f   :  { %5621 = vrot.lane.b32.xlu0 %v8110_v22, %s8646_s6  ;;  %8121 = vtanh.f32 %v5443_v46 }
0x1d60   :  { %v8112_v9 = vpop.eup %8111  ;;  %8123 = vtanh.f32 %v5444_v50 }
0x1d61   :  { %v8114_v26 = vpop.eup %8113  ;;  %5623 = vrot.lane.b32.xlu1 %v8112_v9, %s8646_s6  ;;  %8125 = vpow2.f32 %v7285_v53  ;;  %v7290_v9 = vmul.f32 -1.442695, %v5444_v50  ;;  %v7286_v50 = vmul.f32 -1.442695, %v5440_v47  ;;  %v7289_v47 = vmul.f32 -1.442695, %v5443_v46 }
0x1d62   :  { %5625 = vrot.lane.b32.xlu2 %v8114_v26, %s8646_s6  ;;  %v8116_v14 = vpop.eup %8115  ;;  %8127 = vpow2.f32 %v7287_v60 }
0x1d63   :  { %v8118_v59 = vpop.eup %8117 }
0x1d64   :  { %v8120_v55 = vpop.eup %8119 }
0x1d65   :  { %v8122_v58 = vpop.eup %8121 }
0x1d66   :  { %v8124_v27 = vpop.eup %8123 }
0x1d67   :  { %5631 = vrot.lane.b32.xlu0 %v8116_v14, %s8646_s6  ;;  %v8126_v37 = vpop.eup %8125 }
0x1d68   :  { %v5471_v22 = vadd.f32 1.0, %v8126_v37  ;;  %v8128_v26 = vpop.eup %8127 }
0x1d69   :  { %5627 = vrot.lane.b32.xlu1 %v8118_v59, %s8646_s6  ;;  %v11608_v7 = vadd.f32 1.0, %v8128_v26 }
0x1d6a   :  { %5629 = vrot.lane.b32.xlu2 %v8120_v55, %s8646_s6  ;;  %8129 = vrcp.f32 %v5471_v22  ;;  %v7288_v55 = vmul.f32 -1.442695, %v5442_v25  ;;  %v5518_v25 = vand.u32 2147483648, %v5471_v22  ;;  %vm5512_vm11 = vweird.f32 %v5471_v22 }
0x1d6b   :  { %8131 = vpow2.f32 %v7290_v9  ;;  %vm5542_vm14 = vweird.f32 %v11608_v7 }
0x1d6c   :  { %8133 = vrcp.f32 %v11608_v7 }
0x1d6d   :  { %8135 = vpow2.f32 %v7283_v62 }
0x1d6e   :  { %8137 = vpow2.f32 %v7284_v49 }
0x1d70   :  { %v8130_v30 = vpop.eup %8129 }
0x1d71   :  { %5633 = vrot.lane.b32.xlu1 %v8122_v58, %s8646_s6  ;;  %v8132_v14 = vpop.eup %8131  ;;  %v5508_v59 = vmul.f32 %v8130_v30, %v5471_v22  ;;  %vm5513_vm2 = vweird.f32 %v8130_v30 }
0x1d72   :  { %5635 = vrot.lane.b32.xlu2 %v8124_v27, %s8646_s6  ;;  %v11611_v56 = vadd.f32 1.0, %v8132_v14  ;;  %v8134_v58 = vpop.eup %8133  ;;  %v5516_v14 = vand.u32 2147483647, %v5471_v22  ;;  %vm5514_vm3 = vmor %vm5512_vm11, %vm5513_vm2 }
0x1d73   :  { %v5509_v2 = vsub.f32 1.0, %v5508_v59  ;;  %v8136_v27 = vpop.eup %8135  ;;  %v5538_v42 = vmul.f32 %v8134_v58, %v11608_v7  ;;  %vm5543_vm13 = vweird.f32 %v8134_v58 }
0x1d74   :  { %v8138_v53 = vpop.eup %8137  ;;  %8139 = vrcp.f32 %v11611_v56  ;;  %v11615_v36 = vadd.f32 1.0, %v8136_v27  ;;  %v5519_v27 = vor.u32 1.1754944e-38, %v5518_v25  ;;  %vm5517_vm12 = vcmp.eq.f32.partialorder %v5516_v14, 8.507059e+37  ;;  %vm5544_vm15 = vmor %vm5542_vm14, %vm5543_vm13 }
0x1d75   :  { %v5510_v60 = vmul.f32 %v8130_v30, %v5509_v2  ;;  %8141 = vpow2.f32 %v7288_v55  ;;  %v11617_v37 = vadd.f32 1.0, %v8138_v53  ;;  %v5539_v26 = vsub.f32 1.0, %v5538_v42 }
0x1d76   :  { %8143 = vpow2.f32 %v7286_v50  ;;  %v5548_v25 = vand.u32 2147483648, %v11608_v7  ;;  %vm5587_vm11 = vweird.f32 %v11611_v56 }
0x1d77   :  { %v5511_v9 = vadd.f32 %v8130_v30, %v5510_v60  ;;  %8145 = vrcp.f32 %v11615_v36  ;;  %v5540_v55 = vmul.f32 %v8134_v58, %v5539_v26 }
0x1d78   :  { %8147 = vrcp.f32 %v11617_v37 }
0x1d79   :  { %v5515_v2 = vsel %vm5514_vm3, %v8130_v30, %v5511_v9  ;;  %8149 = vpow2.f32 %v7289_v47  ;;  %v5541_v9 = vadd.f32 %v8134_v58, %v5540_v55  ;;  %v5546_v47 = vand.u32 2147483647, %v11608_v7 }
0x1d7a   :  { %v11619_v62 = vpop.eup %8139  ;;  %v11631_v22 = vsel %vm5517_vm12, %v5519_v27, %v5515_v2 }
0x1d7b   :  { %v8142_v49 = vpop.eup %8141  ;;  %v5583_v50 = vmul.f32 %v11619_v62, %v11611_v56  ;;  %v5545_v2 = vsel %vm5544_vm15, %v8134_v58, %v5541_v9  ;;  %vm5547_vm1 = vcmp.eq.f32.partialorder %v5546_v47, 8.507059e+37  ;;  %vm5588_vm2 = vweird.f32 %v11619_v62 }
0x1d7c   :  { %v8144_v59 = vpop.eup %8143  ;;  %v11625_v53 = vadd.f32 1.0, %v8142_v49  ;;  %v5593_v58 = vand.u32 2147483648, %v11611_v56  ;;  %v5591_v9 = vand.u32 2147483647, %v11611_v56  ;;  %vm5589_vm3 = vmor %vm5587_vm11, %vm5588_vm2  ;;  %vm5482_vm15 = vweird.f32 %v11615_v36 }
0x1d7d   :  { %v11627_v60 = vadd.f32 1.0, %v8144_v59  ;;  %v11629_v46 = vpop.eup %8145  ;;  %v5584_v26 = vsub.f32 1.0, %v5583_v50  ;;  %v5549_v50 = vor.u32 1.1754944e-38, %v5548_v25  ;;  %vm5497_vm2 = vweird.f32 %v11617_v37 }
0x1d7e   :  { %v11633_v32 = vpop.eup %8147  ;;  %8151 = vrcp.f32 %v11625_v53  ;;  %v5478_v49 = vmul.f32 %v11629_v46, %v11615_v36  ;;  %vm5592_vm12 = vcmp.eq.f32.partialorder %v5591_v9, 8.507059e+37  ;;  %vm5483_vm13 = vweird.f32 %v11629_v46 }
0x1d7f   :  { %8153 = vrcp.f32 %v11627_v60  ;;  %v8150_v14 = vpop.eup %8149  ;;  %v5493_v59 = vmul.f32 %v11633_v32, %v11617_v37  ;;  %v5585_v55 = vmul.f32 %v11619_v62, %v5584_v26  ;;  %v11651_v7 = vsel %vm5547_vm1, %v5549_v50, %v5545_v2  ;;  %vm5484_vm1 = vmor %vm5482_vm15, %vm5483_vm13 }
0x1d80   :  { %v5479_v27 = vsub.f32 1.0, %v5478_v49  ;;  %vm5498_vm14 = vweird.f32 %v11633_v32  ;;  %v5501_v9 = vand.u32 2147483647, %v11617_v37  ;;  %vm5557_vm15 = vweird.f32 %v11625_v53 }
0x1d81   :  { %v5494_v24 = vsub.f32 1.0, %v5493_v59  ;;  %v5586_v21 = vadd.f32 %v11619_v62, %v5585_v55  ;;  %vm5499_vm11 = vmor %vm5497_vm2, %vm5498_vm14  ;;  %vm5527_vm2 = vweird.f32 %v11627_v60 }
0x1d82   :  { %v5480_v26 = vmul.f32 %v11629_v46, %v5479_v27 }
0x1d83   :  { %v5590_v49 = vsel %vm5589_vm3, %v11619_v62, %v5586_v21  ;;  %v5486_v62 = vand.u32 2147483647, %v11615_v36 }
0x1d84   :  { %v5481_v56 = vadd.f32 %v11629_v46, %v5480_v26 }
0x1d85   :  { %vm5487_vm3 = vcmp.eq.f32.partialorder %v5486_v62, 8.507059e+37  ;;  %v5533_v62 = vand.u32 2147483648, %v11627_v60 }
0x1d86   :  { %v5485_v26 = vsel %vm5484_vm1, %v11629_v46, %v5481_v56 }
0x1dbc   :  { %v5626_v42 = vpop.permute.xlu2 %5625 }
0x1dbd   :  { %v5647_v30 = vmul.f32 %v5626_v42, %v11631_v22  ;;  %v11647_v42 = vadd.f32 1.0, %v8150_v14  ;;  %v5594_v14 = vor.u32 1.1754944e-38, %v5593_v58  ;;  %v5503_v58 = vand.u32 2147483648, %v11617_v37 }
0x1dbe   :  { %v5563_v37 = vand.u32 2147483648, %v11625_v53 }
0x1dbf   :  { %5665 = vrot.lane.b32.xlu1 %v5647_v30, %s8647_s7  ;;  %v11649_v30 = vpop.eup %8151  ;;  %8155 = vrcp.f32 %v11647_v42  ;;  %v11673_v2 = vsel %vm5592_vm12, %v5594_v14, %v5590_v49  ;;  %v5504_v14 = vor.u32 1.1754944e-38, %v5503_v58  ;;  %vm5502_vm12 = vcmp.eq.f32.partialorder %v5501_v9, 8.507059e+37 }
0x1dc0   :  { %v11653_v6 = vpop.eup %8153  ;;  %v5553_v25 = vmul.f32 %v11649_v30, %v11625_v53  ;;  %vm5558_vm13 = vweird.f32 %v11649_v30  ;;  %v5531_v58 = vand.u32 2147483647, %v11627_v60 }
0x1dc1   :  { %v5523_v47 = vmul.f32 %v11653_v6, %v11627_v60  ;;  %vm5528_vm14 = vweird.f32 %v11653_v6  ;;  %vm5559_vm1 = vmor %vm5557_vm15, %vm5558_vm13 }
0x1dc2   :  { %v5554_v59 = vsub.f32 1.0, %v5553_v25 }
0x1dc4   :  { %v5630_v51 = vpop.permute.xlu2 %5629  ;;  %v5555_v25 = vmul.f32 %v11649_v30, %v5554_v59 }
0x1dc5   :  { %v5649_v5 = vmul.f32 %v5630_v51, %v11651_v7  ;;  %v5495_v51 = vmul.f32 %v11633_v32, %v5494_v24  ;;  %v5524_v24 = vsub.f32 1.0, %v5523_v47  ;;  %v11677_v27 = vpop.eup %8155 }
0x1dc6   :  { %vm5573_vm13 = vweird.f32 %v11677_v27 }
0x1dc7   :  { %5669 = vrot.lane.b32.xlu1 %v5649_v5, %s8647_s7  ;;  %v5488_v5 = vand.u32 2147483648, %v11615_v36  ;;  %v5496_v50 = vadd.f32 %v11633_v32, %v5495_v51  ;;  %v5525_v49 = vmul.f32 %v11653_v6, %v5524_v24  ;;  %v5568_v36 = vmul.f32 %v11677_v27, %v11647_v42 }
0x1dc9   :  { %v5489_v51 = vor.u32 1.1754944e-38, %v5488_v5  ;;  %v5500_v47 = vsel %vm5499_vm11, %v11633_v32, %v5496_v50  ;;  %v5556_v32 = vadd.f32 %v11649_v30, %v5555_v25  ;;  %v5526_v50 = vadd.f32 %v11653_v6, %v5525_v49  ;;  %vm5529_vm11 = vmor %vm5527_vm2, %vm5528_vm14 }
0x1dca   :  { %v11696_v59 = vsel %vm5502_vm12, %v5504_v14, %v5500_v47  ;;  %v5569_v24 = vsub.f32 1.0, %v5568_v36  ;;  %v5534_v47 = vor.u32 1.1754944e-38, %v5533_v62  ;;  %vm5532_vm12 = vcmp.eq.f32.partialorder %v5531_v58, 8.507059e+37 }
0x1dcb   :  { %v11692_v19 = vsel %vm5487_vm3, %v5489_v51, %v5485_v26  ;;  %v5560_v9 = vsel %vm5559_vm1, %v11649_v30, %v5556_v32  ;;  %v5564_v26 = vor.u32 1.1754944e-38, %v5563_v37  ;;  %v5530_v25 = vsel %vm5529_vm11, %v11653_v6, %v5526_v50 }
0x1dcc   :  { %v5636_v55 = vpop.permute.xlu2 %5635  ;;  %v5570_v51 = vmul.f32 %v11677_v27, %v5569_v24  ;;  %v11716_v14 = vsel %vm5532_vm12, %v5534_v47, %v5530_v25  ;;  %v5578_v6 = vand.u32 2147483648, %v11647_v42  ;;  %vm5572_vm14 = vweird.f32 %v11647_v42 }
0x1dcd   :  { %v5652_v21 = vmul.f32 %v5636_v55, %v11673_v2  ;;  %v5576_v37 = vand.u32 2147483647, %v11647_v42  ;;  %vm5574_vm15 = vmor %vm5572_vm14, %vm5573_vm13  ;;  %v5605_v24 = vmul.f32 %v11692_v19, %v11515_v33  ;;  %v5607_v42 = vmul.f32 %v11631_v22, %v11542_v13 }
0x1dce   :  { %v5571_v30 = vadd.f32 %v11677_v27, %v5570_v51  ;;  %v5609_v33 = vmul.f32 %v11651_v7, %v11548_v43 }
0x1dcf   :  { %5675 = vrot.lane.b32.xlu1 %v5652_v21, %s8647_s7  ;;  %v5561_v21 = vand.u32 2147483647, %v11625_v53  ;;  %vm5577_vm1 = vcmp.eq.f32.partialorder %v5576_v37, 8.507059e+37 }
0x1dd1   :  { %v5622_v55 = vpop.permute.xlu0 %5621  ;;  %vm5562_vm3 = vcmp.eq.f32.partialorder %v5561_v21, 8.507059e+37 }
0x1dd2   :  { %v5645_v46 = vmul.f32 %v5622_v55, %v11692_v19  ;;  %v11713_v49 = vsel %vm5562_vm3, %v5564_v26, %v5560_v9 }
0x1dd3   :  { %v5624_v56 = vpop.permute.xlu1 %5623  ;;  %v5610_v9 = vmul.f32 %v11713_v49, %v11525_v52 }
0x1dd4   :  { %v5646_v5 = vmul.f32 %v5624_v56, %v11696_v59  ;;  %5661 = vrot.lane.b32.xlu2 %v5645_v46, %s8647_s7  ;;  %v5575_v46 = vsel %vm5574_vm15, %v11677_v27, %v5571_v30  ;;  %v5579_v56 = vor.u32 1.1754944e-38, %v5578_v6  ;;  %v5606_v30 = vmul.f32 %v11696_v59, %v11517_v4 }
0x1dd6   :  { %5663 = vrot.lane.b32.xlu0 %v5646_v5, %s8647_s7  ;;  %v11727_v32 = vsel %vm5577_vm1, %v5579_v56, %v5575_v46 }
0x1dd7   :  { %v5611_v4 = vmul.f32 %v11727_v32, %v11536_v40 }
0x1dd9   :  { %v5632_v53 = vpop.permute.xlu0 %5631 }
0x1dda   :  { %v5650_v36 = vmul.f32 %v5632_v53, %v11713_v49 }
0x1ddb   :  { %v5628_v55 = vpop.permute.xlu1 %5627 }
0x1ddc   :  { %v5648_v60 = vmul.f32 %v5628_v55, %v11716_v14  ;;  %5671 = vrot.lane.b32.xlu2 %v5650_v36, %s8647_s7  ;;  %v5612_v36 = vmul.f32 %v11673_v2, %v11554_v38  ;;  %v5608_v38 = vmul.f32 %v11716_v14, %v11528_v28 }
0x1dde   :  { %5667 = vrot.lane.b32.xlu0 %v5648_v60, %s8647_s7 }
0x1de3   :  { %v5634_v5 = vpop.permute.xlu1 %5633 }
0x1de4   :  { %v5651_v50 = vmul.f32 %v5634_v5, %v11727_v32 }
0x1de6   :  { %5673 = vrot.lane.b32.xlu0 %v5651_v50, %s8647_s7 }
0x1e2e   :  { %v5662_v21 = vpop.permute.xlu2 %5661 }
0x1e2f   :  { %v11733_v62 = vadd.f32 %v5662_v21, %v5605_v24 }
0x1e31   :  { %v5666_v58 = vpop.permute.xlu1 %5665  ;;  %8157 = vtanh.f32 %v11733_v62 }
0x1e32   :  { %v11738_v27 = vadd.f32 %v5666_v58, %v5607_v42 }
0x1e34   :  { %8159 = vtanh.f32 %v11738_v27 }
0x1e36   :  { %v5672_v26 = vpop.permute.xlu2 %5671 }
0x1e37   :  { %v8158_v25 = vpop.eup %8157  ;;  %v11743_v51 = vadd.f32 %v5672_v26, %v5610_v9 }
0x1e38   :  { %5709 = vrot.lane.b32.xlu1 %v8158_v25, %s8646_s6 }
0x1e39   :  { %v5670_v13 = vpop.permute.xlu1 %5669  ;;  %8161 = vtanh.f32 %v11743_v51 }
0x1e3a   :  { %v8160_v47 = vpop.eup %8159  ;;  %v11749_v53 = vadd.f32 %v5670_v13, %v5609_v33 }
0x1e3b   :  { %5713 = vrot.lane.b32.xlu0 %v8160_v47, %s8646_s6 }
0x1e3c   :  { %8163 = vtanh.f32 %v11749_v53 }
0x1e3f   :  { %v8162_v52 = vpop.eup %8161 }
0x1e40   :  { %5719 = vrot.lane.b32.xlu1 %v8162_v52, %s8646_s6 }
0x1e41   :  { %v5676_v55 = vpop.permute.xlu1 %5675 }
0x1e42   :  { %v8164_v43 = vpop.eup %8163  ;;  %v11756_v60 = vadd.f32 %v5676_v55, %v5612_v36 }
0x1e43   :  { %5717 = vrot.lane.b32.xlu0 %v8164_v43, %s8646_s6 }
0x1e44   :  { %8165 = vtanh.f32 %v11756_v60 }
0x1e48   :  { %v5664_v6 = vpop.permute.xlu0 %5663 }
0x1e49   :  { %v11762_v37 = vadd.f32 %v5664_v6, %v5606_v30 }
0x1e4a   :  { %v8166_v46 = vpop.eup %8165 }
0x1e4b   :  { %8167 = vtanh.f32 %v11762_v37  ;;  %5723 = vrot.lane.b32.xlu0 %v8166_v46, %s8646_s6 }
0x1e50   :  { %v5668_v56 = vpop.permute.xlu0 %5667 }
0x1e51   :  { %v8168_v5 = vpop.eup %8167  ;;  %v11768_v50 = vadd.f32 %v5668_v56, %v5608_v38 }
0x1e52   :  { %5711 = vrot.lane.b32.xlu2 %v8168_v5, %s8646_s6 }
0x1e53   :  { %8169 = vtanh.f32 %v11768_v50 }
0x1e58   :  { %v5674_v24 = vpop.permute.xlu0 %5673 }
0x1e59   :  { %v8170_v21 = vpop.eup %8169  ;;  %v11774_v42 = vadd.f32 %v5674_v24, %v5611_v4 }
0x1e5a   :  { %5715 = vrot.lane.b32.xlu2 %v8170_v21, %s8646_s6 }
0x1e5b   :  { %8171 = vtanh.f32 %v11774_v42 }
0x1e61   :  { %v8172_v28 = vpop.eup %8171 }
0x1e62   :  { %5721 = vrot.lane.b32.xlu2 %v8172_v28, %s8646_s6 }
0x1eaa   :  { %v5710_v9 = vpop.permute.xlu1 %5709 }
0x1eab   :  { %v11787_v13 = vmul.f32 %v5710_v9, %v11692_v19 }
0x1eac   :  { %v5712_v58 = vpop.permute.xlu2 %5711 }
0x1ead   :  { %v5714_v26 = vpop.permute.xlu0 %5713  ;;  %v11780_v25 = vmul.f32 %v5712_v58, %v11696_v59  ;;  %12791 = vst [vmem:[#allocation56_spill] sm:$0xff] %v11787_v13 }
0x1eae   :  { %v11783_v33 = vmul.f32 %v5714_v26, %v11631_v22 }
0x1eaf   :  { %12789 = vst [vmem:[#allocation49_spill] sm:$0xff] %v11780_v25  ;;  %v5789_v40 = vrot.slane %v11780_v25, 7 }
0x1eb0   :  { %12790 = vst [vmem:[#allocation52_spill] sm:$0xff] %v11783_v33  ;;  %v5791_v52 = vrot.slane %v11783_v33, 6 }
0x1eb1   :  { %v5790_v43 = vsel %vm753_vm4, %v5789_v40, %v11787_v13  ;;  %v5781_v40 = vld [vmem:[#allocation11 + $0x5] sm:$0x1] }
0x1eb2   :  { %v5720_v22 = vpop.permute.xlu1 %5719  ;;  %v5792_v19 = vsel %vm756_vm5, %v5791_v52, %v5790_v43  ;;  %v5782_v52 = vld [vmem:[#allocation11 + $0xd] sm:$0x1] }
0x1eb3   :  { %v11802_v46 = vmul.f32 %v5720_v22, %v11713_v49 }
0x1eb4   :  { %v5716_v47 = vpop.permute.xlu2 %5715 }
0x1eb5   :  { %v5718_v36 = vpop.permute.xlu0 %5717  ;;  %v11791_v55 = vmul.f32 %v5716_v47, %v11716_v14  ;;  %12794 = vst [vmem:[#allocation48_spill] sm:$0xff] %v11802_v46  ;;  %v5797_v4 = vrot.slane %v11802_v46, 3 }
0x1eb6   :  { %v11796_v59 = vmul.f32 %v5718_v36, %v11651_v7  ;;  %v5783_v36 = vld [vmem:[#allocation11 + $0x15] sm:$0x1] }
0x1eb7   :  { %12792 = vst [vmem:[#allocation59_spill] sm:$0xff] %v11791_v55  ;;  %v5793_v30 = vrot.slane %v11791_v55, 5 }
0x1eb8   :  { %12793 = vst [vmem:[#allocation51_spill] sm:$0xff] %v11796_v59  ;;  %v5795_v6 = vrot.slane %v11796_v59, 4 }
0x1eb9   :  { %v5794_v38 = vsel %vm759_vm6, %v5793_v30, %v5792_v19 }
0x1eba   :  { %v5796_v7 = vsel %vm762_vm7, %v5795_v6, %v5794_v38 }
0x1ebb   :  { %v5798_v49 = vsel %vm765_vm8, %v5797_v4, %v5796_v7  ;;  %v5785_v4 = vld [vmem:[#allocation11 + $0x25] sm:$0x1] }
0x1ebc   :  { %v5722_v14 = vpop.permute.xlu2 %5721 }
0x1ebd   :  { %v5724_v56 = vpop.permute.xlu0 %5723  ;;  %v11806_v5 = vmul.f32 %v5722_v14, %v11727_v32  ;;  %v5786_v14 = vld [vmem:[#allocation11 + $0x2d] sm:$0x1] }
0x1ebe   :  { %v11811_v24 = vmul.f32 %v5724_v56, %v11673_v2  ;;  %v5784_v56 = vld [vmem:[#allocation11 + $0x1d] sm:$0x1] }
0x1ebf   :  { %12795 = vst [vmem:[#allocation58_spill] sm:$0xff] %v11806_v5  ;;  %v5799_v21 = vrot.slane %v11806_v5, 2 }
0x1ec0   :  { %12796 = vst [vmem:[#allocation63_spill] sm:$0xff] %v11811_v24  ;;  %v5801_v28 = vrot.slane %v11811_v24, 1 }
0x1ec1   :  { %v5800_v58 = vsel %vm768_vm9, %v5799_v21, %v5798_v49 }
0x1ec2   :  { %v5802_v9 = vsel %vm771_vm10, %v5801_v28, %v5800_v58 }
0x1ec3   :  { %5803 = vrot.lane.b32.xlu1 %v5802_v9, %s8647_s7 }
0x1f35   :  { %v5804_v32 = vpop.permute.xlu1 %5803 }
0x1f36   :  { %7291 = vmatmul.msk.f32.vlgmr.msra.gmra.mxu2 %vm203_vm0, %v5804_v32 }
0x1fb9   :  { %v5824_v26 = vpop.f32.mrf.mxu2 }
0x1fba   :  { %v5828_v47 = vrot.slane %v5824_v26, 1  ;;  %v5829_v2 = vrot.slane %v5824_v26, 2  ;;  %v5843_v43 = vadd.f32 %v5824_v26, %v5781_v40  ;;  %v5832_v6 = vrot.slane %v5824_v26, 5 }
0x1fbb   :  { %v5830_v19 = vrot.slane %v5824_v26, 3  ;;  %v5831_v38 = vrot.slane %v5824_v26, 4  ;;  %v5833_v32 = vrot.slane %v5824_v26, 6  ;;  %v5834_v40 = vrot.slane %v5824_v26, 7 }
0x1fbc   :  { %v5844_v22 = vadd.f32 %v5828_v47, %v5782_v52  ;;  %v5845_v30 = vadd.f32 %v5829_v2, %v5783_v36  ;;  %8173 = vtanh.f32 %v5843_v43  ;;  %v5848_v7 = vadd.f32 %v5832_v6, %v5786_v14  ;;  %v5787_v47 = vld [vmem:[#allocation11 + $0x35] sm:$0x1]  ;;  %v5788_v2 = vld [vmem:[#allocation11 + $0x3d] sm:$0x1] }
0x1fbd   :  { %v5846_v21 = vadd.f32 %v5830_v19, %v5784_v56  ;;  %v5847_v49 = vadd.f32 %v5831_v38, %v5785_v4  ;;  %v5849_v52 = vadd.f32 %v5833_v32, %v5787_v47  ;;  %v5850_v6 = vadd.f32 %v5834_v40, %v5788_v2 }
0x1fbe   :  { %8175 = vtanh.f32 %v5844_v22  ;;  %v7293_v26 = vmul.f32 -1.442695, %v5844_v22  ;;  %v7292_v2 = vmul.f32 -1.442695, %v5843_v43 }
0x1fbf   :  { %8177 = vtanh.f32 %v5845_v30  ;;  %v7295_v4 = vmul.f32 -1.442695, %v5846_v21 }
0x1fc0   :  { %8179 = vtanh.f32 %v5848_v7 }
0x1fc1   :  { %8181 = vtanh.f32 %v5846_v21 }
0x1fc2   :  { %v8174_v28 = vpop.eup %8173  ;;  %8183 = vtanh.f32 %v5847_v49 }
0x1fc3   :  { %6027 = vrot.lane.b32.xlu1 %v8174_v28, %s8646_s6  ;;  %8185 = vtanh.f32 %v5849_v52 }
0x1fc4   :  { %v8176_v58 = vpop.eup %8175  ;;  %8187 = vtanh.f32 %v5850_v6 }
0x1fc5   :  { %v8178_v9 = vpop.eup %8177  ;;  %6029 = vrot.lane.b32.xlu2 %v8176_v58, %s8646_s6  ;;  %8189 = vpow2.f32 %v7293_v26  ;;  %v7296_v26 = vmul.f32 -1.442695, %v5847_v49 }
0x1fc6   :  { %6031 = vrot.lane.b32.xlu0 %v8178_v9, %s8646_s6  ;;  %v8180_v36 = vpop.eup %8179  ;;  %8191 = vpow2.f32 %v7295_v4  ;;  %v7298_v9 = vmul.f32 -1.442695, %v5849_v52 }
0x1fc7   :  { %v8182_v19 = vpop.eup %8181 }
0x1fc8   :  { %v8184_v38 = vpop.eup %8183 }
0x1fc9   :  { %v8186_v14 = vpop.eup %8185 }
0x1fca   :  { %v8188_v56 = vpop.eup %8187 }
0x1fcb   :  { %6037 = vrot.lane.b32.xlu1 %v8180_v36, %s8646_s6  ;;  %v8190_v28 = vpop.eup %8189  ;;  %v7294_v36 = vmul.f32 -1.442695, %v5845_v30 }
0x1fcc   :  { %v5876_v58 = vadd.f32 1.0, %v8190_v28  ;;  %v8192_v32 = vpop.eup %8191 }
0x1fcd   :  { %6033 = vrot.lane.b32.xlu2 %v8182_v19, %s8646_s6  ;;  %v11828_v40 = vadd.f32 1.0, %v8192_v32 }
0x1fce   :  { %6035 = vrot.lane.b32.xlu0 %v8184_v38, %s8646_s6  ;;  %8193 = vrcp.f32 %v5876_v58  ;;  %vm5903_vm11 = vweird.f32 %v5876_v58 }
0x1fcf   :  { %8195 = vpow2.f32 %v7298_v9  ;;  %v5939_v24 = vand.u32 2147483648, %v11828_v40  ;;  %vm5933_vm14 = vweird.f32 %v11828_v40 }
0x1fd0   :  { %8197 = vrcp.f32 %v11828_v40 }
0x1fd1   :  { %8199 = vpow2.f32 %v7292_v2 }
0x1fd2   :  { %8201 = vpow2.f32 %v7294_v36 }
0x1fd4   :  { %v8194_v47 = vpop.eup %8193 }
0x1fd5   :  { %6039 = vrot.lane.b32.xlu2 %v8186_v14, %s8646_s6  ;;  %v8196_v19 = vpop.eup %8195  ;;  %v5899_v38 = vmul.f32 %v8194_v47, %v5876_v58  ;;  %vm5904_vm2 = vweird.f32 %v8194_v47 }
0x1fd6   :  { %6041 = vrot.lane.b32.xlu0 %v8188_v56, %s8646_s6  ;;  %v11831_v22 = vadd.f32 1.0, %v8196_v19  ;;  %v8198_v14 = vpop.eup %8197  ;;  %v7297_v56 = vmul.f32 -1.442695, %v5848_v7  ;;  %v5909_v7 = vand.u32 2147483648, %v5876_v58  ;;  %v5907_v19 = vand.u32 2147483647, %v5876_v58  ;;  %vm5905_vm3 = vmor %vm5903_vm11, %vm5904_vm2 }
0x1fd7   :  { %v5900_v21 = vsub.f32 1.0, %v5899_v38  ;;  %v8200_v52 = vpop.eup %8199  ;;  %v5929_v28 = vmul.f32 %v8198_v14, %v11828_v40  ;;  %v7299_v38 = vmul.f32 -1.442695, %v5850_v6  ;;  %vm5934_vm13 = vweird.f32 %v8198_v14 }
0x1fd8   :  { %8203 = vrcp.f32 %v11831_v22  ;;  %v8202_v43 = vpop.eup %8201  ;;  %v11835_v9 = vadd.f32 1.0, %v8200_v52  ;;  %vm5908_vm12 = vcmp.eq.f32.partialorder %v5907_v19, 8.507059e+37  ;;  %vm5935_vm15 = vmor %vm5933_vm14, %vm5934_vm13  ;;  %vm5978_vm11 = vweird.f32 %v11831_v22 }
0x1fd9   :  { %v5901_v4 = vmul.f32 %v8194_v47, %v5900_v21  ;;  %8205 = vpow2.f32 %v7297_v56  ;;  %v5930_v32 = vsub.f32 1.0, %v5929_v28  ;;  %v11837_v2 = vadd.f32 1.0, %v8202_v43 }
0x1fda   :  { %8207 = vpow2.f32 %v7296_v26  ;;  %vm5888_vm14 = vweird.f32 %v11835_v9 }
0x1fdb   :  { %v5902_v30 = vadd.f32 %v8194_v47, %v5901_v4  ;;  %8209 = vrcp.f32 %v11835_v9  ;;  %v5931_v56 = vmul.f32 %v8198_v14, %v5930_v32  ;;  %v5910_v4 = vor.u32 1.1754944e-38, %v5909_v7 }
0x1fdc   :  { %8211 = vrcp.f32 %v11837_v2  ;;  %v5937_v7 = vand.u32 2147483647, %v11828_v40 }
0x1fdd   :  { %v5906_v21 = vsel %vm5905_vm3, %v8194_v47, %v5902_v30  ;;  %8213 = vpow2.f32 %v7299_v38  ;;  %v5932_v47 = vadd.f32 %v8198_v14, %v5931_v56  ;;  %v5940_v56 = vor.u32 1.1754944e-38, %v5939_v24 }
0x1fde   :  { %v11839_v36 = vpop.eup %8203  ;;  %v11847_v46 = vsel %vm5908_vm12, %v5910_v4, %v5906_v21  ;;  %vm5938_vm1 = vcmp.eq.f32.partialorder %v5937_v7, 8.507059e+37  ;;  %v5984_v24 = vand.u32 2147483648, %v11831_v22  ;;  %v5982_v7 = vand.u32 2147483647, %v11831_v22 }
0x1fdf   :  { %v8206_v49 = vpop.eup %8205  ;;  %v5974_v52 = vmul.f32 %v11839_v36, %v11831_v22  ;;  %vm5979_vm2 = vweird.f32 %v11839_v36 }
0x1fe0   :  { %v8208_v26 = vpop.eup %8207  ;;  %v11845_v28 = vadd.f32 1.0, %v8206_v49  ;;  %v5936_v49 = vsel %vm5935_vm15, %v8198_v14, %v5932_v47  ;;  %vm5980_vm3 = vmor %vm5978_vm11, %vm5979_vm2  ;;  %vm5983_vm12 = vcmp.eq.f32.partialorder %v5982_v7, 8.507059e+37  ;;  %vm5918_vm2 = vweird.f32 %v11837_v2 }
0x1fe1   :  { %v11849_v58 = vpop.eup %8209  ;;  %v5975_v30 = vsub.f32 1.0, %v5974_v52  ;;  %v11852_v32 = vadd.f32 1.0, %v8208_v26  ;;  %v11867_v26 = vsel %vm5938_vm1, %v5940_v56, %v5936_v49 }
0x1fe2   :  { %v11855_v59 = vpop.eup %8211  ;;  %8215 = vrcp.f32 %v11845_v28  ;;  %v5884_v19 = vmul.f32 %v11849_v58, %v11835_v9  ;;  %vm5889_vm13 = vweird.f32 %v11849_v58 }
0x1fe3   :  { %v5976_v38 = vmul.f32 %v11839_v36, %v5975_v30  ;;  %8217 = vrcp.f32 %v11852_v32  ;;  %v8214_v21 = vpop.eup %8213  ;;  %v5914_v52 = vmul.f32 %v11855_v59, %v11837_v2  ;;  %vm5919_vm15 = vweird.f32 %v11855_v59  ;;  %vm5890_vm1 = vmor %vm5888_vm14, %vm5889_vm13 }
0x1fe4   :  { %v5885_v4 = vsub.f32 1.0, %v5884_v19  ;;  %v11874_v47 = vadd.f32 1.0, %v8214_v21  ;;  %v5985_v21 = vor.u32 1.1754944e-38, %v5984_v24  ;;  %vm5920_vm11 = vmor %vm5918_vm2, %vm5919_vm15  ;;  %vm5963_vm14 = vweird.f32 %v11845_v28 }
0x1fe5   :  { %v5977_v14 = vadd.f32 %v11839_v36, %v5976_v38  ;;  %v5915_v30 = vsub.f32 1.0, %v5914_v52  ;;  %vm5948_vm2 = vweird.f32 %v11852_v32 }
0x1fe6   :  { %v5886_v19 = vmul.f32 %v11849_v58, %v5885_v4  ;;  %8219 = vrcp.f32 %v11874_v47 }
0x1fe7   :  { %v5981_v38 = vsel %vm5980_vm3, %v11839_v36, %v5977_v14  ;;  %v5916_v56 = vmul.f32 %v11855_v59, %v5915_v30  ;;  %v5894_v36 = vand.u32 2147483648, %v11835_v9  ;;  %v5892_v14 = vand.u32 2147483647, %v11835_v9 }
0x1fe9   :  { %v5917_v24 = vadd.f32 %v11855_v59, %v5916_v56  ;;  %vm5893_vm3 = vcmp.eq.f32.partialorder %v5892_v14, 8.507059e+37  ;;  %v5969_v14 = vand.u32 2147483648, %v11845_v28 }
0x1feb   :  { %v5921_v56 = vsel %vm5920_vm11, %v11855_v59, %v5917_v24  ;;  %v5967_v59 = vand.u32 2147483647, %v11845_v28 }
0x201f   :  { %v6030_v43 = vpop.permute.xlu2 %6029 }
0x2020   :  { %v6052_v6 = vmul.f32 %v6030_v43, %v11847_v46  ;;  %v11869_v43 = vpop.eup %8215 }
0x2021   :  { %v11877_v5 = vpop.eup %8217  ;;  %v5959_v49 = vmul.f32 %v11869_v43, %v11845_v28  ;;  %vm5964_vm13 = vweird.f32 %v11869_v43  ;;  %v5952_v28 = vand.u32 2147483647, %v11852_v32 }
0x2022   :  { %6069 = vrot.lane.b32.xlu1 %v6052_v6, %s8647_s7  ;;  %v5944_v52 = vmul.f32 %v11877_v5, %v11852_v32  ;;  %v11900_v7 = vpop.eup %8219  ;;  %vm5949_vm15 = vweird.f32 %v11877_v5 }
0x2023   :  { %v5960_v4 = vsub.f32 1.0, %v5959_v49  ;;  %vm5950_vm11 = vmor %vm5948_vm2, %vm5949_vm15 }
0x2024   :  { %v5945_v30 = vsub.f32 1.0, %v5944_v52 }
0x2025   :  { %v5961_v9 = vmul.f32 %v11869_v43, %v5960_v4 }
0x2026   :  { %v5946_v52 = vmul.f32 %v11877_v5, %v5945_v30 }
0x2027   :  { %v6034_v40 = vpop.permute.xlu2 %6033 }
0x2028   :  { %v6054_v6 = vmul.f32 %v6034_v40, %v11867_v26  ;;  %v11890_v40 = vsel %vm5983_vm12, %v5985_v21, %v5981_v38  ;;  %v5922_v38 = vand.u32 2147483647, %v11837_v2  ;;  %v5895_v21 = vor.u32 1.1754944e-38, %v5894_v36 }
0x2029   :  { %v5947_v30 = vadd.f32 %v11877_v5, %v5946_v52 }
0x202a   :  { %6073 = vrot.lane.b32.xlu1 %v6054_v6, %s8647_s7  ;;  %v5887_v6 = vadd.f32 %v11849_v58, %v5886_v19  ;;  %v5924_v19 = vand.u32 2147483648, %v11837_v2  ;;  %vm5923_vm12 = vcmp.eq.f32.partialorder %v5922_v38, 8.507059e+37  ;;  %v5962_v2 = vadd.f32 %v11869_v43, %v5961_v9 }
0x202b   :  { %v5970_v9 = vor.u32 1.1754944e-38, %v5969_v14 }
0x202c   :  { %v5891_v49 = vsel %vm5890_vm1, %v11849_v58, %v5887_v6  ;;  %v5925_v58 = vor.u32 1.1754944e-38, %v5924_v19  ;;  %vm5965_vm1 = vmor %vm5963_vm14, %vm5964_vm13  ;;  %vm5994_vm13 = vweird.f32 %v11900_v7  ;;  %vm5993_vm14 = vweird.f32 %v11874_v47 }
0x202d   :  { %v11912_v25 = vsel %vm5893_vm3, %v5895_v21, %v5891_v49  ;;  %v5954_v49 = vand.u32 2147483648, %v11852_v32  ;;  %v5966_v38 = vsel %vm5965_vm1, %v11869_v43, %v5962_v2  ;;  %vm5968_vm3 = vcmp.eq.f32.partialorder %v5967_v59, 8.507059e+37  ;;  %vm5995_vm15 = vmor %vm5993_vm14, %vm5994_vm13 }
0x202e   :  { %v11917_v36 = vsel %vm5923_vm12, %v5925_v58, %v5921_v56  ;;  %v5951_v21 = vsel %vm5950_vm11, %v11877_v5, %v5947_v30  ;;  %vm5953_vm12 = vcmp.eq.f32.partialorder %v5952_v28, 8.507059e+37  ;;  %v5999_v5 = vand.u32 2147483648, %v11874_v47 }
0x202f   :  { %v6040_v22 = vpop.permute.xlu2 %6039 }
0x2030   :  { %v6057_v55 = vmul.f32 %v6040_v22, %v11890_v40  ;;  %v6000_v14 = vor.u32 1.1754944e-38, %v5999_v5 }
0x2032   :  { %6079 = vrot.lane.b32.xlu1 %v6057_v55, %s8647_s7  ;;  %v5989_v55 = vmul.f32 %v11900_v7, %v11874_v47 }
0x2034   :  { %v5990_v19 = vsub.f32 1.0, %v5989_v55  ;;  %v11933_v55 = vsel %vm5968_vm3, %v5970_v9, %v5966_v38  ;;  %v6013_v38 = vmul.f32 %v11917_v36, %v11738_v27 }
0x2035   :  { %v6028_v22 = vpop.permute.xlu1 %6027 }
0x2036   :  { %v6051_v6 = vmul.f32 %v6028_v22, %v11912_v25  ;;  %v5991_v56 = vmul.f32 %v11900_v7, %v5990_v19  ;;  %v5955_v22 = vor.u32 1.1754944e-38, %v5954_v49  ;;  %v6012_v49 = vmul.f32 %v11847_v46, %v11762_v37 }
0x2038   :  { %v6032_v4 = vpop.permute.xlu0 %6031  ;;  %6067 = vrot.lane.b32.xlu0 %v6051_v6, %s8647_s7  ;;  %v11936_v6 = vsel %vm5953_vm12, %v5955_v22, %v5951_v21  ;;  %v5992_v32 = vadd.f32 %v11900_v7, %v5991_v56  ;;  %v6014_v21 = vmul.f32 %v11867_v26, %v11768_v50  ;;  %v6017_v50 = vmul.f32 %v11890_v40, %v11774_v42 }
0x2039   :  { %v6053_v24 = vmul.f32 %v6032_v4, %v11917_v36  ;;  %v5997_v4 = vand.u32 2147483647, %v11874_v47  ;;  %v6015_v56 = vmul.f32 %v11936_v6, %v11749_v53  ;;  %v6011_v42 = vmul.f32 %v11912_v25, %v11733_v62 }
0x203a   :  { %v5996_v59 = vsel %vm5995_vm15, %v11900_v7, %v5992_v32 }
0x203b   :  { %6071 = vrot.lane.b32.xlu2 %v6053_v24, %s8647_s7  ;;  %vm5998_vm1 = vcmp.eq.f32.partialorder %v5997_v4, 8.507059e+37 }
0x203c   :  { %v11947_v24 = vsel %vm5998_vm1, %v6000_v14, %v5996_v59 }
0x203d   :  { %v6038_v52 = vpop.permute.xlu1 %6037  ;;  %v6018_v53 = vmul.f32 %v11947_v24, %v11756_v60 }
0x203e   :  { %v6056_v58 = vmul.f32 %v6038_v52, %v11933_v55 }
0x2040   :  { %v6036_v43 = vpop.permute.xlu0 %6035  ;;  %6077 = vrot.lane.b32.xlu0 %v6056_v58, %s8647_s7 }
0x2041   :  { %v6055_v2 = vmul.f32 %v6036_v43, %v11936_v6 }
0x2043   :  { %6075 = vrot.lane.b32.xlu2 %v6055_v2, %s8647_s7 }
0x2048   :  { %v6042_v30 = vpop.permute.xlu0 %6041 }
0x2049   :  { %v6058_v19 = vmul.f32 %v6042_v30, %v11947_v24 }
0x204b   :  { %6081 = vrot.lane.b32.xlu2 %v6058_v19, %s8647_s7 }
0x2094   :  { %v6070_v28 = vpop.permute.xlu1 %6069 }
0x2095   :  { %v6072_v47 = vpop.permute.xlu2 %6071  ;;  %v11955_v9 = vadd.f32 %v6070_v28, %v6012_v49 }
0x2096   :  { %v11957_v7 = vadd.f32 %v6072_v47, %v6013_v38  ;;  %v6016_v38 = vmul.f32 %v11933_v55, %v11743_v51 }
0x2097   :  { %8221 = vtanh.f32 %v11955_v9 }
0x2098   :  { %8223 = vtanh.f32 %v11957_v7 }
0x209c   :  { %v6074_v37 = vpop.permute.xlu1 %6073 }
0x209d   :  { %v8222_v52 = vpop.eup %8221  ;;  %v6076_v22 = vpop.permute.xlu2 %6075  ;;  %v11965_v27 = vadd.f32 %v6074_v37, %v6014_v21 }
0x209e   :  { %v8224_v58 = vpop.eup %8223  ;;  %v11967_v43 = vadd.f32 %v6076_v22, %v6015_v56  ;;  %6117 = vrot.lane.b32.xlu0 %v8222_v52, %s8646_s6 }
0x209f   :  { %8225 = vtanh.f32 %v11965_v27  ;;  %6119 = vrot.lane.b32.xlu1 %v8224_v58, %s8646_s6 }
0x20a0   :  { %8227 = vtanh.f32 %v11967_v43 }
0x20a4   :  { %v6080_v2 = vpop.permute.xlu1 %6079 }
0x20a5   :  { %v8226_v32 = vpop.eup %8225  ;;  %v6082_v5 = vpop.permute.xlu2 %6081  ;;  %v11977_v4 = vadd.f32 %v6080_v2, %v6017_v50 }
0x20a6   :  { %v8228_v59 = vpop.eup %8227  ;;  %v11979_v14 = vadd.f32 %v6082_v5, %v6018_v53  ;;  %6121 = vrot.lane.b32.xlu0 %v8226_v32, %s8646_s6 }
0x20a7   :  { %8229 = vtanh.f32 %v11977_v4  ;;  %6123 = vrot.lane.b32.xlu1 %v8228_v59, %s8646_s6 }
0x20a8   :  { %8231 = vtanh.f32 %v11979_v14 }
0x20aa   :  { %v6068_v60 = vpop.permute.xlu0 %6067 }
0x20ab   :  { %v11987_v30 = vadd.f32 %v6068_v60, %v6011_v42 }
0x20ad   :  { %v8230_v19 = vpop.eup %8229  ;;  %8233 = vtanh.f32 %v11987_v30 }
0x20ae   :  { %v8232_v49 = vpop.eup %8231  ;;  %6127 = vrot.lane.b32.xlu0 %v8230_v19, %s8646_s6 }
0x20af   :  { %6129 = vrot.lane.b32.xlu1 %v8232_v49, %s8646_s6 }
0x20b2   :  { %v6078_v28 = vpop.permute.xlu0 %6077 }
0x20b3   :  { %v8234_v47 = vpop.eup %8233  ;;  %v11994_v21 = vadd.f32 %v6078_v28, %v6016_v38 }
0x20b4   :  { %6115 = vrot.lane.b32.xlu2 %v8234_v47, %s8646_s6 }
0x20b5   :  { %8235 = vtanh.f32 %v11994_v21 }
0x20bb   :  { %v8236_v62 = vpop.eup %8235 }
0x20bc   :  { %6125 = vrot.lane.b32.xlu2 %v8236_v62, %s8646_s6 }
0x210e   :  { %v6116_v37 = vpop.permute.xlu2 %6115 }
0x210f   :  { %v12007_v50 = vmul.f32 %v6116_v37, %v11912_v25 }
0x2110   :  { %v6118_v56 = vpop.permute.xlu0 %6117 }
0x2111   :  { %v6120_v52 = vpop.permute.xlu1 %6119  ;;  %v12000_v22 = vmul.f32 %v6118_v56, %v11847_v46  ;;  %12799 = vst [vmem:[#allocation62_spill] sm:$0xff] %v12007_v50 }
0x2112   :  { %v12003_v58 = vmul.f32 %v6120_v52, %v11917_v36 }
0x2113   :  { %12797 = vst [vmem:[#allocation45_spill] sm:$0xff] %v12000_v22  ;;  %v6195_v51 = vrot.slane %v12000_v22, 7 }
0x2114   :  { %12798 = vst [vmem:[#allocation55_spill] sm:$0xff] %v12003_v58  ;;  %v6197_v2 = vrot.slane %v12003_v58, 6 }
0x2115   :  { %v6196_v59 = vsel %vm753_vm4, %v6195_v51, %v12007_v50 }
0x2116   :  { %v6126_v36 = vpop.permute.xlu2 %6125  ;;  %v6198_v25 = vsel %vm756_vm5, %v6197_v2, %v6196_v59  ;;  %v6187_v2 = vld [vmem:[#allocation11 + $0x6] sm:$0x1]  ;;  %v6188_v59 = vld [vmem:[#allocation11 + $0xe] sm:$0x1] }
0x2117   :  { %v12022_v19 = vmul.f32 %v6126_v36, %v11933_v55 }
0x2118   :  { %v6122_v53 = vpop.permute.xlu0 %6121 }
0x2119   :  { %v6124_v32 = vpop.permute.xlu1 %6123  ;;  %v12011_v5 = vmul.f32 %v6122_v53, %v11867_v26  ;;  %12802 = vst [vmem:[#allocation66_spill] sm:$0xff] %v12022_v19 }
0x211a   :  { %v12016_v46 = vmul.f32 %v6124_v32, %v11936_v6  ;;  %v6203_v6 = vrot.slane %v12022_v19, 3 }
0x211b   :  { %12800 = vst [vmem:[#allocation64_spill] sm:$0xff] %v12011_v5  ;;  %v6199_v42 = vrot.slane %v12011_v5, 5 }
0x211c   :  { %12801 = vst [vmem:[#allocation65_spill] sm:$0xff] %v12016_v46  ;;  %v6201_v60 = vrot.slane %v12016_v46, 4 }
0x211d   :  { %v6200_v49 = vsel %vm759_vm6, %v6199_v42, %v6198_v25  ;;  %v6189_v42 = vld [vmem:[#allocation11 + $0x16] sm:$0x1] }
0x211e   :  { %v6202_v38 = vsel %vm762_vm7, %v6201_v60, %v6200_v49 }
0x211f   :  { %v6204_v55 = vsel %vm765_vm8, %v6203_v6, %v6202_v38  ;;  %v6192_v38 = vld [vmem:[#allocation11 + $0x2e] sm:$0x1] }
0x2120   :  { %v6128_v26 = vpop.permute.xlu0 %6127 }
0x2121   :  { %v6130_v28 = vpop.permute.xlu1 %6129  ;;  %v12027_v47 = vmul.f32 %v6128_v26, %v11890_v40 }
0x2122   :  { %v12031_v62 = vmul.f32 %v6130_v28, %v11947_v24 }
0x2123   :  { %12803 = vst [vmem:[#allocation67_spill] sm:$0xff] %v12027_v47  ;;  %v6205_v56 = vrot.slane %v12027_v47, 2 }
0x2124   :  { %12804 = vst [vmem:[#allocation68_spill] sm:$0xff] %v12031_v62  ;;  %v6207_v37 = vrot.slane %v12031_v62, 1 }
0x2125   :  { %v6206_v52 = vsel %vm768_vm9, %v6205_v56, %v6204_v55  ;;  %v6190_v56 = vld [vmem:[#allocation11 + $0x1e] sm:$0x1]  ;;  %v6191_v55 = vld [vmem:[#allocation11 + $0x26] sm:$0x1] }
0x2126   :  { %v6208_v51 = vsel %vm771_vm10, %v6207_v37, %v6206_v52 }
0x2127   :  { %6209 = vrot.lane.b32.xlu2 %v6208_v51, %s8647_s7 }
0x2181   :  { %v6210_v53 = vpop.permute.xlu2 %6209 }
0x2182   :  { %7300 = vmatmul.msk.f32.vlgmr.msrb.gmra.mxu1 %vm203_vm0, %v6210_v53 }
0x21ff   :  { %v6230_v40 = vpop.f32.mrf.mxu1 }
0x2200   :  { %v6234_v32 = vrot.slane %v6230_v40, 1  ;;  %v6235_v24 = vrot.slane %v6230_v40, 2  ;;  %v6249_v36 = vadd.f32 %v6230_v40, %v6187_v2  ;;  %v6238_v49 = vrot.slane %v6230_v40, 5 }
0x2201   :  { %v6236_v26 = vrot.slane %v6230_v40, 3  ;;  %v6237_v28 = vrot.slane %v6230_v40, 4 }
0x2202   :  { %v6250_v60 = vadd.f32 %v6234_v32, %v6188_v59  ;;  %v6251_v25 = vadd.f32 %v6235_v24, %v6189_v42  ;;  %8237 = vtanh.f32 %v6249_v36  ;;  %v6254_v6 = vadd.f32 %v6238_v49, %v6192_v38  ;;  %v6193_v59 = vld [vmem:[#allocation11 + $0x36] sm:$0x1]  ;;  %v6194_v49 = vld [vmem:[#allocation11 + $0x3e] sm:$0x1] }
0x2203   :  { %v6252_v52 = vadd.f32 %v6236_v26, %v6190_v56  ;;  %v6253_v51 = vadd.f32 %v6237_v28, %v6191_v55  ;;  %v6239_v32 = vrot.slane %v6230_v40, 6  ;;  %v6240_v24 = vrot.slane %v6230_v40, 7 }
0x2204   :  { %8239 = vtanh.f32 %v6250_v60  ;;  %v7301_v40 = vmul.f32 -1.442695, %v6249_v36  ;;  %v7306_v55 = vmul.f32 -1.442695, %v6254_v6 }
0x2205   :  { %8241 = vtanh.f32 %v6251_v25  ;;  %v6255_v38 = vadd.f32 %v6239_v32, %v6193_v59  ;;  %v6256_v62 = vadd.f32 %v6240_v24, %v6194_v49 }
0x2206   :  { %8243 = vtanh.f32 %v6254_v6 }
0x2207   :  { %8245 = vtanh.f32 %v6252_v52 }
0x2208   :  { %v8238_v37 = vpop.eup %8237  ;;  %8247 = vtanh.f32 %v6253_v51 }
0x2209   :  { %6433 = vrot.lane.b32.xlu2 %v8238_v37, %s8646_s6  ;;  %8249 = vtanh.f32 %v6255_v38 }
0x220a   :  { %v8240_v53 = vpop.eup %8239  ;;  %8251 = vtanh.f32 %v6256_v62 }
0x220b   :  { %v8242_v2 = vpop.eup %8241  ;;  %6435 = vrot.lane.b32.xlu0 %v8240_v53, %s8646_s6  ;;  %8253 = vpow2.f32 %v7301_v40  ;;  %v7305_v40 = vmul.f32 -1.442695, %v6253_v51 }
0x220c   :  { %6437 = vrot.lane.b32.xlu1 %v8242_v2, %s8646_s6  ;;  %v8244_v42 = vpop.eup %8243  ;;  %8255 = vpow2.f32 %v7306_v55 }
0x220d   :  { %v8246_v26 = vpop.eup %8245 }
0x220e   :  { %v8248_v28 = vpop.eup %8247 }
0x220f   :  { %v8250_v56 = vpop.eup %8249 }
0x2210   :  { %v8252_v37 = vpop.eup %8251 }
0x2211   :  { %6443 = vrot.lane.b32.xlu2 %v8244_v42, %s8646_s6  ;;  %v8254_v53 = vpop.eup %8253  ;;  %v7302_v42 = vmul.f32 -1.442695, %v6250_v60 }
0x2212   :  { %v6281_v2 = vadd.f32 1.0, %v8254_v53  ;;  %v8256_v32 = vpop.eup %8255 }
0x2213   :  { %6439 = vrot.lane.b32.xlu0 %v8246_v26, %s8646_s6  ;;  %v6286_v24 = vadd.f32 1.0, %v8256_v32  ;;  %v7303_v26 = vmul.f32 -1.442695, %v6251_v25 }
0x2214   :  { %6441 = vrot.lane.b32.xlu1 %v8248_v28, %s8646_s6  ;;  %8257 = vrcp.f32 %v6281_v2  ;;  %v6300_v32 = vand.u32 2147483648, %v6281_v2  ;;  %vm6294_vm11 = vweird.f32 %v6281_v2  ;;  %v6298_v60 = vand.u32 2147483647, %v6281_v2 }
0x2215   :  { %8259 = vrcp.f32 %v6286_v24  ;;  %vm6369_vm14 = vweird.f32 %v6286_v24 }
0x2216   :  { %8261 = vpow2.f32 %v7302_v42  ;;  %v7307_v42 = vmul.f32 -1.442695, %v6255_v38  ;;  %v6301_v51 = vor.u32 1.1754944e-38, %v6300_v32  ;;  %vm6299_vm12 = vcmp.eq.f32.partialorder %v6298_v60, 8.507059e+37 }
0x2217   :  { %8263 = vpow2.f32 %v7303_v26  ;;  %v7308_v26 = vmul.f32 -1.442695, %v6256_v62  ;;  %v6375_v38 = vand.u32 2147483648, %v6286_v24  ;;  %v6373_v62 = vand.u32 2147483647, %v6286_v24 }
0x2219   :  { %v6376_v32 = vor.u32 1.1754944e-38, %v6375_v38  ;;  %vm6374_vm1 = vcmp.eq.f32.partialorder %v6373_v62, 8.507059e+37 }
0x221a   :  { %v8258_v59 = vpop.eup %8257 }
0x221b   :  { %6445 = vrot.lane.b32.xlu0 %v8250_v56, %s8646_s6  ;;  %v6290_v49 = vmul.f32 %v8258_v59, %v6281_v2  ;;  %v8260_v47 = vpop.eup %8259  ;;  %v7304_v56 = vmul.f32 -1.442695, %v6252_v52  ;;  %vm6295_vm2 = vweird.f32 %v8258_v59 }
0x221c   :  { %6447 = vrot.lane.b32.xlu1 %v8252_v37, %s8646_s6  ;;  %v6365_v36 = vmul.f32 %v8260_v47, %v6286_v24  ;;  %v8262_v6 = vpop.eup %8261  ;;  %vm6296_vm3 = vmor %vm6294_vm11, %vm6295_vm2  ;;  %vm6370_vm13 = vweird.f32 %v8260_v47 }
0x221d   :  { %v6291_v28 = vsub.f32 1.0, %v6290_v49  ;;  %v8264_v19 = vpop.eup %8263  ;;  %8265 = vpow2.f32 %v7304_v56  ;;  %v12048_v46 = vadd.f32 1.0, %v8262_v6  ;;  %vm6371_vm15 = vmor %vm6369_vm14, %vm6370_vm13 }
0x221e   :  { %v6366_v53 = vsub.f32 1.0, %v6365_v36  ;;  %8267 = vpow2.f32 %v7305_v40  ;;  %v12050_v25 = vadd.f32 1.0, %v8264_v19 }
0x221f   :  { %v6292_v37 = vmul.f32 %v8258_v59, %v6291_v28  ;;  %8269 = vrcp.f32 %v12048_v46 }
0x2220   :  { %v6367_v49 = vmul.f32 %v8260_v47, %v6366_v53  ;;  %8271 = vrcp.f32 %v12050_v25  ;;  %v6330_v22 = vand.u32 2147483648, %v12050_v25 }
0x2221   :  { %v6293_v55 = vadd.f32 %v8258_v59, %v6292_v37  ;;  %8273 = vpow2.f32 %v7307_v42 }
0x2222   :  { %v6368_v19 = vadd.f32 %v8260_v47, %v6367_v49  ;;  %8275 = vpow2.f32 %v7308_v26  ;;  %v6331_v33 = vor.u32 1.1754944e-38, %v6330_v22 }
0x2223   :  { %v6297_v52 = vsel %vm6296_vm3, %v8258_v59, %v6293_v55  ;;  %v8266_v28 = vpop.eup %8265  ;;  %vm6309_vm3 = vweird.f32 %v12048_v46 }
0x2224   :  { %v8268_v56 = vpop.eup %8267  ;;  %v12054_v36 = vsel %vm6299_vm12, %v6301_v51, %v6297_v52  ;;  %v12057_v59 = vadd.f32 1.0, %v8266_v28  ;;  %v6372_v53 = vsel %vm6371_vm15, %v8260_v47, %v6368_v19  ;;  %vm6324_vm12 = vweird.f32 %v12050_v25 }
0x2225   :  { %v12060_v40 = vadd.f32 1.0, %v8268_v56  ;;  %v8270_v6 = vpop.eup %8269  ;;  %v12065_v26 = vsel %vm6374_vm1, %v6376_v32, %v6372_v53 }
0x2226   :  { %v8272_v55 = vpop.eup %8271  ;;  %8277 = vrcp.f32 %v12057_v59  ;;  %v6305_v42 = vmul.f32 %v8270_v6, %v12048_v46  ;;  %vm6310_vm2 = vweird.f32 %v8270_v6 }
0x2227   :  { %v8274_v60 = vpop.eup %8273  ;;  %8279 = vrcp.f32 %v12060_v40  ;;  %v6320_v24 = vmul.f32 %v8272_v55, %v12050_v25  ;;  %vm6325_vm11 = vweird.f32 %v8272_v55  ;;  %vm6311_vm13 = vmor %vm6309_vm3, %vm6310_vm2  ;;  %vm6339_vm3 = vweird.f32 %v12057_v59 }
0x2228   :  { %v8276_v52 = vpop.eup %8275  ;;  %v12069_v28 = vadd.f32 1.0, %v8274_v60  ;;  %v6306_v47 = vsub.f32 1.0, %v6305_v42  ;;  %vm12094_vm14 = vmor %vm6324_vm12, %vm6325_vm11  ;;  %vm6354_vm12 = vweird.f32 %v12060_v40 }
0x2229   :  { %v12072_v56 = vadd.f32 1.0, %v8276_v52 }
0x222a   :  { %8281 = vrcp.f32 %v12069_v28  ;;  %v6307_v38 = vmul.f32 %v8270_v6, %v6306_v47 }
0x222b   :  { %8283 = vrcp.f32 %v12072_v56 }
0x222c   :  { %v6308_v60 = vadd.f32 %v8270_v6, %v6307_v38  ;;  %v6328_v38 = vand.u32 2147483647, %v12050_v25 }
0x222e   :  { %vm6329_vm1 = vcmp.eq.f32.partialorder %v6328_v38, 8.507059e+37 }
0x2263   :  { %v6434_v37 = vpop.permute.xlu2 %6433 }
0x2264   :  { %v6457_v2 = vmul.f32 %v6434_v37, %v12054_v36  ;;  %v12074_v37 = vpop.eup %8277 }
0x2265   :  { %v12076_v19 = vpop.eup %8279  ;;  %v6335_v62 = vmul.f32 %v12074_v37, %v12057_v59  ;;  %vm6340_vm11 = vweird.f32 %v12074_v37 }
0x2266   :  { %6473 = vrot.lane.b32.xlu1 %v6457_v2, %s8647_s7  ;;  %v6321_v2 = vsub.f32 1.0, %v6320_v24  ;;  %v6350_v32 = vmul.f32 %v12076_v19, %v12060_v40  ;;  %v12084_v52 = vpop.eup %8281  ;;  %v6315_v24 = vand.u32 2147483648, %v12048_v46  ;;  %vm6355_vm2 = vweird.f32 %v12076_v19 }
0x2267   :  { %v6336_v42 = vsub.f32 1.0, %v6335_v62  ;;  %v12087_v47 = vpop.eup %8283  ;;  %v6380_v50 = vmul.f32 %v12084_v52, %v12069_v28 }
0x2268   :  { %v6322_v53 = vmul.f32 %v8272_v55, %v6321_v2  ;;  %v6313_v2 = vand.u32 2147483647, %v12048_v46  ;;  %v6316_v58 = vor.u32 1.1754944e-38, %v6315_v24  ;;  %v6395_v25 = vmul.f32 %v12087_v47, %v12072_v56 }
0x226a   :  { %vm6314_vm15 = vcmp.eq.f32.partialorder %v6313_v2, 8.507059e+37  ;;  %v6360_v2 = vand.u32 2147483648, %v12060_v40 }
0x226b   :  { %v6444_v49 = vpop.permute.xlu2 %6443 }
0x226c   :  { %v6462_v51 = vmul.f32 %v6444_v49, %v12065_v26  ;;  %v6323_v49 = vadd.f32 %v8272_v55, %v6322_v53  ;;  %v6312_v53 = vsel %vm6311_vm13, %v8270_v6, %v6308_v60  ;;  %vm6341_vm13 = vmor %vm6339_vm3, %vm6340_vm11  ;;  %vm6400_vm11 = vweird.f32 %v12087_v47 }
0x226d   :  { %v12106_v17 = vsel %vm6314_vm15, %v6316_v58, %v6312_v53  ;;  %v6396_v58 = vsub.f32 1.0, %v6395_v25  ;;  %v6361_v53 = vor.u32 1.1754944e-38, %v6360_v2  ;;  %vm6384_vm3 = vweird.f32 %v12069_v28 }
0x226e   :  { %6483 = vrot.lane.b32.xlu1 %v6462_v51, %s8647_s7  ;;  %v6351_v51 = vsub.f32 1.0, %v6350_v32  ;;  %v6337_v32 = vmul.f32 %v12074_v37, %v6336_v42  ;;  %v6327_v5 = vsel %vm12094_vm14, %v8272_v55, %v6323_v49  ;;  %v6381_v49 = vsub.f32 1.0, %v6380_v50  ;;  %vm6356_vm14 = vmor %vm6354_vm12, %vm6355_vm2 }
0x226f   :  { %v12110_v60 = vsel %vm6329_vm1, %v6331_v33, %v6327_v5  ;;  %v6343_v33 = vand.u32 2147483647, %v12057_v59  ;;  %vm6385_vm2 = vweird.f32 %v12084_v52  ;;  %vm6399_vm12 = vweird.f32 %v12072_v56 }
0x2270   :  { %v6352_v46 = vmul.f32 %v12076_v19, %v6351_v51  ;;  %v6338_v42 = vadd.f32 %v12074_v37, %v6337_v32  ;;  %v6345_v51 = vand.u32 2147483648, %v12057_v59  ;;  %v6382_v5 = vmul.f32 %v12084_v52, %v6381_v49 }
0x2271   :  { %v6397_v59 = vmul.f32 %v12087_v47, %v6396_v58  ;;  %vm6344_vm15 = vcmp.eq.f32.partialorder %v6343_v33, 8.507059e+37  ;;  %v6405_v49 = vand.u32 2147483648, %v12072_v56 }
0x2272   :  { %v6353_v22 = vadd.f32 %v12076_v19, %v6352_v46  ;;  %v6342_v50 = vsel %vm6341_vm13, %v12074_v37, %v6338_v42  ;;  %v6346_v62 = vor.u32 1.1754944e-38, %v6345_v51  ;;  %v6383_v37 = vadd.f32 %v12084_v52, %v6382_v5  ;;  %vm6386_vm13 = vmor %vm6384_vm3, %vm6385_vm2 }
0x2273   :  { %v6390_v42 = vand.u32 2147483648, %v12069_v28  ;;  %v6406_v33 = vor.u32 1.1754944e-38, %v6405_v49  ;;  %vm12807_vm2 = vcmask 253952  }
0x2274   :  { %v6357_v38 = vsel %vm6356_vm14, %v12076_v19, %v6353_v22  ;;  %v12132_v32 = vsel %vm6344_vm15, %v6346_v62, %v6342_v50  ;;  %v6403_v22 = vand.u32 2147483647, %v12072_v56  ;;  %vm6401_vm14 = vmor %vm6399_vm12, %vm6400_vm11  ;;  %v6387_v51 = vsel %vm6386_vm13, %v12084_v52, %v6383_v37 }
0x2275   :  { %v6391_v2 = vor.u32 1.1754944e-38, %v6390_v42  ;;  %v6417_v52 = vmul.f32 %v12054_v36, %v11987_v30  ;;  %v6420_v30 = vmul.f32 %v12132_v32, %v11965_v27  ;;  %vm12808_vm11 = vmmov %vm12807_vm2 }
0x2276   :  { %vm12809_vm3 = vmmov %vm12807_vm2 }
0x2277   :  { %vm12810_vm12 = vmmov %vm12807_vm2 }
0x2278   :  { %vm12811_vm13 = vmmov %vm12807_vm2 }
0x227d   :  { %v6436_v13 = vpop.permute.xlu0 %6435 }
0x227e   :  { %v6438_v6 = vpop.permute.xlu1 %6437  ;;  %v6458_v55 = vmul.f32 %v6436_v13, %v12106_v17  ;;  %v6358_v13 = vand.u32 2147483647, %v12060_v40 }
0x227f   :  { %v6459_v24 = vmul.f32 %v6438_v6, %v12110_v60 }
0x2280   :  { %6475 = vrot.lane.b32.xlu2 %v6458_v55, %s8647_s7  ;;  %vm6359_vm1 = vcmp.eq.f32.partialorder %v6358_v13, 8.507059e+37  ;;  %v6398_v55 = vadd.f32 %v12087_v47, %v6397_v59  ;;  %v6418_v59 = vmul.f32 %v12106_v17, %v11955_v9 }
0x2281   :  { %6477 = vrot.lane.b32.xlu0 %v6459_v24, %s8647_s7  ;;  %v12134_v46 = vsel %vm6359_vm1, %v6361_v53, %v6357_v38  ;;  %v6388_v24 = vand.u32 2147483647, %v12069_v28  ;;  %vm6404_vm1 = vcmp.eq.f32.partialorder %v6403_v22, 8.507059e+37 }
0x2282   :  { %v6402_v58 = vsel %vm6401_vm14, %v12087_v47, %v6398_v55  ;;  %vm12812_vm14 = vmmov %vm12807_vm2 }
0x2283   :  { %vm6389_vm15 = vcmp.eq.f32.partialorder %v6388_v24, 8.507059e+37  ;;  %v12154_v28 = vsel %vm6404_vm1, %v6406_v33, %v6402_v58  ;;  %vm12814_vm1 = vmmov %vm12807_vm2 }
0x2284   :  { %v12152_v13 = vsel %vm6389_vm15, %v6391_v2, %v6387_v51  ;;  %v6419_v51 = vmul.f32 %v12110_v60, %v11957_v7  ;;  %v6424_v7 = vmul.f32 %v12154_v28, %v11979_v14  ;;  %vm12813_vm15 = vmmov %vm12807_vm2 }
0x2285   :  { %v6440_v40 = vpop.permute.xlu0 %6439  ;;  %v6423_v49 = vmul.f32 %v12152_v13, %v11977_v4  ;;  %v6421_v4 = vmul.f32 %v12134_v46, %v11967_v43 }
0x2286   :  { %v6442_v25 = vpop.permute.xlu1 %6441  ;;  %v6460_v6 = vmul.f32 %v6440_v40, %v12132_v32 }
0x2287   :  { %v6461_v19 = vmul.f32 %v6442_v25, %v12134_v46  ;;  %v6422_v25 = vmul.f32 %v12065_v26, %v11994_v21 }
0x2288   :  { %6479 = vrot.lane.b32.xlu2 %v6460_v6, %s8647_s7 }
0x2289   :  { %6481 = vrot.lane.b32.xlu0 %v6461_v19, %s8647_s7 }
0x228d   :  { %v6446_v50 = vpop.permute.xlu0 %6445 }
0x228e   :  { %v6448_v5 = vpop.permute.xlu1 %6447  ;;  %v6463_v38 = vmul.f32 %v6446_v50, %v12152_v13 }
0x228f   :  { %v6464_v56 = vmul.f32 %v6448_v5, %v12154_v28 }
0x2290   :  { %6485 = vrot.lane.b32.xlu2 %v6463_v38, %s8647_s7 }
0x2291   :  { %6487 = vrot.lane.b32.xlu0 %v6464_v56, %s8647_s7 }
0x22d8   :  { %v6474_v47 = vpop.permute.xlu1 %6473 }
0x22d9   :  { %v12162_v62 = vadd.f32 %v6474_v47, %v6417_v52 }
0x22da   :  { %v6476_v53 = vpop.permute.xlu2 %6475 }
0x22db   :  { %8285 = vtanh.f32 %v12162_v62  ;;  %v12167_v40 = vadd.f32 %v6476_v53, %v6418_v59 }
0x22dd   :  { %8287 = vtanh.f32 %v12167_v40 }
0x22e0   :  { %v6484_v6 = vpop.permute.xlu1 %6483 }
0x22e1   :  { %v8286_v37 = vpop.eup %8285  ;;  %v12172_v19 = vadd.f32 %v6484_v6, %v6422_v25 }
0x22e2   :  { %6521 = vrot.lane.b32.xlu0 %v8286_v37, %s8646_s6  ;;  %v6480_v9 = vpop.permute.xlu2 %6479 }
0x22e3   :  { %v8288_v55 = vpop.eup %8287  ;;  %8289 = vtanh.f32 %v12172_v19  ;;  %v12178_v42 = vadd.f32 %v6480_v9, %v6420_v30 }
0x22e4   :  { %6523 = vrot.lane.b32.xlu1 %v8288_v55, %s8646_s6 }
0x22e5   :  { %8291 = vtanh.f32 %v12178_v42 }
0x22e9   :  { %v8290_v21 = vpop.eup %8289 }
0x22ea   :  { %6531 = vrot.lane.b32.xlu0 %v8290_v21, %s8646_s6  ;;  %v6486_v24 = vpop.permute.xlu2 %6485 }
0x22eb   :  { %v8292_v27 = vpop.eup %8291  ;;  %v12185_v22 = vadd.f32 %v6486_v24, %v6423_v49 }
0x22ec   :  { %6527 = vrot.lane.b32.xlu1 %v8292_v27, %s8646_s6 }
0x22ed   :  { %8293 = vtanh.f32 %v12185_v22 }
0x22f3   :  { %v8294_v58 = vpop.eup %8293  ;;  %v6478_v2 = vpop.permute.xlu0 %6477 }
0x22f4   :  { %v12191_v33 = vadd.f32 %v6478_v2, %v6419_v51  ;;  %6533 = vrot.lane.b32.xlu1 %v8294_v58, %s8646_s6  ;;  %v12817_v51 = vld [vmem:[#allocation53_spill] sm:$0xff]  ;;  %v12820_v2 = vld [vmem:[#allocation47_spill] sm:$0xff] }
0x22f6   :  { %8295 = vtanh.f32 %v12191_v33 }
0x22fb   :  { %v6482_v50 = vpop.permute.xlu0 %6481 }
0x22fc   :  { %v8296_v5 = vpop.eup %8295  ;;  %v12197_v38 = vadd.f32 %v6482_v50, %v6421_v4  ;;  %3607 = vrot.lane.b32.xlu1 %v10667_v12, %s8647_s7  ;;  %v12823_v50 = vld [vmem:[#allocation57_spill] sm:$0xff] }
0x22fd   :  { %6525 = vrot.lane.b32.xlu2 %v8296_v5, %s8646_s6 }
0x22fe   :  { %8297 = vtanh.f32 %v12197_v38 }
0x2303   :  { %v6488_v56 = vpop.permute.xlu0 %6487 }
0x2304   :  { %v8298_v52 = vpop.eup %8297  ;;  %v12205_v47 = vadd.f32 %v6488_v56, %v6424_v7  ;;  %4127 = vrot.lane.b32.xlu1 %v10893_v18, %s8647_s7  ;;  %v12825_v56 = vld [vmem:[#allocation60_spill] sm:$0xff] }
0x2305   :  { %6529 = vrot.lane.b32.xlu2 %v8298_v52, %s8646_s6 }
0x2306   :  { %8299 = vtanh.f32 %v12205_v47 }
0x230c   :  { %v8300_v43 = vpop.eup %8299  ;;  %4133 = vrot.lane.b32.xlu1 %v10913_v44, %s8647_s7 }
0x230d   :  { %6535 = vrot.lane.b32.xlu2 %v8300_v43, %s8646_s6 }
0x2314   :  { %4139 = vrot.lane.b32.xlu1 %v10918_v48, %s8647_s7 }
0x2315   :  { %3633 = vrot.lane.b32.xlu2 %v10596_v61, %s8648_s8 }
0x231c   :  { %4535 = vrot.lane.b32.xlu1 %v11120_v41, %s8647_s7 }
0x231d   :  { %4129 = vrot.lane.b32.xlu2 %v10900_v23, %s8647_s7 }
0x2324   :  { %4541 = vrot.lane.b32.xlu1 %v11139_v54, %s8647_s7 }
0x2325   :  { %4135 = vrot.lane.b32.xlu2 %v10909_v15, %s8647_s7 }
0x232c   :  { %4937 = vrot.lane.b32.xlu1 %v11356_v20, %s8647_s7 }
0x232d   :  { %4531 = vrot.lane.b32.xlu2 %v11124_v10, %s8647_s7 }
0x2334   :  { %4943 = vrot.lane.b32.xlu1 %v11360_v57, %s8647_s7 }
0x2335   :  { %4537 = vrot.lane.b32.xlu2 %v11128_v63, %s8647_s7 }
0x233c   :  { %4949 = vrot.lane.b32.xlu1 %v11375_v3, %s8647_s7 }
0x233d   :  { %4543 = vrot.lane.b32.xlu2 %v11143_v8, %s8647_s7 }
0x2344   :  { %5345 = vrot.lane.b32.xlu1 %v11560_v45, %s8647_s7 }
0x2345   :  { %4939 = vrot.lane.b32.xlu2 %v11349_v16, %s8647_s7 }
0x234d   :  { %4945 = vrot.lane.b32.xlu2 %v11365_v39, %s8647_s7 }
0x2354   :  { %v6522_v12 = vpop.permute.xlu0 %6521 }
0x2355   :  { %4951 = vrot.lane.b32.xlu2 %v11380_v0, %s8647_s7  ;;  %v12256_v48 = vmul.f32 %v6522_v12, %v12054_v36 }
0x2356   :  { %v6524_v61 = vpop.permute.xlu1 %6523 }
0x2357   :  { %v6526_v18 = vpop.permute.xlu2 %6525  ;;  %v12247_v23 = vmul.f32 %v6524_v61, %v12106_v17  ;;  %v12828_v61 = vld [vmem:[#allocation44_spill] sm:$0xff] }
0x2358   :  { %v12250_v15 = vmul.f32 %v6526_v18, %v12110_v60 }
0x2359   :  { %v6601_v44 = vrot.slane %v12247_v23, 7 }
0x235a   :  { %v6603_v10 = vrot.slane %v12250_v15, 6 }
0x235b   :  { %v6602_v8 = vsel %vm753_vm4, %v6601_v44, %v12256_v48 }
0x235c   :  { %v6532_v16 = vpop.permute.xlu0 %6531  ;;  %v6604_v39 = vsel %vm756_vm5, %v6603_v10, %v6602_v8 }
0x235d   :  { %5347 = vrot.lane.b32.xlu2 %v11563_v29, %s8647_s7  ;;  %v12271_v3 = vmul.f32 %v6532_v16, %v12065_v26 }
0x235e   :  { %v6528_v41 = vpop.permute.xlu1 %6527 }
0x235f   :  { %v6530_v63 = vpop.permute.xlu2 %6529  ;;  %v12260_v54 = vmul.f32 %v6528_v41, %v12132_v32  ;;  %v6609_v60 = vrot.slane %v12271_v3, 3 }
0x2360   :  { %v12265_v17 = vmul.f32 %v6530_v63, %v12134_v46 }
0x2361   :  { %v6605_v20 = vrot.slane %v12260_v54, 5 }
0x2362   :  { %v6607_v57 = vrot.slane %v12265_v17, 4 }
0x2363   :  { %v6606_v0 = vsel %vm759_vm6, %v6605_v20, %v6604_v39 }
0x2364   :  { %v6608_v29 = vsel %vm762_vm7, %v6607_v57, %v6606_v0 }
0x2365   :  { %v6610_v26 = vsel %vm765_vm8, %v6609_v60, %v6608_v29  ;;  %v6594_v60 = vld [vmem:[#allocation11 + $0xf] sm:$0x1] }
0x2366   :  { %v6534_v45 = vpop.permute.xlu1 %6533 }
0x2367   :  { %v6536_v14 = vpop.permute.xlu2 %6535  ;;  %v12276_v36 = vmul.f32 %v6534_v45, %v12152_v13  ;;  %v6593_v45 = vld [vmem:[#allocation11 + $0x7] sm:$0x1] }
0x2368   :  { %v12280_v32 = vmul.f32 %v6536_v14, %v12154_v28 }
0x2369   :  { %v6611_v46 = vrot.slane %v12276_v36, 2 }
0x236a   :  { %v6613_v59 = vrot.slane %v12280_v32, 1 }
0x236b   :  { %v6612_v53 = vsel %vm768_vm9, %v6611_v46, %v6610_v26 }
0x236c   :  { %v6614_v25 = vsel %vm771_vm10, %v6613_v59, %v6612_v53  ;;  %v6595_v59 = vld [vmem:[#allocation11 + $0x17] sm:$0x1] }
0x236d   :  { %6615 = vrot.lane.b32.xlu0 %v6614_v25, %s8647_s7 }
0x236e   :  { %v3608_v6 = vpop.permute.xlu1 %3607 }
0x236f   :  { %v3634_v13 = vpop.permute.xlu2 %3633  ;;  %3610 = vst.msk [vmem:[#allocation9] sm:$0xff] %vm203_vm0, %v3608_v6 }
0x2370   :  { %3636 = vst.msk [vmem:[#allocation10] sm:$0xff] %vm203_vm0, %v3634_v13  ;;  %v6598_v13 = vld [vmem:[#allocation11 + $0x2f] sm:$0x1] }
0x2375   :  { %4125 = vrot.lane.b32.xlu0 %v10903_v31, %s8647_s7 }
0x2376   :  { %v4128_v28 = vpop.permute.xlu1 %4127  ;;  %v7046_v37 = vld [vmem:[#allocation9] sm:$0xff] }
0x2377   :  { %v4130_v30 = vpop.permute.xlu2 %4129  ;;  %4150 = vst.msk [vmem:[#allocation18 + $0x8] sm:$0x1] %vm12807_vm2, %v4128_v28  ;;  %v7050_v9 = vld [vmem:[#allocation10] sm:$0xff]  ;;  %vm12815_vm2 = vmmov %vm12814_vm1 }
0x2378   :  { %4151 = vst.msk [vmem:[#allocation18 + $0x10] sm:$0x1] %vm12808_vm11, %v4130_v30  ;;  %vm12816_vm11 = vmmov %vm12814_vm1  ;;  %v6596_v30 = vld [vmem:[#allocation11 + $0x1f] sm:$0x1] }
0x2379   :  { %7048 = vst.msk [vmem:[#allocation19] sm:$0xff] %vm203_vm0, %v7046_v37 }
0x237a   :  { %7052 = vst.msk [vmem:[#allocation21] sm:$0xff] %vm203_vm0, %v7050_v9 }
0x237d   :  { %4131 = vrot.lane.b32.xlu0 %v10897_v11, %s8647_s7 }
0x237e   :  { %v4134_v55 = vpop.permute.xlu1 %4133 }
0x237f   :  { %v4136_v21 = vpop.permute.xlu2 %4135  ;;  %4153 = vst.msk [vmem:[#allocation18 + $0x20] sm:$0x1] %vm12809_vm3, %v4134_v55  ;;  %vm12818_vm3 = vmmov %vm12814_vm1  ;;  %v6597_v55 = vld [vmem:[#allocation11 + $0x27] sm:$0x1] }
0x2380   :  { %4154 = vst.msk [vmem:[#allocation18 + $0x28] sm:$0x1] %vm12810_vm12, %v4136_v21  ;;  %vm12819_vm12 = vmmov %vm12814_vm1 }
0x2385   :  { %4137 = vrot.lane.b32.xlu0 %v10923_v35, %s8647_s7 }
0x2386   :  { %v4140_v31 = vpop.permute.xlu1 %4139 }
0x2387   :  { %v4532_v49 = vpop.permute.xlu2 %4531  ;;  %4156 = vst.msk [vmem:[#allocation18 + $0x38] sm:$0x1] %vm12811_vm13, %v4140_v31  ;;  %vm12821_vm13 = vmmov %vm12814_vm1 }
0x2388   :  { %4555 = vst.msk [vmem:[#allocation18 + $0x1] sm:$0x1] %vm12812_vm14, %v4532_v49  ;;  %vm12822_vm14 = vmmov %vm12814_vm1 }
0x238d   :  { %4533 = vrot.lane.b32.xlu0 %v11117_v34, %s8647_s7 }
0x238e   :  { %v4536_v24 = vpop.permute.xlu1 %4535 }
0x238f   :  { %v4538_v11 = vpop.permute.xlu2 %4537  ;;  %4557 = vst.msk [vmem:[#allocation18 + $0x11] sm:$0x1] %vm12813_vm15, %v4536_v24  ;;  %vm12824_vm15 = vmmov %vm12814_vm1 }
0x2390   :  { %4558 = vst.msk [vmem:[#allocation18 + $0x19] sm:$0x1] %vm12814_vm1, %v4538_v11 }
0x2395   :  { %4539 = vrot.lane.b32.xlu0 %v11133_v1, %s8647_s7 }
0x2396   :  { %v4542_v27 = vpop.permute.xlu1 %4541 }
0x2397   :  { %v4544_v35 = vpop.permute.xlu2 %4543  ;;  %4560 = vst.msk [vmem:[#allocation18 + $0x29] sm:$0x1] %vm12815_vm2, %v4542_v27  ;;  %vm12826_vm2 = vmmov %vm12814_vm1 }
0x2398   :  { %4561 = vst.msk [vmem:[#allocation18 + $0x31] sm:$0x1] %vm12816_vm11, %v4544_v35  ;;  %vm12827_vm11 = vmmov %vm12814_vm1  ;;  %v6599_v35 = vld [vmem:[#allocation11 + $0x37] sm:$0x1] }
0x239d   :  { %4545 = vrot.lane.b32.xlu0 %v12817_v51, %s8647_s7 }
0x239e   :  { %v4938_v58 = vpop.permute.xlu1 %4937 }
0x239f   :  { %v4940_v34 = vpop.permute.xlu2 %4939  ;;  %4961 = vst.msk [vmem:[#allocation18 + $0x2] sm:$0x1] %vm12818_vm3, %v4938_v58  ;;  %vm12829_vm3 = vmmov %vm12814_vm1  ;;  %v6600_v58 = vld [vmem:[#allocation11 + $0x3f] sm:$0x1] }
0x23a0   :  { %4962 = vst.msk [vmem:[#allocation18 + $0xa] sm:$0x1] %vm12819_vm12, %v4940_v34  ;;  %vm12830_vm12 = vmmov %vm12814_vm1 }
0x23a5   :  { %4941 = vrot.lane.b32.xlu0 %v12820_v2, %s8647_s7 }
0x23a6   :  { %v4944_v4 = vpop.permute.xlu1 %4943 }
0x23a7   :  { %v4946_v1 = vpop.permute.xlu2 %4945  ;;  %4964 = vst.msk [vmem:[#allocation18 + $0x1a] sm:$0x1] %vm12821_vm13, %v4944_v4  ;;  %vm12831_vm13 = vmmov %vm12814_vm1 }
0x23a8   :  { %4965 = vst.msk [vmem:[#allocation18 + $0x22] sm:$0x1] %vm12822_vm14, %v4946_v1  ;;  %vm12832_vm14 = vmmov %vm12814_vm1 }
0x23ad   :  { %4947 = vrot.lane.b32.xlu0 %v12823_v50, %s8647_s7  ;;  %v12838_v50 = vld [vmem:[#allocation50_spill] sm:$0xff] }
0x23ae   :  { %v4950_v5 = vpop.permute.xlu1 %4949 }
0x23af   :  { %v4952_v7 = vpop.permute.xlu2 %4951  ;;  %4967 = vst.msk [vmem:[#allocation18 + $0x32] sm:$0x1] %vm12824_vm15, %v4950_v5  ;;  %vm12833_vm15 = vmmov %vm12814_vm1 }
0x23b0   :  { %4968 = vst.msk [vmem:[#allocation18 + $0x3a] sm:$0x1] %vm12814_vm1, %v4952_v7 }
0x23b5   :  { %5343 = vrot.lane.b32.xlu0 %v12825_v56, %s8647_s7  ;;  %v12839_v56 = vld [vmem:[#allocation46_spill] sm:$0xff] }
0x23b6   :  { %v5346_v52 = vpop.permute.xlu1 %5345 }
0x23b7   :  { %v5348_v43 = vpop.permute.xlu2 %5347  ;;  %5368 = vst.msk [vmem:[#allocation18 + $0xb] sm:$0x1] %vm12826_vm2, %v5346_v52  ;;  %vm12834_vm2 = vmmov %vm12814_vm1  ;;  %v12840_v52 = vld [vmem:[#allocation54_spill] sm:$0xff] }
0x23b8   :  { %5369 = vst.msk [vmem:[#allocation18 + $0x13] sm:$0x1] %vm12827_vm11, %v5348_v43  ;;  %vm12835_vm11 = vmmov %vm12814_vm1  ;;  %v12841_v43 = vld [vmem:[#allocation61_spill] sm:$0xff] }
0x23bd   :  { %5349 = vrot.lane.b32.xlu0 %v12828_v61, %s8647_s7  ;;  %v12842_v61 = vld [vmem:[#allocation56_spill] sm:$0xff] }
0x23df   :  { %v6616_v12 = vpop.permute.xlu0 %6615 }
0x23e0   :  { %7309 = vmatmul.msk.f32.vlgmr.msrb.gmra.mxu2 %vm203_vm0, %v6616_v12  ;;  %v12843_v12 = vld [vmem:[#allocation52_spill] sm:$0xff] }
0x23e7   :  { %v4126_v18 = vpop.permute.xlu0 %4125 }
0x23e8   :  { %4149 = vst.msk [vmem:[#allocation18] sm:$0x1] %vm12829_vm3, %v4126_v18  ;;  %vm12836_vm3 = vmmov %vm12814_vm1  ;;  %v12844_v18 = vld [vmem:[#allocation49_spill] sm:$0xff] }
0x23ef   :  { %v4132_v44 = vpop.permute.xlu0 %4131 }
0x23f0   :  { %4152 = vst.msk [vmem:[#allocation18 + $0x18] sm:$0x1] %vm12830_vm12, %v4132_v44  ;;  %vm12837_vm12 = vmmov %vm12814_vm1 }
0x23f7   :  { %v4138_v41 = vpop.permute.xlu0 %4137 }
0x23f8   :  { %4155 = vst.msk [vmem:[#allocation18 + $0x30] sm:$0x1] %vm12831_vm13, %v4138_v41 }
0x23ff   :  { %v4534_v10 = vpop.permute.xlu0 %4533 }
0x2400   :  { %4556 = vst.msk [vmem:[#allocation18 + $0x9] sm:$0x1] %vm12832_vm14, %v4534_v10 }
0x2407   :  { %v4540_v63 = vpop.permute.xlu0 %4539 }
0x2408   :  { %4559 = vst.msk [vmem:[#allocation18 + $0x21] sm:$0x1] %vm12833_vm15, %v4540_v63 }
0x240f   :  { %v4546_v8 = vpop.permute.xlu0 %4545 }
0x2410   :  { %4562 = vst.msk [vmem:[#allocation18 + $0x39] sm:$0x1] %vm12814_vm1, %v4546_v8 }
0x2417   :  { %v4942_v16 = vpop.permute.xlu0 %4941 }
0x2418   :  { %4963 = vst.msk [vmem:[#allocation18 + $0x12] sm:$0x1] %vm12834_vm2, %v4942_v16 }
0x241f   :  { %v4948_v20 = vpop.permute.xlu0 %4947 }
0x2420   :  { %4966 = vst.msk [vmem:[#allocation18 + $0x2a] sm:$0x1] %vm12835_vm11, %v4948_v20 }
0x2427   :  { %v5344_v57 = vpop.permute.xlu0 %5343 }
0x2428   :  { %5367 = vst.msk [vmem:[#allocation18 + $0x3] sm:$0x1] %vm12836_vm3, %v5344_v57 }
0x242f   :  { %v5350_v39 = vpop.permute.xlu0 %5349 }
0x2430   :  { %5370 = vst.msk [vmem:[#allocation18 + $0x1b] sm:$0x1] %vm12837_vm12, %v5350_v39 }
0x2463   :  { %v6636_v0 = vpop.f32.mrf.mxu2 }
0x2464   :  { %v6640_v29 = vrot.slane %v6636_v0, 1  ;;  %v6641_v14 = vrot.slane %v6636_v0, 2  ;;  %v6655_v46 = vadd.f32 %v6636_v0, %v6593_v45  ;;  %v6644_v25 = vrot.slane %v6636_v0, 5 }
0x2465   :  { %v6642_v6 = vrot.slane %v6636_v0, 3  ;;  %v6643_v28 = vrot.slane %v6636_v0, 4  ;;  %v6645_v11 = vrot.slane %v6636_v0, 6  ;;  %v6646_v27 = vrot.slane %v6636_v0, 7 }
0x2466   :  { %v6656_v26 = vadd.f32 %v6640_v29, %v6594_v60  ;;  %v6657_v53 = vadd.f32 %v6641_v14, %v6595_v59  ;;  %8301 = vtanh.f32 %v6655_v46  ;;  %v6660_v37 = vadd.f32 %v6644_v25, %v6598_v13 }
0x2467   :  { %v6658_v21 = vadd.f32 %v6642_v6, %v6596_v30  ;;  %v6659_v31 = vadd.f32 %v6643_v28, %v6597_v55  ;;  %v6661_v34 = vadd.f32 %v6645_v11, %v6599_v35  ;;  %v6662_v2 = vadd.f32 %v6646_v27, %v6600_v58 }
0x2468   :  { %8303 = vtanh.f32 %v6656_v26  ;;  %v7312_v44 = vmul.f32 -1.442695, %v6657_v53  ;;  %v7310_v20 = vmul.f32 -1.442695, %v6655_v46  ;;  %v7311_v0 = vmul.f32 -1.442695, %v6656_v26 }
0x2469   :  { %8305 = vtanh.f32 %v6657_v53  ;;  %v7314_v41 = vmul.f32 -1.442695, %v6659_v31  ;;  %v7317_v8 = vmul.f32 -1.442695, %v6662_v2  ;;  %v7315_v14 = vmul.f32 -1.442695, %v6660_v37 }
0x246a   :  { %8307 = vtanh.f32 %v6660_v37  ;;  %v7313_v6 = vmul.f32 -1.442695, %v6658_v21 }
0x246b   :  { %8309 = vtanh.f32 %v6658_v21  ;;  %v7316_v21 = vmul.f32 -1.442695, %v6661_v34 }
0x246c   :  { %v8302_v9 = vpop.eup %8301  ;;  %8311 = vtanh.f32 %v6659_v31 }
0x246d   :  { %6839 = vrot.lane.b32.xlu0 %v8302_v9, %s8646_s6  ;;  %8313 = vtanh.f32 %v6661_v34 }
0x246e   :  { %v8304_v49 = vpop.eup %8303  ;;  %8315 = vtanh.f32 %v6662_v2 }
0x246f   :  { %v8306_v24 = vpop.eup %8305  ;;  %6841 = vrot.lane.b32.xlu1 %v8304_v49, %s8646_s6  ;;  %8317 = vpow2.f32 %v7312_v44 }
0x2470   :  { %6843 = vrot.lane.b32.xlu2 %v8306_v24, %s8646_s6  ;;  %v8308_v51 = vpop.eup %8307  ;;  %8319 = vpow2.f32 %v7314_v41 }
0x2471   :  { %v8310_v4 = vpop.eup %8309 }
0x2472   :  { %v8312_v1 = vpop.eup %8311 }
0x2473   :  { %v8314_v5 = vpop.eup %8313 }
0x2474   :  { %v8316_v7 = vpop.eup %8315 }
0x2475   :  { %6849 = vrot.lane.b32.xlu0 %v8308_v51, %s8646_s6  ;;  %v8318_v10 = vpop.eup %8317 }
0x2476   :  { %v6689_v63 = vadd.f32 1.0, %v8318_v10  ;;  %v8320_v16 = vpop.eup %8319 }
0x2477   :  { %6845 = vrot.lane.b32.xlu1 %v8310_v4, %s8646_s6  ;;  %v12363_v57 = vadd.f32 1.0, %v8320_v16 }
0x2478   :  { %6847 = vrot.lane.b32.xlu2 %v8312_v1, %s8646_s6  ;;  %8321 = vrcp.f32 %v6689_v63  ;;  %v6736_v49 = vand.u32 2147483648, %v6689_v63  ;;  %vm6730_vm14 = vweird.f32 %v6689_v63  ;;  %v6734_v24 = vand.u32 2147483647, %v6689_v63 }
0x2479   :  { %8323 = vpow2.f32 %v7317_v8  ;;  %vm6760_vm11 = vweird.f32 %v12363_v57 }
0x247a   :  { %8325 = vpow2.f32 %v7310_v20  ;;  %v6737_v2 = vor.u32 1.1754944e-38, %v6736_v49  ;;  %vm6735_vm1 = vcmp.eq.f32.partialorder %v6734_v24, 8.507059e+37 }
0x247b   :  { %8327 = vrcp.f32 %v12363_v57 }
0x247c   :  { %8329 = vpow2.f32 %v7311_v0 }
0x247d   :  { %5351 = vrot.lane.b32.xlu0 %v12838_v50, %s8647_s7  ;;  %8331 = vpow2.f32 %v7315_v14 }
0x247e   :  { %v8322_v39 = vpop.eup %8321 }
0x247f   :  { %6851 = vrot.lane.b32.xlu1 %v8314_v5, %s8646_s6  ;;  %v8324_v45 = vpop.eup %8323  ;;  %v6726_v29 = vmul.f32 %v8322_v39, %v6689_v63  ;;  %vm6731_vm13 = vweird.f32 %v8322_v39 }
0x2480   :  { %6853 = vrot.lane.b32.xlu2 %v8316_v7, %s8646_s6  ;;  %v12366_v60 = vadd.f32 1.0, %v8324_v45  ;;  %v8326_v59 = vpop.eup %8325  ;;  %vm6732_vm15 = vmor %vm6730_vm14, %vm6731_vm13 }
0x2481   :  { %v6727_v53 = vsub.f32 1.0, %v6726_v29  ;;  %v8328_v25 = vpop.eup %8327  ;;  %v12370_v28 = vadd.f32 1.0, %v8326_v59 }
0x2482   :  { %v8330_v46 = vpop.eup %8329  ;;  %8333 = vrcp.f32 %v12366_v60  ;;  %v6756_v26 = vmul.f32 %v8328_v25, %v12363_v57  ;;  %vm6761_vm2 = vweird.f32 %v8328_v25  ;;  %v6811_v59 = vand.u32 2147483648, %v12366_v60 }
0x2483   :  { %v6728_v13 = vmul.f32 %v8322_v39, %v6727_v53  ;;  %8335 = vpow2.f32 %v7313_v6  ;;  %v12372_v30 = vadd.f32 1.0, %v8330_v46  ;;  %v8332_v9 = vpop.eup %8331  ;;  %vm6762_vm3 = vmor %vm6760_vm11, %vm6761_vm2  ;;  %vm6805_vm14 = vweird.f32 %v12366_v60 }
0x2484   :  { %v6757_v55 = vsub.f32 1.0, %v6756_v26  ;;  %8337 = vrcp.f32 %v12370_v28  ;;  %v12380_v58 = vadd.f32 1.0, %v8332_v9  ;;  %v6809_v6 = vand.u32 2147483647, %v12366_v60 }
0x2485   :  { %5357 = vrot.lane.b32.xlu0 %v12839_v56, %s8647_s7  ;;  %v6729_v37 = vadd.f32 %v8322_v39, %v6728_v13  ;;  %8339 = vrcp.f32 %v12372_v30  ;;  %v6812_v9 = vor.u32 1.1754944e-38, %v6811_v59  ;;  %vm6700_vm11 = vweird.f32 %v12370_v28  ;;  %v12846_v59 = vld [vmem:[#allocation59_spill] sm:$0xff] }
0x2486   :  { %v6758_v35 = vmul.f32 %v8328_v25, %v6757_v55  ;;  %8341 = vpow2.f32 %v7316_v21  ;;  %vm6810_vm2 = vcmp.eq.f32.partialorder %v6809_v6, 8.507059e+37  ;;  %v6706_v21 = vand.u32 2147483648, %v12370_v28 }
0x2487   :  { %5353 = vrot.lane.b32.xlu1 %v12840_v52, %s8647_s7  ;;  %v6733_v27 = vsel %vm6732_vm15, %v8322_v39, %v6729_v37  ;;  %8343 = vrcp.f32 %v12380_v58 }
0x2488   :  { %5355 = vrot.lane.b32.xlu2 %v12841_v43, %s8647_s7  ;;  %v12375_v31 = vpop.eup %8333  ;;  %v12386_v50 = vsel %vm6735_vm1, %v6737_v2, %v6733_v27  ;;  %v6759_v56 = vadd.f32 %v8328_v25, %v6758_v35  ;;  %v6766_v43 = vand.u32 2147483648, %v12363_v57 }
0x2489   :  { %v8336_v11 = vpop.eup %8335  ;;  %v6801_v51 = vmul.f32 %v12375_v31, %v12366_v60  ;;  %vm6806_vm13 = vweird.f32 %v12375_v31  ;;  %v6704_v60 = vand.u32 2147483647, %v12370_v28 }
0x248a   :  { %v12382_v4 = vpop.eup %8337  ;;  %v12384_v34 = vadd.f32 1.0, %v8336_v11  ;;  %v6763_v41 = vsel %vm6762_vm3, %v8328_v25, %v6759_v56  ;;  %v6767_v63 = vor.u32 1.1754944e-38, %v6766_v43  ;;  %vm6807_vm15 = vmor %vm6805_vm14, %vm6806_vm13  ;;  %vm6715_vm13 = vweird.f32 %v12372_v30 }
0x248b   :  { %v12388_v5 = vpop.eup %8339  ;;  %v6802_v52 = vsub.f32 1.0, %v6801_v51  ;;  %vm6701_vm1 = vweird.f32 %v12382_v4  ;;  %v6721_v51 = vand.u32 2147483648, %v12372_v30 }
0x248c   :  { %8345 = vrcp.f32 %v12384_v34  ;;  %v6711_v44 = vmul.f32 %v12388_v5, %v12372_v30  ;;  %vm6716_vm3 = vweird.f32 %v12388_v5 }
0x248d   :  { %v6803_v10 = vmul.f32 %v12375_v31, %v6802_v52  ;;  %vm6717_vm14 = vmor %vm6715_vm13, %vm6716_vm3 }
0x248e   :  { %v6712_v0 = vsub.f32 1.0, %v6711_v44 }
0x248f   :  { %5749 = vrot.lane.b32.xlu1 %v12842_v61, %s8647_s7  ;;  %v6696_v61 = vmul.f32 %v12382_v4, %v12370_v28  ;;  %v6804_v14 = vadd.f32 %v12375_v31, %v6803_v10  ;;  %v6719_v28 = vand.u32 2147483647, %v12372_v30  ;;  %v6781_v10 = vand.u32 2147483648, %v12380_v58 }
0x2490   :  { %5753 = vrot.lane.b32.xlu2 %v12843_v12, %s8647_s7  ;;  %v6764_v12 = vand.u32 2147483647, %v12363_v57  ;;  %v6713_v46 = vmul.f32 %v12388_v5, %v6712_v0 }
0x2491   :  { %v6697_v8 = vsub.f32 1.0, %v6696_v61  ;;  %v6808_v26 = vsel %vm6807_vm15, %v12375_v31, %v6804_v14  ;;  %vm6705_vm15 = vcmp.eq.f32.partialorder %v6704_v60, 8.507059e+37 }
0x2492   :  { %vm6765_vm12 = vcmp.eq.f32.partialorder %v6764_v12, 8.507059e+37  ;;  %v12430_v49 = vsel %vm6810_vm2, %v6812_v9, %v6808_v26  ;;  %v6714_v11 = vadd.f32 %v12388_v5, %v6713_v46  ;;  %v6722_v12 = vor.u32 1.1754944e-38, %v6721_v51 }
0x2493   :  { %v12406_v39 = vsel %vm6765_vm12, %v6767_v63, %v6763_v41  ;;  %v6698_v53 = vmul.f32 %v12382_v4, %v6697_v8  ;;  %vm6702_vm12 = vmor %vm6700_vm11, %vm6701_vm1  ;;  %vm6720_vm1 = vcmp.eq.f32.partialorder %v6719_v28, 8.507059e+37  ;;  %vm6775_vm11 = vweird.f32 %v12380_v58 }
0x2494   :  { %v6718_v56 = vsel %vm6717_vm14, %v12388_v5, %v6714_v11  ;;  %v6779_v5 = vand.u32 2147483647, %v12380_v58  ;;  %vm6745_vm14 = vweird.f32 %v12384_v34 }
0x2495   :  { %v6699_v37 = vadd.f32 %v12382_v4, %v6698_v53  ;;  %v12452_v44 = vsel %vm6720_vm1, %v6722_v12, %v6718_v56  ;;  %v6782_v53 = vor.u32 1.1754944e-38, %v6781_v10  ;;  %v12854_v56 = vld [vmem:[#allocation63_spill] sm:$0xff]  ;;  %v12858_v12 = vld [vmem:[#allocation62_spill] sm:$0xff]  ;;  %v6825_v10 = vmul.f32 %v12386_v50, %v12191_v33 }
0x2496   :  { %vm6780_vm1 = vcmp.eq.f32.partialorder %v6779_v5, 8.507059e+37  ;;  %v6824_v5 = vmul.f32 %v12452_v44, %v12167_v40 }
0x2497   :  { %5751 = vrot.lane.b32.xlu1 %v12844_v18, %s8647_s7  ;;  %v8342_v18 = vpop.eup %8341  ;;  %v6703_v2 = vsel %vm6702_vm12, %v12382_v4, %v6699_v37  ;;  %vm12845_vm12 = vcmask 253952  }
0x2498   :  { %v12402_v16 = vpop.eup %8343  ;;  %v12404_v20 = vadd.f32 1.0, %v8342_v18 }
0x2499   :  { %v12408_v45 = vpop.eup %8345  ;;  %v6771_v25 = vmul.f32 %v12402_v16, %v12380_v58  ;;  %vm6776_vm2 = vweird.f32 %v12402_v16  ;;  %v6749_v58 = vand.u32 2147483647, %v12384_v34 }
0x249a   :  { %8347 = vrcp.f32 %v12404_v20  ;;  %v6741_v13 = vmul.f32 %v12408_v45, %v12384_v34  ;;  %vm6746_vm3 = vweird.f32 %v12408_v45  ;;  %vm6777_vm13 = vmor %vm6775_vm11, %vm6776_vm2 }
0x249b   :  { %v6772_v55 = vsub.f32 1.0, %v6771_v25  ;;  %vm6750_vm2 = vcmp.eq.f32.partialorder %v6749_v58, 8.507059e+37 }
0x249c   :  { %v6742_v31 = vsub.f32 1.0, %v6741_v13 }
0x249e   :  { %v6743_v52 = vmul.f32 %v12408_v45, %v6742_v31 }
0x24a0   :  { %v12434_v27 = vpop.eup %8347 }
0x24a1   :  { %v6786_v43 = vmul.f32 %v12434_v27, %v12404_v20  ;;  %vm6791_vm11 = vweird.f32 %v12434_v27 }
0x24a3   :  { %v6787_v0 = vsub.f32 1.0, %v6786_v43 }
0x24a5   :  { %v6788_v6 = vmul.f32 %v12434_v27, %v6787_v0 }
0x24a7   :  { %v6789_v60 = vadd.f32 %v12434_v27, %v6788_v6 }
0x24ca   :  { %v6844_v1 = vpop.permute.xlu2 %6843 }
0x24cb   :  { %v6865_v7 = vmul.f32 %v6844_v1, %v12386_v50  ;;  %v6773_v1 = vmul.f32 %v12402_v16, %v6772_v55 }
0x24cd   :  { %6883 = vrot.lane.b32.xlu0 %v6865_v7, %s8647_s7  ;;  %v6707_v7 = vor.u32 1.1754944e-38, %v6706_v21  ;;  %v6774_v18 = vadd.f32 %v12402_v16, %v6773_v1  ;;  %v6794_v21 = vand.u32 2147483647, %v12404_v20  ;;  %v12850_v1 = vld [vmem:[#allocation51_spill] sm:$0xff] }
0x24cf   :  { %v12447_v61 = vsel %vm6705_vm15, %v6707_v7, %v6703_v2  ;;  %v6778_v14 = vsel %vm6777_vm13, %v12402_v16, %v6774_v18  ;;  %vm6747_vm15 = vmor %vm6745_vm14, %vm6746_vm3  ;;  %v12860_v18 = vld [vmem:[#allocation45_spill] sm:$0xff] }
0x24d0   :  { %v12471_v46 = vsel %vm6780_vm1, %v6782_v53, %v6778_v14  ;;  %vm12847_vm3 = vmmov %vm12845_vm12  ;;  %v6827_v14 = vmul.f32 %v12406_v39, %v12197_v38  ;;  %v6830_v38 = vmul.f32 %v12430_v49, %v12205_v47 }
0x24d1   :  { %vm12849_vm14 = vmmov %vm12847_vm3 }
0x24d2   :  { %v6848_v57 = vpop.permute.xlu2 %6847  ;;  %vm12852_vm1 = vmmov %vm12847_vm3 }
0x24d3   :  { %v6867_v29 = vmul.f32 %v6848_v57, %v12406_v39  ;;  %v6744_v57 = vadd.f32 %v12408_v45, %v6743_v52  ;;  %v12855_v52 = vld [vmem:[#allocation48_spill] sm:$0xff] }
0x24d5   :  { %6887 = vrot.lane.b32.xlu0 %v6867_v29, %s8647_s7  ;;  %v6751_v29 = vand.u32 2147483648, %v12384_v34  ;;  %v6748_v25 = vsel %vm6747_vm15, %v12408_v45, %v6744_v57  ;;  %v6796_v45 = vand.u32 2147483648, %v12404_v20  ;;  %vm6795_vm15 = vcmp.eq.f32.partialorder %v6794_v21, 8.507059e+37 }
0x24d7   :  { %v6752_v26 = vor.u32 1.1754944e-38, %v6751_v29 }
0x24d9   :  { %v12474_v9 = vsel %vm6750_vm2, %v6752_v26, %v6748_v25  ;;  %vm12853_vm2 = vmmov %vm12852_vm1 }
0x24da   :  { %v6854_v24 = vpop.permute.xlu2 %6853  ;;  %v6826_v29 = vmul.f32 %v12474_v9, %v12178_v42 }
0x24db   :  { %v6870_v35 = vmul.f32 %v6854_v24, %v12430_v49  ;;  %v12848_v24 = vld [vmem:[#allocation58_spill] sm:$0xff] }
0x24dd   :  { %6893 = vrot.lane.b32.xlu0 %v6870_v35, %s8647_s7  ;;  %v6797_v35 = vor.u32 1.1754944e-38, %v6796_v45 }
0x24df   :  { %v6840_v4 = vpop.permute.xlu0 %6839 }
0x24e0   :  { %v6863_v30 = vmul.f32 %v6840_v4, %v12447_v61  ;;  %v12857_v4 = vld [vmem:[#allocation64_spill] sm:$0xff] }
0x24e1   :  { %v6842_v41 = vpop.permute.xlu1 %6841 }
0x24e2   :  { %v5356_v63 = vpop.permute.xlu2 %5355  ;;  %v6864_v8 = vmul.f32 %v6842_v41, %v12452_v44  ;;  %6879 = vrot.lane.b32.xlu1 %v6863_v30, %s8647_s7  ;;  %v12861_v41 = vld [vmem:[#allocation65_spill] sm:$0xff] }
0x24e3   :  { %5373 = vst.msk [vmem:[#allocation18 + $0x33] sm:$0x1] %vm12845_vm12, %v5356_v63  ;;  %vm6790_vm12 = vweird.f32 %v12404_v20  ;;  %v12851_v20 = vld [vmem:[#allocation55_spill] sm:$0xff] }
0x24e4   :  { %6881 = vrot.lane.b32.xlu2 %v6864_v8, %s8647_s7  ;;  %vm6792_vm13 = vmor %vm6790_vm12, %vm6791_vm11 }
0x24e5   :  { %5755 = vrot.lane.b32.xlu0 %v12846_v59, %s8647_s7  ;;  %v6793_v11 = vsel %vm6792_vm13, %v12434_v27, %v6789_v60  ;;  %vm12856_vm11 = vmmov %vm12852_vm1 }
0x24e6   :  { %v12489_v51 = vsel %vm6795_vm15, %v6797_v35, %v6793_v11  ;;  %vm12862_vm12 = vmmov %vm12852_vm1  ;;  %v6828_v11 = vmul.f32 %v12471_v46, %v12172_v19 }
0x24e7   :  { %v6850_v13 = vpop.permute.xlu0 %6849  ;;  %v6829_v42 = vmul.f32 %v12489_v51, %v12185_v22  ;;  %v6823_v22 = vmul.f32 %v12447_v61, %v12162_v62  ;;  %vm12863_vm13 = vmmov %vm12852_vm1 }
0x24e8   :  { %v6868_v16 = vmul.f32 %v6850_v13, %v12471_v46  ;;  %vm12865_vm15 = vmmov %vm12852_vm1 }
0x24e9   :  { %v6846_v34 = vpop.permute.xlu1 %6845 }
0x24ea   :  { %v5754_v37 = vpop.permute.xlu2 %5753  ;;  %v6866_v55 = vmul.f32 %v6846_v34, %v12474_v9  ;;  %6889 = vrot.lane.b32.xlu1 %v6868_v16, %s8647_s7 }
0x24eb   :  { %5775 = vst.msk [vmem:[#allocation18 + $0x14] sm:$0x1] %vm12847_vm3, %v5754_v37  ;;  %vm12859_vm3 = vmmov %vm12852_vm1 }
0x24ec   :  { %6885 = vrot.lane.b32.xlu2 %v6866_v55, %s8647_s7 }
0x24ed   :  { %5761 = vrot.lane.b32.xlu0 %v12848_v24, %s8647_s7 }
0x24ef   :  { %v5352_v31 = vpop.permute.xlu0 %5351 }
0x24f0   :  { %5371 = vst.msk [vmem:[#allocation18 + $0x23] sm:$0x1] %vm12849_vm14, %v5352_v31  ;;  %vm12864_vm14 = vmmov %vm12852_vm1 }
0x24f1   :  { %v6852_v2 = vpop.permute.xlu1 %6851 }
0x24f2   :  { %v6869_v28 = vmul.f32 %v6852_v2, %v12489_v51  ;;  %5757 = vrot.lane.b32.xlu1 %v12850_v1, %s8647_s7  ;;  %v12866_v1 = vld [vmem:[#allocation66_spill] sm:$0xff] }
0x24f4   :  { %6891 = vrot.lane.b32.xlu2 %v6869_v28, %s8647_s7 }
0x24f5   :  { %6159 = vrot.lane.b32.xlu0 %v12851_v20, %s8647_s7  ;;  %v12867_v20 = vld [vmem:[#allocation67_spill] sm:$0xff] }
0x24f7   :  { %v5358_v7 = vpop.permute.xlu0 %5357 }
0x24f8   :  { %5374 = vst.msk [vmem:[#allocation18 + $0x3b] sm:$0x1] %vm12852_vm1, %v5358_v7 }
0x24f9   :  { %v5354_v27 = vpop.permute.xlu1 %5353 }
0x24fa   :  { %5372 = vst.msk [vmem:[#allocation18 + $0x2b] sm:$0x1] %vm12853_vm2, %v5354_v27  ;;  %5763 = vrot.lane.b32.xlu1 %v12854_v56, %s8647_s7  ;;  %vm12868_vm2 = vmmov %vm12852_vm1 }
0x24fc   :  { %5759 = vrot.lane.b32.xlu2 %v12855_v52, %s8647_s7 }
0x2501   :  { %v5750_v43 = vpop.permute.xlu1 %5749 }
0x2502   :  { %5773 = vst.msk [vmem:[#allocation18 + $0x4] sm:$0x1] %vm12856_vm11, %v5750_v43  ;;  %6161 = vrot.lane.b32.xlu1 %v12857_v4, %s8647_s7  ;;  %vm12869_vm11 = vmmov %vm12852_vm1 }
0x2504   :  { %6155 = vrot.lane.b32.xlu2 %v12858_v12, %s8647_s7  ;;  %v12871_v12 = vld [vmem:[#allocation68_spill] sm:$0xff] }
0x2509   :  { %v5752_v30 = vpop.permute.xlu1 %5751 }
0x250a   :  { %5774 = vst.msk [vmem:[#allocation18 + $0xc] sm:$0x1] %vm12859_vm3, %v5752_v30  ;;  %vm12870_vm3 = vmmov %vm12852_vm1 }
0x250c   :  { %6157 = vrot.lane.b32.xlu2 %v12860_v18, %s8647_s7 }
0x2514   :  { %6163 = vrot.lane.b32.xlu2 %v12861_v41, %s8647_s7 }
0x253e   :  { %v6882_v63 = vpop.permute.xlu2 %6881 }
0x253f   :  { %v6884_v8 = vpop.permute.xlu0 %6883  ;;  %v12517_v57 = vadd.f32 %v6882_v63, %v6824_v5 }
0x2540   :  { %v12519_v0 = vadd.f32 %v6884_v8, %v6825_v10 }
0x2541   :  { %8349 = vtanh.f32 %v12517_v57  ;;  %v7025_v43 = vrot.slane %v12517_v57, 7 }
0x2542   :  { %8351 = vtanh.f32 %v12519_v0  ;;  %v7027_v18 = vrot.slane %v12519_v0, 6 }
0x2546   :  { %v6886_v40 = vpop.permute.xlu2 %6885 }
0x2547   :  { %v8350_v58 = vpop.eup %8349  ;;  %v6888_v59 = vpop.permute.xlu0 %6887  ;;  %v12527_v33 = vadd.f32 %v6886_v40, %v6826_v29 }
0x2548   :  { %v8352_v53 = vpop.eup %8351  ;;  %v12529_v25 = vadd.f32 %v6888_v59, %v6827_v14  ;;  %6929 = vrot.lane.b32.xlu0 %v8350_v58, %s8646_s6 }
0x2549   :  { %8353 = vtanh.f32 %v12527_v33  ;;  %6931 = vrot.lane.b32.xlu1 %v8352_v53, %s8646_s6 }
0x254a   :  { %8355 = vtanh.f32 %v12529_v25  ;;  %v7031_v63 = vrot.slane %v12529_v25, 4 }
0x254e   :  { %v6892_v6 = vpop.permute.xlu2 %6891 }
0x254f   :  { %v8354_v13 = vpop.eup %8353  ;;  %v6894_v26 = vpop.permute.xlu0 %6893  ;;  %v12539_v16 = vadd.f32 %v6892_v6, %v6829_v42 }
0x2550   :  { %v8356_v34 = vpop.eup %8355  ;;  %v12541_v37 = vadd.f32 %v6894_v26, %v6830_v38  ;;  %6933 = vrot.lane.b32.xlu0 %v8354_v13, %s8646_s6 }
0x2551   :  { %8357 = vtanh.f32 %v12539_v16  ;;  %6935 = vrot.lane.b32.xlu1 %v8356_v34, %s8646_s6  ;;  %v7035_v8 = vrot.slane %v12539_v16, 2 }
0x2552   :  { %8359 = vtanh.f32 %v12541_v37  ;;  %v7037_v0 = vrot.slane %v12541_v37, 1 }
0x2554   :  { %v6880_v47 = vpop.permute.xlu1 %6879 }
0x2555   :  { %v6903_v55 = vadd.f32 %v6880_v47, %v6823_v22 }
0x2556   :  { %v5760_v60 = vpop.permute.xlu2 %5759 }
0x2557   :  { %v8358_v45 = vpop.eup %8357  ;;  %8361 = vtanh.f32 %v6903_v55  ;;  %v5756_v21 = vpop.permute.xlu0 %5755  ;;  %5778 = vst.msk [vmem:[#allocation18 + $0x2c] sm:$0x1] %vm12862_vm12, %v5760_v60  ;;  %v7026_v30 = vsel %vm753_vm4, %v7025_v43, %v6903_v55  ;;  %vm12872_vm12 = vmmov %vm12852_vm1 }
0x2558   :  { %v8360_v24 = vpop.eup %8359  ;;  %5776 = vst.msk [vmem:[#allocation18 + $0x1c] sm:$0x1] %vm12863_vm13, %v5756_v21  ;;  %6939 = vrot.lane.b32.xlu0 %v8358_v45, %s8646_s6  ;;  %vm12873_vm13 = vmmov %vm12852_vm1 }
0x2559   :  { %6941 = vrot.lane.b32.xlu1 %v8360_v24, %s8646_s6 }
0x255c   :  { %v6890_v31 = vpop.permute.xlu1 %6889 }
0x255d   :  { %v8362_v62 = vpop.eup %8361  ;;  %v6908_v35 = vadd.f32 %v6890_v31, %v6828_v11 }
0x255e   :  { %v6156_v2 = vpop.permute.xlu2 %6155  ;;  %6927 = vrot.lane.b32.xlu2 %v8362_v62, %s8646_s6 }
0x255f   :  { %8363 = vtanh.f32 %v6908_v35  ;;  %v5762_v28 = vpop.permute.xlu0 %5761  ;;  %6179 = vst.msk [vmem:[#allocation18 + $0x5] sm:$0x1] %vm12864_vm14, %v6156_v2  ;;  %v7033_v10 = vrot.slane %v6908_v35, 3  ;;  %vm12874_vm14 = vmmov %vm12852_vm1 }
0x2560   :  { %5779 = vst.msk [vmem:[#allocation18 + $0x34] sm:$0x1] %vm12865_vm15, %v5762_v28  ;;  %6165 = vrot.lane.b32.xlu0 %v12866_v1, %s8647_s7  ;;  %vm12882_vm15 = vmmov %vm12852_vm1 }
0x2561   :  { %6167 = vrot.lane.b32.xlu1 %v12867_v20, %s8647_s7 }
0x2564   :  { %v5758_v7 = vpop.permute.xlu1 %5757 }
0x2565   :  { %v8364_v19 = vpop.eup %8363  ;;  %5777 = vst.msk [vmem:[#allocation18 + $0x24] sm:$0x1] %vm12852_vm1, %v5758_v7 }
0x2566   :  { %v6158_v27 = vpop.permute.xlu2 %6157  ;;  %6937 = vrot.lane.b32.xlu2 %v8364_v19, %s8646_s6 }
0x2567   :  { %v6160_v56 = vpop.permute.xlu0 %6159  ;;  %6180 = vst.msk [vmem:[#allocation18 + $0xd] sm:$0x1] %vm12868_vm2, %v6158_v27  ;;  %vm12883_vm2 = vmmov %vm12852_vm1 }
0x2568   :  { %6181 = vst.msk [vmem:[#allocation18 + $0x15] sm:$0x1] %vm12869_vm11, %v6160_v56  ;;  %6561 = vrot.lane.b32.xlu0 %v12256_v48, %s8647_s7  ;;  %v7029_v48 = vrot.slane %v12527_v33, 5  ;;  %vm12884_vm11 = vmmov %vm12852_vm1 }
0x2569   :  { %6563 = vrot.lane.b32.xlu1 %v12247_v23, %s8647_s7  ;;  %v7028_v23 = vsel %vm756_vm5, %v7027_v18, %v7026_v30 }
0x256a   :  { %v7030_v5 = vsel %vm759_vm6, %v7029_v48, %v7028_v23 }
0x256c   :  { %v5764_v52 = vpop.permute.xlu1 %5763 }
0x256d   :  { %5780 = vst.msk [vmem:[#allocation18 + $0x3c] sm:$0x1] %vm12870_vm3, %v5764_v52  ;;  %vm12885_vm3 = vmmov %vm12852_vm1 }
0x256e   :  { %v6164_v4 = vpop.permute.xlu2 %6163  ;;  %6169 = vrot.lane.b32.xlu2 %v12871_v12, %s8647_s7 }
0x256f   :  { %6183 = vst.msk [vmem:[#allocation18 + $0x25] sm:$0x1] %vm12872_vm12, %v6164_v4  ;;  %vm12886_vm12 = vmmov %vm12852_vm1 }
0x2570   :  { %6569 = vrot.lane.b32.xlu0 %v12265_v17, %s8647_s7  ;;  %v7032_v17 = vsel %vm762_vm7, %v7031_v63, %v7030_v5 }
0x2571   :  { %6565 = vrot.lane.b32.xlu1 %v12250_v15, %s8647_s7  ;;  %v7034_v15 = vsel %vm765_vm8, %v7033_v10, %v7032_v17 }
0x2572   :  { %v7036_v57 = vsel %vm768_vm9, %v7035_v8, %v7034_v15 }
0x2574   :  { %v6162_v41 = vpop.permute.xlu1 %6161 }
0x2575   :  { %6182 = vst.msk [vmem:[#allocation18 + $0x1d] sm:$0x1] %vm12873_vm13, %v6162_v41  ;;  %vm12887_vm13 = vmmov %vm12852_vm1 }
0x2576   :  { %6567 = vrot.lane.b32.xlu2 %v12260_v54, %s8647_s7  ;;  %v7038_v54 = vsel %vm771_vm10, %v7037_v0, %v7036_v57 }
0x2578   :  { %6575 = vrot.lane.b32.xlu0 %v12280_v32, %s8647_s7 }
0x2579   :  { %6571 = vrot.lane.b32.xlu1 %v12271_v3, %s8647_s7 }
0x257e   :  { %6573 = vrot.lane.b32.xlu2 %v12276_v36, %s8647_s7 }
0x2580   :  { %7039 = vrot.lane.b32.xlu0 %v7038_v54, %s8648_s8 }
0x25b8   :  { %v6928_v29 = vpop.permute.xlu2 %6927 }
0x25b9   :  { %v6951_v32 = vmul.f32 %v6928_v29, %v12447_v61 }
0x25ba   :  { %v6930_v14 = vpop.permute.xlu0 %6929 }
0x25bb   :  { %v6952_v40 = vmul.f32 %v6930_v14, %v12452_v44  ;;  %v6932_v3 = vpop.permute.xlu1 %6931  ;;  %6967 = vrot.lane.b32.xlu1 %v6951_v32, %s8647_s7 }
0x25bc   :  { %v6953_v58 = vmul.f32 %v6932_v3, %v12386_v50 }
0x25bd   :  { %6969 = vrot.lane.b32.xlu2 %v6952_v40, %s8647_s7  ;;  %v6999_v36 = vrot.slane %v6952_v40, 7 }
0x25be   :  { %6971 = vrot.lane.b32.xlu0 %v6953_v58, %s8647_s7  ;;  %v7001_v53 = vrot.slane %v6953_v58, 6 }
0x25bf   :  { %v7000_v61 = vsel %vm753_vm4, %v6999_v36, %v6951_v32  ;;  %vm12875_vm4 = vmmov %vm12852_vm1 }
0x25c0   :  { %v6938_v59 = vpop.permute.xlu2 %6937  ;;  %v7002_v50 = vsel %vm756_vm5, %v7001_v53, %v7000_v61  ;;  %vm12876_vm5 = vmmov %vm12852_vm1 }
0x25c1   :  { %v6956_v44 = vmul.f32 %v6938_v59, %v12471_v46 }
0x25c2   :  { %v6934_v33 = vpop.permute.xlu0 %6933 }
0x25c3   :  { %v6954_v25 = vmul.f32 %v6934_v33, %v12474_v9  ;;  %v6936_v42 = vpop.permute.xlu1 %6935 }
0x25c4   :  { %v6955_v38 = vmul.f32 %v6936_v42, %v12406_v39  ;;  %v7007_v39 = vrot.slane %v6956_v44, 3 }
0x25c5   :  { %v7003_v6 = vrot.slane %v6954_v25, 5  ;;  %6973 = vrot.lane.b32.xlu1 %v6954_v25, %s8647_s7 }
0x25c6   :  { %6977 = vrot.lane.b32.xlu0 %v6956_v44, %s8647_s7  ;;  %v7005_v13 = vrot.slane %v6955_v38, 4 }
0x25c7   :  { %v7004_v26 = vsel %vm759_vm6, %v7003_v6, %v7002_v50  ;;  %vm12877_vm6 = vmmov %vm12852_vm1 }
0x25c8   :  { %v6170_v16 = vpop.permute.xlu2 %6169  ;;  %v7006_v34 = vsel %vm762_vm7, %v7005_v13, %v7004_v26  ;;  %vm12878_vm7 = vmmov %vm12852_vm1 }
0x25c9   :  { %6186 = vst.msk [vmem:[#allocation18 + $0x3d] sm:$0x1] %vm12874_vm14, %v6170_v16  ;;  %v7008_v60 = vsel %vm765_vm8, %v7007_v39, %v7006_v34  ;;  %vm12879_vm8 = vmmov %vm12852_vm1 }
0x25ca   :  { %v6940_v9 = vpop.permute.xlu0 %6939  ;;  %vm12888_vm14 = vmmov %vm12852_vm1 }
0x25cb   :  { %v6957_v46 = vmul.f32 %v6940_v9, %v12489_v51  ;;  %v6942_v37 = vpop.permute.xlu1 %6941 }
0x25cc   :  { %v6958_v22 = vmul.f32 %v6942_v37, %v12430_v49 }
0x25cd   :  { %v7009_v47 = vrot.slane %v6957_v46, 2  ;;  %6979 = vrot.lane.b32.xlu1 %v6957_v46, %s8647_s7 }
0x25ce   :  { %v7011_v55 = vrot.slane %v6958_v22, 1 }
0x25cf   :  { %v7010_v45 = vsel %vm768_vm9, %v7009_v47, %v7008_v60  ;;  %vm12880_vm9 = vmmov %vm12852_vm1 }
0x25d0   :  { %v6568_v21 = vpop.permute.xlu2 %6567  ;;  %v7012_v24 = vsel %vm771_vm10, %v7011_v55, %v7010_v45  ;;  %vm12881_vm10 = vmmov %vm12852_vm1 }
0x25d1   :  { %6588 = vst.msk [vmem:[#allocation18 + $0x1e] sm:$0x1] %vm12875_vm4, %v6568_v21  ;;  %7013 = vrot.lane.b32.xlu2 %v7012_v24, %s8647_s7  ;;  %vm12889_vm4 = vmmov %vm12852_vm1 }
0x25d2   :  { %v6166_v51 = vpop.permute.xlu0 %6165 }
0x25d3   :  { %6184 = vst.msk [vmem:[#allocation18 + $0x2d] sm:$0x1] %vm12876_vm5, %v6166_v51  ;;  %v6168_v11 = vpop.permute.xlu1 %6167 }
0x25d4   :  { %6185 = vst.msk [vmem:[#allocation18 + $0x35] sm:$0x1] %vm12877_vm6, %v6168_v11 }
0x25d8   :  { %v6574_v49 = vpop.permute.xlu2 %6573 }
0x25d9   :  { %6591 = vst.msk [vmem:[#allocation18 + $0x36] sm:$0x1] %vm12878_vm7, %v6574_v49  ;;  %6975 = vrot.lane.b32.xlu2 %v6955_v38, %s8647_s7 }
0x25da   :  { %v6562_v31 = vpop.permute.xlu0 %6561 }
0x25db   :  { %6585 = vst.msk [vmem:[#allocation18 + $0x6] sm:$0x1] %vm12879_vm8, %v6562_v31  ;;  %v6564_v62 = vpop.permute.xlu1 %6563 }
0x25dc   :  { %6586 = vst.msk [vmem:[#allocation18 + $0xe] sm:$0x1] %vm12880_vm9, %v6564_v62 }
0x25e1   :  { %6981 = vrot.lane.b32.xlu2 %v6958_v22, %s8647_s7 }
0x25e2   :  { %v6570_v35 = vpop.permute.xlu0 %6569 }
0x25e3   :  { %6589 = vst.msk [vmem:[#allocation18 + $0x26] sm:$0x1] %vm12881_vm10, %v6570_v35  ;;  %v6566_v2 = vpop.permute.xlu1 %6565 }
0x25e4   :  { %6587 = vst.msk [vmem:[#allocation18 + $0x16] sm:$0x1] %vm12882_vm15, %v6566_v2 }
0x25ea   :  { %v6576_v28 = vpop.permute.xlu0 %6575 }
0x25eb   :  { %6592 = vst.msk [vmem:[#allocation18 + $0x3e] sm:$0x1] %vm12852_vm1, %v6576_v28  ;;  %v6572_v1 = vpop.permute.xlu1 %6571 }
0x25ec   :  { %6590 = vst.msk [vmem:[#allocation18 + $0x2e] sm:$0x1] %vm12883_vm2, %v6572_v1 }
0x25f2   :  { %v7040_v20 = vpop.permute.xlu0 %7039 }
0x25f3   :  { %7042 = vst.msk [vmem:[#allocation10 + $0x8] sm:$0xff] %vm203_vm0, %v7040_v20 }
0x25fa   :  { %v7051_v7 = vld [vmem:[#allocation10 + $0x8] sm:$0xff] }
0x25fb   :  { %7053 = vst.msk [vmem:[#allocation21 + $0x8] sm:$0xff] %vm203_vm0, %v7051_v7 }
0x2617   :  { %v6970_v19 = vpop.permute.xlu2 %6969 }
0x2618   :  { %6992 = vst.msk [vmem:[#allocation18 + $0xf] sm:$0x1] %vm12884_vm11, %v6970_v19 }
0x262b   :  { %v7014_v27 = vpop.permute.xlu2 %7013 }
0x262c   :  { %7016 = vst.msk [vmem:[#allocation9 + $0x8] sm:$0xff] %vm203_vm0, %v7014_v27 }
0x262d   :  { %v6968_v56 = vpop.permute.xlu1 %6967 }
0x262e   :  { %6991 = vst.msk [vmem:[#allocation18 + $0x7] sm:$0x1] %vm12885_vm3, %v6968_v56 }
0x2630   :  { %v6972_v52 = vpop.permute.xlu0 %6971 }
0x2631   :  { %6993 = vst.msk [vmem:[#allocation18 + $0x17] sm:$0x1] %vm12886_vm12, %v6972_v52 }
0x2633   :  { %v6976_v43 = vpop.permute.xlu2 %6975  ;;  %v7047_v4 = vld [vmem:[#allocation9 + $0x8] sm:$0xff] }
0x2634   :  { %6995 = vst.msk [vmem:[#allocation18 + $0x27] sm:$0x1] %vm12887_vm13, %v6976_v43 }
0x2635   :  { %7049 = vst.msk [vmem:[#allocation19 + $0x8] sm:$0xff] %vm203_vm0, %v7047_v4  ;;  %vm12890_vm0 = vmmov %vm12852_vm1 }
0x2636   :  { %7079 = dma.vmem_to_hbm [thread:$0]  %s7072_s2, 256, %s7074_s17, [#allocation20], %s8638_s25, %s8638_s25, %s8639_s26   ;;  %vm12891_vm5 = vmmov %vm12890_vm0 }
0x2637   :  { %v6974_v12 = vpop.permute.xlu1 %6973  ;;  %7092 = dma.vmem_to_hbm [thread:$0]  %s7085_s19, 256, %s7087_s22, [#allocation20], %s8638_s25, %s8638_s25, %s8639_s26  }
0x2638   :  { %v6978_v30 = vpop.permute.xlu0 %6977  ;;  %6994 = vst.msk [vmem:[#allocation18 + $0x1f] sm:$0x1] %vm12888_vm14, %v6974_v12 }
0x2639   :  { %6996 = vst.msk [vmem:[#allocation18 + $0x2f] sm:$0x1] %vm12889_vm4, %v6978_v30 }
0x263b   :  { %v6982_v18 = vpop.permute.xlu2 %6981 }
0x263c   :  { %6998 = vst.msk [vmem:[#allocation18 + $0x3f] sm:$0x1] %vm12890_vm0, %v6982_v18 }
0x263f   :  { %v6980_v23 = vpop.permute.xlu1 %6979 }
0x2640   :  { %6997 = vst.msk [vmem:[#allocation18 + $0x37] sm:$0x1] %vm12891_vm5, %v6980_v23 }
0x2641   :  { %7066 = dma.vmem_to_hbm [thread:$0]  %s7059_s11, 1024, %s7061_s24, [#allocation14], %s8638_s25, %s8638_s25, %s8639_s26  }
0x2642   :  { %8633 = dma.done.wait [#allocation14], 1024  }
0x2643   :  { %8634 = vsyncadd [#allocation14], 4294966272 }
0x2644   :  { %8635 = dma.done.wait [#allocation20], 512  }
0x2645   :  { %8636 = vsyncadd [#allocation20], 4294966784 }
0x2646   :  { %7105 = vsyncpa [#allocation13], 1 }
0x2647   :  { %7106 = vsyncpa [#allocation16], 1 }
0x2648   :  { %7107 = vsyncpa [#allocation14], 1 }
0x2649   :  { %7108 = vsyncpa [#allocation20], 1 }
0x264a   :  { %7109 = vsyncmov [#allocation8] }
0x264d   :  { %s7110_s9 = vpop.sfrf %7109 }
0x264e   :  { %p7318_p0 = scmp.ne.s32.totalorder %s7110_s9, 0 }
0x2650   :  { %7114 = shalt.err (%p7318_p0)  }
0x2651   :  { %7116 = vsyncmov [#allocation8 + $0x1] }
0x2654   :  { %s7117_s27 = vpop.sfrf %7116 }
0x2655   :  { %p7319_p1 = scmp.ne.s32.totalorder %s7117_s27, 0 }
0x2657   :  { %7121 = shalt.err (%p7319_p1)  }
0x2658   :  { %7123 = vsyncmov [#allocation8 + $0x2] }
0x265b   :  { %s7124_s28 = vpop.sfrf %7123 }
0x265c   :  { %p7320_p2 = scmp.ne.s32.totalorder %s7124_s28, 0 }
0x265e   :  { %7128 = shalt.err (%p7320_p2)  }
0x265f   :  { %7130 = vsyncmov [#allocation8 + $0x3] }
0x2662   :  { %s7131_s25 = vpop.sfrf %7130 }
0x2663   :  { %p7321_p3 = scmp.ne.s32.totalorder %s7131_s25, 0 }
0x2665   :  { %7135 = shalt.err (%p7321_p3)  }
0x2666   :  { %7137 = vsyncmov [#allocation8 + $0x4] }
0x2669   :  { %s7138_s26 = vpop.sfrf %7137 }
0x266a   :  { %p7322_p4 = scmp.ne.s32.totalorder %s7138_s26, 0 }
0x266c   :  { %7142 = shalt.err (%p7322_p4)  }
0x266d   :  { %7144 = vsyncmov [#allocation8 + $0x5] }
0x2670   :  { %s7145_s29 = vpop.sfrf %7144 }
0x2671   :  { %p7323_p5 = scmp.ne.s32.totalorder %s7145_s29, 0 }
0x2673   :  { %7149 = shalt.err (%p7323_p5)  }

</bundles_post_ra>
